<compile_context>
chip_gen: v5e
topology: v5e:2x2
jax: 0.10.0
libtpu: 0.0.40
codegen_flags: <defaults>
</compile_context>

<pallas_src>
import functools
import math

import jax
import jax.numpy as jnp
from jax.experimental import pallas as pl
from jax.experimental.pallas import tpu as pltpu


# ----------------------------------------------------------------------------
# In-kernel helpers (operate on traced f32 values inside Pallas kernels)
# ----------------------------------------------------------------------------
def _layernorm(x, g, b, eps):
    mu = jnp.mean(x, axis=-1, keepdims=True)
    var = jnp.mean((x - mu) * (x - mu), axis=-1, keepdims=True)
    return (x - mu) * jax.lax.rsqrt(var + eps) * g + b


def _rmsnorm(x, g, eps):
    var = jnp.mean(x * x, axis=-1, keepdims=True)
    return x * jax.lax.rsqrt(var + eps) * g


def _gelu(x):
    # tanh-approx GELU.  TODO(synk): HF ViT/Q-Former use erf-GELU; tanh approximation used here.
    return 0.5 * x * (1.0 + jnp.tanh(0.7978845608028654 * (x + 0.044715 * x * x * x)))


def _mm(x, w, b=None):
    y = jnp.dot(x, w, preferred_element_type=jnp.float32)
    if b is not None:
        y = y + b
    return y


def _mha(q, k, v, wo, *, heads, scale, causal):
    """Multi-head attention on 2-D (seq, d_model) values; the output projection `wo`
    is folded into the per-head loop (sum_h o_h @ wo[h*dh:(h+1)*dh, :])."""
    sq, d = q.shape
    sk = k.shape[0]
    dh = d // heads
    d_out = wo.shape[-1]
    if causal:
        row = jax.lax.broadcasted_iota(jnp.int32, (sq, sk), 0)
        col = jax.lax.broadcasted_iota(jnp.int32, (sq, sk), 1)
        causal_mask = col <= row
    out = jnp.zeros((sq, d_out), jnp.float32)
    for h in range(heads):
        qh = q[:, h * dh:(h + 1) * dh]
        kh = k[:, h * dh:(h + 1) * dh]
        vh = v[:, h * dh:(h + 1) * dh]
        s = jax.lax.dot_general(qh, kh, (((1,), (1,)), ((), ())),
                                preferred_element_type=jnp.float32) * scale
        if causal:
            s = jnp.where(causal_mask, s, -1e30)
        s = s - jnp.max(s, axis=-1, keepdims=True)
        p = jnp.exp(s)
        p = p * pl.reciprocal(jnp.sum(p, axis=-1, keepdims=True), approx=True)
        oh = jnp.dot(p, vh, preferred_element_type=jnp.float32)
        out = out + jnp.dot(oh, wo[h * dh:(h + 1) * dh, :],
                            preferred_element_type=jnp.float32)
    return out


# ----------------------------------------------------------------------------
# Fused per-layer kernels
# ----------------------------------------------------------------------------
def _vit_layer_kernel(x_ref, ln1g, ln1b, wqkv, bqkv, wo, bo,
                      ln2g, ln2b, w1, b1, w2, b2, o_ref,
                      *, heads, scale, eps):
    x = x_ref[0]                                  # (S, D)
    d = x.shape[-1]
    h = _layernorm(x, ln1g[...], ln1b[...], eps)
    qkv = _mm(h, wqkv[...], bqkv[...])            # (S, 3D)
    attn = _mha(qkv[:, :d], qkv[:, d:2 * d], qkv[:, 2 * d:], wo[...],
                heads=heads, scale=scale, causal=False) + bo[...]
    x = x + attn
    h = _layernorm(x, ln2g[...], ln2b[...], eps)
    h = _gelu(_mm(h, w1[...], b1[...]))
    x = x + _mm(h, w2[...], b2[...])
    o_ref[0] = x


def _qformer_layer_kernel(x_ref, img_ref,
                          wqkv_s, bqkv_s, wo_s, bo_s, lnsg, lnsb,
                          wq_c, bq_c, wkv_c, bkv_c, wo_c, bo_c, lncg, lncb,
                          w1, b1, w2, b2, lnfg, lnfb, o_ref,
                          *, heads, scale, eps):
    x = x_ref[0]                                  # (Sq, Dq)
    img = img_ref[0]                              # (Si, Dv)
    d = x.shape[-1]
    # self-attention (post-LN, BERT-style)
    qkv = _mm(x, wqkv_s[...], bqkv_s[...])
    a = _mha(qkv[:, :d], qkv[:, d:2 * d], qkv[:, 2 * d:], wo_s[...],
             heads=heads, scale=scale, causal=False) + bo_s[...]
    x = _layernorm(x + a, lnsg[...], lnsb[...], eps)
    # cross-attention over image embeddings (all-ones image mask -> no masking)
    q = _mm(x, wq_c[...], bq_c[...])
    kv = _mm(img, wkv_c[...], bkv_c[...])
    a = _mha(q, kv[:, :d], kv[:, d:], wo_c[...],
             heads=heads, scale=scale, causal=False) + bo_c[...]
    x = _layernorm(x + a, lncg[...], lncb[...], eps)
    # FFN
    h = _gelu(_mm(x, w1[...], b1[...]))
    x = _layernorm(x + _mm(h, w2[...], b2[...]), lnfg[...], lnfb[...], eps)
    o_ref[0] = x


def _t5_enc_layer_kernel(x_ref, ln1g, wqkv, wo, ln2g, wi0, wi1, wo_ff, o_ref,
                         *, heads, eps):
    x = x_ref[0]                                  # (S, D)
    d = x.shape[-1]
    h = _rmsnorm(x, ln1g[...], eps)
    qkv = _mm(h, wqkv[...])
    x = x + _mha(qkv[:, :d], qkv[:, d:2 * d], qkv[:, 2 * d:], wo[...],
                 heads=heads, scale=1.0, causal=False)
    h = _rmsnorm(x, ln2g[...], eps)
    g = _gelu(_mm(h, wi0[...]))
    u = _mm(h, wi1[...])
    x = x + _mm(g * u, wo_ff[...])
    o_ref[0] = x
    # TODO(synk): T5 relative-position attention bias and dropout are omitted.


def _t5_dec_layer_kernel(x_ref, enc_ref, ln1g, wqkv_s, wo_s, ln2g,
                         wq_c, wkv_c, wo_c, ln3g, wi0, wi1, wo_ff, o_ref,
                         *, heads, eps):
    x = x_ref[0]                                  # (T, D)
    enc = enc_ref[0]                              # (Se, D)
    d = x.shape[-1]
    h = _rmsnorm(x, ln1g[...], eps)
    qkv = _mm(h, wqkv_s[...])
    x = x + _mha(qkv[:, :d], qkv[:, d:2 * d], qkv[:, 2 * d:], wo_s[...],
                 heads=heads, scale=1.0, causal=True)
    h = _rmsnorm(x, ln2g[...], eps)
    q = _mm(h, wq_c[...])
    kv = _mm(enc, wkv_c[...])
    x = x + _mha(q, kv[:, :d], kv[:, d:], wo_c[...],
                 heads=heads, scale=1.0, causal=False)
    h = _rmsnorm(x, ln3g[...], eps)
    g = _gelu(_mm(h, wi0[...]))
    u = _mm(h, wi1[...])
    x = x + _mm(g * u, wo_ff[...])
    o_ref[0] = x


# ----------------------------------------------------------------------------
# Small standalone kernels (patch embed / language projection / final norms / lm_head+CE)
# ----------------------------------------------------------------------------
def _linear_kernel(x_ref, w_ref, b_ref, o_ref):
    o_ref[...] = _mm(x_ref[...], w_ref[...], b_ref[...])


def _norm_kernel(x_ref, g_ref, b_ref, o_ref, *, rms, eps):
    x = x_ref[...]
    if rms:
        y = _rmsnorm(x, g_ref[...], eps) + b_ref[...]
    else:
        y = _layernorm(x, g_ref[...], b_ref[...], eps)
    o_ref[...] = y


def _lmhead_xent_kernel(x_ref, w_ref, labels_ref, loss_ref, *, ignore_index):
    logits = jnp.dot(x_ref[...], w_ref[...], preferred_element_type=jnp.float32)  # (M, V)
    labels = labels_ref[...]                                                       # (M, 1)
    m = jnp.max(logits, axis=-1, keepdims=True)
    lse = jnp.log(jnp.sum(jnp.exp(logits - m), axis=-1, keepdims=True)) + m
    col = jax.lax.broadcasted_iota(jnp.int32, logits.shape, 1)
    picked = jnp.sum(jnp.where(col == labels, logits, 0.0), axis=-1, keepdims=True)
    valid = (labels != ignore_index).astype(jnp.float32)
    nll = (lse - picked) * valid
    total = jnp.sum(nll, keepdims=True)                  # (1, 1)
    denom = jnp.maximum(jnp.sum(valid, keepdims=True), 1.0)
    loss_ref[...] = total / denom


# ----------------------------------------------------------------------------
# pallas_call wrappers
# ----------------------------------------------------------------------------
def _w2d(a):
    # full-array 2-D block, shared across all grid steps
    return pl.BlockSpec(a.shape, lambda b: (0, 0))


def _xblk(shape):
    # one batch element per grid step: block (1, S, D) at index (b, 0, 0)
    return pl.BlockSpec((1,) + tuple(shape[1:]), lambda b: (b,) + (0,) * (len(shape) - 1))


def _layer_call(kernel, batched, weights, out_shape, **static):
    grid = (batched[0].shape[0],)
    in_specs = [_xblk(a.shape) for a in batched] + [_w2d(w) for w in weights]
    return pl.pallas_call(
        functools.partial(kernel, **static),
        grid=grid,
        in_specs=in_specs,
        out_specs=_xblk(out_shape),
        out_shape=jax.ShapeDtypeStruct(out_shape, jnp.float32),
        compiler_params=pltpu.CompilerParams(dimension_semantics=("parallel",)),
    )(*batched, *weights)


def vit_layer(x, lp, *, heads, eps=1e-5):
    scale = 1.0 / math.sqrt(x.shape[-1] // heads)
    ws = (lp["ln1_g"], lp["ln1_b"], lp["wqkv"], lp["bqkv"], lp["wo"], lp["bo"],
          lp["ln2_g"], lp["ln2_b"], lp["fc1_w"], lp["fc1_b"], lp["fc2_w"], lp["fc2_b"])
    return _layer_call(_vit_layer_kernel, (x,), ws, x.shape,
                       heads=heads, scale=scale, eps=eps)


def qformer_layer(x, img, lp, *, heads, eps=1e-12):
    scale = 1.0 / math.sqrt(x.shape[-1] // heads)
    ws = (lp["wqkv_s"], lp["bqkv_s"], lp["wo_s"], lp["bo_s"], lp["ln_self_g"], lp["ln_self_b"],
          lp["wq_c"], lp["bq_c"], lp["wkv_c"], lp["bkv_c"], lp["wo_c"], lp["bo_c"],
          lp["ln_cross_g"], lp["ln_cross_b"],
          lp["fc1_w"], lp["fc1_b"], lp["fc2_w"], lp["fc2_b"], lp["ln_ffn_g"], lp["ln_ffn_b"])
    return _layer_call(_qformer_layer_kernel, (x, img), ws, x.shape,
                       heads=heads, scale=scale, eps=eps)


def t5_enc_layer(x, lp, *, heads, eps=1e-6):
    ws = (lp["ln1_g"], lp["wqkv"], lp["wo"], lp["ln2_g"], lp["wi0"], lp["wi1"], lp["wo_ff"])
    return _layer_call(_t5_enc_layer_kernel, (x,), ws, x.shape, heads=heads, eps=eps)


def t5_dec_layer(x, enc, lp, *, heads, eps=1e-6):
    ws = (lp["ln1_g"], lp["wqkv"], lp["wo"], lp["ln2_g"],
          lp["wq_c"], lp["wkv_c"], lp["wo_c"], lp["ln3_g"],
          lp["wi0"], lp["wi1"], lp["wo_ff"])
    return _layer_call(_t5_dec_layer_kernel, (x, enc), ws, x.shape, heads=heads, eps=eps)


def pallas_linear(x2d, w, b):
    M, K = x2d.shape
    N = w.shape[1]
    return pl.pallas_call(
        _linear_kernel,
        grid=(1,),
        in_specs=[pl.BlockSpec((M, K), lambda i: (0, 0)),
                  pl.BlockSpec((K, N), lambda i: (0, 0)),
                  pl.BlockSpec((1, N), lambda i: (0, 0))],
        out_specs=pl.BlockSpec((M, N), lambda i: (0, 0)),
        out_shape=jax.ShapeDtypeStruct((M, N), jnp.float32),
    )(x2d, w, b)


def pallas_norm(x2d, g, b=None, *, rms=False, eps=1e-6):
    M, D = x2d.shape
    if b is None:
        b = jnp.zeros((1, D), jnp.float32)
    return pl.pallas_call(
        functools.partial(_norm_kernel, rms=rms, eps=eps),
        grid=(1,),
        in_specs=[pl.BlockSpec((M, D), lambda i: (0, 0)),
                  pl.BlockSpec((1, D), lambda i: (0, 0)),
                  pl.BlockSpec((1, D), lambda i: (0, 0))],
        out_specs=pl.BlockSpec((M, D), lambda i: (0, 0)),
        out_shape=jax.ShapeDtypeStruct((M, D), jnp.float32),
    )(x2d, g, b)


def pallas_lmhead_xent(x2d, w, labels2d, *, ignore_index=-100):
    M, D = x2d.shape
    V = w.shape[1]
    loss = pl.pallas_call(
        functools.partial(_lmhead_xent_kernel, ignore_index=ignore_index),
        grid=(1,),
        in_specs=[pl.BlockSpec((M, D), lambda i: (0, 0)),
                  pl.BlockSpec((D, V), lambda i: (0, 0)),
                  pl.BlockSpec((M, 1), lambda i: (0, 0))],
        out_specs=pl.BlockSpec((1, 1), lambda i: (0, 0)),
        out_shape=jax.ShapeDtypeStruct((1, 1), jnp.float32),
    )(x2d, w, labels2d)
    return loss[0, 0]


# ----------------------------------------------------------------------------
# Model glue (reshapes / embedding lookup / residual wiring stay in plain JAX)
# ----------------------------------------------------------------------------
CFG = dict(
    img=16, chan=3, patch=8,
    d_vis=32, vis_heads=4, vis_layers=2, vis_mlp=64,
    num_query=8, d_q=32, q_heads=4, q_layers=2, q_mlp=64,
    d_model=32, t5_heads=4, t5_ff=64, t5_enc_layers=1, t5_dec_layers=1,
    vocab=128, dec_len=6,
)


def vision_model(pixel_values, p, cfg):
    B, C, H, W = pixel_values.shape
    P = cfg["patch"]
    nh, nw = H // P, W // P
    # NCHW -> (B*num_patches, C*P*P); patch-embed conv(stride=P) == matmul on flattened patches
    patches = pixel_values.reshape(B, C, nh, P, nw, P).transpose(0, 2, 4, 1, 3, 5)
    patches = patches.reshape(B * nh * nw, C * P * P)
    x = pallas_linear(patches, p["patch_w"], p["patch_b"]).reshape(B, nh * nw, cfg["d_vis"])
    cls = jnp.broadcast_to(p["cls"], (B, 1, cfg["d_vis"]))
    x = jnp.concatenate([cls, x], axis=1) + p["pos"]
    for lp in p["layers"]:
        x = vit_layer(x, lp, heads=cfg["vis_heads"], eps=1e-5)
    S = x.shape[1]
    out = pallas_norm(x.reshape(B * S, cfg["d_vis"]), p["post_g"], p["post_b"],
                      rms=False, eps=1e-5)
    return out.reshape(B, S, cfg["d_vis"])


def qformer(query_tokens, image_embeds, p, cfg):
    B = image_embeds.shape[0]
    x = jnp.broadcast_to(query_tokens, (B,) + query_tokens.shape[1:])
    Sq = x.shape[1]
    x = pallas_norm(x.reshape(B * Sq, cfg["d_q"]), p["emb_ln_g"], p["emb_ln_b"],
                    rms=False, eps=1e-12).reshape(B, Sq, cfg["d_q"])
    for lp in p["layers"]:
        x = qformer_layer(x, image_embeds, lp, heads=cfg["q_heads"], eps=1e-12)
    return x


def t5_encoder(x, p, cfg):
    for lp in p["layers"]:
        x = t5_enc_layer(x, lp, heads=cfg["t5_heads"], eps=1e-6)
    B, S, D = x.shape
    out = pallas_norm(x.reshape(B * S, D), p["final_ln_g"], None, rms=True, eps=1e-6)
    return out.reshape(B, S, D)


def t5_decoder(dec_emb, enc_out, p, cfg):
    x = dec_emb
    for lp in p["layers"]:
        x = t5_dec_layer(x, enc_out, lp, heads=cfg["t5_heads"], eps=1e-6)
    B, S, D = x.shape
    out = pallas_norm(x.reshape(B * S, D), p["final_ln_g"], None, rms=True, eps=1e-6)
    return out.reshape(B, S, D)


def shift_right(labels, start_id=0, pad_id=0):
    B = labels.shape[0]
    shifted = jnp.concatenate(
        [jnp.full((B, 1), start_id, labels.dtype), labels[:, :-1]], axis=1)
    return jnp.where(shifted == -100, pad_id, shifted)


def blip_forward(params, pixel_values, labels, cfg=CFG):
    """Mirrors BLIPWrapper.forward: returns the scalar LM loss."""
    image_embeds = vision_model(pixel_values, params["vision"], cfg)
    # image_attention_mask = all ones -> unmasked Q-Former cross-attention
    query_out = qformer(params["query_tokens"], image_embeds, params["qformer"], cfg)
    B, Sq, _ = query_out.shape
    lm_inputs = pallas_linear(query_out.reshape(B * Sq, cfg["d_q"]),
                              params["proj_w"], params["proj_b"]).reshape(B, Sq, cfg["d_model"])
    # attention_mask = ones over query tokens -> unmasked T5 encoder
    enc_out = t5_encoder(lm_inputs, params["t5_enc"], cfg)
    dec_ids = shift_right(labels)                          # HF T5 shift-right of labels
    dec_emb = params["t5_shared"][dec_ids]                 # embedding lookup (XLA glue gather)
    dec_out = t5_decoder(dec_emb, enc_out, params["t5_dec"], cfg)
    B, T, D = dec_out.shape
    return pallas_lmhead_xent(dec_out.reshape(B * T, D), params["lm_head_w"],
                              labels.reshape(B * T, 1), ignore_index=-100)


# ----------------------------------------------------------------------------
# Deterministic parameter init (weights stored pre-fused: QKV concat, (1,D) biases/norms)
# ----------------------------------------------------------------------------
def init_params(key, cfg=CFG):
    keys = iter(jax.random.split(key, 256))
    nk = lambda: next(keys)
    rnd = lambda shape, s=0.02: s * jax.random.normal(nk(), shape, jnp.float32)
    ones2 = lambda d: jnp.ones((1, d), jnp.float32)
    zeros2 = lambda d: jnp.zeros((1, d), jnp.float32)

    d_vis, d_q, d_m = cfg["d_vis"], cfg["d_q"], cfg["d_model"]
    patch_dim = cfg["chan"] * cfg["patch"] ** 2
    n_patch = (cfg["img"] // cfg["patch"]) ** 2

    vision_layers = []
    for _ in range(cfg["vis_layers"]):
        vision_layers.append(dict(
            ln1_g=ones2(d_vis), ln1_b=zeros2(d_vis),
            wqkv=rnd((d_vis, 3 * d_vis)), bqkv=zeros2(3 * d_vis),
            wo=rnd((d_vis, d_vis)), bo=zeros2(d_vis),
            ln2_g=ones2(d_vis), ln2_b=zeros2(d_vis),
            fc1_w=rnd((d_vis, cfg["vis_mlp"])), fc1_b=zeros2(cfg["vis_mlp"]),
            fc2_w=rnd((cfg["vis_mlp"], d_vis)), fc2_b=zeros2(d_vis)))
    vision = dict(
        patch_w=rnd((patch_dim, d_vis)), patch_b=zeros2(d_vis),
        cls=rnd((1, 1, d_vis)), pos=rnd((1, 1 + n_patch, d_vis)),
        post_g=ones2(d_vis), post_b=zeros2(d_vis), layers=vision_layers)

    q_layers = []
    for _ in range(cfg["q_layers"]):
        q_layers.append(dict(
            wqkv_s=rnd((d_q, 3 * d_q)), bqkv_s=zeros2(3 * d_q),
            wo_s=rnd((d_q, d_q)), bo_s=zeros2(d_q),
            ln_self_g=ones2(d_q), ln_self_b=zeros2(d_q),
            wq_c=rnd((d_q, d_q)), bq_c=zeros2(d_q),
            wkv_c=rnd((d_vis, 2 * d_q)), bkv_c=zeros2(2 * d_q),
            wo_c=rnd((d_q, d_q)), bo_c=zeros2(d_q),
            ln_cross_g=ones2(d_q), ln_cross_b=zeros2(d_q),
            fc1_w=rnd((d_q, cfg["q_mlp"])), fc1_b=zeros2(cfg["q_mlp"]),
            fc2_w=rnd((cfg["q_mlp"], d_q)), fc2_b=zeros2(d_q),
            ln_ffn_g=ones2(d_q), ln_ffn_b=zeros2(d_q)))
    qformer_p = dict(emb_ln_g=ones2(d_q), emb_ln_b=zeros2(d_q), layers=q_layers)

    def t5_layer(decoder):
        lp = dict(
            ln1_g=ones2(d_m), wqkv=rnd((d_m, 3 * d_m)), wo=rnd((d_m, d_m)),
            ln2_g=ones2(d_m),
            wi0=rnd((d_m, cfg["t5_ff"])), wi1=rnd((d_m, cfg["t5_ff"])),
            wo_ff=rnd((cfg["t5_ff"], d_m)))
        if decoder:
            lp["wq_c"] = rnd((d_m, d_m))
            lp["wkv_c"] = rnd((d_m, 2 * d_m))
            lp["wo_c"] = rnd((d_m, d_m))
            lp["ln3_g"] = ones2(d_m)
        return lp

    t5_enc = dict(layers=[t5_layer(False) for _ in range(cfg["t5_enc_layers"])],
                  final_ln_g=ones2(d_m))
    t5_dec = dict(layers=[t5_layer(True) for _ in range(cfg["t5_dec_layers"])],
                  final_ln_g=ones2(d_m))

    return dict(
        vision=vision,
        query_tokens=rnd((1, cfg["num_query"], d_q)),
        qformer=qformer_p,
        proj_w=rnd((d_q, d_m)), proj_b=zeros2(d_m),
        t5_shared=rnd((cfg["vocab"], d_m)),
        t5_enc=t5_enc, t5_dec=t5_dec,
        lm_head_w=rnd((d_m, cfg["vocab"])),
    )


# ----------------------------------------------------------------------------
if __name__ == "__main__":
    root = jax.random.PRNGKey(0)
    k_param, k_pix, k_lab = jax.random.split(root, 3)

    params = init_params(k_param, CFG)
    pixel_values = jax.random.normal(k_pix, (2, CFG["chan"], CFG["img"], CFG["img"]), jnp.float32)
    labels = jax.random.randint(k_lab, (2, CFG["dec_len"]), 1, CFG["vocab"], jnp.int32)

    loss = jax.jit(blip_forward)(params, pixel_values, labels)
    jax.block_until_ready(loss)
    assert loss.shape == () and bool(jnp.isfinite(loss))
    print("KERNEL_OK")
</pallas_src>

<mosaic_0001>
module attributes {stable_mosaic.version = 11 : i64} {
  func.func @_linear_kernel(%arg0: i32, %arg1: memref<8x192xf32, #tpu.memory_space<vmem>>, %arg2: memref<192x32xf32, #tpu.memory_space<vmem>>, %arg3: memref<1x32xf32, #tpu.memory_space<vmem>>, %arg4: memref<8x32xf32, #tpu.memory_space<vmem>>) attributes {dimension_semantics = [#tpu.dimension_semantics<arbitrary>], iteration_bounds = array<i64: 1>, scalar_prefetch = 0 : i64, scratch_operands = 0 : i64, tpu.core_type = #tpu.core_type<tc>, window_params = [{pipeline_mode = #tpu.pipeline_mode<synchronous>, transform_indices = @transform_0, window_bounds = array<i64: 8, 192>}, {pipeline_mode = #tpu.pipeline_mode<synchronous>, transform_indices = @transform_1, window_bounds = array<i64: 192, 32>}, {pipeline_mode = #tpu.pipeline_mode<synchronous>, transform_indices = @transform_2, window_bounds = array<i64: 1, 32>}, {pipeline_mode = #tpu.pipeline_mode<synchronous>, transform_indices = @transform_3, window_bounds = array<i64: 8, 32>}]} {
    %c0 = arith.constant 0 : index
    %c0_0 = arith.constant 0 : index
    %0 = vector.load %arg1[%c0, %c0_0] : memref<8x192xf32, #tpu.memory_space<vmem>>, vector<8x192xf32>
    %c0_1 = arith.constant 0 : index
    %c0_2 = arith.constant 0 : index
    %1 = vector.load %arg2[%c0_1, %c0_2] : memref<192x32xf32, #tpu.memory_space<vmem>>, vector<192x32xf32>
    %c0_3 = arith.constant 0 : index
    %c0_4 = arith.constant 0 : index
    %2 = vector.load %arg3[%c0_3, %c0_4] : memref<1x32xf32, #tpu.memory_space<vmem>>, vector<1x32xf32>
    %cst = arith.constant dense<0.000000e+00> : vector<8x32xf32>
    %3 = tpu.matmul %0, %1, %cst {dimension_numbers = #tpu.dot_dimension_numbers<[1], [0], [0], [1], [0, 0, 1, 1], [], []>} : vector<8x192xf32>, vector<192x32xf32>, vector<8x32xf32> -> vector<8x32xf32>
    %4 = vector.broadcast %2 : vector<1x32xf32> to vector<8x32xf32>
    %5 = arith.addf %3, %4 : vector<8x32xf32>
    %c0_5 = arith.constant 0 : index
    %c0_6 = arith.constant 0 : index
    %6 = vector.load %arg4[%c0_5, %c0_6] : memref<8x32xf32, #tpu.memory_space<vmem>>, vector<8x32xf32>
    tpu.vector_store %arg4[%c0_5, %c0_6], %5 {strides = array<i32>} : memref<8x32xf32, #tpu.memory_space<vmem>>, vector<8x32xf32>,
    return
  }
  func.func @transform_0(%arg0: i32) -> (i32, i32) {
    %c0_i32 = arith.constant 0 : i32
    %c0_i32_0 = arith.constant 0 : i32
    %c0_i32_1 = arith.constant 0 : i32
    return %c0_i32, %c0_i32_0 : i32, i32
  }
  func.func @transform_1(%arg0: i32) -> (i32, i32) {
    %c0_i32 = arith.constant 0 : i32
    %c0_i32_0 = arith.constant 0 : i32
    %c0_i32_1 = arith.constant 0 : i32
    return %c0_i32, %c0_i32_0 : i32, i32
  }
  func.func @transform_2(%arg0: i32) -> (i32, i32) {
    %c0_i32 = arith.constant 0 : i32
    %c0_i32_0 = arith.constant 0 : i32
    %c0_i32_1 = arith.constant 0 : i32
    return %c0_i32, %c0_i32_0 : i32, i32
  }
  func.func @transform_3(%arg0: i32) -> (i32, i32) {
    %c0_i32 = arith.constant 0 : i32
    %c0_i32_0 = arith.constant 0 : i32
    %c0_i32_1 = arith.constant 0 : i32
    return %c0_i32, %c0_i32_0 : i32, i32
  }
}

module attributes {stable_mosaic.version = 11 : i64} {
  func.func @_norm_kernel(%arg0: i32, %arg1: memref<16x32xf32, #tpu.memory_space<vmem>>, %arg2: memref<1x32xf32, #tpu.memory_space<vmem>>, %arg3: memref<1x32xf32, #tpu.memory_space<vmem>>, %arg4: memref<16x32xf32, #tpu.memory_space<vmem>>) attributes {dimension_semantics = [#tpu.dimension_semantics<arbitrary>], iteration_bounds = array<i64: 1>, scalar_prefetch = 0 : i64, scratch_operands = 0 : i64, tpu.core_type = #tpu.core_type<tc>, window_params = [{pipeline_mode = #tpu.pipeline_mode<synchronous>, transform_indices = @transform_0, window_bounds = array<i64: 16, 32>}, {pipeline_mode = #tpu.pipeline_mode<synchronous>, transform_indices = @transform_1, window_bounds = array<i64: 1, 32>}, {pipeline_mode = #tpu.pipeline_mode<synchronous>, transform_indices = @transform_2, window_bounds = array<i64: 1, 32>}, {pipeline_mode = #tpu.pipeline_mode<synchronous>, transform_indices = @transform_3, window_bounds = array<i64: 16, 32>}]} {
    %c0 = arith.constant 0 : index
    %c0_0 = arith.constant 0 : index
    %0 = vector.load %arg1[%c0, %c0_0] : memref<16x32xf32, #tpu.memory_space<vmem>>, vector<16x32xf32>
    %c0_1 = arith.constant 0 : index
    %c0_2 = arith.constant 0 : index
    %1 = vector.load %arg2[%c0_1, %c0_2] : memref<1x32xf32, #tpu.memory_space<vmem>>, vector<1x32xf32>
    %c0_3 = arith.constant 0 : index
    %c0_4 = arith.constant 0 : index
    %2 = vector.load %arg3[%c0_3, %c0_4] : memref<1x32xf32, #tpu.memory_space<vmem>>, vector<1x32xf32>
    %cst = arith.constant dense<0.000000e+00> : vector<16xf32>
    %3 = vector.multi_reduction <add>, %0, %cst [1] : vector<16x32xf32> to vector<16xf32>
    %4 = vector.shape_cast %3 : vector<16xf32> to vector<16x1xf32>
    %cst_5 = arith.constant 3.200000e+01 : f32
    %5 = vector.broadcast %cst_5 : f32 to vector<16x1xf32>
    %6 = arith.divf %4, %5 : vector<16x1xf32>
    %7 = vector.broadcast %6 : vector<16x1xf32> to vector<16x32xf32>
    %8 = arith.subf %0, %7 : vector<16x32xf32>
    %9 = vector.broadcast %6 : vector<16x1xf32> to vector<16x32xf32>
    %10 = arith.subf %0, %9 : vector<16x32xf32>
    %11 = arith.mulf %8, %10 : vector<16x32xf32>
    %cst_6 = arith.constant dense<0.000000e+00> : vector<16xf32>
    %12 = vector.multi_reduction <add>, %11, %cst_6 [1] : vector<16x32xf32> to vector<16xf32>
    %13 = vector.shape_cast %12 : vector<16xf32> to vector<16x1xf32>
    %cst_7 = arith.constant 3.200000e+01 : f32
    %14 = vector.broadcast %cst_7 : f32 to vector<16x1xf32>
    %15 = arith.divf %13, %14 : vector<16x1xf32>
    %16 = vector.broadcast %6 : vector<16x1xf32> to vector<16x32xf32>
    %17 = arith.subf %0, %16 : vector<16x32xf32>
    %cst_8 = arith.constant 9.99999996E-13 : f32
    %18 = vector.broadcast %cst_8 : f32 to vector<16x1xf32>
    %19 = arith.addf %15, %18 : vector<16x1xf32>
    %20 = math.rsqrt %19 : vector<16x1xf32>
    %21 = vector.broadcast %20 : vector<16x1xf32> to vector<16x32xf32>
    %22 = arith.mulf %17, %21 : vector<16x32xf32>
    %23 = vector.broadcast %1 : vector<1x32xf32> to vector<16x32xf32>
    %24 = arith.mulf %22, %23 : vector<16x32xf32>
    %25 = vector.broadcast %2 : vector<1x32xf32> to vector<16x32xf32>
    %26 = arith.addf %24, %25 : vector<16x32xf32>
    %c0_9 = arith.constant 0 : index
    %c0_10 = arith.constant 0 : index
    %27 = vector.load %arg4[%c0_9, %c0_10] : memref<16x32xf32, #tpu.memory_space<vmem>>, vector<16x32xf32>
    tpu.vector_store %arg4[%c0_9, %c0_10], %26 {strides = array<i32>} : memref<16x32xf32, #tpu.memory_space<vmem>>, vector<16x32xf32>,
    return
  }
  func.func @transform_0(%arg0: i32) -> (i32, i32) {
    %c0_i32 = arith.constant 0 : i32
    %c0_i32_0 = arith.constant 0 : i32
    %c0_i32_1 = arith.constant 0 : i32
    return %c0_i32, %c0_i32_0 : i32, i32
  }
  func.func @transform_1(%arg0: i32) -> (i32, i32) {
    %c0_i32 = arith.constant 0 : i32
    %c0_i32_0 = arith.constant 0 : i32
    %c0_i32_1 = arith.constant 0 : i32
    return %c0_i32, %c0_i32_0 : i32, i32
  }
  func.func @transform_2(%arg0: i32) -> (i32, i32) {
    %c0_i32 = arith.constant 0 : i32
    %c0_i32_0 = arith.constant 0 : i32
    %c0_i32_1 = arith.constant 0 : i32
    return %c0_i32, %c0_i32_0 : i32, i32
  }
  func.func @transform_3(%arg0: i32) -> (i32, i32) {
    %c0_i32 = arith.constant 0 : i32
    %c0_i32_0 = arith.constant 0 : i32
    %c0_i32_1 = arith.constant 0 : i32
    return %c0_i32, %c0_i32_0 : i32, i32
  }
}

module attributes {stable_mosaic.version = 11 : i64} {
  func.func @_vit_layer_kernel(%arg0: i32, %arg1: memref<1x5x32xf32, #tpu.memory_space<vmem>>, %arg2: memref<1x32xf32, #tpu.memory_space<vmem>>, %arg3: memref<1x32xf32, #tpu.memory_space<vmem>>, %arg4: memref<32x96xf32, #tpu.memory_space<vmem>>, %arg5: memref<1x96xf32, #tpu.memory_space<vmem>>, %arg6: memref<32x32xf32, #tpu.memory_space<vmem>>, %arg7: memref<1x32xf32, #tpu.memory_space<vmem>>, %arg8: memref<1x32xf32, #tpu.memory_space<vmem>>, %arg9: memref<1x32xf32, #tpu.memory_space<vmem>>, %arg10: memref<32x64xf32, #tpu.memory_space<vmem>>, %arg11: memref<1x64xf32, #tpu.memory_space<vmem>>, %arg12: memref<64x32xf32, #tpu.memory_space<vmem>>, %arg13: memref<1x32xf32, #tpu.memory_space<vmem>>, %arg14: memref<1x5x32xf32, #tpu.memory_space<vmem>>) attributes {dimension_semantics = [#tpu.dimension_semantics<parallel>], iteration_bounds = array<i64: 2>, scalar_prefetch = 0 : i64, scratch_operands = 0 : i64, tpu.core_type = #tpu.core_type<tc>, window_params = [{transform_indices = @transform_0, window_bounds = array<i64: 1, 5, 32>}, {pipeline_mode = #tpu.pipeline_mode<synchronous>, transform_indices = @transform_1, window_bounds = array<i64: 1, 32>}, {pipeline_mode = #tpu.pipeline_mode<synchronous>, transform_indices = @transform_2, window_bounds = array<i64: 1, 32>}, {pipeline_mode = #tpu.pipeline_mode<synchronous>, transform_indices = @transform_3, window_bounds = array<i64: 32, 96>}, {pipeline_mode = #tpu.pipeline_mode<synchronous>, transform_indices = @transform_4, window_bounds = array<i64: 1, 96>}, {pipeline_mode = #tpu.pipeline_mode<synchronous>, transform_indices = @transform_5, window_bounds = array<i64: 32, 32>}, {pipeline_mode = #tpu.pipeline_mode<synchronous>, transform_indices = @transform_6, window_bounds = array<i64: 1, 32>}, {pipeline_mode = #tpu.pipeline_mode<synchronous>, transform_indices = @transform_7, window_bounds = array<i64: 1, 32>}, {pipeline_mode = #tpu.pipeline_mode<synchronous>, transform_indices = @transform_8, window_bounds = array<i64: 1, 32>}, {pipeline_mode = #tpu.pipeline_mode<synchronous>, transform_indices = @transform_9, window_bounds = array<i64: 32, 64>}, {pipeline_mode = #tpu.pipeline_mode<synchronous>, transform_indices = @transform_10, window_bounds = array<i64: 1, 64>}, {pipeline_mode = #tpu.pipeline_mode<synchronous>, transform_indices = @transform_11, window_bounds = array<i64: 64, 32>}, {pipeline_mode = #tpu.pipeline_mode<synchronous>, transform_indices = @transform_12, window_bounds = array<i64: 1, 32>}, {transform_indices = @transform_13, window_bounds = array<i64: 1, 5, 32>}]} {
    %c0 = arith.constant 0 : index
    %c0_0 = arith.constant 0 : index
    %c0_1 = arith.constant 0 : index
    %0 = vector.load %arg1[%c0, %c0_0, %c0_1] : memref<1x5x32xf32, #tpu.memory_space<vmem>>, vector<1x5x32xf32>
    %1 = vector.shape_cast %0 : vector<1x5x32xf32> to vector<5x32xf32>
    %c0_2 = arith.constant 0 : index
    %c0_3 = arith.constant 0 : index
    %2 = vector.load %arg2[%c0_2, %c0_3] : memref<1x32xf32, #tpu.memory_space<vmem>>, vector<1x32xf32>
    %c0_4 = arith.constant 0 : index
    %c0_5 = arith.constant 0 : index
    %3 = vector.load %arg3[%c0_4, %c0_5] : memref<1x32xf32, #tpu.memory_space<vmem>>, vector<1x32xf32>
    %cst = arith.constant dense<0.000000e+00> : vector<5xf32>
    %4 = vector.multi_reduction <add>, %1, %cst [1] : vector<5x32xf32> to vector<5xf32>
    %5 = vector.shape_cast %4 : vector<5xf32> to vector<5x1xf32>
    %cst_6 = arith.constant 3.200000e+01 : f32
    %6 = vector.broadcast %cst_6 : f32 to vector<5x1xf32>
    %7 = arith.divf %5, %6 : vector<5x1xf32>
    %8 = vector.broadcast %7 : vector<5x1xf32> to vector<5x32xf32>
    %9 = arith.subf %1, %8 : vector<5x32xf32>
    %10 = vector.broadcast %7 : vector<5x1xf32> to vector<5x32xf32>
    %11 = arith.subf %1, %10 : vector<5x32xf32>
    %12 = arith.mulf %9, %11 : vector<5x32xf32>
    %cst_7 = arith.constant dense<0.000000e+00> : vector<5xf32>
    %13 = vector.multi_reduction <add>, %12, %cst_7 [1] : vector<5x32xf32> to vector<5xf32>
    %14 = vector.shape_cast %13 : vector<5xf32> to vector<5x1xf32>
    %cst_8 = arith.constant 3.200000e+01 : f32
    %15 = vector.broadcast %cst_8 : f32 to vector<5x1xf32>
    %16 = arith.divf %14, %15 : vector<5x1xf32>
    %17 = vector.broadcast %7 : vector<5x1xf32> to vector<5x32xf32>
    %18 = arith.subf %1, %17 : vector<5x32xf32>
    %cst_9 = arith.constant 9.99999974E-6 : f32
    %19 = vector.broadcast %cst_9 : f32 to vector<5x1xf32>
    %20 = arith.addf %16, %19 : vector<5x1xf32>
    %21 = math.rsqrt %20 : vector<5x1xf32>
    %22 = vector.broadcast %21 : vector<5x1xf32> to vector<5x32xf32>
    %23 = arith.mulf %18, %22 : vector<5x32xf32>
    %24 = vector.broadcast %2 : vector<1x32xf32> to vector<5x32xf32>
    %25 = arith.mulf %23, %24 : vector<5x32xf32>
    %26 = vector.broadcast %3 : vector<1x32xf32> to vector<5x32xf32>
    %27 = arith.addf %25, %26 : vector<5x32xf32>
    %c0_10 = arith.constant 0 : index
    %c0_11 = arith.constant 0 : index
    %28 = vector.load %arg4[%c0_10, %c0_11] : memref<32x96xf32, #tpu.memory_space<vmem>>, vector<32x96xf32>
    %c0_12 = arith.constant 0 : index
    %c0_13 = arith.constant 0 : index
    %29 = vector.load %arg5[%c0_12, %c0_13] : memref<1x96xf32, #tpu.memory_space<vmem>>, vector<1x96xf32>
    %cst_14 = arith.constant dense<0.000000e+00> : vector<5x96xf32>
    %30 = tpu.matmul %27, %28, %cst_14 {dimension_numbers = #tpu.dot_dimension_numbers<[1], [0], [0], [1], [0, 0, 1, 1], [], []>} : vector<5x32xf32>, vector<32x96xf32>, vector<5x96xf32> -> vector<5x96xf32>
    %31 = vector.broadcast %29 : vector<1x96xf32> to vector<5x96xf32>
    %32 = arith.addf %30, %31 : vector<5x96xf32>
    %33 = vector.extract_strided_slice %32 {offsets = [0, 0], sizes = [5, 32], strides = [1, 1]} : vector<5x96xf32> to vector<5x32xf32>
    %34 = vector.extract_strided_slice %32 {offsets = [0, 32], sizes = [5, 32], strides = [1, 1]} : vector<5x96xf32> to vector<5x32xf32>
    %35 = vector.extract_strided_slice %32 {offsets = [0, 64], sizes = [5, 32], strides = [1, 1]} : vector<5x96xf32> to vector<5x32xf32>
    %c0_15 = arith.constant 0 : index
    %c0_16 = arith.constant 0 : index
    %36 = vector.load %arg6[%c0_15, %c0_16] : memref<32x32xf32, #tpu.memory_space<vmem>>, vector<32x32xf32>
    %cst_17 = arith.constant 0.000000e+00 : f32
    %37 = vector.broadcast %cst_17 : f32 to vector<5x32xf32>
    %38 = vector.extract_strided_slice %33 {offsets = [0, 0], sizes = [5, 8], strides = [1, 1]} : vector<5x32xf32> to vector<5x8xf32>
    %39 = vector.extract_strided_slice %34 {offsets = [0, 0], sizes = [5, 8], strides = [1, 1]} : vector<5x32xf32> to vector<5x8xf32>
    %40 = vector.extract_strided_slice %35 {offsets = [0, 0], sizes = [5, 8], strides = [1, 1]} : vector<5x32xf32> to vector<5x8xf32>
    %cst_18 = arith.constant dense<0.000000e+00> : vector<5x5xf32>
    %41 = tpu.matmul %38, %39, %cst_18 {dimension_numbers = #tpu.dot_dimension_numbers<[1], [1], [0], [0], [0, 0, 1, 0], [], []>} : vector<5x8xf32>, vector<5x8xf32>, vector<5x5xf32> -> vector<5x5xf32>
    %cst_19 = arith.constant 0.353553385 : f32
    %42 = vector.broadcast %cst_19 : f32 to vector<5x5xf32>
    %43 = arith.mulf %41, %42 : vector<5x5xf32>
    %cst_20 = arith.constant dense<0xFF800000> : vector<5xf32>
    %44 = vector.multi_reduction <maximumf>, %43, %cst_20 [1] : vector<5x5xf32> to vector<5xf32>
    %45 = vector.shape_cast %44 : vector<5xf32> to vector<5x1xf32>
    %46 = vector.broadcast %45 : vector<5x1xf32> to vector<5x5xf32>
    %47 = arith.subf %43, %46 : vector<5x5xf32>
    %48 = math.exp %47 : vector<5x5xf32>
    %cst_21 = arith.constant dense<0.000000e+00> : vector<5xf32>
    %49 = vector.multi_reduction <add>, %48, %cst_21 [1] : vector<5x5xf32> to vector<5xf32>
    %50 = vector.shape_cast %49 : vector<5xf32> to vector<5x1xf32>
    %51 = tpu.reciprocal %50 {approx = true} : vector<5x1xf32> -> vector<5x1xf32>
    %52 = vector.broadcast %51 : vector<5x1xf32> to vector<5x5xf32>
    %53 = arith.mulf %48, %52 : vector<5x5xf32>
    %cst_22 = arith.constant dense<0.000000e+00> : vector<5x8xf32>
    %54 = tpu.matmul %53, %40, %cst_22 {dimension_numbers = #tpu.dot_dimension_numbers<[1], [0], [0], [1], [0, 0, 1, 1], [], []>} : vector<5x5xf32>, vector<5x8xf32>, vector<5x8xf32> -> vector<5x8xf32>
    %55 = vector.extract_strided_slice %36 {offsets = [0, 0], sizes = [8, 32], strides = [1, 1]} : vector<32x32xf32> to vector<8x32xf32>
    %cst_23 = arith.constant dense<0.000000e+00> : vector<5x32xf32>
    %56 = tpu.matmul %54, %55, %cst_23 {dimension_numbers = #tpu.dot_dimension_numbers<[1], [0], [0], [1], [0, 0, 1, 1], [], []>} : vector<5x8xf32>, vector<8x32xf32>, vector<5x32xf32> -> vector<5x32xf32>
    %57 = arith.addf %37, %56 : vector<5x32xf32>
    %58 = vector.extract_strided_slice %33 {offsets = [0, 8], sizes = [5, 8], strides = [1, 1]} : vector<5x32xf32> to vector<5x8xf32>
    %59 = vector.extract_strided_slice %34 {offsets = [0, 8], sizes = [5, 8], strides = [1, 1]} : vector<5x32xf32> to vector<5x8xf32>
    %60 = vector.extract_strided_slice %35 {offsets = [0, 8], sizes = [5, 8], strides = [1, 1]} : vector<5x32xf32> to vector<5x8xf32>
    %cst_24 = arith.constant dense<0.000000e+00> : vector<5x5xf32>
    %61 = tpu.matmul %58, %59, %cst_24 {dimension_numbers = #tpu.dot_dimension_numbers<[1], [1], [0], [0], [0, 0, 1, 0], [], []>} : vector<5x8xf32>, vector<5x8xf32>, vector<5x5xf32> -> vector<5x5xf32>
    %cst_25 = arith.constant 0.353553385 : f32
    %62 = vector.broadcast %cst_25 : f32 to vector<5x5xf32>
    %63 = arith.mulf %61, %62 : vector<5x5xf32>
    %cst_26 = arith.constant dense<0xFF800000> : vector<5xf32>
    %64 = vector.multi_reduction <maximumf>, %63, %cst_26 [1] : vector<5x5xf32> to vector<5xf32>
    %65 = vector.shape_cast %64 : vector<5xf32> to vector<5x1xf32>
    %66 = vector.broadcast %65 : vector<5x1xf32> to vector<5x5xf32>
    %67 = arith.subf %63, %66 : vector<5x5xf32>
    %68 = math.exp %67 : vector<5x5xf32>
    %cst_27 = arith.constant dense<0.000000e+00> : vector<5xf32>
    %69 = vector.multi_reduction <add>, %68, %cst_27 [1] : vector<5x5xf32> to vector<5xf32>
    %70 = vector.shape_cast %69 : vector<5xf32> to vector<5x1xf32>
    %71 = tpu.reciprocal %70 {approx = true} : vector<5x1xf32> -> vector<5x1xf32>
    %72 = vector.broadcast %71 : vector<5x1xf32> to vector<5x5xf32>
    %73 = arith.mulf %68, %72 : vector<5x5xf32>
    %cst_28 = arith.constant dense<0.000000e+00> : vector<5x8xf32>
    %74 = tpu.matmul %73, %60, %cst_28 {dimension_numbers = #tpu.dot_dimension_numbers<[1], [0], [0], [1], [0, 0, 1, 1], [], []>} : vector<5x5xf32>, vector<5x8xf32>, vector<5x8xf32> -> vector<5x8xf32>
    %75 = vector.extract_strided_slice %36 {offsets = [8, 0], sizes = [8, 32], strides = [1, 1]} : vector<32x32xf32> to vector<8x32xf32>
    %cst_29 = arith.constant dense<0.000000e+00> : vector<5x32xf32>
    %76 = tpu.matmul %74, %75, %cst_29 {dimension_numbers = #tpu.dot_dimension_numbers<[1], [0], [0], [1], [0, 0, 1, 1], [], []>} : vector<5x8xf32>, vector<8x32xf32>, vector<5x32xf32> -> vector<5x32xf32>
    %77 = arith.addf %57, %76 : vector<5x32xf32>
    %78 = vector.extract_strided_slice %33 {offsets = [0, 16], sizes = [5, 8], strides = [1, 1]} : vector<5x32xf32> to vector<5x8xf32>
    %79 = vector.extract_strided_slice %34 {offsets = [0, 16], sizes = [5, 8], strides = [1, 1]} : vector<5x32xf32> to vector<5x8xf32>
    %80 = vector.extract_strided_slice %35 {offsets = [0, 16], sizes = [5, 8], strides = [1, 1]} : vector<5x32xf32> to vector<5x8xf32>
    %cst_30 = arith.constant dense<0.000000e+00> : vector<5x5xf32>
    %81 = tpu.matmul %78, %79, %cst_30 {dimension_numbers = #tpu.dot_dimension_numbers<[1], [1], [0], [0], [0, 0, 1, 0], [], []>} : vector<5x8xf32>, vector<5x8xf32>, vector<5x5xf32> -> vector<5x5xf32>
    %cst_31 = arith.constant 0.353553385 : f32
    %82 = vector.broadcast %cst_31 : f32 to vector<5x5xf32>
    %83 = arith.mulf %81, %82 : vector<5x5xf32>
    %cst_32 = arith.constant dense<0xFF800000> : vector<5xf32>
    %84 = vector.multi_reduction <maximumf>, %83, %cst_32 [1] : vector<5x5xf32> to vector<5xf32>
    %85 = vector.shape_cast %84 : vector<5xf32> to vector<5x1xf32>
    %86 = vector.broadcast %85 : vector<5x1xf32> to vector<5x5xf32>
    %87 = arith.subf %83, %86 : vector<5x5xf32>
    %88 = math.exp %87 : vector<5x5xf32>
    %cst_33 = arith.constant dense<0.000000e+00> : vector<5xf32>
    %89 = vector.multi_reduction <add>, %88, %cst_33 [1] : vector<5x5xf32> to vector<5xf32>
    %90 = vector.shape_cast %89 : vector<5xf32> to vector<5x1xf32>
    %91 = tpu.reciprocal %90 {approx = true} : vector<5x1xf32> -> vector<5x1xf32>
    %92 = vector.broadcast %91 : vector<5x1xf32> to vector<5x5xf32>
    %93 = arith.mulf %88, %92 : vector<5x5xf32>
    %cst_34 = arith.constant dense<0.000000e+00> : vector<5x8xf32>
    %94 = tpu.matmul %93, %80, %cst_34 {dimension_numbers = #tpu.dot_dimension_numbers<[1], [0], [0], [1], [0, 0, 1, 1], [], []>} : vector<5x5xf32>, vector<5x8xf32>, vector<5x8xf32> -> vector<5x8xf32>
    %95 = vector.extract_strided_slice %36 {offsets = [16, 0], sizes = [8, 32], strides = [1, 1]} : vector<32x32xf32> to vector<8x32xf32>
    %cst_35 = arith.constant dense<0.000000e+00> : vector<5x32xf32>
    %96 = tpu.matmul %94, %95, %cst_35 {dimension_numbers = #tpu.dot_dimension_numbers<[1], [0], [0], [1], [0, 0, 1, 1], [], []>} : vector<5x8xf32>, vector<8x32xf32>, vector<5x32xf32> -> vector<5x32xf32>
    %97 = arith.addf %77, %96 : vector<5x32xf32>
    %98 = vector.extract_strided_slice %33 {offsets = [0, 24], sizes = [5, 8], strides = [1, 1]} : vector<5x32xf32> to vector<5x8xf32>
    %99 = vector.extract_strided_slice %34 {offsets = [0, 24], sizes = [5, 8], strides = [1, 1]} : vector<5x32xf32> to vector<5x8xf32>
    %100 = vector.extract_strided_slice %35 {offsets = [0, 24], sizes = [5, 8], strides = [1, 1]} : vector<5x32xf32> to vector<5x8xf32>
    %cst_36 = arith.constant dense<0.000000e+00> : vector<5x5xf32>
    %101 = tpu.matmul %98, %99, %cst_36 {dimension_numbers = #tpu.dot_dimension_numbers<[1], [1], [0], [0], [0, 0, 1, 0], [], []>} : vector<5x8xf32>, vector<5x8xf32>, vector<5x5xf32> -> vector<5x5xf32>
    %cst_37 = arith.constant 0.353553385 : f32
    %102 = vector.broadcast %cst_37 : f32 to vector<5x5xf32>
    %103 = arith.mulf %101, %102 : vector<5x5xf32>
    %cst_38 = arith.constant dense<0xFF800000> : vector<5xf32>
    %104 = vector.multi_reduction <maximumf>, %103, %cst_38 [1] : vector<5x5xf32> to vector<5xf32>
    %105 = vector.shape_cast %104 : vector<5xf32> to vector<5x1xf32>
    %106 = vector.broadcast %105 : vector<5x1xf32> to vector<5x5xf32>
    %107 = arith.subf %103, %106 : vector<5x5xf32>
    %108 = math.exp %107 : vector<5x5xf32>
    %cst_39 = arith.constant dense<0.000000e+00> : vector<5xf32>
    %109 = vector.multi_reduction <add>, %108, %cst_39 [1] : vector<5x5xf32> to vector<5xf32>
    %110 = vector.shape_cast %109 : vector<5xf32> to vector<5x1xf32>
    %111 = tpu.reciprocal %110 {approx = true} : vector<5x1xf32> -> vector<5x1xf32>
    %112 = vector.broadcast %111 : vector<5x1xf32> to vector<5x5xf32>
    %113 = arith.mulf %108, %112 : vector<5x5xf32>
    %cst_40 = arith.constant dense<0.000000e+00> : vector<5x8xf32>
    %114 = tpu.matmul %113, %100, %cst_40 {dimension_numbers = #tpu.dot_dimension_numbers<[1], [0], [0], [1], [0, 0, 1, 1], [], []>} : vector<5x5xf32>, vector<5x8xf32>, vector<5x8xf32> -> vector<5x8xf32>
    %115 = vector.extract_strided_slice %36 {offsets = [24, 0], sizes = [8, 32], strides = [1, 1]} : vector<32x32xf32> to vector<8x32xf32>
    %cst_41 = arith.constant dense<0.000000e+00> : vector<5x32xf32>
    %116 = tpu.matmul %114, %115, %cst_41 {dimension_numbers = #tpu.dot_dimension_numbers<[1], [0], [0], [1], [0, 0, 1, 1], [], []>} : vector<5x8xf32>, vector<8x32xf32>, vector<5x32xf32> -> vector<5x32xf32>
    %117 = arith.addf %97, %116 : vector<5x32xf32>
    %c0_42 = arith.constant 0 : index
    %c0_43 = arith.constant 0 : index
    %118 = vector.load %arg7[%c0_42, %c0_43] : memref<1x32xf32, #tpu.memory_space<vmem>>, vector<1x32xf32>
    %119 = vector.broadcast %118 : vector<1x32xf32> to vector<5x32xf32>
    %120 = arith.addf %117, %119 : vector<5x32xf32>
    %121 = arith.addf %1, %120 : vector<5x32xf32>
    %c0_44 = arith.constant 0 : index
    %c0_45 = arith.constant 0 : index
    %122 = vector.load %arg8[%c0_44, %c0_45] : memref<1x32xf32, #tpu.memory_space<vmem>>, vector<1x32xf32>
    %c0_46 = arith.constant 0 : index
    %c0_47 = arith.constant 0 : index
    %123 = vector.load %arg9[%c0_46, %c0_47] : memref<1x32xf32, #tpu.memory_space<vmem>>, vector<1x32xf32>
    %cst_48 = arith.constant dense<0.000000e+00> : vector<5xf32>
    %124 = vector.multi_reduction <add>, %121, %cst_48 [1] : vector<5x32xf32> to vector<5xf32>
    %125 = vector.shape_cast %124 : vector<5xf32> to vector<5x1xf32>
    %cst_49 = arith.constant 3.200000e+01 : f32
    %126 = vector.broadcast %cst_49 : f32 to vector<5x1xf32>
    %127 = arith.divf %125, %126 : vector<5x1xf32>
    %128 = vector.broadcast %127 : vector<5x1xf32> to vector<5x32xf32>
    %129 = arith.subf %121, %128 : vector<5x32xf32>
    %130 = vector.broadcast %127 : vector<5x1xf32> to vector<5x32xf32>
    %131 = arith.subf %121, %130 : vector<5x32xf32>
    %132 = arith.mulf %129, %131 : vector<5x32xf32>
    %cst_50 = arith.constant dense<0.000000e+00> : vector<5xf32>
    %133 = vector.multi_reduction <add>, %132, %cst_50 [1] : vector<5x32xf32> to vector<5xf32>
    %134 = vector.shape_cast %133 : vector<5xf32> to vector<5x1xf32>
    %cst_51 = arith.constant 3.200000e+01 : f32
    %135 = vector.broadcast %cst_51 : f32 to vector<5x1xf32>
    %136 = arith.divf %134, %135 : vector<5x1xf32>
    %137 = vector.broadcast %127 : vector<5x1xf32> to vector<5x32xf32>
    %138 = arith.subf %121, %137 : vector<5x32xf32>
    %cst_52 = arith.constant 9.99999974E-6 : f32
    %139 = vector.broadcast %cst_52 : f32 to vector<5x1xf32>
    %140 = arith.addf %136, %139 : vector<5x1xf32>
    %141 = math.rsqrt %140 : vector<5x1xf32>
    %142 = vector.broadcast %141 : vector<5x1xf32> to vector<5x32xf32>
    %143 = arith.mulf %138, %142 : vector<5x32xf32>
    %144 = vector.broadcast %122 : vector<1x32xf32> to vector<5x32xf32>
    %145 = arith.mulf %143, %144 : vector<5x32xf32>
    %146 = vector.broadcast %123 : vector<1x32xf32> to vector<5x32xf32>
    %147 = arith.addf %145, %146 : vector<5x32xf32>
    %c0_53 = arith.constant 0 : index
    %c0_54 = arith.constant 0 : index
    %148 = vector.load %arg10[%c0_53, %c0_54] : memref<32x64xf32, #tpu.memory_space<vmem>>, vector<32x64xf32>
    %c0_55 = arith.constant 0 : index
    %c0_56 = arith.constant 0 : index
    %149 = vector.load %arg11[%c0_55, %c0_56] : memref<1x64xf32, #tpu.memory_space<vmem>>, vector<1x64xf32>
    %cst_57 = arith.constant dense<0.000000e+00> : vector<5x64xf32>
    %150 = tpu.matmul %147, %148, %cst_57 {dimension_numbers = #tpu.dot_dimension_numbers<[1], [0], [0], [1], [0, 0, 1, 1], [], []>} : vector<5x32xf32>, vector<32x64xf32>, vector<5x64xf32> -> vector<5x64xf32>
    %151 = vector.broadcast %149 : vector<1x64xf32> to vector<5x64xf32>
    %152 = arith.addf %150, %151 : vector<5x64xf32>
    %cst_58 = arith.constant 5.000000e-01 : f32
    %153 = vector.broadcast %cst_58 : f32 to vector<5x64xf32>
    %154 = arith.mulf %153, %152 : vector<5x64xf32>
    %cst_59 = arith.constant 4.471500e-02 : f32
    %155 = vector.broadcast %cst_59 : f32 to vector<5x64xf32>
    %156 = arith.mulf %155, %152 : vector<5x64xf32>
    %157 = arith.mulf %156, %152 : vector<5x64xf32>
    %158 = arith.mulf %157, %152 : vector<5x64xf32>
    %159 = arith.addf %152, %158 : vector<5x64xf32>
    %cst_60 = arith.constant 0.797884583 : f32
    %160 = vector.broadcast %cst_60 : f32 to vector<5x64xf32>
    %161 = arith.mulf %160, %159 : vector<5x64xf32>
    %162 = math.tanh %161 : vector<5x64xf32>
    %cst_61 = arith.constant 1.000000e+00 : f32
    %163 = vector.broadcast %cst_61 : f32 to vector<5x64xf32>
    %164 = arith.addf %163, %162 : vector<5x64xf32>
    %165 = arith.mulf %154, %164 : vector<5x64xf32>
    %c0_62 = arith.constant 0 : index
    %c0_63 = arith.constant 0 : index
    %166 = vector.load %arg12[%c0_62, %c0_63] : memref<64x32xf32, #tpu.memory_space<vmem>>, vector<64x32xf32>
    %c0_64 = arith.constant 0 : index
    %c0_65 = arith.constant 0 : index
    %167 = vector.load %arg13[%c0_64, %c0_65] : memref<1x32xf32, #tpu.memory_space<vmem>>, vector<1x32xf32>
    %cst_66 = arith.constant dense<0.000000e+00> : vector<5x32xf32>
    %168 = tpu.matmul %165, %166, %cst_66 {dimension_numbers = #tpu.dot_dimension_numbers<[1], [0], [0], [1], [0, 0, 1, 1], [], []>} : vector<5x64xf32>, vector<64x32xf32>, vector<5x32xf32> -> vector<5x32xf32>
    %169 = vector.broadcast %167 : vector<1x32xf32> to vector<5x32xf32>
    %170 = arith.addf %168, %169 : vector<5x32xf32>
    %171 = arith.addf %121, %170 : vector<5x32xf32>
    %c0_67 = arith.constant 0 : index
    %c0_68 = arith.constant 0 : index
    %c0_69 = arith.constant 0 : index
    %172 = vector.load %arg14[%c0_67, %c0_68, %c0_69] : memref<1x5x32xf32, #tpu.memory_space<vmem>>, vector<1x5x32xf32>
    %173 = vector.shape_cast %172 : vector<1x5x32xf32> to vector<5x32xf32>
    %174 = vector.shape_cast %171 : vector<5x32xf32> to vector<1x5x32xf32>
    tpu.vector_store %arg14[%c0_67, %c0_68, %c0_69], %174 {strides = array<i32>} : memref<1x5x32xf32, #tpu.memory_space<vmem>>, vector<1x5x32xf32>,
    return
  }
  func.func @transform_0(%arg0: i32) -> (i32, i32, i32) {
    %c0_i32 = arith.constant 0 : i32
    %c0_i32_0 = arith.constant 0 : i32
    %c0_i32_1 = arith.constant 0 : i32
    return %arg0, %c0_i32, %c0_i32_0 : i32, i32, i32
  }
  func.func @transform_1(%arg0: i32) -> (i32, i32) {
    %c0_i32 = arith.constant 0 : i32
    %c0_i32_0 = arith.constant 0 : i32
    %c0_i32_1 = arith.constant 0 : i32
    return %c0_i32, %c0_i32_0 : i32, i32
  }
  func.func @transform_2(%arg0: i32) -> (i32, i32) {
    %c0_i32 = arith.constant 0 : i32
    %c0_i32_0 = arith.constant 0 : i32
    %c0_i32_1 = arith.constant 0 : i32
    return %c0_i32, %c0_i32_0 : i32, i32
  }
  func.func @transform_3(%arg0: i32) -> (i32, i32) {
    %c0_i32 = arith.constant 0 : i32
    %c0_i32_0 = arith.constant 0 : i32
    %c0_i32_1 = arith.constant 0 : i32
    return %c0_i32, %c0_i32_0 : i32, i32
  }
  func.func @transform_4(%arg0: i32) -> (i32, i32) {
    %c0_i32 = arith.constant 0 : i32
    %c0_i32_0 = arith.constant 0 : i32
    %c0_i32_1 = arith.constant 0 : i32
    return %c0_i32, %c0_i32_0 : i32, i32
  }
  func.func @transform_5(%arg0: i32) -> (i32, i32) {
    %c0_i32 = arith.constant 0 : i32
    %c0_i32_0 = arith.constant 0 : i32
    %c0_i32_1 = arith.constant 0 : i32
    return %c0_i32, %c0_i32_0 : i32, i32
  }
  func.func @transform_6(%arg0: i32) -> (i32, i32) {
    %c0_i32 = arith.constant 0 : i32
    %c0_i32_0 = arith.constant 0 : i32
    %c0_i32_1 = arith.constant 0 : i32
    return %c0_i32, %c0_i32_0 : i32, i32
  }
  func.func @transform_7(%arg0: i32) -> (i32, i32) {
    %c0_i32 = arith.constant 0 : i32
    %c0_i32_0 = arith.constant 0 : i32
    %c0_i32_1 = arith.constant 0 : i32
    return %c0_i32, %c0_i32_0 : i32, i32
  }
  func.func @transform_8(%arg0: i32) -> (i32, i32) {
    %c0_i32 = arith.constant 0 : i32
    %c0_i32_0 = arith.constant 0 : i32
    %c0_i32_1 = arith.constant 0 : i32
    return %c0_i32, %c0_i32_0 : i32, i32
  }
  func.func @transform_9(%arg0: i32) -> (i32, i32) {
    %c0_i32 = arith.constant 0 : i32
    %c0_i32_0 = arith.constant 0 : i32
    %c0_i32_1 = arith.constant 0 : i32
    return %c0_i32, %c0_i32_0 : i32, i32
  }
  func.func @transform_10(%arg0: i32) -> (i32, i32) {
    %c0_i32 = arith.constant 0 : i32
    %c0_i32_0 = arith.constant 0 : i32
    %c0_i32_1 = arith.constant 0 : i32
    return %c0_i32, %c0_i32_0 : i32, i32
  }
  func.func @transform_11(%arg0: i32) -> (i32, i32) {
    %c0_i32 = arith.constant 0 : i32
    %c0_i32_0 = arith.constant 0 : i32
    %c0_i32_1 = arith.constant 0 : i32
    return %c0_i32, %c0_i32_0 : i32, i32
  }
  func.func @transform_12(%arg0: i32) -> (i32, i32) {
    %c0_i32 = arith.constant 0 : i32
    %c0_i32_0 = arith.constant 0 : i32
    %c0_i32_1 = arith.constant 0 : i32
    return %c0_i32, %c0_i32_0 : i32, i32
  }
  func.func @transform_13(%arg0: i32) -> (i32, i32, i32) {
    %c0_i32 = arith.constant 0 : i32
    %c0_i32_0 = arith.constant 0 : i32
    %c0_i32_1 = arith.constant 0 : i32
    return %arg0, %c0_i32, %c0_i32_0 : i32, i32, i32
  }
}

module attributes {stable_mosaic.version = 11 : i64} {
  func.func @_norm_kernel(%arg0: i32, %arg1: memref<10x32xf32, #tpu.memory_space<vmem>>, %arg2: memref<1x32xf32, #tpu.memory_space<vmem>>, %arg3: memref<1x32xf32, #tpu.memory_space<vmem>>, %arg4: memref<10x32xf32, #tpu.memory_space<vmem>>) attributes {dimension_semantics = [#tpu.dimension_semantics<arbitrary>], iteration_bounds = array<i64: 1>, scalar_prefetch = 0 : i64, scratch_operands = 0 : i64, tpu.core_type = #tpu.core_type<tc>, window_params = [{pipeline_mode = #tpu.pipeline_mode<synchronous>, transform_indices = @transform_0, window_bounds = array<i64: 10, 32>}, {pipeline_mode = #tpu.pipeline_mode<synchronous>, transform_indices = @transform_1, window_bounds = array<i64: 1, 32>}, {pipeline_mode = #tpu.pipeline_mode<synchronous>, transform_indices = @transform_2, window_bounds = array<i64: 1, 32>}, {pipeline_mode = #tpu.pipeline_mode<synchronous>, transform_indices = @transform_3, window_bounds = array<i64: 10, 32>}]} {
    %c0 = arith.constant 0 : index
    %c0_0 = arith.constant 0 : index
    %0 = vector.load %arg1[%c0, %c0_0] : memref<10x32xf32, #tpu.memory_space<vmem>>, vector<10x32xf32>
    %c0_1 = arith.constant 0 : index
    %c0_2 = arith.constant 0 : index
    %1 = vector.load %arg2[%c0_1, %c0_2] : memref<1x32xf32, #tpu.memory_space<vmem>>, vector<1x32xf32>
    %c0_3 = arith.constant 0 : index
    %c0_4 = arith.constant 0 : index
    %2 = vector.load %arg3[%c0_3, %c0_4] : memref<1x32xf32, #tpu.memory_space<vmem>>, vector<1x32xf32>
    %cst = arith.constant dense<0.000000e+00> : vector<10xf32>
    %3 = vector.multi_reduction <add>, %0, %cst [1] : vector<10x32xf32> to vector<10xf32>
    %4 = vector.shape_cast %3 : vector<10xf32> to vector<10x1xf32>
    %cst_5 = arith.constant 3.200000e+01 : f32
    %5 = vector.broadcast %cst_5 : f32 to vector<10x1xf32>
    %6 = arith.divf %4, %5 : vector<10x1xf32>
    %7 = vector.broadcast %6 : vector<10x1xf32> to vector<10x32xf32>
    %8 = arith.subf %0, %7 : vector<10x32xf32>
    %9 = vector.broadcast %6 : vector<10x1xf32> to vector<10x32xf32>
    %10 = arith.subf %0, %9 : vector<10x32xf32>
    %11 = arith.mulf %8, %10 : vector<10x32xf32>
    %cst_6 = arith.constant dense<0.000000e+00> : vector<10xf32>
    %12 = vector.multi_reduction <add>, %11, %cst_6 [1] : vector<10x32xf32> to vector<10xf32>
    %13 = vector.shape_cast %12 : vector<10xf32> to vector<10x1xf32>
    %cst_7 = arith.constant 3.200000e+01 : f32
    %14 = vector.broadcast %cst_7 : f32 to vector<10x1xf32>
    %15 = arith.divf %13, %14 : vector<10x1xf32>
    %16 = vector.broadcast %6 : vector<10x1xf32> to vector<10x32xf32>
    %17 = arith.subf %0, %16 : vector<10x32xf32>
    %cst_8 = arith.constant 9.99999974E-6 : f32
    %18 = vector.broadcast %cst_8 : f32 to vector<10x1xf32>
    %19 = arith.addf %15, %18 : vector<10x1xf32>
    %20 = math.rsqrt %19 : vector<10x1xf32>
    %21 = vector.broadcast %20 : vector<10x1xf32> to vector<10x32xf32>
    %22 = arith.mulf %17, %21 : vector<10x32xf32>
    %23 = vector.broadcast %1 : vector<1x32xf32> to vector<10x32xf32>
    %24 = arith.mulf %22, %23 : vector<10x32xf32>
    %25 = vector.broadcast %2 : vector<1x32xf32> to vector<10x32xf32>
    %26 = arith.addf %24, %25 : vector<10x32xf32>
    %c0_9 = arith.constant 0 : index
    %c0_10 = arith.constant 0 : index
    %27 = vector.load %arg4[%c0_9, %c0_10] : memref<10x32xf32, #tpu.memory_space<vmem>>, vector<10x32xf32>
    tpu.vector_store %arg4[%c0_9, %c0_10], %26 {strides = array<i32>} : memref<10x32xf32, #tpu.memory_space<vmem>>, vector<10x32xf32>,
    return
  }
  func.func @transform_0(%arg0: i32) -> (i32, i32) {
    %c0_i32 = arith.constant 0 : i32
    %c0_i32_0 = arith.constant 0 : i32
    %c0_i32_1 = arith.constant 0 : i32
    return %c0_i32, %c0_i32_0 : i32, i32
  }
  func.func @transform_1(%arg0: i32) -> (i32, i32) {
    %c0_i32 = arith.constant 0 : i32
    %c0_i32_0 = arith.constant 0 : i32
    %c0_i32_1 = arith.constant 0 : i32
    return %c0_i32, %c0_i32_0 : i32, i32
  }
  func.func @transform_2(%arg0: i32) -> (i32, i32) {
    %c0_i32 = arith.constant 0 : i32
    %c0_i32_0 = arith.constant 0 : i32
    %c0_i32_1 = arith.constant 0 : i32
    return %c0_i32, %c0_i32_0 : i32, i32
  }
  func.func @transform_3(%arg0: i32) -> (i32, i32) {
    %c0_i32 = arith.constant 0 : i32
    %c0_i32_0 = arith.constant 0 : i32
    %c0_i32_1 = arith.constant 0 : i32
    return %c0_i32, %c0_i32_0 : i32, i32
  }
}

module attributes {stable_mosaic.version = 11 : i64} {
  func.func @_linear_kernel(%arg0: i32, %arg1: memref<16x32xf32, #tpu.memory_space<vmem>>, %arg2: memref<32x32xf32, #tpu.memory_space<vmem>>, %arg3: memref<1x32xf32, #tpu.memory_space<vmem>>, %arg4: memref<16x32xf32, #tpu.memory_space<vmem>>) attributes {dimension_semantics = [#tpu.dimension_semantics<arbitrary>], iteration_bounds = array<i64: 1>, scalar_prefetch = 0 : i64, scratch_operands = 0 : i64, tpu.core_type = #tpu.core_type<tc>, window_params = [{pipeline_mode = #tpu.pipeline_mode<synchronous>, transform_indices = @transform_0, window_bounds = array<i64: 16, 32>}, {pipeline_mode = #tpu.pipeline_mode<synchronous>, transform_indices = @transform_1, window_bounds = array<i64: 32, 32>}, {pipeline_mode = #tpu.pipeline_mode<synchronous>, transform_indices = @transform_2, window_bounds = array<i64: 1, 32>}, {pipeline_mode = #tpu.pipeline_mode<synchronous>, transform_indices = @transform_3, window_bounds = array<i64: 16, 32>}]} {
    %c0 = arith.constant 0 : index
    %c0_0 = arith.constant 0 : index
    %0 = vector.load %arg1[%c0, %c0_0] : memref<16x32xf32, #tpu.memory_space<vmem>>, vector<16x32xf32>
    %c0_1 = arith.constant 0 : index
    %c0_2 = arith.constant 0 : index
    %1 = vector.load %arg2[%c0_1, %c0_2] : memref<32x32xf32, #tpu.memory_space<vmem>>, vector<32x32xf32>
    %c0_3 = arith.constant 0 : index
    %c0_4 = arith.constant 0 : index
    %2 = vector.load %arg3[%c0_3, %c0_4] : memref<1x32xf32, #tpu.memory_space<vmem>>, vector<1x32xf32>
    %cst = arith.constant dense<0.000000e+00> : vector<16x32xf32>
    %3 = tpu.matmul %0, %1, %cst {dimension_numbers = #tpu.dot_dimension_numbers<[1], [0], [0], [1], [0, 0, 1, 1], [], []>} : vector<16x32xf32>, vector<32x32xf32>, vector<16x32xf32> -> vector<16x32xf32>
    %4 = vector.broadcast %2 : vector<1x32xf32> to vector<16x32xf32>
    %5 = arith.addf %3, %4 : vector<16x32xf32>
    %c0_5 = arith.constant 0 : index
    %c0_6 = arith.constant 0 : index
    %6 = vector.load %arg4[%c0_5, %c0_6] : memref<16x32xf32, #tpu.memory_space<vmem>>, vector<16x32xf32>
    tpu.vector_store %arg4[%c0_5, %c0_6], %5 {strides = array<i32>} : memref<16x32xf32, #tpu.memory_space<vmem>>, vector<16x32xf32>,
    return
  }
  func.func @transform_0(%arg0: i32) -> (i32, i32) {
    %c0_i32 = arith.constant 0 : i32
    %c0_i32_0 = arith.constant 0 : i32
    %c0_i32_1 = arith.constant 0 : i32
    return %c0_i32, %c0_i32_0 : i32, i32
  }
  func.func @transform_1(%arg0: i32) -> (i32, i32) {
    %c0_i32 = arith.constant 0 : i32
    %c0_i32_0 = arith.constant 0 : i32
    %c0_i32_1 = arith.constant 0 : i32
    return %c0_i32, %c0_i32_0 : i32, i32
  }
  func.func @transform_2(%arg0: i32) -> (i32, i32) {
    %c0_i32 = arith.constant 0 : i32
    %c0_i32_0 = arith.constant 0 : i32
    %c0_i32_1 = arith.constant 0 : i32
    return %c0_i32, %c0_i32_0 : i32, i32
  }
  func.func @transform_3(%arg0: i32) -> (i32, i32) {
    %c0_i32 = arith.constant 0 : i32
    %c0_i32_0 = arith.constant 0 : i32
    %c0_i32_1 = arith.constant 0 : i32
    return %c0_i32, %c0_i32_0 : i32, i32
  }
}

module attributes {stable_mosaic.version = 11 : i64} {
  func.func @_qformer_layer_kernel(%arg0: i32, %arg1: memref<1x8x32xf32, #tpu.memory_space<vmem>>, %arg2: memref<1x5x32xf32, #tpu.memory_space<vmem>>, %arg3: memref<32x96xf32, #tpu.memory_space<vmem>>, %arg4: memref<1x96xf32, #tpu.memory_space<vmem>>, %arg5: memref<32x32xf32, #tpu.memory_space<vmem>>, %arg6: memref<1x32xf32, #tpu.memory_space<vmem>>, %arg7: memref<1x32xf32, #tpu.memory_space<vmem>>, %arg8: memref<1x32xf32, #tpu.memory_space<vmem>>, %arg9: memref<32x32xf32, #tpu.memory_space<vmem>>, %arg10: memref<1x32xf32, #tpu.memory_space<vmem>>, %arg11: memref<32x64xf32, #tpu.memory_space<vmem>>, %arg12: memref<1x64xf32, #tpu.memory_space<vmem>>, %arg13: memref<32x32xf32, #tpu.memory_space<vmem>>, %arg14: memref<1x32xf32, #tpu.memory_space<vmem>>, %arg15: memref<1x32xf32, #tpu.memory_space<vmem>>, %arg16: memref<1x32xf32, #tpu.memory_space<vmem>>, %arg17: memref<32x64xf32, #tpu.memory_space<vmem>>, %arg18: memref<1x64xf32, #tpu.memory_space<vmem>>, %arg19: memref<64x32xf32, #tpu.memory_space<vmem>>, %arg20: memref<1x32xf32, #tpu.memory_space<vmem>>, %arg21: memref<1x32xf32, #tpu.memory_space<vmem>>, %arg22: memref<1x32xf32, #tpu.memory_space<vmem>>, %arg23: memref<1x8x32xf32, #tpu.memory_space<vmem>>) attributes {dimension_semantics = [#tpu.dimension_semantics<parallel>], iteration_bounds = array<i64: 2>, scalar_prefetch = 0 : i64, scratch_operands = 0 : i64, tpu.core_type = #tpu.core_type<tc>, window_params = [{transform_indices = @transform_0, window_bounds = array<i64: 1, 8, 32>}, {transform_indices = @transform_1, window_bounds = array<i64: 1, 5, 32>}, {pipeline_mode = #tpu.pipeline_mode<synchronous>, transform_indices = @transform_2, window_bounds = array<i64: 32, 96>}, {pipeline_mode = #tpu.pipeline_mode<synchronous>, transform_indices = @transform_3, window_bounds = array<i64: 1, 96>}, {pipeline_mode = #tpu.pipeline_mode<synchronous>, transform_indices = @transform_4, window_bounds = array<i64: 32, 32>}, {pipeline_mode = #tpu.pipeline_mode<synchronous>, transform_indices = @transform_5, window_bounds = array<i64: 1, 32>}, {pipeline_mode = #tpu.pipeline_mode<synchronous>, transform_indices = @transform_6, window_bounds = array<i64: 1, 32>}, {pipeline_mode = #tpu.pipeline_mode<synchronous>, transform_indices = @transform_7, window_bounds = array<i64: 1, 32>}, {pipeline_mode = #tpu.pipeline_mode<synchronous>, transform_indices = @transform_8, window_bounds = array<i64: 32, 32>}, {pipeline_mode = #tpu.pipeline_mode<synchronous>, transform_indices = @transform_9, window_bounds = array<i64: 1, 32>}, {pipeline_mode = #tpu.pipeline_mode<synchronous>, transform_indices = @transform_10, window_bounds = array<i64: 32, 64>}, {pipeline_mode = #tpu.pipeline_mode<synchronous>, transform_indices = @transform_11, window_bounds = array<i64: 1, 64>}, {pipeline_mode = #tpu.pipeline_mode<synchronous>, transform_indices = @transform_12, window_bounds = array<i64: 32, 32>}, {pipeline_mode = #tpu.pipeline_mode<synchronous>, transform_indices = @transform_13, window_bounds = array<i64: 1, 32>}, {pipeline_mode = #tpu.pipeline_mode<synchronous>, transform_indices = @transform_14, window_bounds = array<i64: 1, 32>}, {pipeline_mode = #tpu.pipeline_mode<synchronous>, transform_indices = @transform_15, window_bounds = array<i64: 1, 32>}, {pipeline_mode = #tpu.pipeline_mode<synchronous>, transform_indices = @transform_16, window_bounds = array<i64: 32, 64>}, {pipeline_mode = #tpu.pipeline_mode<synchronous>, transform_indices = @transform_17, window_bounds = array<i64: 1, 64>}, {pipeline_mode = #tpu.pipeline_mode<synchronous>, transform_indices = @transform_18, window_bounds = array<i64: 64, 32>}, {pipeline_mode = #tpu.pipeline_mode<synchronous>, transform_indices = @transform_19, window_bounds = array<i64: 1, 32>}, {pipeline_mode = #tpu.pipeline_mode<synchronous>, transform_indices = @transform_20, window_bounds = array<i64: 1, 32>}, {pipeline_mode = #tpu.pipeline_mode<synchronous>, transform_indices = @transform_21, window_bounds = array<i64: 1, 32>}, {transform_indices = @transform_22, window_bounds = array<i64: 1, 8, 32>}]} {
    %c0 = arith.constant 0 : index
    %c0_0 = arith.constant 0 : index
    %c0_1 = arith.constant 0 : index
    %0 = vector.load %arg1[%c0, %c0_0, %c0_1] : memref<1x8x32xf32, #tpu.memory_space<vmem>>, vector<1x8x32xf32>
    %1 = vector.shape_cast %0 : vector<1x8x32xf32> to vector<8x32xf32>
    %c0_2 = arith.constant 0 : index
    %c0_3 = arith.constant 0 : index
    %c0_4 = arith.constant 0 : index
    %2 = vector.load %arg2[%c0_2, %c0_3, %c0_4] : memref<1x5x32xf32, #tpu.memory_space<vmem>>, vector<1x5x32xf32>
    %3 = vector.shape_cast %2 : vector<1x5x32xf32> to vector<5x32xf32>
    %c0_5 = arith.constant 0 : index
    %c0_6 = arith.constant 0 : index
    %4 = vector.load %arg3[%c0_5, %c0_6] : memref<32x96xf32, #tpu.memory_space<vmem>>, vector<32x96xf32>
    %c0_7 = arith.constant 0 : index
    %c0_8 = arith.constant 0 : index
    %5 = vector.load %arg4[%c0_7, %c0_8] : memref<1x96xf32, #tpu.memory_space<vmem>>, vector<1x96xf32>
    %cst = arith.constant dense<0.000000e+00> : vector<8x96xf32>
    %6 = tpu.matmul %1, %4, %cst {dimension_numbers = #tpu.dot_dimension_numbers<[1], [0], [0], [1], [0, 0, 1, 1], [], []>} : vector<8x32xf32>, vector<32x96xf32>, vector<8x96xf32> -> vector<8x96xf32>
    %7 = vector.broadcast %5 : vector<1x96xf32> to vector<8x96xf32>
    %8 = arith.addf %6, %7 : vector<8x96xf32>
    %9 = vector.extract_strided_slice %8 {offsets = [0, 0], sizes = [8, 32], strides = [1, 1]} : vector<8x96xf32> to vector<8x32xf32>
    %10 = vector.extract_strided_slice %8 {offsets = [0, 32], sizes = [8, 32], strides = [1, 1]} : vector<8x96xf32> to vector<8x32xf32>
    %11 = vector.extract_strided_slice %8 {offsets = [0, 64], sizes = [8, 32], strides = [1, 1]} : vector<8x96xf32> to vector<8x32xf32>
    %c0_9 = arith.constant 0 : index
    %c0_10 = arith.constant 0 : index
    %12 = vector.load %arg5[%c0_9, %c0_10] : memref<32x32xf32, #tpu.memory_space<vmem>>, vector<32x32xf32>
    %cst_11 = arith.constant 0.000000e+00 : f32
    %13 = vector.broadcast %cst_11 : f32 to vector<8x32xf32>
    %14 = vector.extract_strided_slice %9 {offsets = [0, 0], sizes = [8, 8], strides = [1, 1]} : vector<8x32xf32> to vector<8x8xf32>
    %15 = vector.extract_strided_slice %10 {offsets = [0, 0], sizes = [8, 8], strides = [1, 1]} : vector<8x32xf32> to vector<8x8xf32>
    %16 = vector.extract_strided_slice %11 {offsets = [0, 0], sizes = [8, 8], strides = [1, 1]} : vector<8x32xf32> to vector<8x8xf32>
    %cst_12 = arith.constant dense<0.000000e+00> : vector<8x8xf32>
    %17 = tpu.matmul %14, %15, %cst_12 {dimension_numbers = #tpu.dot_dimension_numbers<[1], [1], [0], [0], [0, 0, 1, 0], [], []>} : vector<8x8xf32>, vector<8x8xf32>, vector<8x8xf32> -> vector<8x8xf32>
    %cst_13 = arith.constant 0.353553385 : f32
    %18 = vector.broadcast %cst_13 : f32 to vector<8x8xf32>
    %19 = arith.mulf %17, %18 : vector<8x8xf32>
    %cst_14 = arith.constant dense<0xFF800000> : vector<8xf32>
    %20 = vector.multi_reduction <maximumf>, %19, %cst_14 [1] : vector<8x8xf32> to vector<8xf32>
    %21 = vector.shape_cast %20 : vector<8xf32> to vector<8x1xf32>
    %22 = vector.broadcast %21 : vector<8x1xf32> to vector<8x8xf32>
    %23 = arith.subf %19, %22 : vector<8x8xf32>
    %24 = math.exp %23 : vector<8x8xf32>
    %cst_15 = arith.constant dense<0.000000e+00> : vector<8xf32>
    %25 = vector.multi_reduction <add>, %24, %cst_15 [1] : vector<8x8xf32> to vector<8xf32>
    %26 = vector.shape_cast %25 : vector<8xf32> to vector<8x1xf32>
    %27 = tpu.reciprocal %26 {approx = true} : vector<8x1xf32> -> vector<8x1xf32>
    %28 = vector.broadcast %27 : vector<8x1xf32> to vector<8x8xf32>
    %29 = arith.mulf %24, %28 : vector<8x8xf32>
    %cst_16 = arith.constant dense<0.000000e+00> : vector<8x8xf32>
    %30 = tpu.matmul %29, %16, %cst_16 {dimension_numbers = #tpu.dot_dimension_numbers<[1], [0], [0], [1], [0, 0, 1, 1], [], []>} : vector<8x8xf32>, vector<8x8xf32>, vector<8x8xf32> -> vector<8x8xf32>
    %31 = vector.extract_strided_slice %12 {offsets = [0, 0], sizes = [8, 32], strides = [1, 1]} : vector<32x32xf32> to vector<8x32xf32>
    %cst_17 = arith.constant dense<0.000000e+00> : vector<8x32xf32>
    %32 = tpu.matmul %30, %31, %cst_17 {dimension_numbers = #tpu.dot_dimension_numbers<[1], [0], [0], [1], [0, 0, 1, 1], [], []>} : vector<8x8xf32>, vector<8x32xf32>, vector<8x32xf32> -> vector<8x32xf32>
    %33 = arith.addf %13, %32 : vector<8x32xf32>
    %34 = vector.extract_strided_slice %9 {offsets = [0, 8], sizes = [8, 8], strides = [1, 1]} : vector<8x32xf32> to vector<8x8xf32>
    %35 = vector.extract_strided_slice %10 {offsets = [0, 8], sizes = [8, 8], strides = [1, 1]} : vector<8x32xf32> to vector<8x8xf32>
    %36 = vector.extract_strided_slice %11 {offsets = [0, 8], sizes = [8, 8], strides = [1, 1]} : vector<8x32xf32> to vector<8x8xf32>
    %cst_18 = arith.constant dense<0.000000e+00> : vector<8x8xf32>
    %37 = tpu.matmul %34, %35, %cst_18 {dimension_numbers = #tpu.dot_dimension_numbers<[1], [1], [0], [0], [0, 0, 1, 0], [], []>} : vector<8x8xf32>, vector<8x8xf32>, vector<8x8xf32> -> vector<8x8xf32>
    %cst_19 = arith.constant 0.353553385 : f32
    %38 = vector.broadcast %cst_19 : f32 to vector<8x8xf32>
    %39 = arith.mulf %37, %38 : vector<8x8xf32>
    %cst_20 = arith.constant dense<0xFF800000> : vector<8xf32>
    %40 = vector.multi_reduction <maximumf>, %39, %cst_20 [1] : vector<8x8xf32> to vector<8xf32>
    %41 = vector.shape_cast %40 : vector<8xf32> to vector<8x1xf32>
    %42 = vector.broadcast %41 : vector<8x1xf32> to vector<8x8xf32>
    %43 = arith.subf %39, %42 : vector<8x8xf32>
    %44 = math.exp %43 : vector<8x8xf32>
    %cst_21 = arith.constant dense<0.000000e+00> : vector<8xf32>
    %45 = vector.multi_reduction <add>, %44, %cst_21 [1] : vector<8x8xf32> to vector<8xf32>
    %46 = vector.shape_cast %45 : vector<8xf32> to vector<8x1xf32>
    %47 = tpu.reciprocal %46 {approx = true} : vector<8x1xf32> -> vector<8x1xf32>
    %48 = vector.broadcast %47 : vector<8x1xf32> to vector<8x8xf32>
    %49 = arith.mulf %44, %48 : vector<8x8xf32>
    %cst_22 = arith.constant dense<0.000000e+00> : vector<8x8xf32>
    %50 = tpu.matmul %49, %36, %cst_22 {dimension_numbers = #tpu.dot_dimension_numbers<[1], [0], [0], [1], [0, 0, 1, 1], [], []>} : vector<8x8xf32>, vector<8x8xf32>, vector<8x8xf32> -> vector<8x8xf32>
    %51 = vector.extract_strided_slice %12 {offsets = [8, 0], sizes = [8, 32], strides = [1, 1]} : vector<32x32xf32> to vector<8x32xf32>
    %cst_23 = arith.constant dense<0.000000e+00> : vector<8x32xf32>
    %52 = tpu.matmul %50, %51, %cst_23 {dimension_numbers = #tpu.dot_dimension_numbers<[1], [0], [0], [1], [0, 0, 1, 1], [], []>} : vector<8x8xf32>, vector<8x32xf32>, vector<8x32xf32> -> vector<8x32xf32>
    %53 = arith.addf %33, %52 : vector<8x32xf32>
    %54 = vector.extract_strided_slice %9 {offsets = [0, 16], sizes = [8, 8], strides = [1, 1]} : vector<8x32xf32> to vector<8x8xf32>
    %55 = vector.extract_strided_slice %10 {offsets = [0, 16], sizes = [8, 8], strides = [1, 1]} : vector<8x32xf32> to vector<8x8xf32>
    %56 = vector.extract_strided_slice %11 {offsets = [0, 16], sizes = [8, 8], strides = [1, 1]} : vector<8x32xf32> to vector<8x8xf32>
    %cst_24 = arith.constant dense<0.000000e+00> : vector<8x8xf32>
    %57 = tpu.matmul %54, %55, %cst_24 {dimension_numbers = #tpu.dot_dimension_numbers<[1], [1], [0], [0], [0, 0, 1, 0], [], []>} : vector<8x8xf32>, vector<8x8xf32>, vector<8x8xf32> -> vector<8x8xf32>
    %cst_25 = arith.constant 0.353553385 : f32
    %58 = vector.broadcast %cst_25 : f32 to vector<8x8xf32>
    %59 = arith.mulf %57, %58 : vector<8x8xf32>
    %cst_26 = arith.constant dense<0xFF800000> : vector<8xf32>
    %60 = vector.multi_reduction <maximumf>, %59, %cst_26 [1] : vector<8x8xf32> to vector<8xf32>
    %61 = vector.shape_cast %60 : vector<8xf32> to vector<8x1xf32>
    %62 = vector.broadcast %61 : vector<8x1xf32> to vector<8x8xf32>
    %63 = arith.subf %59, %62 : vector<8x8xf32>
    %64 = math.exp %63 : vector<8x8xf32>
    %cst_27 = arith.constant dense<0.000000e+00> : vector<8xf32>
    %65 = vector.multi_reduction <add>, %64, %cst_27 [1] : vector<8x8xf32> to vector<8xf32>
    %66 = vector.shape_cast %65 : vector<8xf32> to vector<8x1xf32>
    %67 = tpu.reciprocal %66 {approx = true} : vector<8x1xf32> -> vector<8x1xf32>
    %68 = vector.broadcast %67 : vector<8x1xf32> to vector<8x8xf32>
    %69 = arith.mulf %64, %68 : vector<8x8xf32>
    %cst_28 = arith.constant dense<0.000000e+00> : vector<8x8xf32>
    %70 = tpu.matmul %69, %56, %cst_28 {dimension_numbers = #tpu.dot_dimension_numbers<[1], [0], [0], [1], [0, 0, 1, 1], [], []>} : vector<8x8xf32>, vector<8x8xf32>, vector<8x8xf32> -> vector<8x8xf32>
    %71 = vector.extract_strided_slice %12 {offsets = [16, 0], sizes = [8, 32], strides = [1, 1]} : vector<32x32xf32> to vector<8x32xf32>
    %cst_29 = arith.constant dense<0.000000e+00> : vector<8x32xf32>
    %72 = tpu.matmul %70, %71, %cst_29 {dimension_numbers = #tpu.dot_dimension_numbers<[1], [0], [0], [1], [0, 0, 1, 1], [], []>} : vector<8x8xf32>, vector<8x32xf32>, vector<8x32xf32> -> vector<8x32xf32>
    %73 = arith.addf %53, %72 : vector<8x32xf32>
    %74 = vector.extract_strided_slice %9 {offsets = [0, 24], sizes = [8, 8], strides = [1, 1]} : vector<8x32xf32> to vector<8x8xf32>
    %75 = vector.extract_strided_slice %10 {offsets = [0, 24], sizes = [8, 8], strides = [1, 1]} : vector<8x32xf32> to vector<8x8xf32>
    %76 = vector.extract_strided_slice %11 {offsets = [0, 24], sizes = [8, 8], strides = [1, 1]} : vector<8x32xf32> to vector<8x8xf32>
    %cst_30 = arith.constant dense<0.000000e+00> : vector<8x8xf32>
    %77 = tpu.matmul %74, %75, %cst_30 {dimension_numbers = #tpu.dot_dimension_numbers<[1], [1], [0], [0], [0, 0, 1, 0], [], []>} : vector<8x8xf32>, vector<8x8xf32>, vector<8x8xf32> -> vector<8x8xf32>
    %cst_31 = arith.constant 0.353553385 : f32
    %78 = vector.broadcast %cst_31 : f32 to vector<8x8xf32>
    %79 = arith.mulf %77, %78 : vector<8x8xf32>
    %cst_32 = arith.constant dense<0xFF800000> : vector<8xf32>
    %80 = vector.multi_reduction <maximumf>, %79, %cst_32 [1] : vector<8x8xf32> to vector<8xf32>
    %81 = vector.shape_cast %80 : vector<8xf32> to vector<8x1xf32>
    %82 = vector.broadcast %81 : vector<8x1xf32> to vector<8x8xf32>
    %83 = arith.subf %79, %82 : vector<8x8xf32>
    %84 = math.exp %83 : vector<8x8xf32>
    %cst_33 = arith.constant dense<0.000000e+00> : vector<8xf32>
    %85 = vector.multi_reduction <add>, %84, %cst_33 [1] : vector<8x8xf32> to vector<8xf32>
    %86 = vector.shape_cast %85 : vector<8xf32> to vector<8x1xf32>
    %87 = tpu.reciprocal %86 {approx = true} : vector<8x1xf32> -> vector<8x1xf32>
    %88 = vector.broadcast %87 : vector<8x1xf32> to vector<8x8xf32>
    %89 = arith.mulf %84, %88 : vector<8x8xf32>
    %cst_34 = arith.constant dense<0.000000e+00> : vector<8x8xf32>
    %90 = tpu.matmul %89, %76, %cst_34 {dimension_numbers = #tpu.dot_dimension_numbers<[1], [0], [0], [1], [0, 0, 1, 1], [], []>} : vector<8x8xf32>, vector<8x8xf32>, vector<8x8xf32> -> vector<8x8xf32>
    %91 = vector.extract_strided_slice %12 {offsets = [24, 0], sizes = [8, 32], strides = [1, 1]} : vector<32x32xf32> to vector<8x32xf32>
    %cst_35 = arith.constant dense<0.000000e+00> : vector<8x32xf32>
    %92 = tpu.matmul %90, %91, %cst_35 {dimension_numbers = #tpu.dot_dimension_numbers<[1], [0], [0], [1], [0, 0, 1, 1], [], []>} : vector<8x8xf32>, vector<8x32xf32>, vector<8x32xf32> -> vector<8x32xf32>
    %93 = arith.addf %73, %92 : vector<8x32xf32>
    %c0_36 = arith.constant 0 : index
    %c0_37 = arith.constant 0 : index
    %94 = vector.load %arg6[%c0_36, %c0_37] : memref<1x32xf32, #tpu.memory_space<vmem>>, vector<1x32xf32>
    %95 = vector.broadcast %94 : vector<1x32xf32> to vector<8x32xf32>
    %96 = arith.addf %93, %95 : vector<8x32xf32>
    %97 = arith.addf %1, %96 : vector<8x32xf32>
    %c0_38 = arith.constant 0 : index
    %c0_39 = arith.constant 0 : index
    %98 = vector.load %arg7[%c0_38, %c0_39] : memref<1x32xf32, #tpu.memory_space<vmem>>, vector<1x32xf32>
    %c0_40 = arith.constant 0 : index
    %c0_41 = arith.constant 0 : index
    %99 = vector.load %arg8[%c0_40, %c0_41] : memref<1x32xf32, #tpu.memory_space<vmem>>, vector<1x32xf32>
    %cst_42 = arith.constant dense<0.000000e+00> : vector<8xf32>
    %100 = vector.multi_reduction <add>, %97, %cst_42 [1] : vector<8x32xf32> to vector<8xf32>
    %101 = vector.shape_cast %100 : vector<8xf32> to vector<8x1xf32>
    %cst_43 = arith.constant 3.200000e+01 : f32
    %102 = vector.broadcast %cst_43 : f32 to vector<8x1xf32>
    %103 = arith.divf %101, %102 : vector<8x1xf32>
    %104 = vector.broadcast %103 : vector<8x1xf32> to vector<8x32xf32>
    %105 = arith.subf %97, %104 : vector<8x32xf32>
    %106 = vector.broadcast %103 : vector<8x1xf32> to vector<8x32xf32>
    %107 = arith.subf %97, %106 : vector<8x32xf32>
    %108 = arith.mulf %105, %107 : vector<8x32xf32>
    %cst_44 = arith.constant dense<0.000000e+00> : vector<8xf32>
    %109 = vector.multi_reduction <add>, %108, %cst_44 [1] : vector<8x32xf32> to vector<8xf32>
    %110 = vector.shape_cast %109 : vector<8xf32> to vector<8x1xf32>
    %cst_45 = arith.constant 3.200000e+01 : f32
    %111 = vector.broadcast %cst_45 : f32 to vector<8x1xf32>
    %112 = arith.divf %110, %111 : vector<8x1xf32>
    %113 = vector.broadcast %103 : vector<8x1xf32> to vector<8x32xf32>
    %114 = arith.subf %97, %113 : vector<8x32xf32>
    %cst_46 = arith.constant 9.99999996E-13 : f32
    %115 = vector.broadcast %cst_46 : f32 to vector<8x1xf32>
    %116 = arith.addf %112, %115 : vector<8x1xf32>
    %117 = math.rsqrt %116 : vector<8x1xf32>
    %118 = vector.broadcast %117 : vector<8x1xf32> to vector<8x32xf32>
    %119 = arith.mulf %114, %118 : vector<8x32xf32>
    %120 = vector.broadcast %98 : vector<1x32xf32> to vector<8x32xf32>
    %121 = arith.mulf %119, %120 : vector<8x32xf32>
    %122 = vector.broadcast %99 : vector<1x32xf32> to vector<8x32xf32>
    %123 = arith.addf %121, %122 : vector<8x32xf32>
    %c0_47 = arith.constant 0 : index
    %c0_48 = arith.constant 0 : index
    %124 = vector.load %arg9[%c0_47, %c0_48] : memref<32x32xf32, #tpu.memory_space<vmem>>, vector<32x32xf32>
    %c0_49 = arith.constant 0 : index
    %c0_50 = arith.constant 0 : index
    %125 = vector.load %arg10[%c0_49, %c0_50] : memref<1x32xf32, #tpu.memory_space<vmem>>, vector<1x32xf32>
    %cst_51 = arith.constant dense<0.000000e+00> : vector<8x32xf32>
    %126 = tpu.matmul %123, %124, %cst_51 {dimension_numbers = #tpu.dot_dimension_numbers<[1], [0], [0], [1], [0, 0, 1, 1], [], []>} : vector<8x32xf32>, vector<32x32xf32>, vector<8x32xf32> -> vector<8x32xf32>
    %127 = vector.broadcast %125 : vector<1x32xf32> to vector<8x32xf32>
    %128 = arith.addf %126, %127 : vector<8x32xf32>
    %c0_52 = arith.constant 0 : index
    %c0_53 = arith.constant 0 : index
    %129 = vector.load %arg11[%c0_52, %c0_53] : memref<32x64xf32, #tpu.memory_space<vmem>>, vector<32x64xf32>
    %c0_54 = arith.constant 0 : index
    %c0_55 = arith.constant 0 : index
    %130 = vector.load %arg12[%c0_54, %c0_55] : memref<1x64xf32, #tpu.memory_space<vmem>>, vector<1x64xf32>
    %cst_56 = arith.constant dense<0.000000e+00> : vector<5x64xf32>
    %131 = tpu.matmul %3, %129, %cst_56 {dimension_numbers = #tpu.dot_dimension_numbers<[1], [0], [0], [1], [0, 0, 1, 1], [], []>} : vector<5x32xf32>, vector<32x64xf32>, vector<5x64xf32> -> vector<5x64xf32>
    %132 = vector.broadcast %130 : vector<1x64xf32> to vector<5x64xf32>
    %133 = arith.addf %131, %132 : vector<5x64xf32>
    %134 = vector.extract_strided_slice %133 {offsets = [0, 0], sizes = [5, 32], strides = [1, 1]} : vector<5x64xf32> to vector<5x32xf32>
    %135 = vector.extract_strided_slice %133 {offsets = [0, 32], sizes = [5, 32], strides = [1, 1]} : vector<5x64xf32> to vector<5x32xf32>
    %c0_57 = arith.constant 0 : index
    %c0_58 = arith.constant 0 : index
    %136 = vector.load %arg13[%c0_57, %c0_58] : memref<32x32xf32, #tpu.memory_space<vmem>>, vector<32x32xf32>
    %cst_59 = arith.constant 0.000000e+00 : f32
    %137 = vector.broadcast %cst_59 : f32 to vector<8x32xf32>
    %138 = vector.extract_strided_slice %128 {offsets = [0, 0], sizes = [8, 8], strides = [1, 1]} : vector<8x32xf32> to vector<8x8xf32>
    %139 = vector.extract_strided_slice %134 {offsets = [0, 0], sizes = [5, 8], strides = [1, 1]} : vector<5x32xf32> to vector<5x8xf32>
    %140 = vector.extract_strided_slice %135 {offsets = [0, 0], sizes = [5, 8], strides = [1, 1]} : vector<5x32xf32> to vector<5x8xf32>
    %cst_60 = arith.constant dense<0.000000e+00> : vector<8x5xf32>
    %141 = tpu.matmul %138, %139, %cst_60 {dimension_numbers = #tpu.dot_dimension_numbers<[1], [1], [0], [0], [0, 0, 1, 0], [], []>} : vector<8x8xf32>, vector<5x8xf32>, vector<8x5xf32> -> vector<8x5xf32>
    %cst_61 = arith.constant 0.353553385 : f32
    %142 = vector.broadcast %cst_61 : f32 to vector<8x5xf32>
    %143 = arith.mulf %141, %142 : vector<8x5xf32>
    %cst_62 = arith.constant dense<0xFF800000> : vector<8xf32>
    %144 = vector.multi_reduction <maximumf>, %143, %cst_62 [1] : vector<8x5xf32> to vector<8xf32>
    %145 = vector.shape_cast %144 : vector<8xf32> to vector<8x1xf32>
    %146 = vector.broadcast %145 : vector<8x1xf32> to vector<8x5xf32>
    %147 = arith.subf %143, %146 : vector<8x5xf32>
    %148 = math.exp %147 : vector<8x5xf32>
    %cst_63 = arith.constant dense<0.000000e+00> : vector<8xf32>
    %149 = vector.multi_reduction <add>, %148, %cst_63 [1] : vector<8x5xf32> to vector<8xf32>
    %150 = vector.shape_cast %149 : vector<8xf32> to vector<8x1xf32>
    %151 = tpu.reciprocal %150 {approx = true} : vector<8x1xf32> -> vector<8x1xf32>
    %152 = vector.broadcast %151 : vector<8x1xf32> to vector<8x5xf32>
    %153 = arith.mulf %148, %152 : vector<8x5xf32>
    %cst_64 = arith.constant dense<0.000000e+00> : vector<8x8xf32>
    %154 = tpu.matmul %153, %140, %cst_64 {dimension_numbers = #tpu.dot_dimension_numbers<[1], [0], [0], [1], [0, 0, 1, 1], [], []>} : vector<8x5xf32>, vector<5x8xf32>, vector<8x8xf32> -> vector<8x8xf32>
    %155 = vector.extract_strided_slice %136 {offsets = [0, 0], sizes = [8, 32], strides = [1, 1]} : vector<32x32xf32> to vector<8x32xf32>
    %cst_65 = arith.constant dense<0.000000e+00> : vector<8x32xf32>
    %156 = tpu.matmul %154, %155, %cst_65 {dimension_numbers = #tpu.dot_dimension_numbers<[1], [0], [0], [1], [0, 0, 1, 1], [], []>} : vector<8x8xf32>, vector<8x32xf32>, vector<8x32xf32> -> vector<8x32xf32>
    %157 = arith.addf %137, %156 : vector<8x32xf32>
    %158 = vector.extract_strided_slice %128 {offsets = [0, 8], sizes = [8, 8], strides = [1, 1]} : vector<8x32xf32> to vector<8x8xf32>
    %159 = vector.extract_strided_slice %134 {offsets = [0, 8], sizes = [5, 8], strides = [1, 1]} : vector<5x32xf32> to vector<5x8xf32>
    %160 = vector.extract_strided_slice %135 {offsets = [0, 8], sizes = [5, 8], strides = [1, 1]} : vector<5x32xf32> to vector<5x8xf32>
    %cst_66 = arith.constant dense<0.000000e+00> : vector<8x5xf32>
    %161 = tpu.matmul %158, %159, %cst_66 {dimension_numbers = #tpu.dot_dimension_numbers<[1], [1], [0], [0], [0, 0, 1, 0], [], []>} : vector<8x8xf32>, vector<5x8xf32>, vector<8x5xf32> -> vector<8x5xf32>
    %cst_67 = arith.constant 0.353553385 : f32
    %162 = vector.broadcast %cst_67 : f32 to vector<8x5xf32>
    %163 = arith.mulf %161, %162 : vector<8x5xf32>
    %cst_68 = arith.constant dense<0xFF800000> : vector<8xf32>
    %164 = vector.multi_reduction <maximumf>, %163, %cst_68 [1] : vector<8x5xf32> to vector<8xf32>
    %165 = vector.shape_cast %164 : vector<8xf32> to vector<8x1xf32>
    %166 = vector.broadcast %165 : vector<8x1xf32> to vector<8x5xf32>
    %167 = arith.subf %163, %166 : vector<8x5xf32>
    %168 = math.exp %167 : vector<8x5xf32>
    %cst_69 = arith.constant dense<0.000000e+00> : vector<8xf32>
    %169 = vector.multi_reduction <add>, %168, %cst_69 [1] : vector<8x5xf32> to vector<8xf32>
    %170 = vector.shape_cast %169 : vector<8xf32> to vector<8x1xf32>
    %171 = tpu.reciprocal %170 {approx = true} : vector<8x1xf32> -> vector<8x1xf32>
    %172 = vector.broadcast %171 : vector<8x1xf32> to vector<8x5xf32>
    %173 = arith.mulf %168, %172 : vector<8x5xf32>
    %cst_70 = arith.constant dense<0.000000e+00> : vector<8x8xf32>
    %174 = tpu.matmul %173, %160, %cst_70 {dimension_numbers = #tpu.dot_dimension_numbers<[1], [0], [0], [1], [0, 0, 1, 1], [], []>} : vector<8x5xf32>, vector<5x8xf32>, vector<8x8xf32> -> vector<8x8xf32>
    %175 = vector.extract_strided_slice %136 {offsets = [8, 0], sizes = [8, 32], strides = [1, 1]} : vector<32x32xf32> to vector<8x32xf32>
    %cst_71 = arith.constant dense<0.000000e+00> : vector<8x32xf32>
    %176 = tpu.matmul %174, %175, %cst_71 {dimension_numbers = #tpu.dot_dimension_numbers<[1], [0], [0], [1], [0, 0, 1, 1], [], []>} : vector<8x8xf32>, vector<8x32xf32>, vector<8x32xf32> -> vector<8x32xf32>
    %177 = arith.addf %157, %176 : vector<8x32xf32>
    %178 = vector.extract_strided_slice %128 {offsets = [0, 16], sizes = [8, 8], strides = [1, 1]} : vector<8x32xf32> to vector<8x8xf32>
    %179 = vector.extract_strided_slice %134 {offsets = [0, 16], sizes = [5, 8], strides = [1, 1]} : vector<5x32xf32> to vector<5x8xf32>
    %180 = vector.extract_strided_slice %135 {offsets = [0, 16], sizes = [5, 8], strides = [1, 1]} : vector<5x32xf32> to vector<5x8xf32>
    %cst_72 = arith.constant dense<0.000000e+00> : vector<8x5xf32>
    %181 = tpu.matmul %178, %179, %cst_72 {dimension_numbers = #tpu.dot_dimension_numbers<[1], [1], [0], [0], [0, 0, 1, 0], [], []>} : vector<8x8xf32>, vector<5x8xf32>, vector<8x5xf32> -> vector<8x5xf32>
    %cst_73 = arith.constant 0.353553385 : f32
    %182 = vector.broadcast %cst_73 : f32 to vector<8x5xf32>
    %183 = arith.mulf %181, %182 : vector<8x5xf32>
    %cst_74 = arith.constant dense<0xFF800000> : vector<8xf32>
    %184 = vector.multi_reduction <maximumf>, %183, %cst_74 [1] : vector<8x5xf32> to vector<8xf32>
    %185 = vector.shape_cast %184 : vector<8xf32> to vector<8x1xf32>
    %186 = vector.broadcast %185 : vector<8x1xf32> to vector<8x5xf32>
    %187 = arith.subf %183, %186 : vector<8x5xf32>
    %188 = math.exp %187 : vector<8x5xf32>
    %cst_75 = arith.constant dense<0.000000e+00> : vector<8xf32>
    %189 = vector.multi_reduction <add>, %188, %cst_75 [1] : vector<8x5xf32> to vector<8xf32>
    %190 = vector.shape_cast %189 : vector<8xf32> to vector<8x1xf32>
    %191 = tpu.reciprocal %190 {approx = true} : vector<8x1xf32> -> vector<8x1xf32>
    %192 = vector.broadcast %191 : vector<8x1xf32> to vector<8x5xf32>
    %193 = arith.mulf %188, %192 : vector<8x5xf32>
    %cst_76 = arith.constant dense<0.000000e+00> : vector<8x8xf32>
    %194 = tpu.matmul %193, %180, %cst_76 {dimension_numbers = #tpu.dot_dimension_numbers<[1], [0], [0], [1], [0, 0, 1, 1], [], []>} : vector<8x5xf32>, vector<5x8xf32>, vector<8x8xf32> -> vector<8x8xf32>
    %195 = vector.extract_strided_slice %136 {offsets = [16, 0], sizes = [8, 32], strides = [1, 1]} : vector<32x32xf32> to vector<8x32xf32>
    %cst_77 = arith.constant dense<0.000000e+00> : vector<8x32xf32>
    %196 = tpu.matmul %194, %195, %cst_77 {dimension_numbers = #tpu.dot_dimension_numbers<[1], [0], [0], [1], [0, 0, 1, 1], [], []>} : vector<8x8xf32>, vector<8x32xf32>, vector<8x32xf32> -> vector<8x32xf32>
    %197 = arith.addf %177, %196 : vector<8x32xf32>
    %198 = vector.extract_strided_slice %128 {offsets = [0, 24], sizes = [8, 8], strides = [1, 1]} : vector<8x32xf32> to vector<8x8xf32>
    %199 = vector.extract_strided_slice %134 {offsets = [0, 24], sizes = [5, 8], strides = [1, 1]} : vector<5x32xf32> to vector<5x8xf32>
    %200 = vector.extract_strided_slice %135 {offsets = [0, 24], sizes = [5, 8], strides = [1, 1]} : vector<5x32xf32> to vector<5x8xf32>
    %cst_78 = arith.constant dense<0.000000e+00> : vector<8x5xf32>
    %201 = tpu.matmul %198, %199, %cst_78 {dimension_numbers = #tpu.dot_dimension_numbers<[1], [1], [0], [0], [0, 0, 1, 0], [], []>} : vector<8x8xf32>, vector<5x8xf32>, vector<8x5xf32> -> vector<8x5xf32>
    %cst_79 = arith.constant 0.353553385 : f32
    %202 = vector.broadcast %cst_79 : f32 to vector<8x5xf32>
    %203 = arith.mulf %201, %202 : vector<8x5xf32>
    %cst_80 = arith.constant dense<0xFF800000> : vector<8xf32>
    %204 = vector.multi_reduction <maximumf>, %203, %cst_80 [1] : vector<8x5xf32> to vector<8xf32>
    %205 = vector.shape_cast %204 : vector<8xf32> to vector<8x1xf32>
    %206 = vector.broadcast %205 : vector<8x1xf32> to vector<8x5xf32>
    %207 = arith.subf %203, %206 : vector<8x5xf32>
    %208 = math.exp %207 : vector<8x5xf32>
    %cst_81 = arith.constant dense<0.000000e+00> : vector<8xf32>
    %209 = vector.multi_reduction <add>, %208, %cst_81 [1] : vector<8x5xf32> to vector<8xf32>
    %210 = vector.shape_cast %209 : vector<8xf32> to vector<8x1xf32>
    %211 = tpu.reciprocal %210 {approx = true} : vector<8x1xf32> -> vector<8x1xf32>
    %212 = vector.broadcast %211 : vector<8x1xf32> to vector<8x5xf32>
    %213 = arith.mulf %208, %212 : vector<8x5xf32>
    %cst_82 = arith.constant dense<0.000000e+00> : vector<8x8xf32>
    %214 = tpu.matmul %213, %200, %cst_82 {dimension_numbers = #tpu.dot_dimension_numbers<[1], [0], [0], [1], [0, 0, 1, 1], [], []>} : vector<8x5xf32>, vector<5x8xf32>, vector<8x8xf32> -> vector<8x8xf32>
    %215 = vector.extract_strided_slice %136 {offsets = [24, 0], sizes = [8, 32], strides = [1, 1]} : vector<32x32xf32> to vector<8x32xf32>
    %cst_83 = arith.constant dense<0.000000e+00> : vector<8x32xf32>
    %216 = tpu.matmul %214, %215, %cst_83 {dimension_numbers = #tpu.dot_dimension_numbers<[1], [0], [0], [1], [0, 0, 1, 1], [], []>} : vector<8x8xf32>, vector<8x32xf32>, vector<8x32xf32> -> vector<8x32xf32>
    %217 = arith.addf %197, %216 : vector<8x32xf32>
    %c0_84 = arith.constant 0 : index
    %c0_85 = arith.constant 0 : index
    %218 = vector.load %arg14[%c0_84, %c0_85] : memref<1x32xf32, #tpu.memory_space<vmem>>, vector<1x32xf32>
    %219 = vector.broadcast %218 : vector<1x32xf32> to vector<8x32xf32>
    %220 = arith.addf %217, %219 : vector<8x32xf32>
    %221 = arith.addf %123, %220 : vector<8x32xf32>
    %c0_86 = arith.constant 0 : index
    %c0_87 = arith.constant 0 : index
    %222 = vector.load %arg15[%c0_86, %c0_87] : memref<1x32xf32, #tpu.memory_space<vmem>>, vector<1x32xf32>
    %c0_88 = arith.constant 0 : index
    %c0_89 = arith.constant 0 : index
    %223 = vector.load %arg16[%c0_88, %c0_89] : memref<1x32xf32, #tpu.memory_space<vmem>>, vector<1x32xf32>
    %cst_90 = arith.constant dense<0.000000e+00> : vector<8xf32>
    %224 = vector.multi_reduction <add>, %221, %cst_90 [1] : vector<8x32xf32> to vector<8xf32>
    %225 = vector.shape_cast %224 : vector<8xf32> to vector<8x1xf32>
    %cst_91 = arith.constant 3.200000e+01 : f32
    %226 = vector.broadcast %cst_91 : f32 to vector<8x1xf32>
    %227 = arith.divf %225, %226 : vector<8x1xf32>
    %228 = vector.broadcast %227 : vector<8x1xf32> to vector<8x32xf32>
    %229 = arith.subf %221, %228 : vector<8x32xf32>
    %230 = vector.broadcast %227 : vector<8x1xf32> to vector<8x32xf32>
    %231 = arith.subf %221, %230 : vector<8x32xf32>
    %232 = arith.mulf %229, %231 : vector<8x32xf32>
    %cst_92 = arith.constant dense<0.000000e+00> : vector<8xf32>
    %233 = vector.multi_reduction <add>, %232, %cst_92 [1] : vector<8x32xf32> to vector<8xf32>
    %234 = vector.shape_cast %233 : vector<8xf32> to vector<8x1xf32>
    %cst_93 = arith.constant 3.200000e+01 : f32
    %235 = vector.broadcast %cst_93 : f32 to vector<8x1xf32>
    %236 = arith.divf %234, %235 : vector<8x1xf32>
    %237 = vector.broadcast %227 : vector<8x1xf32> to vector<8x32xf32>
    %238 = arith.subf %221, %237 : vector<8x32xf32>
    %cst_94 = arith.constant 9.99999996E-13 : f32
    %239 = vector.broadcast %cst_94 : f32 to vector<8x1xf32>
    %240 = arith.addf %236, %239 : vector<8x1xf32>
    %241 = math.rsqrt %240 : vector<8x1xf32>
    %242 = vector.broadcast %241 : vector<8x1xf32> to vector<8x32xf32>
    %243 = arith.mulf %238, %242 : vector<8x32xf32>
    %244 = vector.broadcast %222 : vector<1x32xf32> to vector<8x32xf32>
    %245 = arith.mulf %243, %244 : vector<8x32xf32>
    %246 = vector.broadcast %223 : vector<1x32xf32> to vector<8x32xf32>
    %247 = arith.addf %245, %246 : vector<8x32xf32>
    %c0_95 = arith.constant 0 : index
    %c0_96 = arith.constant 0 : index
    %248 = vector.load %arg17[%c0_95, %c0_96] : memref<32x64xf32, #tpu.memory_space<vmem>>, vector<32x64xf32>
    %c0_97 = arith.constant 0 : index
    %c0_98 = arith.constant 0 : index
    %249 = vector.load %arg18[%c0_97, %c0_98] : memref<1x64xf32, #tpu.memory_space<vmem>>, vector<1x64xf32>
    %cst_99 = arith.constant dense<0.000000e+00> : vector<8x64xf32>
    %250 = tpu.matmul %247, %248, %cst_99 {dimension_numbers = #tpu.dot_dimension_numbers<[1], [0], [0], [1], [0, 0, 1, 1], [], []>} : vector<8x32xf32>, vector<32x64xf32>, vector<8x64xf32> -> vector<8x64xf32>
    %251 = vector.broadcast %249 : vector<1x64xf32> to vector<8x64xf32>
    %252 = arith.addf %250, %251 : vector<8x64xf32>
    %cst_100 = arith.constant 5.000000e-01 : f32
    %253 = vector.broadcast %cst_100 : f32 to vector<8x64xf32>
    %254 = arith.mulf %253, %252 : vector<8x64xf32>
    %cst_101 = arith.constant 4.471500e-02 : f32
    %255 = vector.broadcast %cst_101 : f32 to vector<8x64xf32>
    %256 = arith.mulf %255, %252 : vector<8x64xf32>
    %257 = arith.mulf %256, %252 : vector<8x64xf32>
    %258 = arith.mulf %257, %252 : vector<8x64xf32>
    %259 = arith.addf %252, %258 : vector<8x64xf32>
    %cst_102 = arith.constant 0.797884583 : f32
    %260 = vector.broadcast %cst_102 : f32 to vector<8x64xf32>
    %261 = arith.mulf %260, %259 : vector<8x64xf32>
    %262 = math.tanh %261 : vector<8x64xf32>
    %cst_103 = arith.constant 1.000000e+00 : f32
    %263 = vector.broadcast %cst_103 : f32 to vector<8x64xf32>
    %264 = arith.addf %263, %262 : vector<8x64xf32>
    %265 = arith.mulf %254, %264 : vector<8x64xf32>
    %c0_104 = arith.constant 0 : index
    %c0_105 = arith.constant 0 : index
    %266 = vector.load %arg19[%c0_104, %c0_105] : memref<64x32xf32, #tpu.memory_space<vmem>>, vector<64x32xf32>
    %c0_106 = arith.constant 0 : index
    %c0_107 = arith.constant 0 : index
    %267 = vector.load %arg20[%c0_106, %c0_107] : memref<1x32xf32, #tpu.memory_space<vmem>>, vector<1x32xf32>
    %cst_108 = arith.constant dense<0.000000e+00> : vector<8x32xf32>
    %268 = tpu.matmul %265, %266, %cst_108 {dimension_numbers = #tpu.dot_dimension_numbers<[1], [0], [0], [1], [0, 0, 1, 1], [], []>} : vector<8x64xf32>, vector<64x32xf32>, vector<8x32xf32> -> vector<8x32xf32>
    %269 = vector.broadcast %267 : vector<1x32xf32> to vector<8x32xf32>
    %270 = arith.addf %268, %269 : vector<8x32xf32>
    %271 = arith.addf %247, %270 : vector<8x32xf32>
    %c0_109 = arith.constant 0 : index
    %c0_110 = arith.constant 0 : index
    %272 = vector.load %arg21[%c0_109, %c0_110] : memref<1x32xf32, #tpu.memory_space<vmem>>, vector<1x32xf32>
    %c0_111 = arith.constant 0 : index
    %c0_112 = arith.constant 0 : index
    %273 = vector.load %arg22[%c0_111, %c0_112] : memref<1x32xf32, #tpu.memory_space<vmem>>, vector<1x32xf32>
    %cst_113 = arith.constant dense<0.000000e+00> : vector<8xf32>
    %274 = vector.multi_reduction <add>, %271, %cst_113 [1] : vector<8x32xf32> to vector<8xf32>
    %275 = vector.shape_cast %274 : vector<8xf32> to vector<8x1xf32>
    %cst_114 = arith.constant 3.200000e+01 : f32
    %276 = vector.broadcast %cst_114 : f32 to vector<8x1xf32>
    %277 = arith.divf %275, %276 : vector<8x1xf32>
    %278 = vector.broadcast %277 : vector<8x1xf32> to vector<8x32xf32>
    %279 = arith.subf %271, %278 : vector<8x32xf32>
    %280 = vector.broadcast %277 : vector<8x1xf32> to vector<8x32xf32>
    %281 = arith.subf %271, %280 : vector<8x32xf32>
    %282 = arith.mulf %279, %281 : vector<8x32xf32>
    %cst_115 = arith.constant dense<0.000000e+00> : vector<8xf32>
    %283 = vector.multi_reduction <add>, %282, %cst_115 [1] : vector<8x32xf32> to vector<8xf32>
    %284 = vector.shape_cast %283 : vector<8xf32> to vector<8x1xf32>
    %cst_116 = arith.constant 3.200000e+01 : f32
    %285 = vector.broadcast %cst_116 : f32 to vector<8x1xf32>
    %286 = arith.divf %284, %285 : vector<8x1xf32>
    %287 = vector.broadcast %277 : vector<8x1xf32> to vector<8x32xf32>
    %288 = arith.subf %271, %287 : vector<8x32xf32>
    %cst_117 = arith.constant 9.99999996E-13 : f32
    %289 = vector.broadcast %cst_117 : f32 to vector<8x1xf32>
    %290 = arith.addf %286, %289 : vector<8x1xf32>
    %291 = math.rsqrt %290 : vector<8x1xf32>
    %292 = vector.broadcast %291 : vector<8x1xf32> to vector<8x32xf32>
    %293 = arith.mulf %288, %292 : vector<8x32xf32>
    %294 = vector.broadcast %272 : vector<1x32xf32> to vector<8x32xf32>
    %295 = arith.mulf %293, %294 : vector<8x32xf32>
    %296 = vector.broadcast %273 : vector<1x32xf32> to vector<8x32xf32>
    %297 = arith.addf %295, %296 : vector<8x32xf32>
    %c0_118 = arith.constant 0 : index
    %c0_119 = arith.constant 0 : index
    %c0_120 = arith.constant 0 : index
    %298 = vector.load %arg23[%c0_118, %c0_119, %c0_120] : memref<1x8x32xf32, #tpu.memory_space<vmem>>, vector<1x8x32xf32>
    %299 = vector.shape_cast %298 : vector<1x8x32xf32> to vector<8x32xf32>
    %300 = vector.shape_cast %297 : vector<8x32xf32> to vector<1x8x32xf32>
    tpu.vector_store %arg23[%c0_118, %c0_119, %c0_120], %300 {strides = array<i32>} : memref<1x8x32xf32, #tpu.memory_space<vmem>>, vector<1x8x32xf32>,
    return
  }
  func.func @transform_0(%arg0: i32) -> (i32, i32, i32) {
    %c0_i32 = arith.constant 0 : i32
    %c0_i32_0 = arith.constant 0 : i32
    %c0_i32_1 = arith.constant 0 : i32
    return %arg0, %c0_i32, %c0_i32_0 : i32, i32, i32
  }
  func.func @transform_1(%arg0: i32) -> (i32, i32, i32) {
    %c0_i32 = arith.constant 0 : i32
    %c0_i32_0 = arith.constant 0 : i32
    %c0_i32_1 = arith.constant 0 : i32
    return %arg0, %c0_i32, %c0_i32_0 : i32, i32, i32
  }
  func.func @transform_2(%arg0: i32) -> (i32, i32) {
    %c0_i32 = arith.constant 0 : i32
    %c0_i32_0 = arith.constant 0 : i32
    %c0_i32_1 = arith.constant 0 : i32
    return %c0_i32, %c0_i32_0 : i32, i32
  }
  func.func @transform_3(%arg0: i32) -> (i32, i32) {
    %c0_i32 = arith.constant 0 : i32
    %c0_i32_0 = arith.constant 0 : i32
    %c0_i32_1 = arith.constant 0 : i32
    return %c0_i32, %c0_i32_0 : i32, i32
  }
  func.func @transform_4(%arg0: i32) -> (i32, i32) {
    %c0_i32 = arith.constant 0 : i32
    %c0_i32_0 = arith.constant 0 : i32
    %c0_i32_1 = arith.constant 0 : i32
    return %c0_i32, %c0_i32_0 : i32, i32
  }
  func.func @transform_5(%arg0: i32) -> (i32, i32) {
    %c0_i32 = arith.constant 0 : i32
    %c0_i32_0 = arith.constant 0 : i32
    %c0_i32_1 = arith.constant 0 : i32
    return %c0_i32, %c0_i32_0 : i32, i32
  }
  func.func @transform_6(%arg0: i32) -> (i32, i32) {
    %c0_i32 = arith.constant 0 : i32
    %c0_i32_0 = arith.constant 0 : i32
    %c0_i32_1 = arith.constant 0 : i32
    return %c0_i32, %c0_i32_0 : i32, i32
  }
  func.func @transform_7(%arg0: i32) -> (i32, i32) {
    %c0_i32 = arith.constant 0 : i32
    %c0_i32_0 = arith.constant 0 : i32
    %c0_i32_1 = arith.constant 0 : i32
    return %c0_i32, %c0_i32_0 : i32, i32
  }
  func.func @transform_8(%arg0: i32) -> (i32, i32) {
    %c0_i32 = arith.constant 0 : i32
    %c0_i32_0 = arith.constant 0 : i32
    %c0_i32_1 = arith.constant 0 : i32
    return %c0_i32, %c0_i32_0 : i32, i32
  }
  func.func @transform_9(%arg0: i32) -> (i32, i32) {
    %c0_i32 = arith.constant 0 : i32
    %c0_i32_0 = arith.constant 0 : i32
    %c0_i32_1 = arith.constant 0 : i32
    return %c0_i32, %c0_i32_0 : i32, i32
  }
  func.func @transform_10(%arg0: i32) -> (i32, i32) {
    %c0_i32 = arith.constant 0 : i32
    %c0_i32_0 = arith.constant 0 : i32
    %c0_i32_1 = arith.constant 0 : i32
    return %c0_i32, %c0_i32_0 : i32, i32
  }
  func.func @transform_11(%arg0: i32) -> (i32, i32) {
    %c0_i32 = arith.constant 0 : i32
    %c0_i32_0 = arith.constant 0 : i32
    %c0_i32_1 = arith.constant 0 : i32
    return %c0_i32, %c0_i32_0 : i32, i32
  }
  func.func @transform_12(%arg0: i32) -> (i32, i32) {
    %c0_i32 = arith.constant 0 : i32
    %c0_i32_0 = arith.constant 0 : i32
    %c0_i32_1 = arith.constant 0 : i32
    return %c0_i32, %c0_i32_0 : i32, i32
  }
  func.func @transform_13(%arg0: i32) -> (i32, i32) {
    %c0_i32 = arith.constant 0 : i32
    %c0_i32_0 = arith.constant 0 : i32
    %c0_i32_1 = arith.constant 0 : i32
    return %c0_i32, %c0_i32_0 : i32, i32
  }
  func.func @transform_14(%arg0: i32) -> (i32, i32) {
    %c0_i32 = arith.constant 0 : i32
    %c0_i32_0 = arith.constant 0 : i32
    %c0_i32_1 = arith.constant 0 : i32
    return %c0_i32, %c0_i32_0 : i32, i32
  }
  func.func @transform_15(%arg0: i32) -> (i32, i32) {
    %c0_i32 = arith.constant 0 : i32
    %c0_i32_0 = arith.constant 0 : i32
    %c0_i32_1 = arith.constant 0 : i32
    return %c0_i32, %c0_i32_0 : i32, i32
  }
  func.func @transform_16(%arg0: i32) -> (i32, i32) {
    %c0_i32 = arith.constant 0 : i32
    %c0_i32_0 = arith.constant 0 : i32
    %c0_i32_1 = arith.constant 0 : i32
    return %c0_i32, %c0_i32_0 : i32, i32
  }
  func.func @transform_17(%arg0: i32) -> (i32, i32) {
    %c0_i32 = arith.constant 0 : i32
    %c0_i32_0 = arith.constant 0 : i32
    %c0_i32_1 = arith.constant 0 : i32
    return %c0_i32, %c0_i32_0 : i32, i32
  }
  func.func @transform_18(%arg0: i32) -> (i32, i32) {
    %c0_i32 = arith.constant 0 : i32
    %c0_i32_0 = arith.constant 0 : i32
    %c0_i32_1 = arith.constant 0 : i32
    return %c0_i32, %c0_i32_0 : i32, i32
  }
  func.func @transform_19(%arg0: i32) -> (i32, i32) {
    %c0_i32 = arith.constant 0 : i32
    %c0_i32_0 = arith.constant 0 : i32
    %c0_i32_1 = arith.constant 0 : i32
    return %c0_i32, %c0_i32_0 : i32, i32
  }
  func.func @transform_20(%arg0: i32) -> (i32, i32) {
    %c0_i32 = arith.constant 0 : i32
    %c0_i32_0 = arith.constant 0 : i32
    %c0_i32_1 = arith.constant 0 : i32
    return %c0_i32, %c0_i32_0 : i32, i32
  }
  func.func @transform_21(%arg0: i32) -> (i32, i32) {
    %c0_i32 = arith.constant 0 : i32
    %c0_i32_0 = arith.constant 0 : i32
    %c0_i32_1 = arith.constant 0 : i32
    return %c0_i32, %c0_i32_0 : i32, i32
  }
  func.func @transform_22(%arg0: i32) -> (i32, i32, i32) {
    %c0_i32 = arith.constant 0 : i32
    %c0_i32_0 = arith.constant 0 : i32
    %c0_i32_1 = arith.constant 0 : i32
    return %arg0, %c0_i32, %c0_i32_0 : i32, i32, i32
  }
}

module attributes {stable_mosaic.version = 11 : i64} {
  func.func @_qformer_layer_kernel(%arg0: i32, %arg1: memref<1x8x32xf32, #tpu.memory_space<vmem>>, %arg2: memref<1x5x32xf32, #tpu.memory_space<vmem>>, %arg3: memref<32x96xf32, #tpu.memory_space<vmem>>, %arg4: memref<1x96xf32, #tpu.memory_space<vmem>>, %arg5: memref<32x32xf32, #tpu.memory_space<vmem>>, %arg6: memref<1x32xf32, #tpu.memory_space<vmem>>, %arg7: memref<1x32xf32, #tpu.memory_space<vmem>>, %arg8: memref<1x32xf32, #tpu.memory_space<vmem>>, %arg9: memref<32x32xf32, #tpu.memory_space<vmem>>, %arg10: memref<1x32xf32, #tpu.memory_space<vmem>>, %arg11: memref<32x64xf32, #tpu.memory_space<vmem>>, %arg12: memref<1x64xf32, #tpu.memory_space<vmem>>, %arg13: memref<32x32xf32, #tpu.memory_space<vmem>>, %arg14: memref<1x32xf32, #tpu.memory_space<vmem>>, %arg15: memref<1x32xf32, #tpu.memory_space<vmem>>, %arg16: memref<1x32xf32, #tpu.memory_space<vmem>>, %arg17: memref<32x64xf32, #tpu.memory_space<vmem>>, %arg18: memref<1x64xf32, #tpu.memory_space<vmem>>, %arg19: memref<64x32xf32, #tpu.memory_space<vmem>>, %arg20: memref<1x32xf32, #tpu.memory_space<vmem>>, %arg21: memref<1x32xf32, #tpu.memory_space<vmem>>, %arg22: memref<1x32xf32, #tpu.memory_space<vmem>>, %arg23: memref<1x8x32xf32, #tpu.memory_space<vmem>>) attributes {dimension_semantics = [#tpu.dimension_semantics<parallel>], iteration_bounds = array<i64: 2>, scalar_prefetch = 0 : i64, scratch_operands = 0 : i64, tpu.core_type = #tpu.core_type<tc>, window_params = [{transform_indices = @transform_0, window_bounds = array<i64: 1, 8, 32>}, {transform_indices = @transform_1, window_bounds = array<i64: 1, 5, 32>}, {pipeline_mode = #tpu.pipeline_mode<synchronous>, transform_indices = @transform_2, window_bounds = array<i64: 32, 96>}, {pipeline_mode = #tpu.pipeline_mode<synchronous>, transform_indices = @transform_3, window_bounds = array<i64: 1, 96>}, {pipeline_mode = #tpu.pipeline_mode<synchronous>, transform_indices = @transform_4, window_bounds = array<i64: 32, 32>}, {pipeline_mode = #tpu.pipeline_mode<synchronous>, transform_indices = @transform_5, window_bounds = array<i64: 1, 32>}, {pipeline_mode = #tpu.pipeline_mode<synchronous>, transform_indices = @transform_6, window_bounds = array<i64: 1, 32>}, {pipeline_mode = #tpu.pipeline_mode<synchronous>, transform_indices = @transform_7, window_bounds = array<i64: 1, 32>}, {pipeline_mode = #tpu.pipeline_mode<synchronous>, transform_indices = @transform_8, window_bounds = array<i64: 32, 32>}, {pipeline_mode = #tpu.pipeline_mode<synchronous>, transform_indices = @transform_9, window_bounds = array<i64: 1, 32>}, {pipeline_mode = #tpu.pipeline_mode<synchronous>, transform_indices = @transform_10, window_bounds = array<i64: 32, 64>}, {pipeline_mode = #tpu.pipeline_mode<synchronous>, transform_indices = @transform_11, window_bounds = array<i64: 1, 64>}, {pipeline_mode = #tpu.pipeline_mode<synchronous>, transform_indices = @transform_12, window_bounds = array<i64: 32, 32>}, {pipeline_mode = #tpu.pipeline_mode<synchronous>, transform_indices = @transform_13, window_bounds = array<i64: 1, 32>}, {pipeline_mode = #tpu.pipeline_mode<synchronous>, transform_indices = @transform_14, window_bounds = array<i64: 1, 32>}, {pipeline_mode = #tpu.pipeline_mode<synchronous>, transform_indices = @transform_15, window_bounds = array<i64: 1, 32>}, {pipeline_mode = #tpu.pipeline_mode<synchronous>, transform_indices = @transform_16, window_bounds = array<i64: 32, 64>}, {pipeline_mode = #tpu.pipeline_mode<synchronous>, transform_indices = @transform_17, window_bounds = array<i64: 1, 64>}, {pipeline_mode = #tpu.pipeline_mode<synchronous>, transform_indices = @transform_18, window_bounds = array<i64: 64, 32>}, {pipeline_mode = #tpu.pipeline_mode<synchronous>, transform_indices = @transform_19, window_bounds = array<i64: 1, 32>}, {pipeline_mode = #tpu.pipeline_mode<synchronous>, transform_indices = @transform_20, window_bounds = array<i64: 1, 32>}, {pipeline_mode = #tpu.pipeline_mode<synchronous>, transform_indices = @transform_21, window_bounds = array<i64: 1, 32>}, {transform_indices = @transform_22, window_bounds = array<i64: 1, 8, 32>}]} {
    %c0 = arith.constant 0 : index
    %c0_0 = arith.constant 0 : index
    %c0_1 = arith.constant 0 : index
    %0 = vector.load %arg1[%c0, %c0_0, %c0_1] : memref<1x8x32xf32, #tpu.memory_space<vmem>>, vector<1x8x32xf32>
    %1 = vector.shape_cast %0 : vector<1x8x32xf32> to vector<8x32xf32>
    %c0_2 = arith.constant 0 : index
    %c0_3 = arith.constant 0 : index
    %c0_4 = arith.constant 0 : index
    %2 = vector.load %arg2[%c0_2, %c0_3, %c0_4] : memref<1x5x32xf32, #tpu.memory_space<vmem>>, vector<1x5x32xf32>
    %3 = vector.shape_cast %2 : vector<1x5x32xf32> to vector<5x32xf32>
    %c0_5 = arith.constant 0 : index
    %c0_6 = arith.constant 0 : index
    %4 = vector.load %arg3[%c0_5, %c0_6] : memref<32x96xf32, #tpu.memory_space<vmem>>, vector<32x96xf32>
    %c0_7 = arith.constant 0 : index
    %c0_8 = arith.constant 0 : index
    %5 = vector.load %arg4[%c0_7, %c0_8] : memref<1x96xf32, #tpu.memory_space<vmem>>, vector<1x96xf32>
    %cst = arith.constant dense<0.000000e+00> : vector<8x96xf32>
    %6 = tpu.matmul %1, %4, %cst {dimension_numbers = #tpu.dot_dimension_numbers<[1], [0], [0], [1], [0, 0, 1, 1], [], []>} : vector<8x32xf32>, vector<32x96xf32>, vector<8x96xf32> -> vector<8x96xf32>
    %7 = vector.broadcast %5 : vector<1x96xf32> to vector<8x96xf32>
    %8 = arith.addf %6, %7 : vector<8x96xf32>
    %9 = vector.extract_strided_slice %8 {offsets = [0, 0], sizes = [8, 32], strides = [1, 1]} : vector<8x96xf32> to vector<8x32xf32>
    %10 = vector.extract_strided_slice %8 {offsets = [0, 32], sizes = [8, 32], strides = [1, 1]} : vector<8x96xf32> to vector<8x32xf32>
    %11 = vector.extract_strided_slice %8 {offsets = [0, 64], sizes = [8, 32], strides = [1, 1]} : vector<8x96xf32> to vector<8x32xf32>
    %c0_9 = arith.constant 0 : index
    %c0_10 = arith.constant 0 : index
    %12 = vector.load %arg5[%c0_9, %c0_10] : memref<32x32xf32, #tpu.memory_space<vmem>>, vector<32x32xf32>
    %cst_11 = arith.constant 0.000000e+00 : f32
    %13 = vector.broadcast %cst_11 : f32 to vector<8x32xf32>
    %14 = vector.extract_strided_slice %9 {offsets = [0, 0], sizes = [8, 8], strides = [1, 1]} : vector<8x32xf32> to vector<8x8xf32>
    %15 = vector.extract_strided_slice %10 {offsets = [0, 0], sizes = [8, 8], strides = [1, 1]} : vector<8x32xf32> to vector<8x8xf32>
    %16 = vector.extract_strided_slice %11 {offsets = [0, 0], sizes = [8, 8], strides = [1, 1]} : vector<8x32xf32> to vector<8x8xf32>
    %cst_12 = arith.constant dense<0.000000e+00> : vector<8x8xf32>
    %17 = tpu.matmul %14, %15, %cst_12 {dimension_numbers = #tpu.dot_dimension_numbers<[1], [1], [0], [0], [0, 0, 1, 0], [], []>} : vector<8x8xf32>, vector<8x8xf32>, vector<8x8xf32> -> vector<8x8xf32>
    %cst_13 = arith.constant 0.353553385 : f32
    %18 = vector.broadcast %cst_13 : f32 to vector<8x8xf32>
    %19 = arith.mulf %17, %18 : vector<8x8xf32>
    %cst_14 = arith.constant dense<0xFF800000> : vector<8xf32>
    %20 = vector.multi_reduction <maximumf>, %19, %cst_14 [1] : vector<8x8xf32> to vector<8xf32>
    %21 = vector.shape_cast %20 : vector<8xf32> to vector<8x1xf32>
    %22 = vector.broadcast %21 : vector<8x1xf32> to vector<8x8xf32>
    %23 = arith.subf %19, %22 : vector<8x8xf32>
    %24 = math.exp %23 : vector<8x8xf32>
    %cst_15 = arith.constant dense<0.000000e+00> : vector<8xf32>
    %25 = vector.multi_reduction <add>, %24, %cst_15 [1] : vector<8x8xf32> to vector<8xf32>
    %26 = vector.shape_cast %25 : vector<8xf32> to vector<8x1xf32>
    %27 = tpu.reciprocal %26 {approx = true} : vector<8x1xf32> -> vector<8x1xf32>
    %28 = vector.broadcast %27 : vector<8x1xf32> to vector<8x8xf32>
    %29 = arith.mulf %24, %28 : vector<8x8xf32>
    %cst_16 = arith.constant dense<0.000000e+00> : vector<8x8xf32>
    %30 = tpu.matmul %29, %16, %cst_16 {dimension_numbers = #tpu.dot_dimension_numbers<[1], [0], [0], [1], [0, 0, 1, 1], [], []>} : vector<8x8xf32>, vector<8x8xf32>, vector<8x8xf32> -> vector<8x8xf32>
    %31 = vector.extract_strided_slice %12 {offsets = [0, 0], sizes = [8, 32], strides = [1, 1]} : vector<32x32xf32> to vector<8x32xf32>
    %cst_17 = arith.constant dense<0.000000e+00> : vector<8x32xf32>
    %32 = tpu.matmul %30, %31, %cst_17 {dimension_numbers = #tpu.dot_dimension_numbers<[1], [0], [0], [1], [0, 0, 1, 1], [], []>} : vector<8x8xf32>, vector<8x32xf32>, vector<8x32xf32> -> vector<8x32xf32>
    %33 = arith.addf %13, %32 : vector<8x32xf32>
    %34 = vector.extract_strided_slice %9 {offsets = [0, 8], sizes = [8, 8], strides = [1, 1]} : vector<8x32xf32> to vector<8x8xf32>
    %35 = vector.extract_strided_slice %10 {offsets = [0, 8], sizes = [8, 8], strides = [1, 1]} : vector<8x32xf32> to vector<8x8xf32>
    %36 = vector.extract_strided_slice %11 {offsets = [0, 8], sizes = [8, 8], strides = [1, 1]} : vector<8x32xf32> to vector<8x8xf32>
    %cst_18 = arith.constant dense<0.000000e+00> : vector<8x8xf32>
    %37 = tpu.matmul %34, %35, %cst_18 {dimension_numbers = #tpu.dot_dimension_numbers<[1], [1], [0], [0], [0, 0, 1, 0], [], []>} : vector<8x8xf32>, vector<8x8xf32>, vector<8x8xf32> -> vector<8x8xf32>
    %cst_19 = arith.constant 0.353553385 : f32
    %38 = vector.broadcast %cst_19 : f32 to vector<8x8xf32>
    %39 = arith.mulf %37, %38 : vector<8x8xf32>
    %cst_20 = arith.constant dense<0xFF800000> : vector<8xf32>
    %40 = vector.multi_reduction <maximumf>, %39, %cst_20 [1] : vector<8x8xf32> to vector<8xf32>
    %41 = vector.shape_cast %40 : vector<8xf32> to vector<8x1xf32>
    %42 = vector.broadcast %41 : vector<8x1xf32> to vector<8x8xf32>
    %43 = arith.subf %39, %42 : vector<8x8xf32>
    %44 = math.exp %43 : vector<8x8xf32>
    %cst_21 = arith.constant dense<0.000000e+00> : vector<8xf32>
    %45 = vector.multi_reduction <add>, %44, %cst_21 [1] : vector<8x8xf32> to vector<8xf32>
    %46 = vector.shape_cast %45 : vector<8xf32> to vector<8x1xf32>
    %47 = tpu.reciprocal %46 {approx = true} : vector<8x1xf32> -> vector<8x1xf32>
    %48 = vector.broadcast %47 : vector<8x1xf32> to vector<8x8xf32>
    %49 = arith.mulf %44, %48 : vector<8x8xf32>
    %cst_22 = arith.constant dense<0.000000e+00> : vector<8x8xf32>
    %50 = tpu.matmul %49, %36, %cst_22 {dimension_numbers = #tpu.dot_dimension_numbers<[1], [0], [0], [1], [0, 0, 1, 1], [], []>} : vector<8x8xf32>, vector<8x8xf32>, vector<8x8xf32> -> vector<8x8xf32>
    %51 = vector.extract_strided_slice %12 {offsets = [8, 0], sizes = [8, 32], strides = [1, 1]} : vector<32x32xf32> to vector<8x32xf32>
    %cst_23 = arith.constant dense<0.000000e+00> : vector<8x32xf32>
    %52 = tpu.matmul %50, %51, %cst_23 {dimension_numbers = #tpu.dot_dimension_numbers<[1], [0], [0], [1], [0, 0, 1, 1], [], []>} : vector<8x8xf32>, vector<8x32xf32>, vector<8x32xf32> -> vector<8x32xf32>
    %53 = arith.addf %33, %52 : vector<8x32xf32>
    %54 = vector.extract_strided_slice %9 {offsets = [0, 16], sizes = [8, 8], strides = [1, 1]} : vector<8x32xf32> to vector<8x8xf32>
    %55 = vector.extract_strided_slice %10 {offsets = [0, 16], sizes = [8, 8], strides = [1, 1]} : vector<8x32xf32> to vector<8x8xf32>
    %56 = vector.extract_strided_slice %11 {offsets = [0, 16], sizes = [8, 8], strides = [1, 1]} : vector<8x32xf32> to vector<8x8xf32>
    %cst_24 = arith.constant dense<0.000000e+00> : vector<8x8xf32>
    %57 = tpu.matmul %54, %55, %cst_24 {dimension_numbers = #tpu.dot_dimension_numbers<[1], [1], [0], [0], [0, 0, 1, 0], [], []>} : vector<8x8xf32>, vector<8x8xf32>, vector<8x8xf32> -> vector<8x8xf32>
    %cst_25 = arith.constant 0.353553385 : f32
    %58 = vector.broadcast %cst_25 : f32 to vector<8x8xf32>
    %59 = arith.mulf %57, %58 : vector<8x8xf32>
    %cst_26 = arith.constant dense<0xFF800000> : vector<8xf32>
    %60 = vector.multi_reduction <maximumf>, %59, %cst_26 [1] : vector<8x8xf32> to vector<8xf32>
    %61 = vector.shape_cast %60 : vector<8xf32> to vector<8x1xf32>
    %62 = vector.broadcast %61 : vector<8x1xf32> to vector<8x8xf32>
    %63 = arith.subf %59, %62 : vector<8x8xf32>
    %64 = math.exp %63 : vector<8x8xf32>
    %cst_27 = arith.constant dense<0.000000e+00> : vector<8xf32>
    %65 = vector.multi_reduction <add>, %64, %cst_27 [1] : vector<8x8xf32> to vector<8xf32>
    %66 = vector.shape_cast %65 : vector<8xf32> to vector<8x1xf32>
    %67 = tpu.reciprocal %66 {approx = true} : vector<8x1xf32> -> vector<8x1xf32>
    %68 = vector.broadcast %67 : vector<8x1xf32> to vector<8x8xf32>
    %69 = arith.mulf %64, %68 : vector<8x8xf32>
    %cst_28 = arith.constant dense<0.000000e+00> : vector<8x8xf32>
    %70 = tpu.matmul %69, %56, %cst_28 {dimension_numbers = #tpu.dot_dimension_numbers<[1], [0], [0], [1], [0, 0, 1, 1], [], []>} : vector<8x8xf32>, vector<8x8xf32>, vector<8x8xf32> -> vector<8x8xf32>
    %71 = vector.extract_strided_slice %12 {offsets = [16, 0], sizes = [8, 32], strides = [1, 1]} : vector<32x32xf32> to vector<8x32xf32>
    %cst_29 = arith.constant dense<0.000000e+00> : vector<8x32xf32>
    %72 = tpu.matmul %70, %71, %cst_29 {dimension_numbers = #tpu.dot_dimension_numbers<[1], [0], [0], [1], [0, 0, 1, 1], [], []>} : vector<8x8xf32>, vector<8x32xf32>, vector<8x32xf32> -> vector<8x32xf32>
    %73 = arith.addf %53, %72 : vector<8x32xf32>
    %74 = vector.extract_strided_slice %9 {offsets = [0, 24], sizes = [8, 8], strides = [1, 1]} : vector<8x32xf32> to vector<8x8xf32>
    %75 = vector.extract_strided_slice %10 {offsets = [0, 24], sizes = [8, 8], strides = [1, 1]} : vector<8x32xf32> to vector<8x8xf32>
    %76 = vector.extract_strided_slice %11 {offsets = [0, 24], sizes = [8, 8], strides = [1, 1]} : vector<8x32xf32> to vector<8x8xf32>
    %cst_30 = arith.constant dense<0.000000e+00> : vector<8x8xf32>
    %77 = tpu.matmul %74, %75, %cst_30 {dimension_numbers = #tpu.dot_dimension_numbers<[1], [1], [0], [0], [0, 0, 1, 0], [], []>} : vector<8x8xf32>, vector<8x8xf32>, vector<8x8xf32> -> vector<8x8xf32>
    %cst_31 = arith.constant 0.353553385 : f32
    %78 = vector.broadcast %cst_31 : f32 to vector<8x8xf32>
    %79 = arith.mulf %77, %78 : vector<8x8xf32>
    %cst_32 = arith.constant dense<0xFF800000> : vector<8xf32>
    %80 = vector.multi_reduction <maximumf>, %79, %cst_32 [1] : vector<8x8xf32> to vector<8xf32>
    %81 = vector.shape_cast %80 : vector<8xf32> to vector<8x1xf32>
    %82 = vector.broadcast %81 : vector<8x1xf32> to vector<8x8xf32>
    %83 = arith.subf %79, %82 : vector<8x8xf32>
    %84 = math.exp %83 : vector<8x8xf32>
    %cst_33 = arith.constant dense<0.000000e+00> : vector<8xf32>
    %85 = vector.multi_reduction <add>, %84, %cst_33 [1] : vector<8x8xf32> to vector<8xf32>
    %86 = vector.shape_cast %85 : vector<8xf32> to vector<8x1xf32>
    %87 = tpu.reciprocal %86 {approx = true} : vector<8x1xf32> -> vector<8x1xf32>
    %88 = vector.broadcast %87 : vector<8x1xf32> to vector<8x8xf32>
    %89 = arith.mulf %84, %88 : vector<8x8xf32>
    %cst_34 = arith.constant dense<0.000000e+00> : vector<8x8xf32>
    %90 = tpu.matmul %89, %76, %cst_34 {dimension_numbers = #tpu.dot_dimension_numbers<[1], [0], [0], [1], [0, 0, 1, 1], [], []>} : vector<8x8xf32>, vector<8x8xf32>, vector<8x8xf32> -> vector<8x8xf32>
    %91 = vector.extract_strided_slice %12 {offsets = [24, 0], sizes = [8, 32], strides = [1, 1]} : vector<32x32xf32> to vector<8x32xf32>
    %cst_35 = arith.constant dense<0.000000e+00> : vector<8x32xf32>
    %92 = tpu.matmul %90, %91, %cst_35 {dimension_numbers = #tpu.dot_dimension_numbers<[1], [0], [0], [1], [0, 0, 1, 1], [], []>} : vector<8x8xf32>, vector<8x32xf32>, vector<8x32xf32> -> vector<8x32xf32>
    %93 = arith.addf %73, %92 : vector<8x32xf32>
    %c0_36 = arith.constant 0 : index
    %c0_37 = arith.constant 0 : index
    %94 = vector.load %arg6[%c0_36, %c0_37] : memref<1x32xf32, #tpu.memory_space<vmem>>, vector<1x32xf32>
    %95 = vector.broadcast %94 : vector<1x32xf32> to vector<8x32xf32>
    %96 = arith.addf %93, %95 : vector<8x32xf32>
    %97 = arith.addf %1, %96 : vector<8x32xf32>
    %c0_38 = arith.constant 0 : index
    %c0_39 = arith.constant 0 : index
    %98 = vector.load %arg7[%c0_38, %c0_39] : memref<1x32xf32, #tpu.memory_space<vmem>>, vector<1x32xf32>
    %c0_40 = arith.constant 0 : index
    %c0_41 = arith.constant 0 : index
    %99 = vector.load %arg8[%c0_40, %c0_41] : memref<1x32xf32, #tpu.memory_space<vmem>>, vector<1x32xf32>
    %cst_42 = arith.constant dense<0.000000e+00> : vector<8xf32>
    %100 = vector.multi_reduction <add>, %97, %cst_42 [1] : vector<8x32xf32> to vector<8xf32>
    %101 = vector.shape_cast %100 : vector<8xf32> to vector<8x1xf32>
    %cst_43 = arith.constant 3.200000e+01 : f32
    %102 = vector.broadcast %cst_43 : f32 to vector<8x1xf32>
    %103 = arith.divf %101, %102 : vector<8x1xf32>
    %104 = vector.broadcast %103 : vector<8x1xf32> to vector<8x32xf32>
    %105 = arith.subf %97, %104 : vector<8x32xf32>
    %106 = vector.broadcast %103 : vector<8x1xf32> to vector<8x32xf32>
    %107 = arith.subf %97, %106 : vector<8x32xf32>
    %108 = arith.mulf %105, %107 : vector<8x32xf32>
    %cst_44 = arith.constant dense<0.000000e+00> : vector<8xf32>
    %109 = vector.multi_reduction <add>, %108, %cst_44 [1] : vector<8x32xf32> to vector<8xf32>
    %110 = vector.shape_cast %109 : vector<8xf32> to vector<8x1xf32>
    %cst_45 = arith.constant 3.200000e+01 : f32
    %111 = vector.broadcast %cst_45 : f32 to vector<8x1xf32>
    %112 = arith.divf %110, %111 : vector<8x1xf32>
    %113 = vector.broadcast %103 : vector<8x1xf32> to vector<8x32xf32>
    %114 = arith.subf %97, %113 : vector<8x32xf32>
    %cst_46 = arith.constant 9.99999996E-13 : f32
    %115 = vector.broadcast %cst_46 : f32 to vector<8x1xf32>
    %116 = arith.addf %112, %115 : vector<8x1xf32>
    %117 = math.rsqrt %116 : vector<8x1xf32>
    %118 = vector.broadcast %117 : vector<8x1xf32> to vector<8x32xf32>
    %119 = arith.mulf %114, %118 : vector<8x32xf32>
    %120 = vector.broadcast %98 : vector<1x32xf32> to vector<8x32xf32>
    %121 = arith.mulf %119, %120 : vector<8x32xf32>
    %122 = vector.broadcast %99 : vector<1x32xf32> to vector<8x32xf32>
    %123 = arith.addf %121, %122 : vector<8x32xf32>
    %c0_47 = arith.constant 0 : index
    %c0_48 = arith.constant 0 : index
    %124 = vector.load %arg9[%c0_47, %c0_48] : memref<32x32xf32, #tpu.memory_space<vmem>>, vector<32x32xf32>
    %c0_49 = arith.constant 0 : index
    %c0_50 = arith.constant 0 : index
    %125 = vector.load %arg10[%c0_49, %c0_50] : memref<1x32xf32, #tpu.memory_space<vmem>>, vector<1x32xf32>
    %cst_51 = arith.constant dense<0.000000e+00> : vector<8x32xf32>
    %126 = tpu.matmul %123, %124, %cst_51 {dimension_numbers = #tpu.dot_dimension_numbers<[1], [0], [0], [1], [0, 0, 1, 1], [], []>} : vector<8x32xf32>, vector<32x32xf32>, vector<8x32xf32> -> vector<8x32xf32>
    %127 = vector.broadcast %125 : vector<1x32xf32> to vector<8x32xf32>
    %128 = arith.addf %126, %127 : vector<8x32xf32>
    %c0_52 = arith.constant 0 : index
    %c0_53 = arith.constant 0 : index
    %129 = vector.load %arg11[%c0_52, %c0_53] : memref<32x64xf32, #tpu.memory_space<vmem>>, vector<32x64xf32>
    %c0_54 = arith.constant 0 : index
    %c0_55 = arith.constant 0 : index
    %130 = vector.load %arg12[%c0_54, %c0_55] : memref<1x64xf32, #tpu.memory_space<vmem>>, vector<1x64xf32>
    %cst_56 = arith.constant dense<0.000000e+00> : vector<5x64xf32>
    %131 = tpu.matmul %3, %129, %cst_56 {dimension_numbers = #tpu.dot_dimension_numbers<[1], [0], [0], [1], [0, 0, 1, 1], [], []>} : vector<5x32xf32>, vector<32x64xf32>, vector<5x64xf32> -> vector<5x64xf32>
    %132 = vector.broadcast %130 : vector<1x64xf32> to vector<5x64xf32>
    %133 = arith.addf %131, %132 : vector<5x64xf32>
    %134 = vector.extract_strided_slice %133 {offsets = [0, 0], sizes = [5, 32], strides = [1, 1]} : vector<5x64xf32> to vector<5x32xf32>
    %135 = vector.extract_strided_slice %133 {offsets = [0, 32], sizes = [5, 32], strides = [1, 1]} : vector<5x64xf32> to vector<5x32xf32>
    %c0_57 = arith.constant 0 : index
    %c0_58 = arith.constant 0 : index
    %136 = vector.load %arg13[%c0_57, %c0_58] : memref<32x32xf32, #tpu.memory_space<vmem>>, vector<32x32xf32>
    %cst_59 = arith.constant 0.000000e+00 : f32
    %137 = vector.broadcast %cst_59 : f32 to vector<8x32xf32>
    %138 = vector.extract_strided_slice %128 {offsets = [0, 0], sizes = [8, 8], strides = [1, 1]} : vector<8x32xf32> to vector<8x8xf32>
    %139 = vector.extract_strided_slice %134 {offsets = [0, 0], sizes = [5, 8], strides = [1, 1]} : vector<5x32xf32> to vector<5x8xf32>
    %140 = vector.extract_strided_slice %135 {offsets = [0, 0], sizes = [5, 8], strides = [1, 1]} : vector<5x32xf32> to vector<5x8xf32>
    %cst_60 = arith.constant dense<0.000000e+00> : vector<8x5xf32>
    %141 = tpu.matmul %138, %139, %cst_60 {dimension_numbers = #tpu.dot_dimension_numbers<[1], [1], [0], [0], [0, 0, 1, 0], [], []>} : vector<8x8xf32>, vector<5x8xf32>, vector<8x5xf32> -> vector<8x5xf32>
    %cst_61 = arith.constant 0.353553385 : f32
    %142 = vector.broadcast %cst_61 : f32 to vector<8x5xf32>
    %143 = arith.mulf %141, %142 : vector<8x5xf32>
    %cst_62 = arith.constant dense<0xFF800000> : vector<8xf32>
    %144 = vector.multi_reduction <maximumf>, %143, %cst_62 [1] : vector<8x5xf32> to vector<8xf32>
    %145 = vector.shape_cast %144 : vector<8xf32> to vector<8x1xf32>
    %146 = vector.broadcast %145 : vector<8x1xf32> to vector<8x5xf32>
    %147 = arith.subf %143, %146 : vector<8x5xf32>
    %148 = math.exp %147 : vector<8x5xf32>
    %cst_63 = arith.constant dense<0.000000e+00> : vector<8xf32>
    %149 = vector.multi_reduction <add>, %148, %cst_63 [1] : vector<8x5xf32> to vector<8xf32>
    %150 = vector.shape_cast %149 : vector<8xf32> to vector<8x1xf32>
    %151 = tpu.reciprocal %150 {approx = true} : vector<8x1xf32> -> vector<8x1xf32>
    %152 = vector.broadcast %151 : vector<8x1xf32> to vector<8x5xf32>
    %153 = arith.mulf %148, %152 : vector<8x5xf32>
    %cst_64 = arith.constant dense<0.000000e+00> : vector<8x8xf32>
    %154 = tpu.matmul %153, %140, %cst_64 {dimension_numbers = #tpu.dot_dimension_numbers<[1], [0], [0], [1], [0, 0, 1, 1], [], []>} : vector<8x5xf32>, vector<5x8xf32>, vector<8x8xf32> -> vector<8x8xf32>
    %155 = vector.extract_strided_slice %136 {offsets = [0, 0], sizes = [8, 32], strides = [1, 1]} : vector<32x32xf32> to vector<8x32xf32>
    %cst_65 = arith.constant dense<0.000000e+00> : vector<8x32xf32>
    %156 = tpu.matmul %154, %155, %cst_65 {dimension_numbers = #tpu.dot_dimension_numbers<[1], [0], [0], [1], [0, 0, 1, 1], [], []>} : vector<8x8xf32>, vector<8x32xf32>, vector<8x32xf32> -> vector<8x32xf32>
    %157 = arith.addf %137, %156 : vector<8x32xf32>
    %158 = vector.extract_strided_slice %128 {offsets = [0, 8], sizes = [8, 8], strides = [1, 1]} : vector<8x32xf32> to vector<8x8xf32>
    %159 = vector.extract_strided_slice %134 {offsets = [0, 8], sizes = [5, 8], strides = [1, 1]} : vector<5x32xf32> to vector<5x8xf32>
    %160 = vector.extract_strided_slice %135 {offsets = [0, 8], sizes = [5, 8], strides = [1, 1]} : vector<5x32xf32> to vector<5x8xf32>
    %cst_66 = arith.constant dense<0.000000e+00> : vector<8x5xf32>
    %161 = tpu.matmul %158, %159, %cst_66 {dimension_numbers = #tpu.dot_dimension_numbers<[1], [1], [0], [0], [0, 0, 1, 0], [], []>} : vector<8x8xf32>, vector<5x8xf32>, vector<8x5xf32> -> vector<8x5xf32>
    %cst_67 = arith.constant 0.353553385 : f32
    %162 = vector.broadcast %cst_67 : f32 to vector<8x5xf32>
    %163 = arith.mulf %161, %162 : vector<8x5xf32>
    %cst_68 = arith.constant dense<0xFF800000> : vector<8xf32>
    %164 = vector.multi_reduction <maximumf>, %163, %cst_68 [1] : vector<8x5xf32> to vector<8xf32>
    %165 = vector.shape_cast %164 : vector<8xf32> to vector<8x1xf32>
    %166 = vector.broadcast %165 : vector<8x1xf32> to vector<8x5xf32>
    %167 = arith.subf %163, %166 : vector<8x5xf32>
    %168 = math.exp %167 : vector<8x5xf32>
    %cst_69 = arith.constant dense<0.000000e+00> : vector<8xf32>
    %169 = vector.multi_reduction <add>, %168, %cst_69 [1] : vector<8x5xf32> to vector<8xf32>
    %170 = vector.shape_cast %169 : vector<8xf32> to vector<8x1xf32>
    %171 = tpu.reciprocal %170 {approx = true} : vector<8x1xf32> -> vector<8x1xf32>
    %172 = vector.broadcast %171 : vector<8x1xf32> to vector<8x5xf32>
    %173 = arith.mulf %168, %172 : vector<8x5xf32>
    %cst_70 = arith.constant dense<0.000000e+00> : vector<8x8xf32>
    %174 = tpu.matmul %173, %160, %cst_70 {dimension_numbers = #tpu.dot_dimension_numbers<[1], [0], [0], [1], [0, 0, 1, 1], [], []>} : vector<8x5xf32>, vector<5x8xf32>, vector<8x8xf32> -> vector<8x8xf32>
    %175 = vector.extract_strided_slice %136 {offsets = [8, 0], sizes = [8, 32], strides = [1, 1]} : vector<32x32xf32> to vector<8x32xf32>
    %cst_71 = arith.constant dense<0.000000e+00> : vector<8x32xf32>
    %176 = tpu.matmul %174, %175, %cst_71 {dimension_numbers = #tpu.dot_dimension_numbers<[1], [0], [0], [1], [0, 0, 1, 1], [], []>} : vector<8x8xf32>, vector<8x32xf32>, vector<8x32xf32> -> vector<8x32xf32>
    %177 = arith.addf %157, %176 : vector<8x32xf32>
    %178 = vector.extract_strided_slice %128 {offsets = [0, 16], sizes = [8, 8], strides = [1, 1]} : vector<8x32xf32> to vector<8x8xf32>
    %179 = vector.extract_strided_slice %134 {offsets = [0, 16], sizes = [5, 8], strides = [1, 1]} : vector<5x32xf32> to vector<5x8xf32>
    %180 = vector.extract_strided_slice %135 {offsets = [0, 16], sizes = [5, 8], strides = [1, 1]} : vector<5x32xf32> to vector<5x8xf32>
    %cst_72 = arith.constant dense<0.000000e+00> : vector<8x5xf32>
    %181 = tpu.matmul %178, %179, %cst_72 {dimension_numbers = #tpu.dot_dimension_numbers<[1], [1], [0], [0], [0, 0, 1, 0], [], []>} : vector<8x8xf32>, vector<5x8xf32>, vector<8x5xf32> -> vector<8x5xf32>
    %cst_73 = arith.constant 0.353553385 : f32
    %182 = vector.broadcast %cst_73 : f32 to vector<8x5xf32>
    %183 = arith.mulf %181, %182 : vector<8x5xf32>
    %cst_74 = arith.constant dense<0xFF800000> : vector<8xf32>
    %184 = vector.multi_reduction <maximumf>, %183, %cst_74 [1] : vector<8x5xf32> to vector<8xf32>
    %185 = vector.shape_cast %184 : vector<8xf32> to vector<8x1xf32>
    %186 = vector.broadcast %185 : vector<8x1xf32> to vector<8x5xf32>
    %187 = arith.subf %183, %186 : vector<8x5xf32>
    %188 = math.exp %187 : vector<8x5xf32>
    %cst_75 = arith.constant dense<0.000000e+00> : vector<8xf32>
    %189 = vector.multi_reduction <add>, %188, %cst_75 [1] : vector<8x5xf32> to vector<8xf32>
    %190 = vector.shape_cast %189 : vector<8xf32> to vector<8x1xf32>
    %191 = tpu.reciprocal %190 {approx = true} : vector<8x1xf32> -> vector<8x1xf32>
    %192 = vector.broadcast %191 : vector<8x1xf32> to vector<8x5xf32>
    %193 = arith.mulf %188, %192 : vector<8x5xf32>
    %cst_76 = arith.constant dense<0.000000e+00> : vector<8x8xf32>
    %194 = tpu.matmul %193, %180, %cst_76 {dimension_numbers = #tpu.dot_dimension_numbers<[1], [0], [0], [1], [0, 0, 1, 1], [], []>} : vector<8x5xf32>, vector<5x8xf32>, vector<8x8xf32> -> vector<8x8xf32>
    %195 = vector.extract_strided_slice %136 {offsets = [16, 0], sizes = [8, 32], strides = [1, 1]} : vector<32x32xf32> to vector<8x32xf32>
    %cst_77 = arith.constant dense<0.000000e+00> : vector<8x32xf32>
    %196 = tpu.matmul %194, %195, %cst_77 {dimension_numbers = #tpu.dot_dimension_numbers<[1], [0], [0], [1], [0, 0, 1, 1], [], []>} : vector<8x8xf32>, vector<8x32xf32>, vector<8x32xf32> -> vector<8x32xf32>
    %197 = arith.addf %177, %196 : vector<8x32xf32>
    %198 = vector.extract_strided_slice %128 {offsets = [0, 24], sizes = [8, 8], strides = [1, 1]} : vector<8x32xf32> to vector<8x8xf32>
    %199 = vector.extract_strided_slice %134 {offsets = [0, 24], sizes = [5, 8], strides = [1, 1]} : vector<5x32xf32> to vector<5x8xf32>
    %200 = vector.extract_strided_slice %135 {offsets = [0, 24], sizes = [5, 8], strides = [1, 1]} : vector<5x32xf32> to vector<5x8xf32>
    %cst_78 = arith.constant dense<0.000000e+00> : vector<8x5xf32>
    %201 = tpu.matmul %198, %199, %cst_78 {dimension_numbers = #tpu.dot_dimension_numbers<[1], [1], [0], [0], [0, 0, 1, 0], [], []>} : vector<8x8xf32>, vector<5x8xf32>, vector<8x5xf32> -> vector<8x5xf32>
    %cst_79 = arith.constant 0.353553385 : f32
    %202 = vector.broadcast %cst_79 : f32 to vector<8x5xf32>
    %203 = arith.mulf %201, %202 : vector<8x5xf32>
    %cst_80 = arith.constant dense<0xFF800000> : vector<8xf32>
    %204 = vector.multi_reduction <maximumf>, %203, %cst_80 [1] : vector<8x5xf32> to vector<8xf32>
    %205 = vector.shape_cast %204 : vector<8xf32> to vector<8x1xf32>
    %206 = vector.broadcast %205 : vector<8x1xf32> to vector<8x5xf32>
    %207 = arith.subf %203, %206 : vector<8x5xf32>
    %208 = math.exp %207 : vector<8x5xf32>
    %cst_81 = arith.constant dense<0.000000e+00> : vector<8xf32>
    %209 = vector.multi_reduction <add>, %208, %cst_81 [1] : vector<8x5xf32> to vector<8xf32>
    %210 = vector.shape_cast %209 : vector<8xf32> to vector<8x1xf32>
    %211 = tpu.reciprocal %210 {approx = true} : vector<8x1xf32> -> vector<8x1xf32>
    %212 = vector.broadcast %211 : vector<8x1xf32> to vector<8x5xf32>
    %213 = arith.mulf %208, %212 : vector<8x5xf32>
    %cst_82 = arith.constant dense<0.000000e+00> : vector<8x8xf32>
    %214 = tpu.matmul %213, %200, %cst_82 {dimension_numbers = #tpu.dot_dimension_numbers<[1], [0], [0], [1], [0, 0, 1, 1], [], []>} : vector<8x5xf32>, vector<5x8xf32>, vector<8x8xf32> -> vector<8x8xf32>
    %215 = vector.extract_strided_slice %136 {offsets = [24, 0], sizes = [8, 32], strides = [1, 1]} : vector<32x32xf32> to vector<8x32xf32>
    %cst_83 = arith.constant dense<0.000000e+00> : vector<8x32xf32>
    %216 = tpu.matmul %214, %215, %cst_83 {dimension_numbers = #tpu.dot_dimension_numbers<[1], [0], [0], [1], [0, 0, 1, 1], [], []>} : vector<8x8xf32>, vector<8x32xf32>, vector<8x32xf32> -> vector<8x32xf32>
    %217 = arith.addf %197, %216 : vector<8x32xf32>
    %c0_84 = arith.constant 0 : index
    %c0_85 = arith.constant 0 : index
    %218 = vector.load %arg14[%c0_84, %c0_85] : memref<1x32xf32, #tpu.memory_space<vmem>>, vector<1x32xf32>
    %219 = vector.broadcast %218 : vector<1x32xf32> to vector<8x32xf32>
    %220 = arith.addf %217, %219 : vector<8x32xf32>
    %221 = arith.addf %123, %220 : vector<8x32xf32>
    %c0_86 = arith.constant 0 : index
    %c0_87 = arith.constant 0 : index
    %222 = vector.load %arg15[%c0_86, %c0_87] : memref<1x32xf32, #tpu.memory_space<vmem>>, vector<1x32xf32>
    %c0_88 = arith.constant 0 : index
    %c0_89 = arith.constant 0 : index
    %223 = vector.load %arg16[%c0_88, %c0_89] : memref<1x32xf32, #tpu.memory_space<vmem>>, vector<1x32xf32>
    %cst_90 = arith.constant dense<0.000000e+00> : vector<8xf32>
    %224 = vector.multi_reduction <add>, %221, %cst_90 [1] : vector<8x32xf32> to vector<8xf32>
    %225 = vector.shape_cast %224 : vector<8xf32> to vector<8x1xf32>
    %cst_91 = arith.constant 3.200000e+01 : f32
    %226 = vector.broadcast %cst_91 : f32 to vector<8x1xf32>
    %227 = arith.divf %225, %226 : vector<8x1xf32>
    %228 = vector.broadcast %227 : vector<8x1xf32> to vector<8x32xf32>
    %229 = arith.subf %221, %228 : vector<8x32xf32>
    %230 = vector.broadcast %227 : vector<8x1xf32> to vector<8x32xf32>
    %231 = arith.subf %221, %230 : vector<8x32xf32>
    %232 = arith.mulf %229, %231 : vector<8x32xf32>
    %cst_92 = arith.constant dense<0.000000e+00> : vector<8xf32>
    %233 = vector.multi_reduction <add>, %232, %cst_92 [1] : vector<8x32xf32> to vector<8xf32>
    %234 = vector.shape_cast %233 : vector<8xf32> to vector<8x1xf32>
    %cst_93 = arith.constant 3.200000e+01 : f32
    %235 = vector.broadcast %cst_93 : f32 to vector<8x1xf32>
    %236 = arith.divf %234, %235 : vector<8x1xf32>
    %237 = vector.broadcast %227 : vector<8x1xf32> to vector<8x32xf32>
    %238 = arith.subf %221, %237 : vector<8x32xf32>
    %cst_94 = arith.constant 9.99999996E-13 : f32
    %239 = vector.broadcast %cst_94 : f32 to vector<8x1xf32>
    %240 = arith.addf %236, %239 : vector<8x1xf32>
    %241 = math.rsqrt %240 : vector<8x1xf32>
    %242 = vector.broadcast %241 : vector<8x1xf32> to vector<8x32xf32>
    %243 = arith.mulf %238, %242 : vector<8x32xf32>
    %244 = vector.broadcast %222 : vector<1x32xf32> to vector<8x32xf32>
    %245 = arith.mulf %243, %244 : vector<8x32xf32>
    %246 = vector.broadcast %223 : vector<1x32xf32> to vector<8x32xf32>
    %247 = arith.addf %245, %246 : vector<8x32xf32>
    %c0_95 = arith.constant 0 : index
    %c0_96 = arith.constant 0 : index
    %248 = vector.load %arg17[%c0_95, %c0_96] : memref<32x64xf32, #tpu.memory_space<vmem>>, vector<32x64xf32>
    %c0_97 = arith.constant 0 : index
    %c0_98 = arith.constant 0 : index
    %249 = vector.load %arg18[%c0_97, %c0_98] : memref<1x64xf32, #tpu.memory_space<vmem>>, vector<1x64xf32>
    %cst_99 = arith.constant dense<0.000000e+00> : vector<8x64xf32>
    %250 = tpu.matmul %247, %248, %cst_99 {dimension_numbers = #tpu.dot_dimension_numbers<[1], [0], [0], [1], [0, 0, 1, 1], [], []>} : vector<8x32xf32>, vector<32x64xf32>, vector<8x64xf32> -> vector<8x64xf32>
    %251 = vector.broadcast %249 : vector<1x64xf32> to vector<8x64xf32>
    %252 = arith.addf %250, %251 : vector<8x64xf32>
    %cst_100 = arith.constant 5.000000e-01 : f32
    %253 = vector.broadcast %cst_100 : f32 to vector<8x64xf32>
    %254 = arith.mulf %253, %252 : vector<8x64xf32>
    %cst_101 = arith.constant 4.471500e-02 : f32
    %255 = vector.broadcast %cst_101 : f32 to vector<8x64xf32>
    %256 = arith.mulf %255, %252 : vector<8x64xf32>
    %257 = arith.mulf %256, %252 : vector<8x64xf32>
    %258 = arith.mulf %257, %252 : vector<8x64xf32>
    %259 = arith.addf %252, %258 : vector<8x64xf32>
    %cst_102 = arith.constant 0.797884583 : f32
    %260 = vector.broadcast %cst_102 : f32 to vector<8x64xf32>
    %261 = arith.mulf %260, %259 : vector<8x64xf32>
    %262 = math.tanh %261 : vector<8x64xf32>
    %cst_103 = arith.constant 1.000000e+00 : f32
    %263 = vector.broadcast %cst_103 : f32 to vector<8x64xf32>
    %264 = arith.addf %263, %262 : vector<8x64xf32>
    %265 = arith.mulf %254, %264 : vector<8x64xf32>
    %c0_104 = arith.constant 0 : index
    %c0_105 = arith.constant 0 : index
    %266 = vector.load %arg19[%c0_104, %c0_105] : memref<64x32xf32, #tpu.memory_space<vmem>>, vector<64x32xf32>
    %c0_106 = arith.constant 0 : index
    %c0_107 = arith.constant 0 : index
    %267 = vector.load %arg20[%c0_106, %c0_107] : memref<1x32xf32, #tpu.memory_space<vmem>>, vector<1x32xf32>
    %cst_108 = arith.constant dense<0.000000e+00> : vector<8x32xf32>
    %268 = tpu.matmul %265, %266, %cst_108 {dimension_numbers = #tpu.dot_dimension_numbers<[1], [0], [0], [1], [0, 0, 1, 1], [], []>} : vector<8x64xf32>, vector<64x32xf32>, vector<8x32xf32> -> vector<8x32xf32>
    %269 = vector.broadcast %267 : vector<1x32xf32> to vector<8x32xf32>
    %270 = arith.addf %268, %269 : vector<8x32xf32>
    %271 = arith.addf %247, %270 : vector<8x32xf32>
    %c0_109 = arith.constant 0 : index
    %c0_110 = arith.constant 0 : index
    %272 = vector.load %arg21[%c0_109, %c0_110] : memref<1x32xf32, #tpu.memory_space<vmem>>, vector<1x32xf32>
    %c0_111 = arith.constant 0 : index
    %c0_112 = arith.constant 0 : index
    %273 = vector.load %arg22[%c0_111, %c0_112] : memref<1x32xf32, #tpu.memory_space<vmem>>, vector<1x32xf32>
    %cst_113 = arith.constant dense<0.000000e+00> : vector<8xf32>
    %274 = vector.multi_reduction <add>, %271, %cst_113 [1] : vector<8x32xf32> to vector<8xf32>
    %275 = vector.shape_cast %274 : vector<8xf32> to vector<8x1xf32>
    %cst_114 = arith.constant 3.200000e+01 : f32
    %276 = vector.broadcast %cst_114 : f32 to vector<8x1xf32>
    %277 = arith.divf %275, %276 : vector<8x1xf32>
    %278 = vector.broadcast %277 : vector<8x1xf32> to vector<8x32xf32>
    %279 = arith.subf %271, %278 : vector<8x32xf32>
    %280 = vector.broadcast %277 : vector<8x1xf32> to vector<8x32xf32>
    %281 = arith.subf %271, %280 : vector<8x32xf32>
    %282 = arith.mulf %279, %281 : vector<8x32xf32>
    %cst_115 = arith.constant dense<0.000000e+00> : vector<8xf32>
    %283 = vector.multi_reduction <add>, %282, %cst_115 [1] : vector<8x32xf32> to vector<8xf32>
    %284 = vector.shape_cast %283 : vector<8xf32> to vector<8x1xf32>
    %cst_116 = arith.constant 3.200000e+01 : f32
    %285 = vector.broadcast %cst_116 : f32 to vector<8x1xf32>
    %286 = arith.divf %284, %285 : vector<8x1xf32>
    %287 = vector.broadcast %277 : vector<8x1xf32> to vector<8x32xf32>
    %288 = arith.subf %271, %287 : vector<8x32xf32>
    %cst_117 = arith.constant 9.99999996E-13 : f32
    %289 = vector.broadcast %cst_117 : f32 to vector<8x1xf32>
    %290 = arith.addf %286, %289 : vector<8x1xf32>
    %291 = math.rsqrt %290 : vector<8x1xf32>
    %292 = vector.broadcast %291 : vector<8x1xf32> to vector<8x32xf32>
    %293 = arith.mulf %288, %292 : vector<8x32xf32>
    %294 = vector.broadcast %272 : vector<1x32xf32> to vector<8x32xf32>
    %295 = arith.mulf %293, %294 : vector<8x32xf32>
    %296 = vector.broadcast %273 : vector<1x32xf32> to vector<8x32xf32>
    %297 = arith.addf %295, %296 : vector<8x32xf32>
    %c0_118 = arith.constant 0 : index
    %c0_119 = arith.constant 0 : index
    %c0_120 = arith.constant 0 : index
    %298 = vector.load %arg23[%c0_118, %c0_119, %c0_120] : memref<1x8x32xf32, #tpu.memory_space<vmem>>, vector<1x8x32xf32>
    %299 = vector.shape_cast %298 : vector<1x8x32xf32> to vector<8x32xf32>
    %300 = vector.shape_cast %297 : vector<8x32xf32> to vector<1x8x32xf32>
    tpu.vector_store %arg23[%c0_118, %c0_119, %c0_120], %300 {strides = array<i32>} : memref<1x8x32xf32, #tpu.memory_space<vmem>>, vector<1x8x32xf32>,
    return
  }
  func.func @transform_0(%arg0: i32) -> (i32, i32, i32) {
    %c0_i32 = arith.constant 0 : i32
    %c0_i32_0 = arith.constant 0 : i32
    %c0_i32_1 = arith.constant 0 : i32
    return %arg0, %c0_i32, %c0_i32_0 : i32, i32, i32
  }
  func.func @transform_1(%arg0: i32) -> (i32, i32, i32) {
    %c0_i32 = arith.constant 0 : i32
    %c0_i32_0 = arith.constant 0 : i32
    %c0_i32_1 = arith.constant 0 : i32
    return %arg0, %c0_i32, %c0_i32_0 : i32, i32, i32
  }
  func.func @transform_2(%arg0: i32) -> (i32, i32) {
    %c0_i32 = arith.constant 0 : i32
    %c0_i32_0 = arith.constant 0 : i32
    %c0_i32_1 = arith.constant 0 : i32
    return %c0_i32, %c0_i32_0 : i32, i32
  }
  func.func @transform_3(%arg0: i32) -> (i32, i32) {
    %c0_i32 = arith.constant 0 : i32
    %c0_i32_0 = arith.constant 0 : i32
    %c0_i32_1 = arith.constant 0 : i32
    return %c0_i32, %c0_i32_0 : i32, i32
  }
  func.func @transform_4(%arg0: i32) -> (i32, i32) {
    %c0_i32 = arith.constant 0 : i32
    %c0_i32_0 = arith.constant 0 : i32
    %c0_i32_1 = arith.constant 0 : i32
    return %c0_i32, %c0_i32_0 : i32, i32
  }
  func.func @transform_5(%arg0: i32) -> (i32, i32) {
    %c0_i32 = arith.constant 0 : i32
    %c0_i32_0 = arith.constant 0 : i32
    %c0_i32_1 = arith.constant 0 : i32
    return %c0_i32, %c0_i32_0 : i32, i32
  }
  func.func @transform_6(%arg0: i32) -> (i32, i32) {
    %c0_i32 = arith.constant 0 : i32
    %c0_i32_0 = arith.constant 0 : i32
    %c0_i32_1 = arith.constant 0 : i32
    return %c0_i32, %c0_i32_0 : i32, i32
  }
  func.func @transform_7(%arg0: i32) -> (i32, i32) {
    %c0_i32 = arith.constant 0 : i32
    %c0_i32_0 = arith.constant 0 : i32
    %c0_i32_1 = arith.constant 0 : i32
    return %c0_i32, %c0_i32_0 : i32, i32
  }
  func.func @transform_8(%arg0: i32) -> (i32, i32) {
    %c0_i32 = arith.constant 0 : i32
    %c0_i32_0 = arith.constant 0 : i32
    %c0_i32_1 = arith.constant 0 : i32
    return %c0_i32, %c0_i32_0 : i32, i32
  }
  func.func @transform_9(%arg0: i32) -> (i32, i32) {
    %c0_i32 = arith.constant 0 : i32
    %c0_i32_0 = arith.constant 0 : i32
    %c0_i32_1 = arith.constant 0 : i32
    return %c0_i32, %c0_i32_0 : i32, i32
  }
  func.func @transform_10(%arg0: i32) -> (i32, i32) {
    %c0_i32 = arith.constant 0 : i32
    %c0_i32_0 = arith.constant 0 : i32
    %c0_i32_1 = arith.constant 0 : i32
    return %c0_i32, %c0_i32_0 : i32, i32
  }
  func.func @transform_11(%arg0: i32) -> (i32, i32) {
    %c0_i32 = arith.constant 0 : i32
    %c0_i32_0 = arith.constant 0 : i32
    %c0_i32_1 = arith.constant 0 : i32
    return %c0_i32, %c0_i32_0 : i32, i32
  }
  func.func @transform_12(%arg0: i32) -> (i32, i32) {
    %c0_i32 = arith.constant 0 : i32
    %c0_i32_0 = arith.constant 0 : i32
    %c0_i32_1 = arith.constant 0 : i32
    return %c0_i32, %c0_i32_0 : i32, i32
  }
  func.func @transform_13(%arg0: i32) -> (i32, i32) {
    %c0_i32 = arith.constant 0 : i32
    %c0_i32_0 = arith.constant 0 : i32
    %c0_i32_1 = arith.constant 0 : i32
    return %c0_i32, %c0_i32_0 : i32, i32
  }
  func.func @transform_14(%arg0: i32) -> (i32, i32) {
    %c0_i32 = arith.constant 0 : i32
    %c0_i32_0 = arith.constant 0 : i32
    %c0_i32_1 = arith.constant 0 : i32
    return %c0_i32, %c0_i32_0 : i32, i32
  }
  func.func @transform_15(%arg0: i32) -> (i32, i32) {
    %c0_i32 = arith.constant 0 : i32
    %c0_i32_0 = arith.constant 0 : i32
    %c0_i32_1 = arith.constant 0 : i32
    return %c0_i32, %c0_i32_0 : i32, i32
  }
  func.func @transform_16(%arg0: i32) -> (i32, i32) {
    %c0_i32 = arith.constant 0 : i32
    %c0_i32_0 = arith.constant 0 : i32
    %c0_i32_1 = arith.constant 0 : i32
    return %c0_i32, %c0_i32_0 : i32, i32
  }
  func.func @transform_17(%arg0: i32) -> (i32, i32) {
    %c0_i32 = arith.constant 0 : i32
    %c0_i32_0 = arith.constant 0 : i32
    %c0_i32_1 = arith.constant 0 : i32
    return %c0_i32, %c0_i32_0 : i32, i32
  }
  func.func @transform_18(%arg0: i32) -> (i32, i32) {
    %c0_i32 = arith.constant 0 : i32
    %c0_i32_0 = arith.constant 0 : i32
    %c0_i32_1 = arith.constant 0 : i32
    return %c0_i32, %c0_i32_0 : i32, i32
  }
  func.func @transform_19(%arg0: i32) -> (i32, i32) {
    %c0_i32 = arith.constant 0 : i32
    %c0_i32_0 = arith.constant 0 : i32
    %c0_i32_1 = arith.constant 0 : i32
    return %c0_i32, %c0_i32_0 : i32, i32
  }
  func.func @transform_20(%arg0: i32) -> (i32, i32) {
    %c0_i32 = arith.constant 0 : i32
    %c0_i32_0 = arith.constant 0 : i32
    %c0_i32_1 = arith.constant 0 : i32
    return %c0_i32, %c0_i32_0 : i32, i32
  }
  func.func @transform_21(%arg0: i32) -> (i32, i32) {
    %c0_i32 = arith.constant 0 : i32
    %c0_i32_0 = arith.constant 0 : i32
    %c0_i32_1 = arith.constant 0 : i32
    return %c0_i32, %c0_i32_0 : i32, i32
  }
  func.func @transform_22(%arg0: i32) -> (i32, i32, i32) {
    %c0_i32 = arith.constant 0 : i32
    %c0_i32_0 = arith.constant 0 : i32
    %c0_i32_1 = arith.constant 0 : i32
    return %arg0, %c0_i32, %c0_i32_0 : i32, i32, i32
  }
}

module attributes {stable_mosaic.version = 11 : i64} {
  func.func @_t5_enc_layer_kernel(%arg0: i32, %arg1: memref<1x8x32xf32, #tpu.memory_space<vmem>>, %arg2: memref<1x32xf32, #tpu.memory_space<vmem>>, %arg3: memref<32x96xf32, #tpu.memory_space<vmem>>, %arg4: memref<32x32xf32, #tpu.memory_space<vmem>>, %arg5: memref<1x32xf32, #tpu.memory_space<vmem>>, %arg6: memref<32x64xf32, #tpu.memory_space<vmem>>, %arg7: memref<32x64xf32, #tpu.memory_space<vmem>>, %arg8: memref<64x32xf32, #tpu.memory_space<vmem>>, %arg9: memref<1x8x32xf32, #tpu.memory_space<vmem>>) attributes {dimension_semantics = [#tpu.dimension_semantics<parallel>], iteration_bounds = array<i64: 2>, scalar_prefetch = 0 : i64, scratch_operands = 0 : i64, tpu.core_type = #tpu.core_type<tc>, window_params = [{transform_indices = @transform_0, window_bounds = array<i64: 1, 8, 32>}, {pipeline_mode = #tpu.pipeline_mode<synchronous>, transform_indices = @transform_1, window_bounds = array<i64: 1, 32>}, {pipeline_mode = #tpu.pipeline_mode<synchronous>, transform_indices = @transform_2, window_bounds = array<i64: 32, 96>}, {pipeline_mode = #tpu.pipeline_mode<synchronous>, transform_indices = @transform_3, window_bounds = array<i64: 32, 32>}, {pipeline_mode = #tpu.pipeline_mode<synchronous>, transform_indices = @transform_4, window_bounds = array<i64: 1, 32>}, {pipeline_mode = #tpu.pipeline_mode<synchronous>, transform_indices = @transform_5, window_bounds = array<i64: 32, 64>}, {pipeline_mode = #tpu.pipeline_mode<synchronous>, transform_indices = @transform_6, window_bounds = array<i64: 32, 64>}, {pipeline_mode = #tpu.pipeline_mode<synchronous>, transform_indices = @transform_7, window_bounds = array<i64: 64, 32>}, {transform_indices = @transform_8, window_bounds = array<i64: 1, 8, 32>}]} {
    %c0 = arith.constant 0 : index
    %c0_0 = arith.constant 0 : index
    %c0_1 = arith.constant 0 : index
    %0 = vector.load %arg1[%c0, %c0_0, %c0_1] : memref<1x8x32xf32, #tpu.memory_space<vmem>>, vector<1x8x32xf32>
    %1 = vector.shape_cast %0 : vector<1x8x32xf32> to vector<8x32xf32>
    %c0_2 = arith.constant 0 : index
    %c0_3 = arith.constant 0 : index
    %2 = vector.load %arg2[%c0_2, %c0_3] : memref<1x32xf32, #tpu.memory_space<vmem>>, vector<1x32xf32>
    %3 = arith.mulf %1, %1 : vector<8x32xf32>
    %cst = arith.constant dense<0.000000e+00> : vector<8xf32>
    %4 = vector.multi_reduction <add>, %3, %cst [1] : vector<8x32xf32> to vector<8xf32>
    %5 = vector.shape_cast %4 : vector<8xf32> to vector<8x1xf32>
    %cst_4 = arith.constant 3.200000e+01 : f32
    %6 = vector.broadcast %cst_4 : f32 to vector<8x1xf32>
    %7 = arith.divf %5, %6 : vector<8x1xf32>
    %cst_5 = arith.constant 9.99999997E-7 : f32
    %8 = vector.broadcast %cst_5 : f32 to vector<8x1xf32>
    %9 = arith.addf %7, %8 : vector<8x1xf32>
    %10 = math.rsqrt %9 : vector<8x1xf32>
    %11 = vector.broadcast %10 : vector<8x1xf32> to vector<8x32xf32>
    %12 = arith.mulf %1, %11 : vector<8x32xf32>
    %13 = vector.broadcast %2 : vector<1x32xf32> to vector<8x32xf32>
    %14 = arith.mulf %12, %13 : vector<8x32xf32>
    %c0_6 = arith.constant 0 : index
    %c0_7 = arith.constant 0 : index
    %15 = vector.load %arg3[%c0_6, %c0_7] : memref<32x96xf32, #tpu.memory_space<vmem>>, vector<32x96xf32>
    %cst_8 = arith.constant dense<0.000000e+00> : vector<8x96xf32>
    %16 = tpu.matmul %14, %15, %cst_8 {dimension_numbers = #tpu.dot_dimension_numbers<[1], [0], [0], [1], [0, 0, 1, 1], [], []>} : vector<8x32xf32>, vector<32x96xf32>, vector<8x96xf32> -> vector<8x96xf32>
    %17 = vector.extract_strided_slice %16 {offsets = [0, 0], sizes = [8, 32], strides = [1, 1]} : vector<8x96xf32> to vector<8x32xf32>
    %18 = vector.extract_strided_slice %16 {offsets = [0, 32], sizes = [8, 32], strides = [1, 1]} : vector<8x96xf32> to vector<8x32xf32>
    %19 = vector.extract_strided_slice %16 {offsets = [0, 64], sizes = [8, 32], strides = [1, 1]} : vector<8x96xf32> to vector<8x32xf32>
    %c0_9 = arith.constant 0 : index
    %c0_10 = arith.constant 0 : index
    %20 = vector.load %arg4[%c0_9, %c0_10] : memref<32x32xf32, #tpu.memory_space<vmem>>, vector<32x32xf32>
    %cst_11 = arith.constant 0.000000e+00 : f32
    %21 = vector.broadcast %cst_11 : f32 to vector<8x32xf32>
    %22 = vector.extract_strided_slice %17 {offsets = [0, 0], sizes = [8, 8], strides = [1, 1]} : vector<8x32xf32> to vector<8x8xf32>
    %23 = vector.extract_strided_slice %18 {offsets = [0, 0], sizes = [8, 8], strides = [1, 1]} : vector<8x32xf32> to vector<8x8xf32>
    %24 = vector.extract_strided_slice %19 {offsets = [0, 0], sizes = [8, 8], strides = [1, 1]} : vector<8x32xf32> to vector<8x8xf32>
    %cst_12 = arith.constant dense<0.000000e+00> : vector<8x8xf32>
    %25 = tpu.matmul %22, %23, %cst_12 {dimension_numbers = #tpu.dot_dimension_numbers<[1], [1], [0], [0], [0, 0, 1, 0], [], []>} : vector<8x8xf32>, vector<8x8xf32>, vector<8x8xf32> -> vector<8x8xf32>
    %cst_13 = arith.constant 1.000000e+00 : f32
    %26 = vector.broadcast %cst_13 : f32 to vector<8x8xf32>
    %27 = arith.mulf %25, %26 : vector<8x8xf32>
    %cst_14 = arith.constant dense<0xFF800000> : vector<8xf32>
    %28 = vector.multi_reduction <maximumf>, %27, %cst_14 [1] : vector<8x8xf32> to vector<8xf32>
    %29 = vector.shape_cast %28 : vector<8xf32> to vector<8x1xf32>
    %30 = vector.broadcast %29 : vector<8x1xf32> to vector<8x8xf32>
    %31 = arith.subf %27, %30 : vector<8x8xf32>
    %32 = math.exp %31 : vector<8x8xf32>
    %cst_15 = arith.constant dense<0.000000e+00> : vector<8xf32>
    %33 = vector.multi_reduction <add>, %32, %cst_15 [1] : vector<8x8xf32> to vector<8xf32>
    %34 = vector.shape_cast %33 : vector<8xf32> to vector<8x1xf32>
    %35 = tpu.reciprocal %34 {approx = true} : vector<8x1xf32> -> vector<8x1xf32>
    %36 = vector.broadcast %35 : vector<8x1xf32> to vector<8x8xf32>
    %37 = arith.mulf %32, %36 : vector<8x8xf32>
    %cst_16 = arith.constant dense<0.000000e+00> : vector<8x8xf32>
    %38 = tpu.matmul %37, %24, %cst_16 {dimension_numbers = #tpu.dot_dimension_numbers<[1], [0], [0], [1], [0, 0, 1, 1], [], []>} : vector<8x8xf32>, vector<8x8xf32>, vector<8x8xf32> -> vector<8x8xf32>
    %39 = vector.extract_strided_slice %20 {offsets = [0, 0], sizes = [8, 32], strides = [1, 1]} : vector<32x32xf32> to vector<8x32xf32>
    %cst_17 = arith.constant dense<0.000000e+00> : vector<8x32xf32>
    %40 = tpu.matmul %38, %39, %cst_17 {dimension_numbers = #tpu.dot_dimension_numbers<[1], [0], [0], [1], [0, 0, 1, 1], [], []>} : vector<8x8xf32>, vector<8x32xf32>, vector<8x32xf32> -> vector<8x32xf32>
    %41 = arith.addf %21, %40 : vector<8x32xf32>
    %42 = vector.extract_strided_slice %17 {offsets = [0, 8], sizes = [8, 8], strides = [1, 1]} : vector<8x32xf32> to vector<8x8xf32>
    %43 = vector.extract_strided_slice %18 {offsets = [0, 8], sizes = [8, 8], strides = [1, 1]} : vector<8x32xf32> to vector<8x8xf32>
    %44 = vector.extract_strided_slice %19 {offsets = [0, 8], sizes = [8, 8], strides = [1, 1]} : vector<8x32xf32> to vector<8x8xf32>
    %cst_18 = arith.constant dense<0.000000e+00> : vector<8x8xf32>
    %45 = tpu.matmul %42, %43, %cst_18 {dimension_numbers = #tpu.dot_dimension_numbers<[1], [1], [0], [0], [0, 0, 1, 0], [], []>} : vector<8x8xf32>, vector<8x8xf32>, vector<8x8xf32> -> vector<8x8xf32>
    %cst_19 = arith.constant 1.000000e+00 : f32
    %46 = vector.broadcast %cst_19 : f32 to vector<8x8xf32>
    %47 = arith.mulf %45, %46 : vector<8x8xf32>
    %cst_20 = arith.constant dense<0xFF800000> : vector<8xf32>
    %48 = vector.multi_reduction <maximumf>, %47, %cst_20 [1] : vector<8x8xf32> to vector<8xf32>
    %49 = vector.shape_cast %48 : vector<8xf32> to vector<8x1xf32>
    %50 = vector.broadcast %49 : vector<8x1xf32> to vector<8x8xf32>
    %51 = arith.subf %47, %50 : vector<8x8xf32>
    %52 = math.exp %51 : vector<8x8xf32>
    %cst_21 = arith.constant dense<0.000000e+00> : vector<8xf32>
    %53 = vector.multi_reduction <add>, %52, %cst_21 [1] : vector<8x8xf32> to vector<8xf32>
    %54 = vector.shape_cast %53 : vector<8xf32> to vector<8x1xf32>
    %55 = tpu.reciprocal %54 {approx = true} : vector<8x1xf32> -> vector<8x1xf32>
    %56 = vector.broadcast %55 : vector<8x1xf32> to vector<8x8xf32>
    %57 = arith.mulf %52, %56 : vector<8x8xf32>
    %cst_22 = arith.constant dense<0.000000e+00> : vector<8x8xf32>
    %58 = tpu.matmul %57, %44, %cst_22 {dimension_numbers = #tpu.dot_dimension_numbers<[1], [0], [0], [1], [0, 0, 1, 1], [], []>} : vector<8x8xf32>, vector<8x8xf32>, vector<8x8xf32> -> vector<8x8xf32>
    %59 = vector.extract_strided_slice %20 {offsets = [8, 0], sizes = [8, 32], strides = [1, 1]} : vector<32x32xf32> to vector<8x32xf32>
    %cst_23 = arith.constant dense<0.000000e+00> : vector<8x32xf32>
    %60 = tpu.matmul %58, %59, %cst_23 {dimension_numbers = #tpu.dot_dimension_numbers<[1], [0], [0], [1], [0, 0, 1, 1], [], []>} : vector<8x8xf32>, vector<8x32xf32>, vector<8x32xf32> -> vector<8x32xf32>
    %61 = arith.addf %41, %60 : vector<8x32xf32>
    %62 = vector.extract_strided_slice %17 {offsets = [0, 16], sizes = [8, 8], strides = [1, 1]} : vector<8x32xf32> to vector<8x8xf32>
    %63 = vector.extract_strided_slice %18 {offsets = [0, 16], sizes = [8, 8], strides = [1, 1]} : vector<8x32xf32> to vector<8x8xf32>
    %64 = vector.extract_strided_slice %19 {offsets = [0, 16], sizes = [8, 8], strides = [1, 1]} : vector<8x32xf32> to vector<8x8xf32>
    %cst_24 = arith.constant dense<0.000000e+00> : vector<8x8xf32>
    %65 = tpu.matmul %62, %63, %cst_24 {dimension_numbers = #tpu.dot_dimension_numbers<[1], [1], [0], [0], [0, 0, 1, 0], [], []>} : vector<8x8xf32>, vector<8x8xf32>, vector<8x8xf32> -> vector<8x8xf32>
    %cst_25 = arith.constant 1.000000e+00 : f32
    %66 = vector.broadcast %cst_25 : f32 to vector<8x8xf32>
    %67 = arith.mulf %65, %66 : vector<8x8xf32>
    %cst_26 = arith.constant dense<0xFF800000> : vector<8xf32>
    %68 = vector.multi_reduction <maximumf>, %67, %cst_26 [1] : vector<8x8xf32> to vector<8xf32>
    %69 = vector.shape_cast %68 : vector<8xf32> to vector<8x1xf32>
    %70 = vector.broadcast %69 : vector<8x1xf32> to vector<8x8xf32>
    %71 = arith.subf %67, %70 : vector<8x8xf32>
    %72 = math.exp %71 : vector<8x8xf32>
    %cst_27 = arith.constant dense<0.000000e+00> : vector<8xf32>
    %73 = vector.multi_reduction <add>, %72, %cst_27 [1] : vector<8x8xf32> to vector<8xf32>
    %74 = vector.shape_cast %73 : vector<8xf32> to vector<8x1xf32>
    %75 = tpu.reciprocal %74 {approx = true} : vector<8x1xf32> -> vector<8x1xf32>
    %76 = vector.broadcast %75 : vector<8x1xf32> to vector<8x8xf32>
    %77 = arith.mulf %72, %76 : vector<8x8xf32>
    %cst_28 = arith.constant dense<0.000000e+00> : vector<8x8xf32>
    %78 = tpu.matmul %77, %64, %cst_28 {dimension_numbers = #tpu.dot_dimension_numbers<[1], [0], [0], [1], [0, 0, 1, 1], [], []>} : vector<8x8xf32>, vector<8x8xf32>, vector<8x8xf32> -> vector<8x8xf32>
    %79 = vector.extract_strided_slice %20 {offsets = [16, 0], sizes = [8, 32], strides = [1, 1]} : vector<32x32xf32> to vector<8x32xf32>
    %cst_29 = arith.constant dense<0.000000e+00> : vector<8x32xf32>
    %80 = tpu.matmul %78, %79, %cst_29 {dimension_numbers = #tpu.dot_dimension_numbers<[1], [0], [0], [1], [0, 0, 1, 1], [], []>} : vector<8x8xf32>, vector<8x32xf32>, vector<8x32xf32> -> vector<8x32xf32>
    %81 = arith.addf %61, %80 : vector<8x32xf32>
    %82 = vector.extract_strided_slice %17 {offsets = [0, 24], sizes = [8, 8], strides = [1, 1]} : vector<8x32xf32> to vector<8x8xf32>
    %83 = vector.extract_strided_slice %18 {offsets = [0, 24], sizes = [8, 8], strides = [1, 1]} : vector<8x32xf32> to vector<8x8xf32>
    %84 = vector.extract_strided_slice %19 {offsets = [0, 24], sizes = [8, 8], strides = [1, 1]} : vector<8x32xf32> to vector<8x8xf32>
    %cst_30 = arith.constant dense<0.000000e+00> : vector<8x8xf32>
    %85 = tpu.matmul %82, %83, %cst_30 {dimension_numbers = #tpu.dot_dimension_numbers<[1], [1], [0], [0], [0, 0, 1, 0], [], []>} : vector<8x8xf32>, vector<8x8xf32>, vector<8x8xf32> -> vector<8x8xf32>
    %cst_31 = arith.constant 1.000000e+00 : f32
    %86 = vector.broadcast %cst_31 : f32 to vector<8x8xf32>
    %87 = arith.mulf %85, %86 : vector<8x8xf32>
    %cst_32 = arith.constant dense<0xFF800000> : vector<8xf32>
    %88 = vector.multi_reduction <maximumf>, %87, %cst_32 [1] : vector<8x8xf32> to vector<8xf32>
    %89 = vector.shape_cast %88 : vector<8xf32> to vector<8x1xf32>
    %90 = vector.broadcast %89 : vector<8x1xf32> to vector<8x8xf32>
    %91 = arith.subf %87, %90 : vector<8x8xf32>
    %92 = math.exp %91 : vector<8x8xf32>
    %cst_33 = arith.constant dense<0.000000e+00> : vector<8xf32>
    %93 = vector.multi_reduction <add>, %92, %cst_33 [1] : vector<8x8xf32> to vector<8xf32>
    %94 = vector.shape_cast %93 : vector<8xf32> to vector<8x1xf32>
    %95 = tpu.reciprocal %94 {approx = true} : vector<8x1xf32> -> vector<8x1xf32>
    %96 = vector.broadcast %95 : vector<8x1xf32> to vector<8x8xf32>
    %97 = arith.mulf %92, %96 : vector<8x8xf32>
    %cst_34 = arith.constant dense<0.000000e+00> : vector<8x8xf32>
    %98 = tpu.matmul %97, %84, %cst_34 {dimension_numbers = #tpu.dot_dimension_numbers<[1], [0], [0], [1], [0, 0, 1, 1], [], []>} : vector<8x8xf32>, vector<8x8xf32>, vector<8x8xf32> -> vector<8x8xf32>
    %99 = vector.extract_strided_slice %20 {offsets = [24, 0], sizes = [8, 32], strides = [1, 1]} : vector<32x32xf32> to vector<8x32xf32>
    %cst_35 = arith.constant dense<0.000000e+00> : vector<8x32xf32>
    %100 = tpu.matmul %98, %99, %cst_35 {dimension_numbers = #tpu.dot_dimension_numbers<[1], [0], [0], [1], [0, 0, 1, 1], [], []>} : vector<8x8xf32>, vector<8x32xf32>, vector<8x32xf32> -> vector<8x32xf32>
    %101 = arith.addf %81, %100 : vector<8x32xf32>
    %102 = arith.addf %1, %101 : vector<8x32xf32>
    %c0_36 = arith.constant 0 : index
    %c0_37 = arith.constant 0 : index
    %103 = vector.load %arg5[%c0_36, %c0_37] : memref<1x32xf32, #tpu.memory_space<vmem>>, vector<1x32xf32>
    %104 = arith.mulf %102, %102 : vector<8x32xf32>
    %cst_38 = arith.constant dense<0.000000e+00> : vector<8xf32>
    %105 = vector.multi_reduction <add>, %104, %cst_38 [1] : vector<8x32xf32> to vector<8xf32>
    %106 = vector.shape_cast %105 : vector<8xf32> to vector<8x1xf32>
    %cst_39 = arith.constant 3.200000e+01 : f32
    %107 = vector.broadcast %cst_39 : f32 to vector<8x1xf32>
    %108 = arith.divf %106, %107 : vector<8x1xf32>
    %cst_40 = arith.constant 9.99999997E-7 : f32
    %109 = vector.broadcast %cst_40 : f32 to vector<8x1xf32>
    %110 = arith.addf %108, %109 : vector<8x1xf32>
    %111 = math.rsqrt %110 : vector<8x1xf32>
    %112 = vector.broadcast %111 : vector<8x1xf32> to vector<8x32xf32>
    %113 = arith.mulf %102, %112 : vector<8x32xf32>
    %114 = vector.broadcast %103 : vector<1x32xf32> to vector<8x32xf32>
    %115 = arith.mulf %113, %114 : vector<8x32xf32>
    %c0_41 = arith.constant 0 : index
    %c0_42 = arith.constant 0 : index
    %116 = vector.load %arg6[%c0_41, %c0_42] : memref<32x64xf32, #tpu.memory_space<vmem>>, vector<32x64xf32>
    %cst_43 = arith.constant dense<0.000000e+00> : vector<8x64xf32>
    %117 = tpu.matmul %115, %116, %cst_43 {dimension_numbers = #tpu.dot_dimension_numbers<[1], [0], [0], [1], [0, 0, 1, 1], [], []>} : vector<8x32xf32>, vector<32x64xf32>, vector<8x64xf32> -> vector<8x64xf32>
    %cst_44 = arith.constant 5.000000e-01 : f32
    %118 = vector.broadcast %cst_44 : f32 to vector<8x64xf32>
    %119 = arith.mulf %118, %117 : vector<8x64xf32>
    %cst_45 = arith.constant 4.471500e-02 : f32
    %120 = vector.broadcast %cst_45 : f32 to vector<8x64xf32>
    %121 = arith.mulf %120, %117 : vector<8x64xf32>
    %122 = arith.mulf %121, %117 : vector<8x64xf32>
    %123 = arith.mulf %122, %117 : vector<8x64xf32>
    %124 = arith.addf %117, %123 : vector<8x64xf32>
    %cst_46 = arith.constant 0.797884583 : f32
    %125 = vector.broadcast %cst_46 : f32 to vector<8x64xf32>
    %126 = arith.mulf %125, %124 : vector<8x64xf32>
    %127 = math.tanh %126 : vector<8x64xf32>
    %cst_47 = arith.constant 1.000000e+00 : f32
    %128 = vector.broadcast %cst_47 : f32 to vector<8x64xf32>
    %129 = arith.addf %128, %127 : vector<8x64xf32>
    %130 = arith.mulf %119, %129 : vector<8x64xf32>
    %c0_48 = arith.constant 0 : index
    %c0_49 = arith.constant 0 : index
    %131 = vector.load %arg7[%c0_48, %c0_49] : memref<32x64xf32, #tpu.memory_space<vmem>>, vector<32x64xf32>
    %cst_50 = arith.constant dense<0.000000e+00> : vector<8x64xf32>
    %132 = tpu.matmul %115, %131, %cst_50 {dimension_numbers = #tpu.dot_dimension_numbers<[1], [0], [0], [1], [0, 0, 1, 1], [], []>} : vector<8x32xf32>, vector<32x64xf32>, vector<8x64xf32> -> vector<8x64xf32>
    %133 = arith.mulf %130, %132 : vector<8x64xf32>
    %c0_51 = arith.constant 0 : index
    %c0_52 = arith.constant 0 : index
    %134 = vector.load %arg8[%c0_51, %c0_52] : memref<64x32xf32, #tpu.memory_space<vmem>>, vector<64x32xf32>
    %cst_53 = arith.constant dense<0.000000e+00> : vector<8x32xf32>
    %135 = tpu.matmul %133, %134, %cst_53 {dimension_numbers = #tpu.dot_dimension_numbers<[1], [0], [0], [1], [0, 0, 1, 1], [], []>} : vector<8x64xf32>, vector<64x32xf32>, vector<8x32xf32> -> vector<8x32xf32>
    %136 = arith.addf %102, %135 : vector<8x32xf32>
    %c0_54 = arith.constant 0 : index
    %c0_55 = arith.constant 0 : index
    %c0_56 = arith.constant 0 : index
    %137 = vector.load %arg9[%c0_54, %c0_55, %c0_56] : memref<1x8x32xf32, #tpu.memory_space<vmem>>, vector<1x8x32xf32>
    %138 = vector.shape_cast %137 : vector<1x8x32xf32> to vector<8x32xf32>
    %139 = vector.shape_cast %136 : vector<8x32xf32> to vector<1x8x32xf32>
    tpu.vector_store %arg9[%c0_54, %c0_55, %c0_56], %139 {strides = array<i32>} : memref<1x8x32xf32, #tpu.memory_space<vmem>>, vector<1x8x32xf32>,
    return
  }
  func.func @transform_0(%arg0: i32) -> (i32, i32, i32) {
    %c0_i32 = arith.constant 0 : i32
    %c0_i32_0 = arith.constant 0 : i32
    %c0_i32_1 = arith.constant 0 : i32
    return %arg0, %c0_i32, %c0_i32_0 : i32, i32, i32
  }
  func.func @transform_1(%arg0: i32) -> (i32, i32) {
    %c0_i32 = arith.constant 0 : i32
    %c0_i32_0 = arith.constant 0 : i32
    %c0_i32_1 = arith.constant 0 : i32
    return %c0_i32, %c0_i32_0 : i32, i32
  }
  func.func @transform_2(%arg0: i32) -> (i32, i32) {
    %c0_i32 = arith.constant 0 : i32
    %c0_i32_0 = arith.constant 0 : i32
    %c0_i32_1 = arith.constant 0 : i32
    return %c0_i32, %c0_i32_0 : i32, i32
  }
  func.func @transform_3(%arg0: i32) -> (i32, i32) {
    %c0_i32 = arith.constant 0 : i32
    %c0_i32_0 = arith.constant 0 : i32
    %c0_i32_1 = arith.constant 0 : i32
    return %c0_i32, %c0_i32_0 : i32, i32
  }
  func.func @transform_4(%arg0: i32) -> (i32, i32) {
    %c0_i32 = arith.constant 0 : i32
    %c0_i32_0 = arith.constant 0 : i32
    %c0_i32_1 = arith.constant 0 : i32
    return %c0_i32, %c0_i32_0 : i32, i32
  }
  func.func @transform_5(%arg0: i32) -> (i32, i32) {
    %c0_i32 = arith.constant 0 : i32
    %c0_i32_0 = arith.constant 0 : i32
    %c0_i32_1 = arith.constant 0 : i32
    return %c0_i32, %c0_i32_0 : i32, i32
  }
  func.func @transform_6(%arg0: i32) -> (i32, i32) {
    %c0_i32 = arith.constant 0 : i32
    %c0_i32_0 = arith.constant 0 : i32
    %c0_i32_1 = arith.constant 0 : i32
    return %c0_i32, %c0_i32_0 : i32, i32
  }
  func.func @transform_7(%arg0: i32) -> (i32, i32) {
    %c0_i32 = arith.constant 0 : i32
    %c0_i32_0 = arith.constant 0 : i32
    %c0_i32_1 = arith.constant 0 : i32
    return %c0_i32, %c0_i32_0 : i32, i32
  }
  func.func @transform_8(%arg0: i32) -> (i32, i32, i32) {
    %c0_i32 = arith.constant 0 : i32
    %c0_i32_0 = arith.constant 0 : i32
    %c0_i32_1 = arith.constant 0 : i32
    return %arg0, %c0_i32, %c0_i32_0 : i32, i32, i32
  }
}

module attributes {stable_mosaic.version = 11 : i64} {
  func.func @_norm_kernel(%arg0: i32, %arg1: memref<16x32xf32, #tpu.memory_space<vmem>>, %arg2: memref<1x32xf32, #tpu.memory_space<vmem>>, %arg3: memref<1x32xf32, #tpu.memory_space<vmem>>, %arg4: memref<16x32xf32, #tpu.memory_space<vmem>>) attributes {dimension_semantics = [#tpu.dimension_semantics<arbitrary>], iteration_bounds = array<i64: 1>, scalar_prefetch = 0 : i64, scratch_operands = 0 : i64, tpu.core_type = #tpu.core_type<tc>, window_params = [{pipeline_mode = #tpu.pipeline_mode<synchronous>, transform_indices = @transform_0, window_bounds = array<i64: 16, 32>}, {pipeline_mode = #tpu.pipeline_mode<synchronous>, transform_indices = @transform_1, window_bounds = array<i64: 1, 32>}, {pipeline_mode = #tpu.pipeline_mode<synchronous>, transform_indices = @transform_2, window_bounds = array<i64: 1, 32>}, {pipeline_mode = #tpu.pipeline_mode<synchronous>, transform_indices = @transform_3, window_bounds = array<i64: 16, 32>}]} {
    %c0 = arith.constant 0 : index
    %c0_0 = arith.constant 0 : index
    %0 = vector.load %arg1[%c0, %c0_0] : memref<16x32xf32, #tpu.memory_space<vmem>>, vector<16x32xf32>
    %c0_1 = arith.constant 0 : index
    %c0_2 = arith.constant 0 : index
    %1 = vector.load %arg2[%c0_1, %c0_2] : memref<1x32xf32, #tpu.memory_space<vmem>>, vector<1x32xf32>
    %2 = arith.mulf %0, %0 : vector<16x32xf32>
    %cst = arith.constant dense<0.000000e+00> : vector<16xf32>
    %3 = vector.multi_reduction <add>, %2, %cst [1] : vector<16x32xf32> to vector<16xf32>
    %4 = vector.shape_cast %3 : vector<16xf32> to vector<16x1xf32>
    %cst_3 = arith.constant 3.200000e+01 : f32
    %5 = vector.broadcast %cst_3 : f32 to vector<16x1xf32>
    %6 = arith.divf %4, %5 : vector<16x1xf32>
    %cst_4 = arith.constant 9.99999997E-7 : f32
    %7 = vector.broadcast %cst_4 : f32 to vector<16x1xf32>
    %8 = arith.addf %6, %7 : vector<16x1xf32>
    %9 = math.rsqrt %8 : vector<16x1xf32>
    %10 = vector.broadcast %9 : vector<16x1xf32> to vector<16x32xf32>
    %11 = arith.mulf %0, %10 : vector<16x32xf32>
    %12 = vector.broadcast %1 : vector<1x32xf32> to vector<16x32xf32>
    %13 = arith.mulf %11, %12 : vector<16x32xf32>
    %c0_5 = arith.constant 0 : index
    %c0_6 = arith.constant 0 : index
    %14 = vector.load %arg3[%c0_5, %c0_6] : memref<1x32xf32, #tpu.memory_space<vmem>>, vector<1x32xf32>
    %15 = vector.broadcast %14 : vector<1x32xf32> to vector<16x32xf32>
    %16 = arith.addf %13, %15 : vector<16x32xf32>
    %c0_7 = arith.constant 0 : index
    %c0_8 = arith.constant 0 : index
    %17 = vector.load %arg4[%c0_7, %c0_8] : memref<16x32xf32, #tpu.memory_space<vmem>>, vector<16x32xf32>
    tpu.vector_store %arg4[%c0_7, %c0_8], %16 {strides = array<i32>} : memref<16x32xf32, #tpu.memory_space<vmem>>, vector<16x32xf32>,
    return
  }
  func.func @transform_0(%arg0: i32) -> (i32, i32) {
    %c0_i32 = arith.constant 0 : i32
    %c0_i32_0 = arith.constant 0 : i32
    %c0_i32_1 = arith.constant 0 : i32
    return %c0_i32, %c0_i32_0 : i32, i32
  }
  func.func @transform_1(%arg0: i32) -> (i32, i32) {
    %c0_i32 = arith.constant 0 : i32
    %c0_i32_0 = arith.constant 0 : i32
    %c0_i32_1 = arith.constant 0 : i32
    return %c0_i32, %c0_i32_0 : i32, i32
  }
  func.func @transform_2(%arg0: i32) -> (i32, i32) {
    %c0_i32 = arith.constant 0 : i32
    %c0_i32_0 = arith.constant 0 : i32
    %c0_i32_1 = arith.constant 0 : i32
    return %c0_i32, %c0_i32_0 : i32, i32
  }
  func.func @transform_3(%arg0: i32) -> (i32, i32) {
    %c0_i32 = arith.constant 0 : i32
    %c0_i32_0 = arith.constant 0 : i32
    %c0_i32_1 = arith.constant 0 : i32
    return %c0_i32, %c0_i32_0 : i32, i32
  }
}

module attributes {stable_mosaic.version = 11 : i64} {
  func.func @_norm_kernel(%arg0: i32, %arg1: memref<12x32xf32, #tpu.memory_space<vmem>>, %arg2: memref<1x32xf32, #tpu.memory_space<vmem>>, %arg3: memref<1x32xf32, #tpu.memory_space<vmem>>, %arg4: memref<12x32xf32, #tpu.memory_space<vmem>>) attributes {dimension_semantics = [#tpu.dimension_semantics<arbitrary>], iteration_bounds = array<i64: 1>, scalar_prefetch = 0 : i64, scratch_operands = 0 : i64, tpu.core_type = #tpu.core_type<tc>, window_params = [{pipeline_mode = #tpu.pipeline_mode<synchronous>, transform_indices = @transform_0, window_bounds = array<i64: 12, 32>}, {pipeline_mode = #tpu.pipeline_mode<synchronous>, transform_indices = @transform_1, window_bounds = array<i64: 1, 32>}, {pipeline_mode = #tpu.pipeline_mode<synchronous>, transform_indices = @transform_2, window_bounds = array<i64: 1, 32>}, {pipeline_mode = #tpu.pipeline_mode<synchronous>, transform_indices = @transform_3, window_bounds = array<i64: 12, 32>}]} {
    %c0 = arith.constant 0 : index
    %c0_0 = arith.constant 0 : index
    %0 = vector.load %arg1[%c0, %c0_0] : memref<12x32xf32, #tpu.memory_space<vmem>>, vector<12x32xf32>
    %c0_1 = arith.constant 0 : index
    %c0_2 = arith.constant 0 : index
    %1 = vector.load %arg2[%c0_1, %c0_2] : memref<1x32xf32, #tpu.memory_space<vmem>>, vector<1x32xf32>
    %2 = arith.mulf %0, %0 : vector<12x32xf32>
    %cst = arith.constant dense<0.000000e+00> : vector<12xf32>
    %3 = vector.multi_reduction <add>, %2, %cst [1] : vector<12x32xf32> to vector<12xf32>
    %4 = vector.shape_cast %3 : vector<12xf32> to vector<12x1xf32>
    %cst_3 = arith.constant 3.200000e+01 : f32
    %5 = vector.broadcast %cst_3 : f32 to vector<12x1xf32>
    %6 = arith.divf %4, %5 : vector<12x1xf32>
    %cst_4 = arith.constant 9.99999997E-7 : f32
    %7 = vector.broadcast %cst_4 : f32 to vector<12x1xf32>
    %8 = arith.addf %6, %7 : vector<12x1xf32>
    %9 = math.rsqrt %8 : vector<12x1xf32>
    %10 = vector.broadcast %9 : vector<12x1xf32> to vector<12x32xf32>
    %11 = arith.mulf %0, %10 : vector<12x32xf32>
    %12 = vector.broadcast %1 : vector<1x32xf32> to vector<12x32xf32>
    %13 = arith.mulf %11, %12 : vector<12x32xf32>
    %c0_5 = arith.constant 0 : index
    %c0_6 = arith.constant 0 : index
    %14 = vector.load %arg3[%c0_5, %c0_6] : memref<1x32xf32, #tpu.memory_space<vmem>>, vector<1x32xf32>
    %15 = vector.broadcast %14 : vector<1x32xf32> to vector<12x32xf32>
    %16 = arith.addf %13, %15 : vector<12x32xf32>
    %c0_7 = arith.constant 0 : index
    %c0_8 = arith.constant 0 : index
    %17 = vector.load %arg4[%c0_7, %c0_8] : memref<12x32xf32, #tpu.memory_space<vmem>>, vector<12x32xf32>
    tpu.vector_store %arg4[%c0_7, %c0_8], %16 {strides = array<i32>} : memref<12x32xf32, #tpu.memory_space<vmem>>, vector<12x32xf32>,
    return
  }
  func.func @transform_0(%arg0: i32) -> (i32, i32) {
    %c0_i32 = arith.constant 0 : i32
    %c0_i32_0 = arith.constant 0 : i32
    %c0_i32_1 = arith.constant 0 : i32
    return %c0_i32, %c0_i32_0 : i32, i32
  }
  func.func @transform_1(%arg0: i32) -> (i32, i32) {
    %c0_i32 = arith.constant 0 : i32
    %c0_i32_0 = arith.constant 0 : i32
    %c0_i32_1 = arith.constant 0 : i32
    return %c0_i32, %c0_i32_0 : i32, i32
  }
  func.func @transform_2(%arg0: i32) -> (i32, i32) {
    %c0_i32 = arith.constant 0 : i32
    %c0_i32_0 = arith.constant 0 : i32
    %c0_i32_1 = arith.constant 0 : i32
    return %c0_i32, %c0_i32_0 : i32, i32
  }
  func.func @transform_3(%arg0: i32) -> (i32, i32) {
    %c0_i32 = arith.constant 0 : i32
    %c0_i32_0 = arith.constant 0 : i32
    %c0_i32_1 = arith.constant 0 : i32
    return %c0_i32, %c0_i32_0 : i32, i32
  }
}

module attributes {stable_mosaic.version = 11 : i64} {
  func.func @_lmhead_xent_kernel(%arg0: i32, %arg1: memref<12x32xf32, #tpu.memory_space<vmem>>, %arg2: memref<32x128xf32, #tpu.memory_space<vmem>>, %arg3: memref<12x1xi32, #tpu.memory_space<vmem>>, %arg4: memref<1x1xf32, #tpu.memory_space<vmem>>) attributes {dimension_semantics = [#tpu.dimension_semantics<arbitrary>], iteration_bounds = array<i64: 1>, scalar_prefetch = 0 : i64, scratch_operands = 0 : i64, tpu.core_type = #tpu.core_type<tc>, window_params = [{pipeline_mode = #tpu.pipeline_mode<synchronous>, transform_indices = @transform_0, window_bounds = array<i64: 12, 32>}, {pipeline_mode = #tpu.pipeline_mode<synchronous>, transform_indices = @transform_1, window_bounds = array<i64: 32, 128>}, {pipeline_mode = #tpu.pipeline_mode<synchronous>, transform_indices = @transform_2, window_bounds = array<i64: 12, 1>}, {pipeline_mode = #tpu.pipeline_mode<synchronous>, transform_indices = @transform_3, window_bounds = array<i64: 1, 1>}]} {
    %c0 = arith.constant 0 : index
    %c0_0 = arith.constant 0 : index
    %0 = vector.load %arg1[%c0, %c0_0] : memref<12x32xf32, #tpu.memory_space<vmem>>, vector<12x32xf32>
    %c0_1 = arith.constant 0 : index
    %c0_2 = arith.constant 0 : index
    %1 = vector.load %arg2[%c0_1, %c0_2] : memref<32x128xf32, #tpu.memory_space<vmem>>, vector<32x128xf32>
    %cst = arith.constant dense<0.000000e+00> : vector<12x128xf32>
    %2 = tpu.matmul %0, %1, %cst {dimension_numbers = #tpu.dot_dimension_numbers<[1], [0], [0], [1], [0, 0, 1, 1], [], []>} : vector<12x32xf32>, vector<32x128xf32>, vector<12x128xf32> -> vector<12x128xf32>
    %c0_3 = arith.constant 0 : index
    %c0_4 = arith.constant 0 : index
    %3 = vector.load %arg3[%c0_3, %c0_4] : memref<12x1xi32, #tpu.memory_space<vmem>>, vector<12x1xi32>
    %cst_5 = arith.constant dense<0xFF800000> : vector<12xf32>
    %4 = vector.multi_reduction <maximumf>, %2, %cst_5 [1] : vector<12x128xf32> to vector<12xf32>
    %5 = vector.shape_cast %4 : vector<12xf32> to vector<12x1xf32>
    %6 = vector.broadcast %5 : vector<12x1xf32> to vector<12x128xf32>
    %7 = arith.subf %2, %6 : vector<12x128xf32>
    %8 = math.exp %7 : vector<12x128xf32>
    %cst_6 = arith.constant dense<0.000000e+00> : vector<12xf32>
    %9 = vector.multi_reduction <add>, %8, %cst_6 [1] : vector<12x128xf32> to vector<12xf32>
    %10 = vector.shape_cast %9 : vector<12xf32> to vector<12x1xf32>
    %11 = math.log %10 : vector<12x1xf32>
    %12 = arith.addf %11, %5 : vector<12x1xf32>
    %13 = tpu.iota {dimensions = array<i32: 1>} : vector<12x128xi32>
    %14 = vector.broadcast %3 : vector<12x1xi32> to vector<12x128xi32>
    %15 = arith.cmpi eq, %13, %14 : vector<12x128xi32>
    %cst_7 = arith.constant 0.000000e+00 : f32
    %16 = vector.broadcast %cst_7 : f32 to vector<12x128xf32>
    %17 = arith.select %15, %2, %16 : vector<12x128xi1>, vector<12x128xf32>
    %cst_8 = arith.constant dense<0.000000e+00> : vector<12xf32>
    %18 = vector.multi_reduction <add>, %17, %cst_8 [1] : vector<12x128xf32> to vector<12xf32>
    %19 = vector.shape_cast %18 : vector<12xf32> to vector<12x1xf32>
    %c-100_i32 = arith.constant -100 : i32
    %20 = vector.broadcast %c-100_i32 : i32 to vector<12x1xi32>
    %21 = arith.cmpi ne, %3, %20 : vector<12x1xi32>
    %22 = arith.extui %21 : vector<12x1xi1> to vector<12x1xi32>
    %23 = arith.sitofp %22 : vector<12x1xi32> to vector<12x1xf32>
    %24 = arith.subf %12, %19 : vector<12x1xf32>
    %25 = arith.mulf %24, %23 : vector<12x1xf32>
    %26 = vector.shape_cast %25 : vector<12x1xf32> to vector<1x12x1xf32>
    %cst_9 = arith.constant dense<0.000000e+00> : vector<1xf32>
    %27 = vector.multi_reduction <add>, %26, %cst_9 [1, 2] : vector<1x12x1xf32> to vector<1xf32>
    %28 = vector.shape_cast %27 : vector<1xf32> to vector<1x1x1xf32>
    %29 = vector.extract %28[0, 0, 0] : f32 from vector<1x1x1xf32>
    %30 = vector.broadcast %29 : f32 to vector<1x1xf32>
    %31 = vector.shape_cast %23 : vector<12x1xf32> to vector<1x12x1xf32>
    %cst_10 = arith.constant dense<0.000000e+00> : vector<1xf32>
    %32 = vector.multi_reduction <add>, %31, %cst_10 [1, 2] : vector<1x12x1xf32> to vector<1xf32>
    %33 = vector.shape_cast %32 : vector<1xf32> to vector<1x1x1xf32>
    %34 = vector.extract %33[0, 0, 0] : f32 from vector<1x1x1xf32>
    %35 = vector.broadcast %34 : f32 to vector<1x1xf32>
    %cst_11 = arith.constant 1.000000e+00 : f32
    %36 = vector.broadcast %cst_11 : f32 to vector<1x1xf32>
    %37 = arith.maximumf %35, %36 : vector<1x1xf32>
    %38 = arith.divf %30, %37 : vector<1x1xf32>
    %c0_12 = arith.constant 0 : index
    %c0_13 = arith.constant 0 : index
    %39 = vector.load %arg4[%c0_12, %c0_13] : memref<1x1xf32, #tpu.memory_space<vmem>>, vector<1x1xf32>
    tpu.vector_store %arg4[%c0_12, %c0_13], %38 {strides = array<i32>} : memref<1x1xf32, #tpu.memory_space<vmem>>, vector<1x1xf32>,
    return
  }
  func.func @transform_0(%arg0: i32) -> (i32, i32) {
    %c0_i32 = arith.constant 0 : i32
    %c0_i32_0 = arith.constant 0 : i32
    %c0_i32_1 = arith.constant 0 : i32
    return %c0_i32, %c0_i32_0 : i32, i32
  }
  func.func @transform_1(%arg0: i32) -> (i32, i32) {
    %c0_i32 = arith.constant 0 : i32
    %c0_i32_0 = arith.constant 0 : i32
    %c0_i32_1 = arith.constant 0 : i32
    return %c0_i32, %c0_i32_0 : i32, i32
  }
  func.func @transform_2(%arg0: i32) -> (i32, i32) {
    %c0_i32 = arith.constant 0 : i32
    %c0_i32_0 = arith.constant 0 : i32
    %c0_i32_1 = arith.constant 0 : i32
    return %c0_i32, %c0_i32_0 : i32, i32
  }
  func.func @transform_3(%arg0: i32) -> (i32, i32) {
    %c0_i32 = arith.constant 0 : i32
    %c0_i32_0 = arith.constant 0 : i32
    %c0_i32_1 = arith.constant 0 : i32
    return %c0_i32, %c0_i32_0 : i32, i32
  }
}

module attributes {stable_mosaic.version = 11 : i64} {
  func.func @_t5_dec_layer_kernel(%arg0: i32, %arg1: memref<1x6x32xf32, #tpu.memory_space<vmem>>, %arg2: memref<1x8x32xf32, #tpu.memory_space<vmem>>, %arg3: memref<1x32xf32, #tpu.memory_space<vmem>>, %arg4: memref<32x96xf32, #tpu.memory_space<vmem>>, %arg5: memref<32x32xf32, #tpu.memory_space<vmem>>, %arg6: memref<1x32xf32, #tpu.memory_space<vmem>>, %arg7: memref<32x32xf32, #tpu.memory_space<vmem>>, %arg8: memref<32x64xf32, #tpu.memory_space<vmem>>, %arg9: memref<32x32xf32, #tpu.memory_space<vmem>>, %arg10: memref<1x32xf32, #tpu.memory_space<vmem>>, %arg11: memref<32x64xf32, #tpu.memory_space<vmem>>, %arg12: memref<32x64xf32, #tpu.memory_space<vmem>>, %arg13: memref<64x32xf32, #tpu.memory_space<vmem>>, %arg14: memref<1x6x32xf32, #tpu.memory_space<vmem>>) attributes {dimension_semantics = [#tpu.dimension_semantics<parallel>], iteration_bounds = array<i64: 2>, scalar_prefetch = 0 : i64, scratch_operands = 0 : i64, tpu.core_type = #tpu.core_type<tc>, window_params = [{transform_indices = @transform_0, window_bounds = array<i64: 1, 6, 32>}, {transform_indices = @transform_1, window_bounds = array<i64: 1, 8, 32>}, {pipeline_mode = #tpu.pipeline_mode<synchronous>, transform_indices = @transform_2, window_bounds = array<i64: 1, 32>}, {pipeline_mode = #tpu.pipeline_mode<synchronous>, transform_indices = @transform_3, window_bounds = array<i64: 32, 96>}, {pipeline_mode = #tpu.pipeline_mode<synchronous>, transform_indices = @transform_4, window_bounds = array<i64: 32, 32>}, {pipeline_mode = #tpu.pipeline_mode<synchronous>, transform_indices = @transform_5, window_bounds = array<i64: 1, 32>}, {pipeline_mode = #tpu.pipeline_mode<synchronous>, transform_indices = @transform_6, window_bounds = array<i64: 32, 32>}, {pipeline_mode = #tpu.pipeline_mode<synchronous>, transform_indices = @transform_7, window_bounds = array<i64: 32, 64>}, {pipeline_mode = #tpu.pipeline_mode<synchronous>, transform_indices = @transform_8, window_bounds = array<i64: 32, 32>}, {pipeline_mode = #tpu.pipeline_mode<synchronous>, transform_indices = @transform_9, window_bounds = array<i64: 1, 32>}, {pipeline_mode = #tpu.pipeline_mode<synchronous>, transform_indices = @transform_10, window_bounds = array<i64: 32, 64>}, {pipeline_mode = #tpu.pipeline_mode<synchronous>, transform_indices = @transform_11, window_bounds = array<i64: 32, 64>}, {pipeline_mode = #tpu.pipeline_mode<synchronous>, transform_indices = @transform_12, window_bounds = array<i64: 64, 32>}, {transform_indices = @transform_13, window_bounds = array<i64: 1, 6, 32>}]} {
    %c0 = arith.constant 0 : index
    %c0_0 = arith.constant 0 : index
    %c0_1 = arith.constant 0 : index
    %0 = vector.load %arg1[%c0, %c0_0, %c0_1] : memref<1x6x32xf32, #tpu.memory_space<vmem>>, vector<1x6x32xf32>
    %1 = vector.shape_cast %0 : vector<1x6x32xf32> to vector<6x32xf32>
    %c0_2 = arith.constant 0 : index
    %c0_3 = arith.constant 0 : index
    %c0_4 = arith.constant 0 : index
    %2 = vector.load %arg2[%c0_2, %c0_3, %c0_4] : memref<1x8x32xf32, #tpu.memory_space<vmem>>, vector<1x8x32xf32>
    %3 = vector.shape_cast %2 : vector<1x8x32xf32> to vector<8x32xf32>
    %c0_5 = arith.constant 0 : index
    %c0_6 = arith.constant 0 : index
    %4 = vector.load %arg3[%c0_5, %c0_6] : memref<1x32xf32, #tpu.memory_space<vmem>>, vector<1x32xf32>
    %5 = arith.mulf %1, %1 : vector<6x32xf32>
    %cst = arith.constant dense<0.000000e+00> : vector<6xf32>
    %6 = vector.multi_reduction <add>, %5, %cst [1] : vector<6x32xf32> to vector<6xf32>
    %7 = vector.shape_cast %6 : vector<6xf32> to vector<6x1xf32>
    %cst_7 = arith.constant 3.200000e+01 : f32
    %8 = vector.broadcast %cst_7 : f32 to vector<6x1xf32>
    %9 = arith.divf %7, %8 : vector<6x1xf32>
    %cst_8 = arith.constant 9.99999997E-7 : f32
    %10 = vector.broadcast %cst_8 : f32 to vector<6x1xf32>
    %11 = arith.addf %9, %10 : vector<6x1xf32>
    %12 = math.rsqrt %11 : vector<6x1xf32>
    %13 = vector.broadcast %12 : vector<6x1xf32> to vector<6x32xf32>
    %14 = arith.mulf %1, %13 : vector<6x32xf32>
    %15 = vector.broadcast %4 : vector<1x32xf32> to vector<6x32xf32>
    %16 = arith.mulf %14, %15 : vector<6x32xf32>
    %c0_9 = arith.constant 0 : index
    %c0_10 = arith.constant 0 : index
    %17 = vector.load %arg4[%c0_9, %c0_10] : memref<32x96xf32, #tpu.memory_space<vmem>>, vector<32x96xf32>
    %cst_11 = arith.constant dense<0.000000e+00> : vector<6x96xf32>
    %18 = tpu.matmul %16, %17, %cst_11 {dimension_numbers = #tpu.dot_dimension_numbers<[1], [0], [0], [1], [0, 0, 1, 1], [], []>} : vector<6x32xf32>, vector<32x96xf32>, vector<6x96xf32> -> vector<6x96xf32>
    %19 = vector.extract_strided_slice %18 {offsets = [0, 0], sizes = [6, 32], strides = [1, 1]} : vector<6x96xf32> to vector<6x32xf32>
    %20 = vector.extract_strided_slice %18 {offsets = [0, 32], sizes = [6, 32], strides = [1, 1]} : vector<6x96xf32> to vector<6x32xf32>
    %21 = vector.extract_strided_slice %18 {offsets = [0, 64], sizes = [6, 32], strides = [1, 1]} : vector<6x96xf32> to vector<6x32xf32>
    %c0_12 = arith.constant 0 : index
    %c0_13 = arith.constant 0 : index
    %22 = vector.load %arg5[%c0_12, %c0_13] : memref<32x32xf32, #tpu.memory_space<vmem>>, vector<32x32xf32>
    %23 = tpu.iota {dimensions = array<i32: 0>} : vector<6x6xi32>
    %24 = tpu.iota {dimensions = array<i32: 1>} : vector<6x6xi32>
    %25 = arith.cmpi sle, %24, %23 : vector<6x6xi32>
    %cst_14 = arith.constant 0.000000e+00 : f32
    %26 = vector.broadcast %cst_14 : f32 to vector<6x32xf32>
    %27 = vector.extract_strided_slice %19 {offsets = [0, 0], sizes = [6, 8], strides = [1, 1]} : vector<6x32xf32> to vector<6x8xf32>
    %28 = vector.extract_strided_slice %20 {offsets = [0, 0], sizes = [6, 8], strides = [1, 1]} : vector<6x32xf32> to vector<6x8xf32>
    %29 = vector.extract_strided_slice %21 {offsets = [0, 0], sizes = [6, 8], strides = [1, 1]} : vector<6x32xf32> to vector<6x8xf32>
    %cst_15 = arith.constant dense<0.000000e+00> : vector<6x6xf32>
    %30 = tpu.matmul %27, %28, %cst_15 {dimension_numbers = #tpu.dot_dimension_numbers<[1], [1], [0], [0], [0, 0, 1, 0], [], []>} : vector<6x8xf32>, vector<6x8xf32>, vector<6x6xf32> -> vector<6x6xf32>
    %cst_16 = arith.constant 1.000000e+00 : f32
    %31 = vector.broadcast %cst_16 : f32 to vector<6x6xf32>
    %32 = arith.mulf %30, %31 : vector<6x6xf32>
    %cst_17 = arith.constant -1.000000e+30 : f32
    %33 = vector.broadcast %cst_17 : f32 to vector<6x6xf32>
    %34 = arith.select %25, %32, %33 : vector<6x6xi1>, vector<6x6xf32>
    %cst_18 = arith.constant dense<0xFF800000> : vector<6xf32>
    %35 = vector.multi_reduction <maximumf>, %34, %cst_18 [1] : vector<6x6xf32> to vector<6xf32>
    %36 = vector.shape_cast %35 : vector<6xf32> to vector<6x1xf32>
    %37 = vector.broadcast %36 : vector<6x1xf32> to vector<6x6xf32>
    %38 = arith.subf %34, %37 : vector<6x6xf32>
    %39 = math.exp %38 : vector<6x6xf32>
    %cst_19 = arith.constant dense<0.000000e+00> : vector<6xf32>
    %40 = vector.multi_reduction <add>, %39, %cst_19 [1] : vector<6x6xf32> to vector<6xf32>
    %41 = vector.shape_cast %40 : vector<6xf32> to vector<6x1xf32>
    %42 = tpu.reciprocal %41 {approx = true} : vector<6x1xf32> -> vector<6x1xf32>
    %43 = vector.broadcast %42 : vector<6x1xf32> to vector<6x6xf32>
    %44 = arith.mulf %39, %43 : vector<6x6xf32>
    %cst_20 = arith.constant dense<0.000000e+00> : vector<6x8xf32>
    %45 = tpu.matmul %44, %29, %cst_20 {dimension_numbers = #tpu.dot_dimension_numbers<[1], [0], [0], [1], [0, 0, 1, 1], [], []>} : vector<6x6xf32>, vector<6x8xf32>, vector<6x8xf32> -> vector<6x8xf32>
    %46 = vector.extract_strided_slice %22 {offsets = [0, 0], sizes = [8, 32], strides = [1, 1]} : vector<32x32xf32> to vector<8x32xf32>
    %cst_21 = arith.constant dense<0.000000e+00> : vector<6x32xf32>
    %47 = tpu.matmul %45, %46, %cst_21 {dimension_numbers = #tpu.dot_dimension_numbers<[1], [0], [0], [1], [0, 0, 1, 1], [], []>} : vector<6x8xf32>, vector<8x32xf32>, vector<6x32xf32> -> vector<6x32xf32>
    %48 = arith.addf %26, %47 : vector<6x32xf32>
    %49 = vector.extract_strided_slice %19 {offsets = [0, 8], sizes = [6, 8], strides = [1, 1]} : vector<6x32xf32> to vector<6x8xf32>
    %50 = vector.extract_strided_slice %20 {offsets = [0, 8], sizes = [6, 8], strides = [1, 1]} : vector<6x32xf32> to vector<6x8xf32>
    %51 = vector.extract_strided_slice %21 {offsets = [0, 8], sizes = [6, 8], strides = [1, 1]} : vector<6x32xf32> to vector<6x8xf32>
    %cst_22 = arith.constant dense<0.000000e+00> : vector<6x6xf32>
    %52 = tpu.matmul %49, %50, %cst_22 {dimension_numbers = #tpu.dot_dimension_numbers<[1], [1], [0], [0], [0, 0, 1, 0], [], []>} : vector<6x8xf32>, vector<6x8xf32>, vector<6x6xf32> -> vector<6x6xf32>
    %cst_23 = arith.constant 1.000000e+00 : f32
    %53 = vector.broadcast %cst_23 : f32 to vector<6x6xf32>
    %54 = arith.mulf %52, %53 : vector<6x6xf32>
    %cst_24 = arith.constant -1.000000e+30 : f32
    %55 = vector.broadcast %cst_24 : f32 to vector<6x6xf32>
    %56 = arith.select %25, %54, %55 : vector<6x6xi1>, vector<6x6xf32>
    %cst_25 = arith.constant dense<0xFF800000> : vector<6xf32>
    %57 = vector.multi_reduction <maximumf>, %56, %cst_25 [1] : vector<6x6xf32> to vector<6xf32>
    %58 = vector.shape_cast %57 : vector<6xf32> to vector<6x1xf32>
    %59 = vector.broadcast %58 : vector<6x1xf32> to vector<6x6xf32>
    %60 = arith.subf %56, %59 : vector<6x6xf32>
    %61 = math.exp %60 : vector<6x6xf32>
    %cst_26 = arith.constant dense<0.000000e+00> : vector<6xf32>
    %62 = vector.multi_reduction <add>, %61, %cst_26 [1] : vector<6x6xf32> to vector<6xf32>
    %63 = vector.shape_cast %62 : vector<6xf32> to vector<6x1xf32>
    %64 = tpu.reciprocal %63 {approx = true} : vector<6x1xf32> -> vector<6x1xf32>
    %65 = vector.broadcast %64 : vector<6x1xf32> to vector<6x6xf32>
    %66 = arith.mulf %61, %65 : vector<6x6xf32>
    %cst_27 = arith.constant dense<0.000000e+00> : vector<6x8xf32>
    %67 = tpu.matmul %66, %51, %cst_27 {dimension_numbers = #tpu.dot_dimension_numbers<[1], [0], [0], [1], [0, 0, 1, 1], [], []>} : vector<6x6xf32>, vector<6x8xf32>, vector<6x8xf32> -> vector<6x8xf32>
    %68 = vector.extract_strided_slice %22 {offsets = [8, 0], sizes = [8, 32], strides = [1, 1]} : vector<32x32xf32> to vector<8x32xf32>
    %cst_28 = arith.constant dense<0.000000e+00> : vector<6x32xf32>
    %69 = tpu.matmul %67, %68, %cst_28 {dimension_numbers = #tpu.dot_dimension_numbers<[1], [0], [0], [1], [0, 0, 1, 1], [], []>} : vector<6x8xf32>, vector<8x32xf32>, vector<6x32xf32> -> vector<6x32xf32>
    %70 = arith.addf %48, %69 : vector<6x32xf32>
    %71 = vector.extract_strided_slice %19 {offsets = [0, 16], sizes = [6, 8], strides = [1, 1]} : vector<6x32xf32> to vector<6x8xf32>
    %72 = vector.extract_strided_slice %20 {offsets = [0, 16], sizes = [6, 8], strides = [1, 1]} : vector<6x32xf32> to vector<6x8xf32>
    %73 = vector.extract_strided_slice %21 {offsets = [0, 16], sizes = [6, 8], strides = [1, 1]} : vector<6x32xf32> to vector<6x8xf32>
    %cst_29 = arith.constant dense<0.000000e+00> : vector<6x6xf32>
    %74 = tpu.matmul %71, %72, %cst_29 {dimension_numbers = #tpu.dot_dimension_numbers<[1], [1], [0], [0], [0, 0, 1, 0], [], []>} : vector<6x8xf32>, vector<6x8xf32>, vector<6x6xf32> -> vector<6x6xf32>
    %cst_30 = arith.constant 1.000000e+00 : f32
    %75 = vector.broadcast %cst_30 : f32 to vector<6x6xf32>
    %76 = arith.mulf %74, %75 : vector<6x6xf32>
    %cst_31 = arith.constant -1.000000e+30 : f32
    %77 = vector.broadcast %cst_31 : f32 to vector<6x6xf32>
    %78 = arith.select %25, %76, %77 : vector<6x6xi1>, vector<6x6xf32>
    %cst_32 = arith.constant dense<0xFF800000> : vector<6xf32>
    %79 = vector.multi_reduction <maximumf>, %78, %cst_32 [1] : vector<6x6xf32> to vector<6xf32>
    %80 = vector.shape_cast %79 : vector<6xf32> to vector<6x1xf32>
    %81 = vector.broadcast %80 : vector<6x1xf32> to vector<6x6xf32>
    %82 = arith.subf %78, %81 : vector<6x6xf32>
    %83 = math.exp %82 : vector<6x6xf32>
    %cst_33 = arith.constant dense<0.000000e+00> : vector<6xf32>
    %84 = vector.multi_reduction <add>, %83, %cst_33 [1] : vector<6x6xf32> to vector<6xf32>
    %85 = vector.shape_cast %84 : vector<6xf32> to vector<6x1xf32>
    %86 = tpu.reciprocal %85 {approx = true} : vector<6x1xf32> -> vector<6x1xf32>
    %87 = vector.broadcast %86 : vector<6x1xf32> to vector<6x6xf32>
    %88 = arith.mulf %83, %87 : vector<6x6xf32>
    %cst_34 = arith.constant dense<0.000000e+00> : vector<6x8xf32>
    %89 = tpu.matmul %88, %73, %cst_34 {dimension_numbers = #tpu.dot_dimension_numbers<[1], [0], [0], [1], [0, 0, 1, 1], [], []>} : vector<6x6xf32>, vector<6x8xf32>, vector<6x8xf32> -> vector<6x8xf32>
    %90 = vector.extract_strided_slice %22 {offsets = [16, 0], sizes = [8, 32], strides = [1, 1]} : vector<32x32xf32> to vector<8x32xf32>
    %cst_35 = arith.constant dense<0.000000e+00> : vector<6x32xf32>
    %91 = tpu.matmul %89, %90, %cst_35 {dimension_numbers = #tpu.dot_dimension_numbers<[1], [0], [0], [1], [0, 0, 1, 1], [], []>} : vector<6x8xf32>, vector<8x32xf32>, vector<6x32xf32> -> vector<6x32xf32>
    %92 = arith.addf %70, %91 : vector<6x32xf32>
    %93 = vector.extract_strided_slice %19 {offsets = [0, 24], sizes = [6, 8], strides = [1, 1]} : vector<6x32xf32> to vector<6x8xf32>
    %94 = vector.extract_strided_slice %20 {offsets = [0, 24], sizes = [6, 8], strides = [1, 1]} : vector<6x32xf32> to vector<6x8xf32>
    %95 = vector.extract_strided_slice %21 {offsets = [0, 24], sizes = [6, 8], strides = [1, 1]} : vector<6x32xf32> to vector<6x8xf32>
    %cst_36 = arith.constant dense<0.000000e+00> : vector<6x6xf32>
    %96 = tpu.matmul %93, %94, %cst_36 {dimension_numbers = #tpu.dot_dimension_numbers<[1], [1], [0], [0], [0, 0, 1, 0], [], []>} : vector<6x8xf32>, vector<6x8xf32>, vector<6x6xf32> -> vector<6x6xf32>
    %cst_37 = arith.constant 1.000000e+00 : f32
    %97 = vector.broadcast %cst_37 : f32 to vector<6x6xf32>
    %98 = arith.mulf %96, %97 : vector<6x6xf32>
    %cst_38 = arith.constant -1.000000e+30 : f32
    %99 = vector.broadcast %cst_38 : f32 to vector<6x6xf32>
    %100 = arith.select %25, %98, %99 : vector<6x6xi1>, vector<6x6xf32>
    %cst_39 = arith.constant dense<0xFF800000> : vector<6xf32>
    %101 = vector.multi_reduction <maximumf>, %100, %cst_39 [1] : vector<6x6xf32> to vector<6xf32>
    %102 = vector.shape_cast %101 : vector<6xf32> to vector<6x1xf32>
    %103 = vector.broadcast %102 : vector<6x1xf32> to vector<6x6xf32>
    %104 = arith.subf %100, %103 : vector<6x6xf32>
    %105 = math.exp %104 : vector<6x6xf32>
    %cst_40 = arith.constant dense<0.000000e+00> : vector<6xf32>
    %106 = vector.multi_reduction <add>, %105, %cst_40 [1] : vector<6x6xf32> to vector<6xf32>
    %107 = vector.shape_cast %106 : vector<6xf32> to vector<6x1xf32>
    %108 = tpu.reciprocal %107 {approx = true} : vector<6x1xf32> -> vector<6x1xf32>
    %109 = vector.broadcast %108 : vector<6x1xf32> to vector<6x6xf32>
    %110 = arith.mulf %105, %109 : vector<6x6xf32>
    %cst_41 = arith.constant dense<0.000000e+00> : vector<6x8xf32>
    %111 = tpu.matmul %110, %95, %cst_41 {dimension_numbers = #tpu.dot_dimension_numbers<[1], [0], [0], [1], [0, 0, 1, 1], [], []>} : vector<6x6xf32>, vector<6x8xf32>, vector<6x8xf32> -> vector<6x8xf32>
    %112 = vector.extract_strided_slice %22 {offsets = [24, 0], sizes = [8, 32], strides = [1, 1]} : vector<32x32xf32> to vector<8x32xf32>
    %cst_42 = arith.constant dense<0.000000e+00> : vector<6x32xf32>
    %113 = tpu.matmul %111, %112, %cst_42 {dimension_numbers = #tpu.dot_dimension_numbers<[1], [0], [0], [1], [0, 0, 1, 1], [], []>} : vector<6x8xf32>, vector<8x32xf32>, vector<6x32xf32> -> vector<6x32xf32>
    %114 = arith.addf %92, %113 : vector<6x32xf32>
    %115 = arith.addf %1, %114 : vector<6x32xf32>
    %c0_43 = arith.constant 0 : index
    %c0_44 = arith.constant 0 : index
    %116 = vector.load %arg6[%c0_43, %c0_44] : memref<1x32xf32, #tpu.memory_space<vmem>>, vector<1x32xf32>
    %117 = arith.mulf %115, %115 : vector<6x32xf32>
    %cst_45 = arith.constant dense<0.000000e+00> : vector<6xf32>
    %118 = vector.multi_reduction <add>, %117, %cst_45 [1] : vector<6x32xf32> to vector<6xf32>
    %119 = vector.shape_cast %118 : vector<6xf32> to vector<6x1xf32>
    %cst_46 = arith.constant 3.200000e+01 : f32
    %120 = vector.broadcast %cst_46 : f32 to vector<6x1xf32>
    %121 = arith.divf %119, %120 : vector<6x1xf32>
    %cst_47 = arith.constant 9.99999997E-7 : f32
    %122 = vector.broadcast %cst_47 : f32 to vector<6x1xf32>
    %123 = arith.addf %121, %122 : vector<6x1xf32>
    %124 = math.rsqrt %123 : vector<6x1xf32>
    %125 = vector.broadcast %124 : vector<6x1xf32> to vector<6x32xf32>
    %126 = arith.mulf %115, %125 : vector<6x32xf32>
    %127 = vector.broadcast %116 : vector<1x32xf32> to vector<6x32xf32>
    %128 = arith.mulf %126, %127 : vector<6x32xf32>
    %c0_48 = arith.constant 0 : index
    %c0_49 = arith.constant 0 : index
    %129 = vector.load %arg7[%c0_48, %c0_49] : memref<32x32xf32, #tpu.memory_space<vmem>>, vector<32x32xf32>
    %cst_50 = arith.constant dense<0.000000e+00> : vector<6x32xf32>
    %130 = tpu.matmul %128, %129, %cst_50 {dimension_numbers = #tpu.dot_dimension_numbers<[1], [0], [0], [1], [0, 0, 1, 1], [], []>} : vector<6x32xf32>, vector<32x32xf32>, vector<6x32xf32> -> vector<6x32xf32>
    %c0_51 = arith.constant 0 : index
    %c0_52 = arith.constant 0 : index
    %131 = vector.load %arg8[%c0_51, %c0_52] : memref<32x64xf32, #tpu.memory_space<vmem>>, vector<32x64xf32>
    %cst_53 = arith.constant dense<0.000000e+00> : vector<8x64xf32>
    %132 = tpu.matmul %3, %131, %cst_53 {dimension_numbers = #tpu.dot_dimension_numbers<[1], [0], [0], [1], [0, 0, 1, 1], [], []>} : vector<8x32xf32>, vector<32x64xf32>, vector<8x64xf32> -> vector<8x64xf32>
    %133 = vector.extract_strided_slice %132 {offsets = [0, 0], sizes = [8, 32], strides = [1, 1]} : vector<8x64xf32> to vector<8x32xf32>
    %134 = vector.extract_strided_slice %132 {offsets = [0, 32], sizes = [8, 32], strides = [1, 1]} : vector<8x64xf32> to vector<8x32xf32>
    %c0_54 = arith.constant 0 : index
    %c0_55 = arith.constant 0 : index
    %135 = vector.load %arg9[%c0_54, %c0_55] : memref<32x32xf32, #tpu.memory_space<vmem>>, vector<32x32xf32>
    %cst_56 = arith.constant 0.000000e+00 : f32
    %136 = vector.broadcast %cst_56 : f32 to vector<6x32xf32>
    %137 = vector.extract_strided_slice %130 {offsets = [0, 0], sizes = [6, 8], strides = [1, 1]} : vector<6x32xf32> to vector<6x8xf32>
    %138 = vector.extract_strided_slice %133 {offsets = [0, 0], sizes = [8, 8], strides = [1, 1]} : vector<8x32xf32> to vector<8x8xf32>
    %139 = vector.extract_strided_slice %134 {offsets = [0, 0], sizes = [8, 8], strides = [1, 1]} : vector<8x32xf32> to vector<8x8xf32>
    %cst_57 = arith.constant dense<0.000000e+00> : vector<6x8xf32>
    %140 = tpu.matmul %137, %138, %cst_57 {dimension_numbers = #tpu.dot_dimension_numbers<[1], [1], [0], [0], [0, 0, 1, 0], [], []>} : vector<6x8xf32>, vector<8x8xf32>, vector<6x8xf32> -> vector<6x8xf32>
    %cst_58 = arith.constant 1.000000e+00 : f32
    %141 = vector.broadcast %cst_58 : f32 to vector<6x8xf32>
    %142 = arith.mulf %140, %141 : vector<6x8xf32>
    %cst_59 = arith.constant dense<0xFF800000> : vector<6xf32>
    %143 = vector.multi_reduction <maximumf>, %142, %cst_59 [1] : vector<6x8xf32> to vector<6xf32>
    %144 = vector.shape_cast %143 : vector<6xf32> to vector<6x1xf32>
    %145 = vector.broadcast %144 : vector<6x1xf32> to vector<6x8xf32>
    %146 = arith.subf %142, %145 : vector<6x8xf32>
    %147 = math.exp %146 : vector<6x8xf32>
    %cst_60 = arith.constant dense<0.000000e+00> : vector<6xf32>
    %148 = vector.multi_reduction <add>, %147, %cst_60 [1] : vector<6x8xf32> to vector<6xf32>
    %149 = vector.shape_cast %148 : vector<6xf32> to vector<6x1xf32>
    %150 = tpu.reciprocal %149 {approx = true} : vector<6x1xf32> -> vector<6x1xf32>
    %151 = vector.broadcast %150 : vector<6x1xf32> to vector<6x8xf32>
    %152 = arith.mulf %147, %151 : vector<6x8xf32>
    %cst_61 = arith.constant dense<0.000000e+00> : vector<6x8xf32>
    %153 = tpu.matmul %152, %139, %cst_61 {dimension_numbers = #tpu.dot_dimension_numbers<[1], [0], [0], [1], [0, 0, 1, 1], [], []>} : vector<6x8xf32>, vector<8x8xf32>, vector<6x8xf32> -> vector<6x8xf32>
    %154 = vector.extract_strided_slice %135 {offsets = [0, 0], sizes = [8, 32], strides = [1, 1]} : vector<32x32xf32> to vector<8x32xf32>
    %cst_62 = arith.constant dense<0.000000e+00> : vector<6x32xf32>
    %155 = tpu.matmul %153, %154, %cst_62 {dimension_numbers = #tpu.dot_dimension_numbers<[1], [0], [0], [1], [0, 0, 1, 1], [], []>} : vector<6x8xf32>, vector<8x32xf32>, vector<6x32xf32> -> vector<6x32xf32>
    %156 = arith.addf %136, %155 : vector<6x32xf32>
    %157 = vector.extract_strided_slice %130 {offsets = [0, 8], sizes = [6, 8], strides = [1, 1]} : vector<6x32xf32> to vector<6x8xf32>
    %158 = vector.extract_strided_slice %133 {offsets = [0, 8], sizes = [8, 8], strides = [1, 1]} : vector<8x32xf32> to vector<8x8xf32>
    %159 = vector.extract_strided_slice %134 {offsets = [0, 8], sizes = [8, 8], strides = [1, 1]} : vector<8x32xf32> to vector<8x8xf32>
    %cst_63 = arith.constant dense<0.000000e+00> : vector<6x8xf32>
    %160 = tpu.matmul %157, %158, %cst_63 {dimension_numbers = #tpu.dot_dimension_numbers<[1], [1], [0], [0], [0, 0, 1, 0], [], []>} : vector<6x8xf32>, vector<8x8xf32>, vector<6x8xf32> -> vector<6x8xf32>
    %cst_64 = arith.constant 1.000000e+00 : f32
    %161 = vector.broadcast %cst_64 : f32 to vector<6x8xf32>
    %162 = arith.mulf %160, %161 : vector<6x8xf32>
    %cst_65 = arith.constant dense<0xFF800000> : vector<6xf32>
    %163 = vector.multi_reduction <maximumf>, %162, %cst_65 [1] : vector<6x8xf32> to vector<6xf32>
    %164 = vector.shape_cast %163 : vector<6xf32> to vector<6x1xf32>
    %165 = vector.broadcast %164 : vector<6x1xf32> to vector<6x8xf32>
    %166 = arith.subf %162, %165 : vector<6x8xf32>
    %167 = math.exp %166 : vector<6x8xf32>
    %cst_66 = arith.constant dense<0.000000e+00> : vector<6xf32>
    %168 = vector.multi_reduction <add>, %167, %cst_66 [1] : vector<6x8xf32> to vector<6xf32>
    %169 = vector.shape_cast %168 : vector<6xf32> to vector<6x1xf32>
    %170 = tpu.reciprocal %169 {approx = true} : vector<6x1xf32> -> vector<6x1xf32>
    %171 = vector.broadcast %170 : vector<6x1xf32> to vector<6x8xf32>
    %172 = arith.mulf %167, %171 : vector<6x8xf32>
    %cst_67 = arith.constant dense<0.000000e+00> : vector<6x8xf32>
    %173 = tpu.matmul %172, %159, %cst_67 {dimension_numbers = #tpu.dot_dimension_numbers<[1], [0], [0], [1], [0, 0, 1, 1], [], []>} : vector<6x8xf32>, vector<8x8xf32>, vector<6x8xf32> -> vector<6x8xf32>
    %174 = vector.extract_strided_slice %135 {offsets = [8, 0], sizes = [8, 32], strides = [1, 1]} : vector<32x32xf32> to vector<8x32xf32>
    %cst_68 = arith.constant dense<0.000000e+00> : vector<6x32xf32>
    %175 = tpu.matmul %173, %174, %cst_68 {dimension_numbers = #tpu.dot_dimension_numbers<[1], [0], [0], [1], [0, 0, 1, 1], [], []>} : vector<6x8xf32>, vector<8x32xf32>, vector<6x32xf32> -> vector<6x32xf32>
    %176 = arith.addf %156, %175 : vector<6x32xf32>
    %177 = vector.extract_strided_slice %130 {offsets = [0, 16], sizes = [6, 8], strides = [1, 1]} : vector<6x32xf32> to vector<6x8xf32>
    %178 = vector.extract_strided_slice %133 {offsets = [0, 16], sizes = [8, 8], strides = [1, 1]} : vector<8x32xf32> to vector<8x8xf32>
    %179 = vector.extract_strided_slice %134 {offsets = [0, 16], sizes = [8, 8], strides = [1, 1]} : vector<8x32xf32> to vector<8x8xf32>
    %cst_69 = arith.constant dense<0.000000e+00> : vector<6x8xf32>
    %180 = tpu.matmul %177, %178, %cst_69 {dimension_numbers = #tpu.dot_dimension_numbers<[1], [1], [0], [0], [0, 0, 1, 0], [], []>} : vector<6x8xf32>, vector<8x8xf32>, vector<6x8xf32> -> vector<6x8xf32>
    %cst_70 = arith.constant 1.000000e+00 : f32
    %181 = vector.broadcast %cst_70 : f32 to vector<6x8xf32>
    %182 = arith.mulf %180, %181 : vector<6x8xf32>
    %cst_71 = arith.constant dense<0xFF800000> : vector<6xf32>
    %183 = vector.multi_reduction <maximumf>, %182, %cst_71 [1] : vector<6x8xf32> to vector<6xf32>
    %184 = vector.shape_cast %183 : vector<6xf32> to vector<6x1xf32>
    %185 = vector.broadcast %184 : vector<6x1xf32> to vector<6x8xf32>
    %186 = arith.subf %182, %185 : vector<6x8xf32>
    %187 = math.exp %186 : vector<6x8xf32>
    %cst_72 = arith.constant dense<0.000000e+00> : vector<6xf32>
    %188 = vector.multi_reduction <add>, %187, %cst_72 [1] : vector<6x8xf32> to vector<6xf32>
    %189 = vector.shape_cast %188 : vector<6xf32> to vector<6x1xf32>
    %190 = tpu.reciprocal %189 {approx = true} : vector<6x1xf32> -> vector<6x1xf32>
    %191 = vector.broadcast %190 : vector<6x1xf32> to vector<6x8xf32>
    %192 = arith.mulf %187, %191 : vector<6x8xf32>
    %cst_73 = arith.constant dense<0.000000e+00> : vector<6x8xf32>
    %193 = tpu.matmul %192, %179, %cst_73 {dimension_numbers = #tpu.dot_dimension_numbers<[1], [0], [0], [1], [0, 0, 1, 1], [], []>} : vector<6x8xf32>, vector<8x8xf32>, vector<6x8xf32> -> vector<6x8xf32>
    %194 = vector.extract_strided_slice %135 {offsets = [16, 0], sizes = [8, 32], strides = [1, 1]} : vector<32x32xf32> to vector<8x32xf32>
    %cst_74 = arith.constant dense<0.000000e+00> : vector<6x32xf32>
    %195 = tpu.matmul %193, %194, %cst_74 {dimension_numbers = #tpu.dot_dimension_numbers<[1], [0], [0], [1], [0, 0, 1, 1], [], []>} : vector<6x8xf32>, vector<8x32xf32>, vector<6x32xf32> -> vector<6x32xf32>
    %196 = arith.addf %176, %195 : vector<6x32xf32>
    %197 = vector.extract_strided_slice %130 {offsets = [0, 24], sizes = [6, 8], strides = [1, 1]} : vector<6x32xf32> to vector<6x8xf32>
    %198 = vector.extract_strided_slice %133 {offsets = [0, 24], sizes = [8, 8], strides = [1, 1]} : vector<8x32xf32> to vector<8x8xf32>
    %199 = vector.extract_strided_slice %134 {offsets = [0, 24], sizes = [8, 8], strides = [1, 1]} : vector<8x32xf32> to vector<8x8xf32>
    %cst_75 = arith.constant dense<0.000000e+00> : vector<6x8xf32>
    %200 = tpu.matmul %197, %198, %cst_75 {dimension_numbers = #tpu.dot_dimension_numbers<[1], [1], [0], [0], [0, 0, 1, 0], [], []>} : vector<6x8xf32>, vector<8x8xf32>, vector<6x8xf32> -> vector<6x8xf32>
    %cst_76 = arith.constant 1.000000e+00 : f32
    %201 = vector.broadcast %cst_76 : f32 to vector<6x8xf32>
    %202 = arith.mulf %200, %201 : vector<6x8xf32>
    %cst_77 = arith.constant dense<0xFF800000> : vector<6xf32>
    %203 = vector.multi_reduction <maximumf>, %202, %cst_77 [1] : vector<6x8xf32> to vector<6xf32>
    %204 = vector.shape_cast %203 : vector<6xf32> to vector<6x1xf32>
    %205 = vector.broadcast %204 : vector<6x1xf32> to vector<6x8xf32>
    %206 = arith.subf %202, %205 : vector<6x8xf32>
    %207 = math.exp %206 : vector<6x8xf32>
    %cst_78 = arith.constant dense<0.000000e+00> : vector<6xf32>
    %208 = vector.multi_reduction <add>, %207, %cst_78 [1] : vector<6x8xf32> to vector<6xf32>
    %209 = vector.shape_cast %208 : vector<6xf32> to vector<6x1xf32>
    %210 = tpu.reciprocal %209 {approx = true} : vector<6x1xf32> -> vector<6x1xf32>
    %211 = vector.broadcast %210 : vector<6x1xf32> to vector<6x8xf32>
    %212 = arith.mulf %207, %211 : vector<6x8xf32>
    %cst_79 = arith.constant dense<0.000000e+00> : vector<6x8xf32>
    %213 = tpu.matmul %212, %199, %cst_79 {dimension_numbers = #tpu.dot_dimension_numbers<[1], [0], [0], [1], [0, 0, 1, 1], [], []>} : vector<6x8xf32>, vector<8x8xf32>, vector<6x8xf32> -> vector<6x8xf32>
    %214 = vector.extract_strided_slice %135 {offsets = [24, 0], sizes = [8, 32], strides = [1, 1]} : vector<32x32xf32> to vector<8x32xf32>
    %cst_80 = arith.constant dense<0.000000e+00> : vector<6x32xf32>
    %215 = tpu.matmul %213, %214, %cst_80 {dimension_numbers = #tpu.dot_dimension_numbers<[1], [0], [0], [1], [0, 0, 1, 1], [], []>} : vector<6x8xf32>, vector<8x32xf32>, vector<6x32xf32> -> vector<6x32xf32>
    %216 = arith.addf %196, %215 : vector<6x32xf32>
    %217 = arith.addf %115, %216 : vector<6x32xf32>
    %c0_81 = arith.constant 0 : index
    %c0_82 = arith.constant 0 : index
    %218 = vector.load %arg10[%c0_81, %c0_82] : memref<1x32xf32, #tpu.memory_space<vmem>>, vector<1x32xf32>
    %219 = arith.mulf %217, %217 : vector<6x32xf32>
    %cst_83 = arith.constant dense<0.000000e+00> : vector<6xf32>
    %220 = vector.multi_reduction <add>, %219, %cst_83 [1] : vector<6x32xf32> to vector<6xf32>
    %221 = vector.shape_cast %220 : vector<6xf32> to vector<6x1xf32>
    %cst_84 = arith.constant 3.200000e+01 : f32
    %222 = vector.broadcast %cst_84 : f32 to vector<6x1xf32>
    %223 = arith.divf %221, %222 : vector<6x1xf32>
    %cst_85 = arith.constant 9.99999997E-7 : f32
    %224 = vector.broadcast %cst_85 : f32 to vector<6x1xf32>
    %225 = arith.addf %223, %224 : vector<6x1xf32>
    %226 = math.rsqrt %225 : vector<6x1xf32>
    %227 = vector.broadcast %226 : vector<6x1xf32> to vector<6x32xf32>
    %228 = arith.mulf %217, %227 : vector<6x32xf32>
    %229 = vector.broadcast %218 : vector<1x32xf32> to vector<6x32xf32>
    %230 = arith.mulf %228, %229 : vector<6x32xf32>
    %c0_86 = arith.constant 0 : index
    %c0_87 = arith.constant 0 : index
    %231 = vector.load %arg11[%c0_86, %c0_87] : memref<32x64xf32, #tpu.memory_space<vmem>>, vector<32x64xf32>
    %cst_88 = arith.constant dense<0.000000e+00> : vector<6x64xf32>
    %232 = tpu.matmul %230, %231, %cst_88 {dimension_numbers = #tpu.dot_dimension_numbers<[1], [0], [0], [1], [0, 0, 1, 1], [], []>} : vector<6x32xf32>, vector<32x64xf32>, vector<6x64xf32> -> vector<6x64xf32>
    %cst_89 = arith.constant 5.000000e-01 : f32
    %233 = vector.broadcast %cst_89 : f32 to vector<6x64xf32>
    %234 = arith.mulf %233, %232 : vector<6x64xf32>
    %cst_90 = arith.constant 4.471500e-02 : f32
    %235 = vector.broadcast %cst_90 : f32 to vector<6x64xf32>
    %236 = arith.mulf %235, %232 : vector<6x64xf32>
    %237 = arith.mulf %236, %232 : vector<6x64xf32>
    %238 = arith.mulf %237, %232 : vector<6x64xf32>
    %239 = arith.addf %232, %238 : vector<6x64xf32>
    %cst_91 = arith.constant 0.797884583 : f32
    %240 = vector.broadcast %cst_91 : f32 to vector<6x64xf32>
    %241 = arith.mulf %240, %239 : vector<6x64xf32>
    %242 = math.tanh %241 : vector<6x64xf32>
    %cst_92 = arith.constant 1.000000e+00 : f32
    %243 = vector.broadcast %cst_92 : f32 to vector<6x64xf32>
    %244 = arith.addf %243, %242 : vector<6x64xf32>
    %245 = arith.mulf %234, %244 : vector<6x64xf32>
    %c0_93 = arith.constant 0 : index
    %c0_94 = arith.constant 0 : index
    %246 = vector.load %arg12[%c0_93, %c0_94] : memref<32x64xf32, #tpu.memory_space<vmem>>, vector<32x64xf32>
    %cst_95 = arith.constant dense<0.000000e+00> : vector<6x64xf32>
    %247 = tpu.matmul %230, %246, %cst_95 {dimension_numbers = #tpu.dot_dimension_numbers<[1], [0], [0], [1], [0, 0, 1, 1], [], []>} : vector<6x32xf32>, vector<32x64xf32>, vector<6x64xf32> -> vector<6x64xf32>
    %248 = arith.mulf %245, %247 : vector<6x64xf32>
    %c0_96 = arith.constant 0 : index
    %c0_97 = arith.constant 0 : index
    %249 = vector.load %arg13[%c0_96, %c0_97] : memref<64x32xf32, #tpu.memory_space<vmem>>, vector<64x32xf32>
    %cst_98 = arith.constant dense<0.000000e+00> : vector<6x32xf32>
    %250 = tpu.matmul %248, %249, %cst_98 {dimension_numbers = #tpu.dot_dimension_numbers<[1], [0], [0], [1], [0, 0, 1, 1], [], []>} : vector<6x64xf32>, vector<64x32xf32>, vector<6x32xf32> -> vector<6x32xf32>
    %251 = arith.addf %217, %250 : vector<6x32xf32>
    %c0_99 = arith.constant 0 : index
    %c0_100 = arith.constant 0 : index
    %c0_101 = arith.constant 0 : index
    %252 = vector.load %arg14[%c0_99, %c0_100, %c0_101] : memref<1x6x32xf32, #tpu.memory_space<vmem>>, vector<1x6x32xf32>
    %253 = vector.shape_cast %252 : vector<1x6x32xf32> to vector<6x32xf32>
    %254 = vector.shape_cast %251 : vector<6x32xf32> to vector<1x6x32xf32>
    tpu.vector_store %arg14[%c0_99, %c0_100, %c0_101], %254 {strides = array<i32>} : memref<1x6x32xf32, #tpu.memory_space<vmem>>, vector<1x6x32xf32>,
    return
  }
  func.func @transform_0(%arg0: i32) -> (i32, i32, i32) {
    %c0_i32 = arith.constant 0 : i32
    %c0_i32_0 = arith.constant 0 : i32
    %c0_i32_1 = arith.constant 0 : i32
    return %arg0, %c0_i32, %c0_i32_0 : i32, i32, i32
  }
  func.func @transform_1(%arg0: i32) -> (i32, i32, i32) {
    %c0_i32 = arith.constant 0 : i32
    %c0_i32_0 = arith.constant 0 : i32
    %c0_i32_1 = arith.constant 0 : i32
    return %arg0, %c0_i32, %c0_i32_0 : i32, i32, i32
  }
  func.func @transform_2(%arg0: i32) -> (i32, i32) {
    %c0_i32 = arith.constant 0 : i32
    %c0_i32_0 = arith.constant 0 : i32
    %c0_i32_1 = arith.constant 0 : i32
    return %c0_i32, %c0_i32_0 : i32, i32
  }
  func.func @transform_3(%arg0: i32) -> (i32, i32) {
    %c0_i32 = arith.constant 0 : i32
    %c0_i32_0 = arith.constant 0 : i32
    %c0_i32_1 = arith.constant 0 : i32
    return %c0_i32, %c0_i32_0 : i32, i32
  }
  func.func @transform_4(%arg0: i32) -> (i32, i32) {
    %c0_i32 = arith.constant 0 : i32
    %c0_i32_0 = arith.constant 0 : i32
    %c0_i32_1 = arith.constant 0 : i32
    return %c0_i32, %c0_i32_0 : i32, i32
  }
  func.func @transform_5(%arg0: i32) -> (i32, i32) {
    %c0_i32 = arith.constant 0 : i32
    %c0_i32_0 = arith.constant 0 : i32
    %c0_i32_1 = arith.constant 0 : i32
    return %c0_i32, %c0_i32_0 : i32, i32
  }
  func.func @transform_6(%arg0: i32) -> (i32, i32) {
    %c0_i32 = arith.constant 0 : i32
    %c0_i32_0 = arith.constant 0 : i32
    %c0_i32_1 = arith.constant 0 : i32
    return %c0_i32, %c0_i32_0 : i32, i32
  }
  func.func @transform_7(%arg0: i32) -> (i32, i32) {
    %c0_i32 = arith.constant 0 : i32
    %c0_i32_0 = arith.constant 0 : i32
    %c0_i32_1 = arith.constant 0 : i32
    return %c0_i32, %c0_i32_0 : i32, i32
  }
  func.func @transform_8(%arg0: i32) -> (i32, i32) {
    %c0_i32 = arith.constant 0 : i32
    %c0_i32_0 = arith.constant 0 : i32
    %c0_i32_1 = arith.constant 0 : i32
    return %c0_i32, %c0_i32_0 : i32, i32
  }
  func.func @transform_9(%arg0: i32) -> (i32, i32) {
    %c0_i32 = arith.constant 0 : i32
    %c0_i32_0 = arith.constant 0 : i32
    %c0_i32_1 = arith.constant 0 : i32
    return %c0_i32, %c0_i32_0 : i32, i32
  }
  func.func @transform_10(%arg0: i32) -> (i32, i32) {
    %c0_i32 = arith.constant 0 : i32
    %c0_i32_0 = arith.constant 0 : i32
    %c0_i32_1 = arith.constant 0 : i32
    return %c0_i32, %c0_i32_0 : i32, i32
  }
  func.func @transform_11(%arg0: i32) -> (i32, i32) {
    %c0_i32 = arith.constant 0 : i32
    %c0_i32_0 = arith.constant 0 : i32
    %c0_i32_1 = arith.constant 0 : i32
    return %c0_i32, %c0_i32_0 : i32, i32
  }
  func.func @transform_12(%arg0: i32) -> (i32, i32) {
    %c0_i32 = arith.constant 0 : i32
    %c0_i32_0 = arith.constant 0 : i32
    %c0_i32_1 = arith.constant 0 : i32
    return %c0_i32, %c0_i32_0 : i32, i32
  }
  func.func @transform_13(%arg0: i32) -> (i32, i32, i32) {
    %c0_i32 = arith.constant 0 : i32
    %c0_i32_0 = arith.constant 0 : i32
    %c0_i32_1 = arith.constant 0 : i32
    return %arg0, %c0_i32, %c0_i32_0 : i32, i32, i32
  }
}

</mosaic_0001>

<bundles_post_ra>
// kernel: blip_forward.17
= control target key start
LH: loop header
LB: loop body
LE: loop exit
PB: predicated region body
PF: predicated region fallthrough
CT: control target
= control target key end

     0   :  { %vm18_vm0 = vcmask 261120   ;;  %v95_v4 = vmov 32.0   ;;  %s140_s0 = inlined_call_operand.vmem [shape: f32[16,32], index: 0, kind: input, shape index: {}]   ;;  %s141_s1 = inlined_call_operand.vmem [shape: f32[1,32], index: 1, kind: input, shape index: {}]   ;;  %s142_s2 = inlined_call_operand.vmem [shape: f32[1,32], index: 2, kind: input, shape index: {}]   ;;  %s143_s3 = inlined_call_operand.vmem [shape: f32[16,32], index: 3, kind: output, shape index: {}]  }
   0x1   :  { %v14_v0 = vld [vmem:[%s140_s0] sm:$0xff]  ;;  %v15_v2 = vld [vmem:[%s140_s0 + $0x8] sm:$0xff]  ;;  %89 = vrcp.f32 %v95_v4 }
   0x2   :  { %v19_v1 = vsel %vm18_vm0, %v14_v0, 0.0  ;;  %v22_v3 = vsel %vm18_vm0, %v15_v2, 0.0  ;;  %v87_v35 = vld [vmem:[%s141_s1] ss:$0 sm:$0xff] }
   0x3   :  { %20 = vadd.xlane.f32.xlu0 %v19_v1  ;;  %v88_v38 = vld [vmem:[%s142_s2] ss:$0 sm:$0xff] }
   0x7   :  { %v90_v5 = vpop.eup %89 }
   0x8   :  { %v26_v6 = vmul.f32 32.0, %v90_v5  ;;  %vm30_vm1 = vweird.f32 %v90_v5 }
   0xa   :  { %v27_v7 = vsub.f32 1.0, %v26_v6 }
   0xb   :  { %23 = vadd.xlane.f32.xlu0 %v22_v3 }
   0xc   :  { %v28_v8 = vmul.f32 %v90_v5, %v27_v7 }
   0xe   :  { %v29_v9 = vadd.f32 %v90_v5, %v28_v8 }
  0x10   :  { %v31_v10 = vsel %vm30_vm1, %v90_v5, %v29_v9 }
  0x76   :  { %v21_v11 = vpop.xlane.xlu0 %20 }
  0x77   :  { %v32_v12 = vmul.f32 %v31_v10, %v21_v11 }
  0x79   :  { %v34_v13 = vsub.f32 %v14_v0, %v32_v12 }
  0x7b   :  { %v36_v14 = vmul.f32 %v34_v13, %v34_v13 }
  0x7d   :  { %v38_v15 = vsel %vm18_vm0, %v36_v14, 0.0 }
  0x7e   :  { %39 = vadd.xlane.f32.xlu1 %v38_v15  ;;  %v24_v16 = vpop.xlane.xlu0 %23 }
  0x7f   :  { %v33_v17 = vmul.f32 %v31_v10, %v24_v16 }
  0x81   :  { %v35_v18 = vsub.f32 %v15_v2, %v33_v17 }
  0x83   :  { %v37_v19 = vmul.f32 %v35_v18, %v35_v18 }
  0x85   :  { %v41_v20 = vsel %vm18_vm0, %v37_v19, 0.0 }
  0x86   :  { %42 = vadd.xlane.f32.xlu1 %v41_v20 }
  0xf1   :  { %v40_v21 = vpop.xlane.xlu1 %39 }
  0xf2   :  { %v44_v22 = vmul.f32 %v40_v21, %v31_v10 }
  0xf4   :  { %v46_v23 = vadd.f32 1e-12, %v44_v22 }
  0xf6   :  { %91 = vrsqrt.f32 %v46_v23  ;;  %vm54_vm3 = vweird.f32 %v46_v23 }
  0xf9   :  { %v43_v24 = vpop.xlane.xlu1 %42 }
  0xfa   :  { %v45_v25 = vmul.f32 %v43_v24, %v31_v10 }
  0xfc   :  { %v92_v26 = vpop.eup %91  ;;  %v47_v27 = vadd.f32 1e-12, %v45_v25 }
  0xfd   :  { %v49_v28 = vmul.f32 %v92_v26, %v46_v23  ;;  %vm55_vm2 = vweird.f32 %v92_v26 }
  0xfe   :  { %93 = vrsqrt.f32 %v47_v27  ;;  %vm56_vm4 = vmor %vm54_vm3, %vm55_vm2  ;;  %vm64_vm6 = vweird.f32 %v47_v27 }
  0xff   :  { %v50_v29 = vmul.f32 %v92_v26, %v49_v28 }
 0x101   :  { %v51_v30 = vmul.f32 0.5, %v50_v29 }
 0x103   :  { %v52_v31 = vsub.f32 1.5, %v51_v30 }
 0x104   :  { %v94_v32 = vpop.eup %93 }
 0x105   :  { %v53_v33 = vmul.f32 %v92_v26, %v52_v31  ;;  %v59_v34 = vmul.f32 %v94_v32, %v47_v27  ;;  %vm65_vm5 = vweird.f32 %v94_v32 }
 0x106   :  { %vm66_vm7 = vmor %vm64_vm6, %vm65_vm5 }
 0x107   :  { %v57_v36 = vsel %vm56_vm4, %v92_v26, %v53_v33  ;;  %v60_v37 = vmul.f32 %v94_v32, %v59_v34 }
 0x108   :  { %v68_v39 = vmul.f32 %v57_v36, %v34_v13 }
 0x109   :  { %v61_v40 = vmul.f32 0.5, %v60_v37 }
 0x10a   :  { %v73_v41 = vmul.f32 %v87_v35, %v68_v39 }
 0x10b   :  { %v62_v42 = vsub.f32 1.5, %v61_v40 }
 0x10c   :  { %v78_v43 = vadd.f32 %v88_v38, %v73_v41 }
 0x10d   :  { %v63_v44 = vmul.f32 %v94_v32, %v62_v42 }
 0x10e   :  { %80 = vst.msk [vmem:[%s143_s3] sm:$0xff] %vm18_vm0, %v78_v43 }
 0x10f   :  { %v67_v45 = vsel %vm66_vm7, %v94_v32, %v63_v44 }
 0x110   :  { %v69_v46 = vmul.f32 %v67_v45, %v35_v18 }
 0x112   :  { %v74_v47 = vmul.f32 %v87_v35, %v69_v46 }
 0x114   :  { %v79_v48 = vadd.f32 %v88_v38, %v74_v47 }
 0x116   :  { %81 = vst.msk [vmem:[%s143_s3 + $0x8] sm:$0xff] %vm18_vm0, %v79_v48 }

// kernel: blip_forward.13
= control target key start
LH: loop header
LB: loop body
LE: loop exit
PB: predicated region body
PF: predicated region fallthrough
CT: control target
= control target key end

     0   :  { %vm44_vm0 = vcmask 523264   ;;  %vm88_vm1 = vcmask 261120   ;;  %s200_s1 = inlined_call_operand.vmem [shape: f32[192,32], index: 1, kind: input, shape index: {}]   ;;  %s201_s2 = inlined_call_operand.vmem [shape: f32[1,32], index: 2, kind: input, shape index: {}]   ;;  %s202_s0 = inlined_call_operand.vmem [shape: f32[8,192], index: 0, kind: input, shape index: {}]   ;;  %s203_s3 = inlined_call_operand.vmem [shape: f32[8,32], index: 3, kind: output, shape index: {}]  }
   0x1   :  { %v31_v0 = vld [vmem:[%s200_s1 + $0x78] sm:$0xff]  ;;  %v30_v1 = vld [vmem:[%s200_s1 + $0x70] sm:$0xff]  ;;  %v29_v2 = vld [vmem:[%s200_s1 + $0x68] sm:$0xff] }
   0x2   :  { %48 = vmatpush.msra.mxu0 %v31_v0  ;;  %v39_v3 = vld [vmem:[%s200_s1 + $0xb8] sm:$0xff]  ;;  %v28_v4 = vld [vmem:[%s200_s1 + $0x60] sm:$0xff]  ;;  %v38_v5 = vld [vmem:[%s200_s1 + $0xb0] sm:$0xff] }
   0x3   :  { %76 = vmatpush.msra.mxu1 %v39_v3  ;;  %v37_v6 = vld [vmem:[%s200_s1 + $0xa8] sm:$0xff]  ;;  %v27_v7 = vld [vmem:[%s200_s1 + $0x58] sm:$0xff]  ;;  %v36_v8 = vld [vmem:[%s200_s1 + $0xa0] sm:$0xff] }
   0x4   :  { %49 = vmatpush.msra.mxu0 %v30_v1  ;;  %v26_v9 = vld [vmem:[%s200_s1 + $0x50] sm:$0xff]  ;;  %v35_v10 = vld [vmem:[%s200_s1 + $0x98] sm:$0xff]  ;;  %v25_v11 = vld [vmem:[%s200_s1 + $0x48] sm:$0xff] }
   0x5   :  { %77 = vmatpush.msra.mxu1 %v38_v5  ;;  %v34_v12 = vld [vmem:[%s200_s1 + $0x90] sm:$0xff]  ;;  %v24_v13 = vld [vmem:[%s200_s1 + $0x40] sm:$0xff]  ;;  %v33_v14 = vld [vmem:[%s200_s1 + $0x88] sm:$0xff] }
   0x6   :  { %50 = vmatpush.msra.mxu0 %v29_v2  ;;  %v23_v15 = vld [vmem:[%s200_s1 + $0x38] sm:$0xff]  ;;  %v32_v16 = vld [vmem:[%s200_s1 + $0x80] sm:$0xff]  ;;  %v22_v17 = vld [vmem:[%s200_s1 + $0x30] sm:$0xff] }
   0x7   :  { %78 = vmatpush.msra.mxu1 %v37_v6  ;;  %v15_v18 = vld [vmem:[%s202_s0 + $0x8] sm:$0xff]  ;;  %v20_v20 = vld [vmem:[%s200_s1 + $0x20] sm:$0xff]  ;;  %v19_v21 = vld [vmem:[%s200_s1 + $0x18] sm:$0xff] }
   0x8   :  { %51 = vmatpush.msra.mxu0 %v28_v4  ;;  %v21_v19 = vld [vmem:[%s200_s1 + $0x28] sm:$0xff]  ;;  %v18_v22 = vld [vmem:[%s200_s1 + $0x10] sm:$0xff]  ;;  %v16_v24 = vld [vmem:[%s200_s1] sm:$0xff] }
   0x9   :  { %79 = vmatpush.msra.mxu1 %v36_v8  ;;  %v17_v23 = vld [vmem:[%s200_s1 + $0x8] sm:$0xff]  ;;  %v14_v25 = vld [vmem:[%s202_s0] sm:$0xff] }
   0xa   :  { %52 = vmatpush.msra.mxu0 %v27_v7  ;;  %v95_v26 = vld [vmem:[%s201_s2] ss:$0 sm:$0xff] }
   0xb   :  { %80 = vmatpush.msra.mxu1 %v35_v10 }
   0xc   :  { %53 = vmatpush.msra.mxu0 %v26_v9 }
   0xd   :  { %81 = vmatpush.msra.mxu1 %v34_v12 }
   0xe   :  { %54 = vmatpush.msra.mxu0 %v25_v11 }
   0xf   :  { %82 = vmatpush.msra.mxu1 %v33_v14 }
  0x10   :  { %55 = vmatpush.msra.mxu0 %v24_v13 }
  0x11   :  { %83 = vmatpush.msra.mxu1 %v32_v16 }
  0x12   :  { %56 = vmatpush.msra.mxu0 %v23_v15  ;;  %94 = vmatmul.msk.f32.vlgmr.msra.gmra.mxu1 %vm44_vm0, %v15_v18 }
  0x14   :  { %57 = vmatpush.msra.mxu0 %v22_v17 }
  0x16   :  { %58 = vmatpush.msra.mxu0 %v21_v19 }
  0x18   :  { %59 = vmatpush.msra.mxu0 %v20_v20 }
  0x1a   :  { %60 = vmatpush.msra.mxu0 %v19_v21 }
  0x1c   :  { %61 = vmatpush.msra.mxu0 %v18_v22 }
  0x1e   :  { %62 = vmatpush.msra.mxu0 %v17_v23 }
  0x20   :  { %63 = vmatpush.msra.mxu0 %v16_v24 }
  0x21   :  { %64 = vmatmul.f32.vlgmr.msra.gmra.mxu0 %v14_v25 }
  0x8f   :  { %v85_v28 = vpop.f32.mrf.mxu1 }
  0x9e   :  { %v65_v27 = vpop.f32.mrf.mxu0 }
  0x9f   :  { %v66_v29 = vadd.f32 %v95_v26, %v65_v27 }
  0xa1   :  { %v86_v30 = vadd.f32 %v85_v28, %v66_v29 }
  0xa3   :  { %89 = vst.msk [vmem:[%s203_s3] sm:$0xff] %vm88_vm1, %v86_v30 }

// kernel: blip_forward.16
= control target key start
LH: loop header
LB: loop body
LE: loop exit
PB: predicated region body
PF: predicated region fallthrough
CT: control target
= control target key end

     0   :  { %vm18_vm0 = vcmask 261120   ;;  %vm22_vm1 = vcmask 254976   ;;  %v96_v4 = vmov 32.0   ;;  %s141_s0 = inlined_call_operand.vmem [shape: f32[10,32], index: 0, kind: input, shape index: {}]   ;;  %s142_s1 = inlined_call_operand.vmem [shape: f32[1,32], index: 1, kind: input, shape index: {}]   ;;  %s143_s2 = inlined_call_operand.vmem [shape: f32[1,32], index: 2, kind: input, shape index: {}]   ;;  %s144_s3 = inlined_call_operand.vmem [shape: f32[10,32], index: 3, kind: output, shape index: {}]  }
   0x1   :  { %v14_v0 = vld [vmem:[%s141_s0] sm:$0xff]  ;;  %v15_v2 = vld [vmem:[%s141_s0 + $0x8] sm:$0x3]  ;;  %90 = vrcp.f32 %v96_v4 }
   0x2   :  { %v19_v1 = vsel %vm18_vm0, %v14_v0, 0.0  ;;  %v23_v3 = vsel %vm22_vm1, %v15_v2, 0.0  ;;  %v88_v35 = vld [vmem:[%s142_s1] ss:$0 sm:$0xff] }
   0x3   :  { %20 = vadd.xlane.f32.xlu0 %v19_v1  ;;  %v89_v38 = vld [vmem:[%s143_s2] ss:$0 sm:$0xff] }
   0x7   :  { %v91_v5 = vpop.eup %90 }
   0x8   :  { %v27_v6 = vmul.f32 32.0, %v91_v5  ;;  %vm31_vm2 = vweird.f32 %v91_v5 }
   0xa   :  { %v28_v7 = vsub.f32 1.0, %v27_v6 }
   0xb   :  { %24 = vadd.xlane.f32.xlu0 %v23_v3 }
   0xc   :  { %v29_v8 = vmul.f32 %v91_v5, %v28_v7 }
   0xe   :  { %v30_v9 = vadd.f32 %v91_v5, %v29_v8 }
  0x10   :  { %v32_v10 = vsel %vm31_vm2, %v91_v5, %v30_v9 }
  0x76   :  { %v21_v11 = vpop.xlane.xlu0 %20 }
  0x77   :  { %v33_v12 = vmul.f32 %v32_v10, %v21_v11 }
  0x79   :  { %v35_v13 = vsub.f32 %v14_v0, %v33_v12 }
  0x7b   :  { %v37_v14 = vmul.f32 %v35_v13, %v35_v13 }
  0x7d   :  { %v39_v15 = vsel %vm18_vm0, %v37_v14, 0.0 }
  0x7e   :  { %40 = vadd.xlane.f32.xlu1 %v39_v15  ;;  %v25_v16 = vpop.xlane.xlu0 %24 }
  0x7f   :  { %v34_v17 = vmul.f32 %v32_v10, %v25_v16 }
  0x81   :  { %v36_v18 = vsub.f32 %v15_v2, %v34_v17 }
  0x83   :  { %v38_v19 = vmul.f32 %v36_v18, %v36_v18 }
  0x85   :  { %v42_v20 = vsel %vm22_vm1, %v38_v19, 0.0 }
  0x86   :  { %43 = vadd.xlane.f32.xlu1 %v42_v20 }
  0xf1   :  { %v41_v21 = vpop.xlane.xlu1 %40 }
  0xf2   :  { %v45_v22 = vmul.f32 %v41_v21, %v32_v10 }
  0xf4   :  { %v47_v23 = vadd.f32 1e-05, %v45_v22 }
  0xf6   :  { %92 = vrsqrt.f32 %v47_v23  ;;  %vm55_vm4 = vweird.f32 %v47_v23 }
  0xf9   :  { %v44_v24 = vpop.xlane.xlu1 %43 }
  0xfa   :  { %v46_v25 = vmul.f32 %v44_v24, %v32_v10 }
  0xfc   :  { %v93_v26 = vpop.eup %92  ;;  %v48_v27 = vadd.f32 1e-05, %v46_v25 }
  0xfd   :  { %v50_v28 = vmul.f32 %v93_v26, %v47_v23  ;;  %vm56_vm3 = vweird.f32 %v93_v26 }
  0xfe   :  { %94 = vrsqrt.f32 %v48_v27  ;;  %vm57_vm5 = vmor %vm55_vm4, %vm56_vm3  ;;  %vm65_vm7 = vweird.f32 %v48_v27 }
  0xff   :  { %v51_v29 = vmul.f32 %v93_v26, %v50_v28 }
 0x101   :  { %v52_v30 = vmul.f32 0.5, %v51_v29 }
 0x103   :  { %v53_v31 = vsub.f32 1.5, %v52_v30 }
 0x104   :  { %v95_v32 = vpop.eup %94 }
 0x105   :  { %v54_v33 = vmul.f32 %v93_v26, %v53_v31  ;;  %v60_v34 = vmul.f32 %v95_v32, %v48_v27  ;;  %vm66_vm6 = vweird.f32 %v95_v32 }
 0x106   :  { %vm67_vm8 = vmor %vm65_vm7, %vm66_vm6 }
 0x107   :  { %v58_v36 = vsel %vm57_vm5, %v93_v26, %v54_v33  ;;  %v61_v37 = vmul.f32 %v95_v32, %v60_v34 }
 0x108   :  { %v69_v39 = vmul.f32 %v58_v36, %v35_v13 }
 0x109   :  { %v62_v40 = vmul.f32 0.5, %v61_v37 }
 0x10a   :  { %v74_v41 = vmul.f32 %v88_v35, %v69_v39 }
 0x10b   :  { %v63_v42 = vsub.f32 1.5, %v62_v40 }
 0x10c   :  { %v79_v43 = vadd.f32 %v89_v38, %v74_v41 }
 0x10d   :  { %v64_v44 = vmul.f32 %v95_v32, %v63_v42 }
 0x10e   :  { %81 = vst.msk [vmem:[%s144_s3] sm:$0xff] %vm18_vm0, %v79_v43 }
 0x10f   :  { %v68_v45 = vsel %vm67_vm8, %v95_v32, %v64_v44 }
 0x110   :  { %v70_v46 = vmul.f32 %v68_v45, %v36_v18 }
 0x112   :  { %v75_v47 = vmul.f32 %v88_v35, %v70_v46 }
 0x114   :  { %v80_v48 = vadd.f32 %v89_v38, %v75_v47 }
 0x116   :  { %82 = vst.msk [vmem:[%s144_s3 + $0x8] sm:$0x3] %vm22_vm1, %v80_v48 }

// kernel: blip_forward.14
= control target key start
LH: loop header
LB: loop body
LE: loop exit
PB: predicated region body
PF: predicated region fallthrough
CT: control target
= control target key end

     0   :  { %s1221_s25 = smov 0   ;;  %s1394_s0 = inlined_call_operand.vmem [shape: f32[2,5,32], index: 0, kind: input, shape index: {}]   ;;  %s1395_s1 = inlined_call_operand.vmem [shape: f32[1,32], index: 1, kind: input, shape index: {}]   ;;  %s1396_s2 = inlined_call_operand.vmem [shape: f32[1,32], index: 2, kind: input, shape index: {}]   ;;  %s1397_s3 = inlined_call_operand.vmem [shape: f32[32,96], index: 3, kind: input, shape index: {}]   ;;  %s1398_s4 = inlined_call_operand.vmem [shape: f32[1,96], index: 4, kind: input, shape index: {}]   ;;  %s1399_s5 = inlined_call_operand.vmem [shape: f32[32,32], index: 5, kind: input, shape index: {}]   ;;  %s1400_s6 = inlined_call_operand.vmem [shape: f32[1,32], index: 6, kind: input, shape index: {}]   ;;  %s1401_s7 = inlined_call_operand.vmem [shape: f32[1,32], index: 7, kind: input, shape index: {}]   ;;  %s1402_s8 = inlined_call_operand.vmem [shape: f32[1,32], index: 8, kind: input, shape index: {}]   ;;  %s1403_s9 = inlined_call_operand.vmem [shape: f32[32,64], index: 9, kind: input, shape index: {}]   ;;  %s1404_s10 = inlined_call_operand.vmem [shape: f32[1,64], index: 10, kind: input, shape index: {}]   ;;  %s1405_s11 = inlined_call_operand.vmem [shape: f32[64,32], index: 11, kind: input, shape index: {}]   ;;  %s1406_s12 = inlined_call_operand.vmem [shape: f32[1,32], index: 12, kind: input, shape index: {}]   ;;  %s1407_s13 = inlined_call_operand.vmem [shape: f32[2,5,32], index: 13, kind: output, shape index: {}]  }
   0x1 LB: > { %s1047_s26 = sadd.s32 4294967295, %s1137_s25   ;;  %p1051_p0 = scmp.ge.s32.totalorder %s1137_s25, 1  ;;  %s1137_s25 = sphi %s1221_s25, %s23_s25  }
   0x2   : > { %p386_p1 = scmp.lt.s32.totalorder %s1137_s25, 3 }
   0x4   : > { %p387_p2 = pnand %p1051_p0, %p386_p1 }
   0x5   : > { %p428_p3 = scmp.lt.s32.totalorder (!%p387_p2), %s1047_s26, 1  ;;  %s1140_s14 = smov (!%p387_p2), 88  }
   0x6   : > { %390 = sbr.rel (%p387_p2) target bundleno = 2257 (0x8d1), region = 72  ;;  %s1141_s15 = smov (!%p387_p2), 96  }
   0x7   : > { %s1142_s16 = smov (!%p387_p2), 72   ;;  %s1143_s17 = smov (!%p387_p2), 80  }
   0x8   : > { %s1144_s20 = smov (!%p387_p2), 64   ;;  %s1145_s21 = smov (!%p387_p2), 120  }
   0x9   : > { %s1146_s22 = smov (!%p387_p2), 104   ;;  %s1147_s23 = smov (!%p387_p2), 112  }
   0xa   : > { %s1148_s24 = smov (!%p387_p2), 48   ;;  %s1149_s28 = smov (!%p387_p2), 56  }
   0xb   : > { %s1409_s26 = smov (!%p428_p3, %s1047_s26), 1  ;;  %vm439_vm0 = vcmask 258048   ;;  %v1139_v2 = vmov 32.0   ;;  %v480_v14 = vld [vmem:[%s1397_s3 + $0x18] sm:$0xff]  ;;  %v479_v15 = vld [vmem:[%s1397_s3 + $0x10] sm:$0xff]  ;;  %v478_v16 = vld [vmem:[%s1397_s3 + $0x8] sm:$0xff] }
   0xc   : > { %s1052_s27 = sshll.u32 %s1409_s26, 3  ;;  %1107 = vrcp.f32 %v1139_v2  ;;  %501 = vmatpush.msra.mxu0 %v480_v14  ;;  %v477_v17 = vld [vmem:[%s1397_s3] sm:$0xff]  ;;  %vm485_vm5 = vcmask 261120   ;;  %vm516_vm6 = vcmask 64512   ;;  %vm542_vm7 = vcmask 36864   ;;  %s1150_s29 = smov 40  }
   0xd   : > { %s431_s30 = scalar_lea.vmem %s1394_s0, %s1052_s27  ;;  %v1099_v27 = vld [vmem:[%s1395_s1] ss:$0 sm:$0xff]  ;;  %vm560_vm8 = vcmask 1044480   ;;  %vm556_vm9 = vcmask 39936   ;;  %vm968_vm13 = vcmask 523264  }
   0xe   : > { %v1237_v0 = vld [vmem:[%s431_s30] sm:$0x1f]  ;;  %502 = vmatpush.msra.mxu0 %v479_v15  ;;  %s435_s30 = scalar_lea.vmem %s1407_s13, %s1052_s27 }
   0xf   : > { %v440_v1 = vsel %vm439_vm0, %v1237_v0, 0.0  ;;  %v1100_v30 = vld [vmem:[%s1396_s2] ss:$0 sm:$0xff] }
  0x10   : > { %441 = vadd.xlane.f32.xlu0 %v440_v1  ;;  %503 = vmatpush.msra.mxu0 %v478_v16  ;;  %v1101_v33 = vld [vmem:[%s1398_s4] ss:$0 sm:$0xff] }
  0x11   : > { %v509_v36 = vld [vmem:[%s1399_s5] sm:$0xff] }
  0x12   : > { %v1108_v3 = vpop.eup %1107  ;;  %504 = vmatpush.msra.mxu0 %v477_v17  ;;  %691 = vmatpush.msra.mxu3 %v509_v36 }
  0x13   : > { %v444_v4 = vmul.f32 32.0, %v1108_v3  ;;  %vm448_vm1 = vweird.f32 %v1108_v3 }
  0x15   : > { %v445_v5 = vsub.f32 1.0, %v444_v4 }
  0x17   : > { %v446_v6 = vmul.f32 %v1108_v3, %v445_v5 }
  0x19   : > { %v447_v7 = vadd.f32 %v1108_v3, %v446_v6 }
  0x1b   : > { %v1241_v8 = vsel %vm448_vm1, %v1108_v3, %v447_v7 }
  0x83   : > { %v442_v9 = vpop.xlane.xlu0 %441 }
  0x84   : > { %v450_v10 = vmul.f32 %v1241_v8, %v442_v9 }
  0x86   : > { %v451_v11 = vsub.f32 %v1237_v0, %v450_v10 }
  0x88   : > { %v452_v12 = vmul.f32 %v451_v11, %v451_v11 }
  0x8a   : > { %v453_v13 = vsel %vm439_vm0, %v452_v12, 0.0 }
  0x8b   : > { %454 = vadd.xlane.f32.xlu0 %v453_v13 }
  0xfe   : > { %v455_v18 = vpop.xlane.xlu0 %454 }
  0xff   : > { %v456_v19 = vmul.f32 %v455_v18, %v1241_v8 }
 0x101   : > { %v457_v20 = vadd.f32 1e-05, %v456_v19 }
 0x103   : > { %1109 = vrsqrt.f32 %v457_v20  ;;  %vm464_vm3 = vweird.f32 %v457_v20 }
 0x109   : > { %v1110_v21 = vpop.eup %1109 }
 0x10a   : > { %v459_v22 = vmul.f32 %v1110_v21, %v457_v20  ;;  %vm465_vm2 = vweird.f32 %v1110_v21 }
 0x10b   : > { %vm466_vm4 = vmor %vm464_vm3, %vm465_vm2 }
 0x10c   : > { %v460_v23 = vmul.f32 %v1110_v21, %v459_v22 }
 0x10e   : > { %v461_v24 = vmul.f32 0.5, %v460_v23 }
 0x110   : > { %v462_v25 = vsub.f32 1.5, %v461_v24 }
 0x112   : > { %v463_v26 = vmul.f32 %v1110_v21, %v462_v25 }
 0x114   : > { %v467_v28 = vsel %vm466_vm4, %v1110_v21, %v463_v26 }
 0x115   : > { %v468_v29 = vmul.f32 %v467_v28, %v451_v11 }
 0x117   : > { %v472_v31 = vmul.f32 %v1099_v27, %v468_v29 }
 0x119   : > { %v476_v32 = vadd.f32 %v1100_v30, %v472_v31  ;;  %v510_v30 = vld [vmem:[%s1399_s5 + $0x8] sm:$0xff] }
 0x11b   : > { %1054 = vmatmul.msk.f32.vlgmr.msra.gmra.mxu0 %vm485_vm5, %v476_v32 }
 0x198   : > { %v506_v34 = vpop.f32.mrf.mxu0 }
 0x199   : > { %v1269_v35 = vadd.f32 %v1101_v33, %v506_v34  ;;  %v511_v33 = vld [vmem:[%s1399_s5 + $0x10] sm:$0xff]  ;;  %v512_v34 = vld [vmem:[%s1399_s5 + $0x18] sm:$0xff] }
 0x19b   : > { %585 = vrot.lane.b32.xlu0 %v1269_v35, %s1140_s14  ;;  %514 = vrot.lane.b32.xlu1 %v1269_v35, %s1141_s15 }
 0x1a3   : > { %789 = vrot.lane.b32.xlu0 %v1269_v35, %s1142_s16 }
 0x1ab   : > { %698 = vrot.lane.b32.xlu0 %v1269_v35, %s1143_s17 }
 0x20d   : > { %v586_v37 = vpop.permute.xlu0 %585  ;;  %v515_v38 = vpop.permute.xlu1 %514 }
 0x20e   : > { %1055 = vmatpush.xpose.msk.msra.mxu1 %vm516_vm6, %v515_v38  ;;  %1059 = vmatpush.xpose.msk.msrb.mxu0 %vm516_vm6, %v586_v37 }
 0x211   : > { %1056 = vmatmul.msk.f32.vlgmr.msra.gmra.mxu1 %vm516_vm6, %v1269_v35 }
 0x212   : > { %668 = vmatpush.msrb.mxu1 %v510_v30 }
 0x214   : > { %781 = vmatpush.msra.mxu1 %v511_v33 }
 0x215   : > { %v790_v39 = vpop.permute.xlu0 %789 }
 0x216   : > { %1070 = vmatpush.xpose.msk.msrb.mxu3 %vm516_vm6, %v790_v39 }
 0x21d   : > { %v699_v40 = vpop.permute.xlu0 %698 }
 0x21e   : > { %1065 = vmatpush.xpose.msk.msra.mxu0 %vm516_vm6, %v699_v40 }
 0x28e   : > { %v538_v41 = vpop.f32.mrf.mxu1 }
 0x28f   : > { %v541_v42 = vmul.f32 0.35355338, %v538_v41 }
 0x291   : > { %v543_v43 = vsel %vm542_vm7, %v541_v42, -inf }
 0x292   : > { %544 = vmax.xlane.f32.xlu1 %v543_v43 }
 0x305   : > { %v545_v44 = vpop.xlane.xlu1 %544 }
 0x306   : > { %v546_v45 = vsub.f32 %v541_v42, %v545_v44  ;;  %v1102_v42 = vld [vmem:[%s1400_s6] ss:$0 sm:$0xff] }
 0x308   : > { %v547_v46 = vmul.f32 1.442695, %v546_v45 }
 0x30a   : > { %1111 = vpow2.f32 %v547_v46 }
 0x310   : > { %v1112_v47 = vpop.eup %1111 }
 0x311   : > { %v549_v48 = vsel %vm542_vm7, %v1112_v47, 0.0 }
 0x312   : > { %550 = vadd.xlane.f32.xlu2 %v549_v48 }
 0x32a   : > { %554 = vrot.lane.b32.xlu2 %v1269_v35, %s1144_s20 }
 0x332   : > { %583 = vrot.lane.b32.xlu2 %v1269_v35, %s1145_s21 }
 0x33a   : > { %787 = vrot.lane.b32.xlu2 %v1269_v35, %s1146_s22 }
 0x342   : > { %696 = vrot.lane.b32.xlu2 %v1269_v35, %s1147_s23 }
 0x385   : > { %v551_v49 = vpop.xlane.xlu2 %550 }
 0x386   : > { %1113 = vrcp.f32 %v551_v49 }
 0x38c   : > { %v1114_v50 = vpop.eup %1113 }
 0x38d   : > { %v555_v51 = vpop.permute.xlu2 %554  ;;  %v553_v52 = vmul.f32 %v1114_v50, %v1112_v47 }
 0x38e   : > { %1057 = vmatpush.msk.msra.mxu2 %vm560_vm8, %v555_v51 }
 0x38f   : > { %1058 = vmatmul.msk.f32.vlgmr.msra.gmra.mxu2 %vm556_vm9, %v553_v52 }
 0x395   : > { %v584_v53 = vpop.permute.xlu2 %583 }
 0x396   : > { %1060 = vmatmul.msk.f32.vlgmr.msrb.gmra.mxu0 %vm516_vm6, %v584_v53  ;;  %v919_v53 = vld [vmem:[%s1403_s9 + $0x18] sm:$0xff] }
 0x39d   : > { %v788_v54 = vpop.permute.xlu2 %787 }
 0x3a5   : > { %v697_v55 = vpop.permute.xlu2 %696 }
 0x3a6   : > { %1066 = vmatmul.msk.f32.vlgmr.msra.gmra.mxu0 %vm516_vm6, %v697_v55  ;;  %v916_v55 = vld [vmem:[%s1403_s9] sm:$0xff] }
 0x412   : > { %v580_v56 = vpop.f32.mrf.mxu2 }
 0x413   : > { %v608_v57 = vpop.f32.mrf.mxu0  ;;  %1064 = vmatmul.msk.f32.vlgmr.msra.gmra.mxu3 %vm516_vm6, %v580_v56 }
 0x414   : > { %v611_v58 = vmul.f32 0.35355338, %v608_v57 }
 0x416   : > { %v612_v59 = vsel %vm542_vm7, %v611_v58, -inf }
 0x417   : > { %613 = vmax.xlane.f32.xlu1 %v612_v59 }
 0x41b   : > { %1071 = vmatmul.msk.f32.vlgmr.msrb.gmra.mxu3 %vm516_vm6, %v788_v54  ;;  %v917_v54 = vld [vmem:[%s1403_s9 + $0x8] sm:$0xff] }
 0x423   : > { %v721_v60 = vpop.f32.mrf.mxu0 }
 0x424   : > { %v724_v61 = vmul.f32 0.35355338, %v721_v60 }
 0x426   : > { %v725_v62 = vsel %vm542_vm7, %v724_v61, -inf }
 0x427   : > { %726 = vmax.xlane.f32.xlu0 %v725_v62 }
 0x48a   : > { %v614_v63 = vpop.xlane.xlu1 %613 }
 0x48b   : > { %v615_v1 = vsub.f32 %v611_v58, %v614_v63 }
 0x48d   : > { %v616_v2 = vmul.f32 1.442695, %v615_v1 }
 0x48f   : > { %1115 = vpow2.f32 %v616_v2  ;;  %v1103_v2 = vld [vmem:[%s1401_s7] ss:$0 sm:$0xff] }
 0x495   : > { %v1116_v3 = vpop.eup %1115 }
 0x496   : > { %v693_v4 = vpop.f32.mrf.mxu3  ;;  %v618_v5 = vsel %vm542_vm7, %v1116_v3, 0.0 }
 0x497   : > { %619 = vadd.xlane.f32.xlu1 %v618_v5 }
 0x49a   : > { %v727_v6 = vpop.xlane.xlu0 %726 }
 0x49b   : > { %v728_v7 = vsub.f32 %v724_v61, %v727_v6 }
 0x49d   : > { %v729_v9 = vmul.f32 1.442695, %v728_v7  ;;  %v963_v7 = vld [vmem:[%s1405_s11 + $0x38] sm:$0xff] }
 0x49e   : > { %v812_v10 = vpop.f32.mrf.mxu3  ;;  %980 = vmatpush.msra.mxu3 %v963_v7 }
 0x49f   : > { %1117 = vpow2.f32 %v729_v9  ;;  %v815_v11 = vmul.f32 0.35355338, %v812_v10  ;;  %v962_v9 = vld [vmem:[%s1405_s11 + $0x30] sm:$0xff]  ;;  %v961_v10 = vld [vmem:[%s1405_s11 + $0x28] sm:$0xff] }
 0x4a0   : > { %981 = vmatpush.msra.mxu3 %v962_v9 }
 0x4a1   : > { %v816_v12 = vsel %vm542_vm7, %v815_v11, -inf }
 0x4a2   : > { %817 = vmax.xlane.f32.xlu2 %v816_v12  ;;  %982 = vmatpush.msra.mxu3 %v961_v10  ;;  %v959_v12 = vld [vmem:[%s1405_s11 + $0x18] sm:$0xff] }
 0x4a5   : > { %v1118_v13 = vpop.eup %1117 }
 0x4a6   : > { %v731_v14 = vsel %vm542_vm7, %v1118_v13, 0.0 }
 0x4a7   : > { %732 = vadd.xlane.f32.xlu1 %v731_v14  ;;  %v957_v14 = vld [vmem:[%s1405_s11 + $0x8] sm:$0xff] }
 0x4ba   : > { %736 = vrot.lane.b32.xlu2 %v1269_v35, %s1148_s24 }
 0x4c0   : > { %623 = vrot.lane.b32.xlu1 %v1269_v35, %s1149_s28 }
 0x4c8   : > { %827 = vrot.lane.b32.xlu1 %v1269_v35, %s1150_s29 }
 0x50a   : > { %v620_v20 = vpop.xlane.xlu1 %619 }
 0x515   : > { %v818_v15 = vpop.xlane.xlu2 %817 }
 0x516   : > { %v819_v16 = vsub.f32 %v815_v11, %v818_v15  ;;  %v960_v11 = vld [vmem:[%s1405_s11 + $0x20] sm:$0xff] }
 0x517   : > { %983 = vmatpush.msra.mxu3 %v960_v11  ;;  %v956_v15 = vld [vmem:[%s1405_s11] sm:$0xff] }
 0x518   : > { %v820_v17 = vmul.f32 1.442695, %v819_v16  ;;  %v1105_v16 = vld [vmem:[%s1404_s10] ss:$0 sm:$0xff] }
 0x519   : > { %984 = vmatpush.msra.mxu3 %v959_v12 }
 0x51a   : > { %1119 = vpow2.f32 %v820_v17  ;;  %v733_v21 = vpop.xlane.xlu1 %732 }
 0x51b   : > { %1121 = vrcp.f32 %v620_v20 }
 0x51c   : > { %1123 = vrcp.f32 %v733_v21 }
 0x51d   : > { %v737_v25 = vpop.permute.xlu2 %736 }
 0x520   : > { %v1120_v18 = vpop.eup %1119 }
 0x521   : > { %v822_v19 = vsel %vm542_vm7, %v1120_v18, 0.0  ;;  %v1122_v22 = vpop.eup %1121 }
 0x522   : > { %823 = vadd.xlane.f32.xlu0 %v822_v19  ;;  %v622_v24 = vmul.f32 %v1122_v22, %v1116_v3  ;;  %v1124_v26 = vpop.eup %1123 }
 0x523   : > { %v735_v27 = vmul.f32 %v1124_v26, %v1118_v13  ;;  %v958_v13 = vld [vmem:[%s1405_s11 + $0x10] sm:$0xff] }
 0x524   : > { %985 = vmatpush.msra.mxu3 %v958_v13 }
 0x526   : > { %986 = vmatpush.msra.mxu3 %v957_v14 }
 0x528   : > { %987 = vmatpush.msra.mxu3 %v956_v15 }
 0x532   : > { %v624_v23 = vpop.permute.xlu1 %623 }
 0x533   : > { %1061 = vmatpush.msk.msrb.mxu2 %vm560_vm8, %v624_v23 }
 0x534   : > { %1062 = vmatmul.msk.f32.vlgmr.msrb.gmra.mxu2 %vm556_vm9, %v622_v24 }
 0x535   : > { %1067 = vmatpush.msk.msra.mxu2 %vm560_vm8, %v737_v25 }
 0x537   : > { %872 = vmatpush.msrb.mxu2 %v512_v34 }
 0x53a   : > { %v828_v28 = vpop.permute.xlu1 %827 }
 0x53b   : > { %1072 = vmatpush.msk.msrb.mxu0 %vm560_vm8, %v828_v28  ;;  %v1106_v28 = vld [vmem:[%s1406_s12] ss:$0 sm:$0xff] }
 0x53c   : > { %1068 = vmatmul.msk.f32.vlgmr.msra.gmra.mxu2 %vm556_vm9, %v735_v27 }
 0x595   : > { %v824_v29 = vpop.xlane.xlu0 %823 }
 0x596   : > { %1125 = vrcp.f32 %v824_v29 }
 0x59c   : > { %v1126_v31 = vpop.eup %1125 }
 0x59d   : > { %v826_v32 = vmul.f32 %v1126_v31, %v1120_v18 }
 0x59f   : > { %1073 = vmatmul.msk.f32.vlgmr.msrb.gmra.mxu0 %vm556_vm9, %v826_v32 }
 0x5b7   : > { %v647_v35 = vpop.f32.mrf.mxu2 }
 0x5b8   : > { %1063 = vmatmul.msk.f32.vlgmr.msrb.gmra.mxu1 %vm516_vm6, %v647_v35 }
 0x5b9   : > { %939 = vmatpush.msrb.mxu1 %v919_v53 }
 0x5bf   : > { %v760_v36 = vpop.f32.mrf.mxu2 }
 0x5c0   : > { %1069 = vmatmul.msk.f32.vlgmr.msra.gmra.mxu1 %vm516_vm6, %v760_v36 }
 0x61c   : > { %v851_v37 = vpop.f32.mrf.mxu0 }
 0x61d   : > { %1074 = vmatmul.msk.f32.vlgmr.msrb.gmra.mxu2 %vm516_vm6, %v851_v37 }
 0x635   : > { %v670_v38 = vpop.f32.mrf.mxu1 }
 0x636   : > { %v694_v40 = vadd.f32 %v693_v4, %v670_v38 }
 0x63d   : > { %v783_v39 = vpop.f32.mrf.mxu1 }
 0x63e   : > { %v786_v41 = vadd.f32 %v783_v39, %v694_v40 }
 0x6a0   : > { %v874_v43 = vpop.f32.mrf.mxu2 }
 0x6a1   : > { %v877_v44 = vadd.f32 %v874_v43, %v786_v41 }
 0x6a3   : > { %v882_v45 = vadd.f32 %v1102_v42, %v877_v44 }
 0x6a5   : > { %v1327_v46 = vadd.f32 %v882_v45, %v1237_v0  ;;  %v918_v0 = vld [vmem:[%s1403_s9 + $0x10] sm:$0xff] }
 0x6a6   : > { %940 = vmatpush.msrb.mxu1 %v918_v0 }
 0x6a7   : > { %v886_v47 = vsel %vm439_vm0, %v1327_v46, 0.0 }
 0x6a8   : > { %887 = vadd.xlane.f32.xlu0 %v886_v47  ;;  %941 = vmatpush.msrb.mxu1 %v917_v54 }
 0x6aa   : > { %942 = vmatpush.msrb.mxu1 %v916_v55 }
 0x71b   : > { %v888_v48 = vpop.xlane.xlu0 %887 }
 0x71c   : > { %v889_v49 = vmul.f32 %v888_v48, %v1241_v8 }
 0x71e   : > { %v890_v50 = vsub.f32 %v1327_v46, %v889_v49 }
 0x720   : > { %v891_v51 = vmul.f32 %v890_v50, %v890_v50 }
 0x722   : > { %v892_v52 = vsel %vm439_vm0, %v891_v51, 0.0 }
 0x723   : > { %893 = vadd.xlane.f32.xlu1 %v892_v52 }
 0x796   : > { %v894_v56 = vpop.xlane.xlu1 %893 }
 0x797   : > { %v895_v57 = vmul.f32 %v894_v56, %v1241_v8  ;;  %v1104_v8 = vld [vmem:[%s1402_s8] ss:$0 sm:$0xff] }
 0x799   : > { %v896_v58 = vadd.f32 1e-05, %v895_v57 }
 0x79b   : > { %1127 = vrsqrt.f32 %v896_v58  ;;  %vm903_vm11 = vweird.f32 %v896_v58 }
 0x7a1   : > { %v1128_v59 = vpop.eup %1127 }
 0x7a2   : > { %v898_v60 = vmul.f32 %v1128_v59, %v896_v58  ;;  %vm904_vm10 = vweird.f32 %v1128_v59 }
 0x7a3   : > { %vm905_vm12 = vmor %vm903_vm11, %vm904_vm10 }
 0x7a4   : > { %v899_v61 = vmul.f32 %v1128_v59, %v898_v60 }
 0x7a6   : > { %v900_v62 = vmul.f32 0.5, %v899_v61 }
 0x7a8   : > { %v901_v63 = vsub.f32 1.5, %v900_v62 }
 0x7aa   : > { %v902_v1 = vmul.f32 %v1128_v59, %v901_v63 }
 0x7ac   : > { %v906_v3 = vsel %vm905_vm12, %v1128_v59, %v902_v1 }
 0x7ad   : > { %v907_v4 = vmul.f32 %v906_v3, %v890_v50 }
 0x7af   : > { %v911_v5 = vmul.f32 %v1103_v2, %v907_v4 }
 0x7b1   : > { %v915_v6 = vadd.f32 %v1104_v8, %v911_v5 }
 0x7b3   : > { %1075 = vmatmul.msk.f32.vlgmr.msrb.gmra.mxu1 %vm485_vm5, %v915_v6 }
 0x830   : > { %v944_v17 = vpop.f32.mrf.mxu1 }
 0x831   : > { %v945_v18 = vadd.f32 %v1105_v16, %v944_v17 }
 0x833   : > { %v948_v19 = vmul.f32 0.044715, %v945_v18  ;;  %v947_v25 = vmul.f32 0.5, %v945_v18 }
 0x835   : > { %v949_v20 = vmul.f32 %v948_v19, %v945_v18 }
 0x837   : > { %v950_v21 = vmul.f32 %v949_v20, %v945_v18 }
 0x839   : > { %v951_v22 = vadd.f32 %v950_v21, %v945_v18 }
 0x83b   : > { %v952_v23 = vmul.f32 0.7978846, %v951_v22 }
 0x83d   : > { %1129 = vtanh.f32 %v952_v23 }
 0x843   : > { %v1130_v24 = vpop.eup %1129 }
 0x844   : > { %v954_v26 = vadd.f32 1.0, %v1130_v24 }
 0x846   : > { %v955_v27 = vmul.f32 %v954_v26, %v947_v25 }
 0x848   : > { %1076 = vmatmul.msk.f32.vlgmr.msra.gmra.mxu3 %vm968_vm13, %v955_v27 }
 0x8cb   : > { %v989_v29 = vpop.f32.mrf.mxu3 }
 0x8cc   : > { %v990_v30 = vadd.f32 %v1106_v28, %v989_v29 }
 0x8ce   : > { %v992_v31 = vadd.f32 %v990_v30, %v1327_v46 }
 0x8d0   : > { %993 = vst.msk [vmem:[%s435_s30] sm:$0x1f] %vm439_vm0, %v992_v31 }
 0x8d1 PF: > { %s23_s25 = sadd.s32 1, %s1137_s25  }
 0x8d2   : > { %p20_p4 = scmp.ge.s32.totalorder %s23_s25, 4  }
 0x8d4   :  { %22 = sbr.rel (!%p20_p4) target bundleno = 1 (0x1), region = 102 }

// kernel: blip_forward.20
= control target key start
LH: loop header
LB: loop body
LE: loop exit
PB: predicated region body
PF: predicated region fallthrough
CT: control target
= control target key end

     0   :  { %vm24_vm0 = vcmask 261120   ;;  %s114_s1 = inlined_call_operand.vmem [shape: f32[32,32], index: 1, kind: input, shape index: {}]   ;;  %s115_s2 = inlined_call_operand.vmem [shape: f32[1,32], index: 2, kind: input, shape index: {}]   ;;  %s116_s0 = inlined_call_operand.vmem [shape: f32[16,32], index: 0, kind: input, shape index: {}]   ;;  %s117_s3 = inlined_call_operand.vmem [shape: f32[16,32], index: 3, kind: output, shape index: {}]  }
   0x1   :  { %v19_v0 = vld [vmem:[%s114_s1 + $0x18] sm:$0xff]  ;;  %v18_v1 = vld [vmem:[%s114_s1 + $0x10] sm:$0xff]  ;;  %v17_v2 = vld [vmem:[%s114_s1 + $0x8] sm:$0xff] }
   0x2   :  { %43 = vmatpush.msra.mxu0 %v19_v0  ;;  %62 = vmatpush.msra.mxu1 %v19_v0  ;;  %v16_v3 = vld [vmem:[%s114_s1] sm:$0xff]  ;;  %v15_v5 = vld [vmem:[%s116_s0 + $0x8] sm:$0xff] }
   0x3   :  { %v14_v4 = vld [vmem:[%s116_s0] sm:$0xff] }
   0x4   :  { %44 = vmatpush.msra.mxu0 %v18_v1  ;;  %63 = vmatpush.msra.mxu1 %v18_v1  ;;  %v66_v6 = vld [vmem:[%s115_s2] ss:$0 sm:$0xff] }
   0x6   :  { %45 = vmatpush.msra.mxu0 %v17_v2  ;;  %64 = vmatpush.msra.mxu1 %v17_v2 }
   0x8   :  { %46 = vmatpush.msra.mxu0 %v16_v3  ;;  %65 = vmatpush.msra.mxu1 %v16_v3 }
   0x9   :  { %60 = vmatmul.msk.f32.vlgmr.msra.gmra.mxu0 %vm24_vm0, %v14_v4  ;;  %61 = vmatmul.msk.f32.vlgmr.msra.gmra.mxu1 %vm24_vm0, %v15_v5 }
  0x86   :  { %v48_v7 = vpop.f32.mrf.mxu0  ;;  %v51_v8 = vpop.f32.mrf.mxu1 }
  0x87   :  { %v49_v9 = vadd.f32 %v66_v6, %v48_v7  ;;  %v52_v10 = vadd.f32 %v66_v6, %v51_v8 }
  0x89   :  { %54 = vst.msk [vmem:[%s117_s3] sm:$0xff] %vm24_vm0, %v49_v9 }
  0x8a   :  { %55 = vst.msk [vmem:[%s117_s3 + $0x8] sm:$0xff] %vm24_vm0, %v52_v10 }

// kernel: blip_forward.22
= control target key start
LH: loop header
LB: loop body
LE: loop exit
PB: predicated region body
PF: predicated region fallthrough
CT: control target
= control target key end

     0   :  { %vm19_vm0 = vcmask 261120   ;;  %v85_v6 = vmov 32.0   ;;  %s128_s0 = inlined_call_operand.vmem [shape: f32[16,32], index: 0, kind: input, shape index: {}]   ;;  %s129_s1 = inlined_call_operand.vmem [shape: f32[1,32], index: 1, kind: input, shape index: {}]   ;;  %s130_s2 = inlined_call_operand.vmem [shape: f32[1,32], index: 2, kind: input, shape index: {}]   ;;  %s131_s3 = inlined_call_operand.vmem [shape: f32[16,32], index: 3, kind: output, shape index: {}]  }
   0x1   :  { %v14_v0 = vld [vmem:[%s128_s0] sm:$0xff]  ;;  %v15_v2 = vld [vmem:[%s128_s0 + $0x8] sm:$0xff]  ;;  %79 = vrcp.f32 %v85_v6 }
   0x2   :  { %v17_v1 = vmul.f32 %v14_v0, %v14_v0  ;;  %v18_v4 = vmul.f32 %v15_v2, %v15_v2  ;;  %v77_v27 = vld [vmem:[%s129_s1] ss:$0 sm:$0xff] }
   0x3   :  { %v78_v30 = vld [vmem:[%s130_s2] ss:$0 sm:$0xff] }
   0x4   :  { %v20_v3 = vsel %vm19_vm0, %v17_v1, 0.0  ;;  %v23_v5 = vsel %vm19_vm0, %v18_v4, 0.0 }
   0x5   :  { %21 = vadd.xlane.f32.xlu0 %v20_v3 }
   0x7   :  { %v80_v7 = vpop.eup %79 }
   0x8   :  { %v27_v8 = vmul.f32 32.0, %v80_v7  ;;  %vm31_vm1 = vweird.f32 %v80_v7 }
   0xa   :  { %v28_v9 = vsub.f32 1.0, %v27_v8 }
   0xc   :  { %v29_v10 = vmul.f32 %v80_v7, %v28_v9 }
   0xd   :  { %24 = vadd.xlane.f32.xlu0 %v23_v5 }
   0xe   :  { %v30_v11 = vadd.f32 %v80_v7, %v29_v10 }
  0x10   :  { %v32_v12 = vsel %vm31_vm1, %v80_v7, %v30_v11 }
  0x78   :  { %v22_v13 = vpop.xlane.xlu0 %21 }
  0x79   :  { %v33_v14 = vmul.f32 %v32_v12, %v22_v13 }
  0x7b   :  { %v35_v15 = vadd.f32 1e-06, %v33_v14 }
  0x7d   :  { %81 = vrsqrt.f32 %v35_v15  ;;  %vm43_vm3 = vweird.f32 %v35_v15 }
  0x80   :  { %v25_v16 = vpop.xlane.xlu0 %24 }
  0x81   :  { %v34_v17 = vmul.f32 %v32_v12, %v25_v16 }
  0x83   :  { %v82_v18 = vpop.eup %81  ;;  %v36_v19 = vadd.f32 1e-06, %v34_v17 }
  0x84   :  { %v38_v20 = vmul.f32 %v82_v18, %v35_v15  ;;  %vm44_vm2 = vweird.f32 %v82_v18 }
  0x85   :  { %83 = vrsqrt.f32 %v36_v19  ;;  %vm45_vm4 = vmor %vm43_vm3, %vm44_vm2  ;;  %vm53_vm6 = vweird.f32 %v36_v19 }
  0x86   :  { %v39_v21 = vmul.f32 %v82_v18, %v38_v20 }
  0x88   :  { %v40_v22 = vmul.f32 0.5, %v39_v21 }
  0x8a   :  { %v41_v23 = vsub.f32 1.5, %v40_v22 }
  0x8b   :  { %v84_v24 = vpop.eup %83 }
  0x8c   :  { %v42_v25 = vmul.f32 %v82_v18, %v41_v23  ;;  %v48_v26 = vmul.f32 %v84_v24, %v36_v19  ;;  %vm54_vm5 = vweird.f32 %v84_v24 }
  0x8d   :  { %vm55_vm7 = vmor %vm53_vm6, %vm54_vm5 }
  0x8e   :  { %v46_v28 = vsel %vm45_vm4, %v82_v18, %v42_v25  ;;  %v49_v29 = vmul.f32 %v84_v24, %v48_v26 }
  0x8f   :  { %v57_v31 = vmul.f32 %v46_v28, %v14_v0 }
  0x90   :  { %v50_v32 = vmul.f32 0.5, %v49_v29 }
  0x91   :  { %v62_v33 = vmul.f32 %v77_v27, %v57_v31 }
  0x92   :  { %v51_v34 = vsub.f32 1.5, %v50_v32 }
  0x93   :  { %v68_v35 = vadd.f32 %v78_v30, %v62_v33 }
  0x94   :  { %v52_v36 = vmul.f32 %v84_v24, %v51_v34 }
  0x95   :  { %70 = vst.msk [vmem:[%s131_s3] sm:$0xff] %vm19_vm0, %v68_v35 }
  0x96   :  { %v56_v37 = vsel %vm55_vm7, %v84_v24, %v52_v36 }
  0x97   :  { %v58_v38 = vmul.f32 %v56_v37, %v15_v2 }
  0x99   :  { %v63_v39 = vmul.f32 %v77_v27, %v58_v38 }
  0x9b   :  { %v69_v40 = vadd.f32 %v78_v30, %v63_v39 }
  0x9d   :  { %71 = vst.msk [vmem:[%s131_s3 + $0x8] sm:$0xff] %vm19_vm0, %v69_v40 }

// kernel: blip_forward.19
= control target key start
LH: loop header
LB: loop body
LE: loop exit
PB: predicated region body
PF: predicated region fallthrough
CT: control target
= control target key end

     0   :  { %s2792_s0 = inlined_call_operand.vmem [shape: f32[2,8,32], index: 0, kind: input, shape index: {}]   ;;  %s2793_s1 = inlined_call_operand.vmem [shape: f32[2,5,32], index: 1, kind: input, shape index: {}]   ;;  %s2794_s2 = inlined_call_operand.vmem [shape: f32[32,96], index: 2, kind: input, shape index: {}]   ;;  %s2795_s3 = inlined_call_operand.vmem [shape: f32[1,96], index: 3, kind: input, shape index: {}]   ;;  %s2796_s4 = inlined_call_operand.vmem [shape: f32[32,32], index: 4, kind: input, shape index: {}]   ;;  %s2797_s5 = inlined_call_operand.vmem [shape: f32[1,32], index: 5, kind: input, shape index: {}]   ;;  %s2798_s6 = inlined_call_operand.vmem [shape: f32[1,32], index: 6, kind: input, shape index: {}]   ;;  %s2799_s7 = inlined_call_operand.vmem [shape: f32[1,32], index: 7, kind: input, shape index: {}]   ;;  %s2800_s8 = inlined_call_operand.vmem [shape: f32[32,32], index: 8, kind: input, shape index: {}]   ;;  %s2801_s9 = inlined_call_operand.vmem [shape: f32[1,32], index: 9, kind: input, shape index: {}]   ;;  %s2802_s10 = inlined_call_operand.vmem [shape: f32[32,64], index: 10, kind: input, shape index: {}]   ;;  %s2803_s11 = inlined_call_operand.vmem [shape: f32[1,64], index: 11, kind: input, shape index: {}]   ;;  %s2804_s12 = inlined_call_operand.vmem [shape: f32[32,32], index: 12, kind: input, shape index: {}]   ;;  %s2805_s13 = inlined_call_operand.vmem [shape: f32[1,32], index: 13, kind: input, shape index: {}]   ;;  %s2806_s14 = inlined_call_operand.hbm [shape: f32[1,32], index: 14, kind: input, shape index: {}]   ;;  %s2807_s15 = inlined_call_operand.hbm [shape: f32[1,32], index: 15, kind: input, shape index: {}]   ;;  %s2808_s16 = inlined_call_operand.vmem [shape: f32[32,64], index: 16, kind: input, shape index: {}]   ;;  %s2809_s17 = inlined_call_operand.hbm [shape: f32[1,64], index: 17, kind: input, shape index: {}]   ;;  %s2810_s18 = inlined_call_operand.vmem [shape: f32[64,32], index: 18, kind: input, shape index: {}]   ;;  %s2811_s19 = inlined_call_operand.hbm [shape: f32[1,32], index: 19, kind: input, shape index: {}]   ;;  %s2812_s20 = inlined_call_operand.hbm [shape: f32[1,32], index: 20, kind: input, shape index: {}]   ;;  %s2813_s21 = inlined_call_operand.hbm [shape: f32[1,32], index: 21, kind: input, shape index: {}]   ;;  %s2814_s22 = inlined_call_operand.vmem [shape: f32[2,8,32], index: 22, kind: output, shape index: {}]  }
   0x1   :  { %2823 = sst [smem:[#allocation16_spill]] %s2792_s0 }
   0x2   :  { %2824 = sst [smem:[#allocation17_spill]] %s2793_s1 }
   0x3   :  { %2825 = sst [smem:[#allocation18_spill]] %s2794_s2 }
   0x4   :  { %2826 = sst [smem:[#allocation19_spill]] %s2795_s3 }
   0x5   :  { %2827 = sst [smem:[#allocation20_spill]] %s2796_s4 }
   0x6   :  { %2828 = sst [smem:[#allocation21_spill]] %s2797_s5 }
   0x7   :  { %2829 = sst [smem:[#allocation22_spill]] %s2798_s6 }
   0x8   :  { %2830 = sst [smem:[#allocation23_spill]] %s2806_s14 }
   0x9   :  { %2831 = sst [smem:[#allocation24_spill]] %s2807_s15 }
   0xa   :  { %2832 = sst [smem:[#allocation25_spill]] %s2811_s19 }
   0xb   :  { %27 = vsyncpa [#allocation3], 0 }
   0xc   :  { %28 = vsyncpa [#allocation5], 0 }
   0xd   :  { %29 = vsyncpa [#allocation8], 0 }
   0xe   :  { %30 = vsyncpa [#allocation11], 0  ;;  %s2462_s3 = smov 0  }
   0xf LB: > { %s2833_s15 = sld [smem:[#allocation24_spill]]  ;;  %s2471_s4 = sadd.s32 4294967295, %s2327_s3   ;;  %s2327_s3 = sphi %s2462_s3, %s36_s3  }
  0x10   : > { %p1928_p0 = scmp.ge.s32.totalorder %s2327_s3, 1  ;;  %p539_p1 = scmp.lt.s32.totalorder %s2327_s3, 3 }
  0x11   : > { %p2032_p2 = scmp.eq.s32.totalorder %s2471_s4, 0  ;;  %s2329_s23 = smov [#allocation4]  }
  0x12   : > { %p2476_p3 = pnand %p1928_p0, %p539_p1  ;;  %s601_s1 = sshll.u32 %s2329_s23, 4  ;;  %s602_s1 = int_to_ptr.vmem [resolvable:$true] %s601_s1 }
  0x13   : > { %s2835_s19 = sld [smem:[#allocation25_spill]]  ;;  %s2330_s28 = smov [#allocation7]  }
  0x14   : > { %p2013_p4 = pneg %p2476_p3  ;;  %s2836_s14 = sld [smem:[#allocation23_spill]] }
  0x15   : > { %s599_s30 = sshll.u32 %s2833_s15, 4  ;;  %s631_s29 = sshll.u32 %s2330_s28, 4  ;;  %s600_s30 = int_to_ptr.hbm [resolvable:$true] %s599_s30  ;;  %s632_s29 = int_to_ptr.vmem [resolvable:$true] %s631_s29 }
  0x16   : > { %p2490_p5 = pnand %p2032_p2, %p2013_p4  ;;  %s2331_s23 = smov [#allocation2]  }
  0x17   : > { %s589_s5 = sshll.u32 %s2331_s23, 4  ;;  %s614_s26 = sshll.u32 %s2809_s17, 4  ;;  %s590_s5 = int_to_ptr.vmem [resolvable:$true] %s589_s5  ;;  %s615_s26 = int_to_ptr.hbm [resolvable:$true] %s614_s26 }
  0x18   : > { %2019 = dma.hbm_to_vmem [thread:$0]  (!%p2490_p5), %s600_s30, 16, %s602_s1, [#allocation5]  }
  0x19   : > { %s629_s6 = sshll.u32 %s2835_s19, 4  ;;  %s641_s15 = sshll.u32 %s2812_s20, 4  ;;  %s630_s6 = int_to_ptr.hbm [resolvable:$true] %s629_s6  ;;  %s642_s15 = int_to_ptr.hbm [resolvable:$true] %s641_s15 }
  0x1a   : > { %s587_s2 = sshll.u32 %s2836_s14, 4  ;;  %s2332_s19 = smov [#allocation6]   ;;  %s588_s2 = int_to_ptr.hbm [resolvable:$true] %s587_s2 }
  0x1b   : > { %2025 = dma.hbm_to_vmem [thread:$0]  (!%p2490_p5), %s630_s6, 16, %s632_s29, [#allocation8]  }
  0x1c   : > { %2016 = dma.hbm_to_vmem [thread:$0]  (!%p2490_p5), %s588_s2, 16, %s590_s5, [#allocation3]  }
  0x1d   : > { %s616_s30 = sshll.u32 %s2332_s19, 4  ;;  %s2333_s1 = smov [#allocation9]   ;;  %s617_s30 = int_to_ptr.vmem [resolvable:$true] %s616_s30 }
  0x1e   : > { %2022 = dma.hbm_to_vmem [thread:$0]  (!%p2490_p5), %s615_s26, 16, %s617_s30, [#allocation5]  }
  0x1f   : > { %s643_s6 = sshll.u32 %s2333_s1, 4  ;;  %s653_s24 = sshll.u32 %s2813_s21, 4  ;;  %s644_s6 = int_to_ptr.vmem [resolvable:$true] %s643_s6  ;;  %s654_s24 = int_to_ptr.hbm [resolvable:$true] %s653_s24 }
  0x20   : > { %2028 = dma.hbm_to_vmem [thread:$0]  (!%p2490_p5), %s642_s15, 16, %s644_s6, [#allocation8]  }
  0x21   : > { %s2334_s2 = smov [#allocation10]   ;;  %682 = sbr.rel (%p2476_p3) target bundleno = 3909 (0xf45), region = 108 }
  0x22   : > { %s655_s14 = sshll.u32 %s2334_s2, 4  ;;  %s656_s14 = int_to_ptr.vmem [resolvable:$true] %s655_s14 }
  0x23   : > { %2031 = dma.hbm_to_vmem [thread:$0]  (!%p2490_p5), %s654_s24, 16, %s656_s14, [#allocation11]  }
  0x26   : > { %2310 = dma.done.wait (%p2032_p2), [#allocation3], 16  }
  0x27   : > { %2312 = vsyncadd (%p2032_p2), [#allocation3], 4294967280 }
  0x28   : > { %2314 = dma.done.wait (%p2032_p2), [#allocation5], 32  }
  0x29   : > { %2316 = vsyncadd (%p2032_p2), [#allocation5], 4294967264 }
  0x2a   : > { %2318 = dma.done.wait (%p2032_p2), [#allocation8], 32  }
  0x2b   : > { %2320 = vsyncadd (%p2032_p2), [#allocation8], 4294967264 }
  0x2c   : > { %2322 = dma.done.wait (%p2032_p2), [#allocation11], 16  }
  0x2d   : > { %2324 = vsyncadd (%p2032_p2), [#allocation11], 4294967280  ;;  %p772_p6 = scmp.lt.s32.totalorder %s2471_s4, 1  ;;  %s2838_s27 = sld [smem:[#allocation18_spill]]  ;;  %vm794_vm0 = vcmask 261120   ;;  %vm825_vm1 = vcmask 64512  }
  0x2e   : > { %s2839_s30 = sld [smem:[#allocation16_spill]]  ;;  %s2818_s19 = smov 88   ;;  %vm1318_vm6 = vcmask 39936   ;;  %vm1335_vm7 = vcmask 1044480   ;;  %vm1743_vm11 = vcmask 523264  }
  0x2f   : > { %s2851_s4 = smov (!%p772_p6, %s2471_s4), 1  ;;  %s2840_s14 = sld [smem:[#allocation19_spill]] }
  0x30   : > { %s2535_s15 = sshll.u32 %s2851_s4, 3  ;;  %s2822_s0 = smov 96  }
  0x31   : > { %s2337_s5 = smov 120   ;;  %s2817_s25 = smov 72  }
  0x32   : > { %s2820_s26 = smov 104   ;;  %s2819_s28 = smov 80  }
  0x33   : > { %v789_v0 = vld [vmem:[%s2838_s27 + $0x18] sm:$0xff]  ;;  %v788_v1 = vld [vmem:[%s2838_s27 + $0x10] sm:$0xff]  ;;  %v787_v2 = vld [vmem:[%s2838_s27 + $0x8] sm:$0xff]  ;;  %s2841_s4 = sld [smem:[#allocation20_spill]]  ;;  %s2343_s23 = smov 48  }
  0x34   : > { %s775_s1 = scalar_lea.vmem %s2839_s30, %s2535_s15  ;;  %810 = vmatpush.msra.mxu0 %v789_v0  ;;  %v786_v3 = vld [vmem:[%s2838_s27] sm:$0xff]  ;;  %s2341_s30 = smov 64  }
  0x35   : > { %v2553_v4 = vld [vmem:[%s775_s1] sm:$0xff]  ;;  %s2342_s1 = smov 112   ;;  %s2344_s24 = smov 56  }
  0x36   : > { %811 = vmatpush.msra.mxu0 %v788_v1  ;;  %v2070_v5 = vld [vmem:[%s2840_s14] ss:$0 sm:$0xff]  ;;  %s2345_s2 = smov 40   ;;  %s2844_s14 = sld [smem:[#allocation22_spill]] }
  0x38   : > { %812 = vmatpush.msra.mxu0 %v787_v2 }
  0x39   : > { %v818_v26 = vld [vmem:[%s2841_s4] sm:$0xff]  ;;  %v819_v2 = vld [vmem:[%s2841_s4 + $0x8] sm:$0xff] }
  0x3a   : > { %813 = vmatpush.msra.mxu0 %v786_v3  ;;  %v820_v3 = vld [vmem:[%s2841_s4 + $0x10] sm:$0xff] }
  0x3b   : > { %1946 = vmatmul.msk.f32.vlgmr.msra.gmra.mxu0 %vm794_vm0, %v2553_v4 }
  0xb8   : > { %v815_v6 = vpop.f32.mrf.mxu0 }
  0xb9   : > { %v2560_v7 = vadd.f32 %v2070_v5, %v815_v6 }
  0xbb   : > { %890 = vrot.lane.b32.xlu2 %v2560_v7, %s2818_s19  ;;  %823 = vrot.lane.b32.xlu0 %v2560_v7, %s2822_s0  ;;  %s2843_s19 = sld [smem:[#allocation17_spill]] }
  0xc3   : > { %888 = vrot.lane.b32.xlu2 %v2560_v7, %s2337_s5 }
  0xcb   : > { %1092 = vrot.lane.b32.xlu2 %v2560_v7, %s2817_s25  ;;  %s2845_s25 = smov 96  }
  0xd3   : > { %1090 = vrot.lane.b32.xlu2 %v2560_v7, %s2820_s26  ;;  %s2847_s26 = smov 80  }
  0xdb   : > { %1002 = vrot.lane.b32.xlu2 %v2560_v7, %s2819_s28  ;;  %s779_s28 = scalar_lea.vmem %s2843_s19, %s2535_s15  ;;  %s783_s19 = scalar_lea.vmem %s2814_s22, %s2535_s15 }
 0x115   : > { %v891_v8 = vpop.permute.xlu2 %890 }
 0x11d   : > { %v889_v9 = vpop.permute.xlu2 %888 }
 0x125   : > { %v1093_v10 = vpop.permute.xlu2 %1092 }
 0x12d   : > { %v1091_v11 = vpop.permute.xlu2 %1090  ;;  %v824_v12 = vpop.permute.xlu0 %823 }
 0x12e   : > { %1947 = vmatpush.xpose.msk.msra.mxu1 %vm825_vm1, %v824_v12 }
 0x131   : > { %1948 = vmatmul.msk.f32.vlgmr.msra.gmra.mxu1 %vm825_vm1, %v2560_v7 }
 0x132   : > { %972 = vmatpush.msrb.mxu1 %v819_v2 }
 0x134   : > { %1084 = vmatpush.msra.mxu1 %v820_v3 }
 0x135   : > { %v1003_v13 = vpop.permute.xlu2 %1002 }
 0x136   : > { %1955 = vmatpush.xpose.msk.msrb.mxu0 %vm825_vm1, %v1003_v13 }
 0x1ae   : > { %v847_v14 = vpop.f32.mrf.mxu1 }
 0x1af   : > { %v850_v15 = vmul.f32 0.35355338, %v847_v14 }
 0x1b1   : > { %v851_v16 = vsel %vm825_vm1, %v850_v15, -inf }
 0x1b2   : > { %852 = vmax.xlane.f32.xlu0 %v851_v16 }
 0x225   : > { %v853_v17 = vpop.xlane.xlu0 %852 }
 0x226   : > { %v854_v18 = vsub.f32 %v850_v15, %v853_v17 }
 0x228   : > { %v855_v19 = vmul.f32 1.442695, %v854_v18 }
 0x22a   : > { %2083 = vpow2.f32 %v855_v19  ;;  %v2346_v19 = vmov 32.0  }
 0x230   : > { %v2084_v20 = vpop.eup %2083 }
 0x231   : > { %v857_v21 = vsel %vm825_vm1, %v2084_v20, 0.0 }
 0x232   : > { %858 = vadd.xlane.f32.xlu1 %v857_v21 }
 0x24b   : > { %862 = vrot.lane.b32.xlu1 %v2560_v7, %s2341_s30  ;;  %s2842_s30 = sld [smem:[#allocation21_spill]] }
 0x251   : > { %v2071_v13 = vld [vmem:[%s2842_s30] ss:$0 sm:$0xff] }
 0x253   : > { %1000 = vrot.lane.b32.xlu1 %v2560_v7, %s2342_s1 }
 0x2a5   : > { %v859_v22 = vpop.xlane.xlu1 %858 }
 0x2a6   : > { %2085 = vrcp.f32 %v859_v22 }
 0x2ac   : > { %v2086_v23 = vpop.eup %2085 }
 0x2ad   : > { %v861_v25 = vmul.f32 %v2086_v23, %v2084_v20 }
 0x2bd   : > { %v863_v24 = vpop.permute.xlu1 %862 }
 0x2be   : > { %883 = vmatpush.msra.mxu3 %v863_v24 }
 0x2bf   : > { %1949 = vmatmul.msk.f32.vlgmr.msra.gmra.mxu3 %vm825_vm1, %v861_v25 }
 0x2c0   : > { %1950 = vmatpush.xpose.msk.msrb.mxu3 %vm825_vm1, %v891_v8 }
 0x2c4   : > { %995 = vmatpush.msra.mxu3 %v818_v26 }
 0x2c5   : > { %v1001_v27 = vpop.permute.xlu1 %1000 }
 0x2c6   : > { %1956 = vmatmul.msk.f32.vlgmr.msrb.gmra.mxu0 %vm825_vm1, %v1001_v27 }
 0x2c7   : > { %1951 = vmatmul.msk.f32.vlgmr.msrb.gmra.mxu3 %vm825_vm1, %v889_v9 }
 0x2c8   : > { %1959 = vmatpush.xpose.msk.msrb.mxu3 %vm825_vm1, %v1093_v10 }
 0x342   : > { %v885_v28 = vpop.f32.mrf.mxu3 }
 0x343   : > { %1954 = vmatmul.msk.f32.vlgmr.msra.gmra.mxu3 %vm825_vm1, %v885_v28  ;;  %v1025_v29 = vpop.f32.mrf.mxu0 }
 0x344   : > { %v1028_v30 = vmul.f32 0.35355338, %v1025_v29 }
 0x346   : > { %v1029_v31 = vsel %vm825_vm1, %v1028_v30, -inf }
 0x347   : > { %1030 = vmax.xlane.f32.xlu1 %v1029_v31  ;;  %v1258_v31 = vld [vmem:[%s2802_s10 + $0x10] sm:$0xff] }
 0x34a   : > { %v913_v32 = vpop.f32.mrf.mxu3 }
 0x34b   : > { %v916_v33 = vmul.f32 0.35355338, %v913_v32  ;;  %1960 = vmatmul.msk.f32.vlgmr.msrb.gmra.mxu3 %vm825_vm1, %v1091_v11  ;;  %v1257_v32 = vld [vmem:[%s2802_s10 + $0x8] sm:$0xff] }
 0x34d   : > { %v917_v34 = vsel %vm825_vm1, %v916_v33, -inf }
 0x34e   : > { %918 = vmax.xlane.f32.xlu2 %v917_v34  ;;  %v785_v34 = vld [vmem:[%s779_s28] sm:$0x1f]  ;;  %s2848_s28 = smov 88  }
 0x360   : > { %1040 = vrot.lane.b32.xlu1 %v2560_v7, %s2343_s23 }
 0x3ba   : > { %v1031_v39 = vpop.xlane.xlu1 %1030 }
 0x3bb   : > { %v1032_v42 = vsub.f32 %v1028_v30, %v1031_v39  ;;  %v1259_v30 = vld [vmem:[%s2802_s10 + $0x18] sm:$0xff] }
 0x3bc   : > { %1279 = vmatpush.msra.mxu3 %v1259_v30 }
 0x3bd   : > { %v1033_v44 = vmul.f32 1.442695, %v1032_v42 }
 0x3be   : > { %1280 = vmatpush.msra.mxu3 %v1258_v31 }
 0x3c0   : > { %1281 = vmatpush.msra.mxu3 %v1257_v32 }
 0x3c1   : > { %v919_v35 = vpop.xlane.xlu2 %918 }
 0x3c2   : > { %v920_v37 = vsub.f32 %v916_v33, %v919_v35  ;;  %v1256_v33 = vld [vmem:[%s2802_s10] sm:$0xff]  ;;  %v1228_v35 = vld [vmem:[%s2800_s8 + $0x18] sm:$0xff] }
 0x3c3   : > { %1282 = vmatpush.msra.mxu3 %v1256_v33 }
 0x3c4   : > { %v921_v38 = vmul.f32 1.442695, %v920_v37  ;;  %1964 = vmatmul.msk.f32.vlgmr.msra.gmra.mxu3 %vm794_vm0, %v785_v34  ;;  %v1226_v37 = vld [vmem:[%s2800_s8 + $0x8] sm:$0xff] }
 0x3c6   : > { %v2596_v36 = vpop.f32.mrf.mxu3  ;;  %2087 = vpow2.f32 %v921_v38  ;;  %v1225_v38 = vld [vmem:[%s2800_s8] sm:$0xff] }
 0x3c7   : > { %2089 = vpow2.f32 %v1033_v44 }
 0x3cc   : > { %v2088_v45 = vpop.eup %2087 }
 0x3cd   : > { %v923_v46 = vsel %vm825_vm1, %v2088_v45, 0.0  ;;  %v2090_v47 = vpop.eup %2089 }
 0x3ce   : > { %v1115_v40 = vpop.f32.mrf.mxu3  ;;  %v1035_v48 = vsel %vm825_vm1, %v2090_v47, 0.0 }
 0x3cf   : > { %v1118_v41 = vmul.f32 0.35355338, %v1115_v40 }
 0x3d1   : > { %v1119_v43 = vsel %vm825_vm1, %v1118_v41, -inf }
 0x3d2   : > { %1120 = vmax.xlane.f32.xlu0 %v1119_v43  ;;  %v1041_v59 = vpop.permute.xlu1 %1040 }
 0x3da   : > { %924 = vadd.xlane.f32.xlu0 %v923_v46 }
 0x3e2   : > { %1036 = vadd.xlane.f32.xlu0 %v1035_v48  ;;  %v2072_v48 = vld [vmem:[%s2844_s14] ss:$0 sm:$0xff] }
 0x3f6   : > { %928 = vrot.lane.b32.xlu0 %v2560_v7, %s2344_s24 }
 0x445   : > { %v1121_v49 = vpop.xlane.xlu0 %1120 }
 0x446   : > { %v1122_v50 = vsub.f32 %v1118_v41, %v1121_v49 }
 0x448   : > { %v1123_v51 = vmul.f32 1.442695, %v1122_v50 }
 0x44a   : > { %2091 = vpow2.f32 %v1123_v51  ;;  %v2073_v51 = vld [vmem:[%s2799_s7] ss:$0 sm:$0xff] }
 0x44d   : > { %v925_v54 = vpop.xlane.xlu0 %924 }
 0x44e   : > { %2093 = vrcp.f32 %v925_v54  ;;  %v2074_v54 = vld [vmem:[%s2803_s11] ss:$0 sm:$0xff] }
 0x450   : > { %v2092_v52 = vpop.eup %2091 }
 0x451   : > { %v1125_v53 = vsel %vm825_vm1, %v2092_v52, 0.0 }
 0x452   : > { %1126 = vadd.xlane.f32.xlu2 %v1125_v53 }
 0x454   : > { %v2094_v56 = vpop.eup %2093 }
 0x455   : > { %v1037_v55 = vpop.xlane.xlu0 %1036  ;;  %v927_v58 = vmul.f32 %v2094_v56, %v2088_v45 }
 0x456   : > { %2095 = vrcp.f32 %v1037_v55  ;;  %v1284_v55 = vpop.f32.mrf.mxu3 }
 0x457   : > { %v2672_v56 = vadd.f32 %v2074_v54, %v1284_v55 }
 0x45c   : > { %v2096_v60 = vpop.eup %2095 }
 0x45d   : > { %v1039_v61 = vmul.f32 %v2096_v60, %v2090_v47 }
 0x468   : > { %v929_v57 = vpop.permute.xlu0 %928 }
 0x469   : > { %949 = vmatpush.msra.mxu2 %v929_v57  ;;  %v2075_v57 = vld [vmem:[%s2801_s9] ss:$0 sm:$0xff] }
 0x46a   : > { %1130 = vrot.lane.b32.xlu2 %v2560_v7, %s2345_s2  ;;  %1952 = vmatmul.msk.f32.vlgmr.msra.gmra.mxu2 %vm825_vm1, %v927_v58  ;;  %v821_v7 = vld [vmem:[%s2841_s4 + $0x18] sm:$0xff]  ;;  %s2849_s2 = smov 72  }
 0x46b   : > { %1061 = vmatpush.msrb.mxu2 %v1041_v59 }
 0x46d   : > { %1174 = vmatpush.msra.mxu2 %v821_v7 }
 0x472   : > { %1957 = vmatmul.msk.f32.vlgmr.msrb.gmra.mxu2 %vm825_vm1, %v1039_v61 }
 0x4c5   : > { %v1127_v62 = vpop.xlane.xlu2 %1126 }
 0x4c6   : > { %2097 = vrcp.f32 %v1127_v62 }
 0x4c7   : > { %2099 = vrcp.f32 %v2346_v19  ;;  %v1287_v19 = vld [vmem:[%s2804_s12] sm:$0xff] }
 0x4cc   : > { %v2098_v63 = vpop.eup %2097 }
 0x4cd   : > { %v1129_v0 = vmul.f32 %v2098_v63, %v2092_v52  ;;  %v1131_v1 = vpop.permute.xlu2 %1130  ;;  %v2100_v20 = vpop.eup %2099 }
 0x4ce   : > { %1151 = vmatpush.msra.mxu0 %v1131_v1  ;;  %v1192_v21 = vmul.f32 32.0, %v2100_v20  ;;  %vm1196_vm2 = vweird.f32 %v2100_v20 }
 0x4cf   : > { %1961 = vmatmul.msk.f32.vlgmr.msra.gmra.mxu0 %vm825_vm1, %v1129_v0 }
 0x4d0   : > { %v1193_v22 = vsub.f32 1.0, %v1192_v21  ;;  %1965 = vmatpush.xpose.msk.msrb.mxu0 %vm825_vm1, %v2672_v56 }
 0x4d2   : > { %v1194_v23 = vmul.f32 %v2100_v20, %v1193_v22 }
 0x4d4   : > { %v1195_v24 = vadd.f32 %v2100_v20, %v1194_v23 }
 0x4d6   : > { %v2625_v25 = vsel %vm1196_vm2, %v2100_v20, %v1195_v24 }
 0x4ed   : > { %v951_v5 = vpop.f32.mrf.mxu2 }
 0x4ee   : > { %1953 = vmatmul.msk.f32.vlgmr.msrb.gmra.mxu1 %vm825_vm1, %v951_v5 }
 0x4ef   : > { %1248 = vmatpush.msrb.mxu1 %v1228_v35 }
 0x4f5   : > { %v1063_v6 = vpop.f32.mrf.mxu2 }
 0x4f6   : > { %1958 = vmatmul.msk.f32.vlgmr.msra.gmra.mxu1 %vm825_vm1, %v1063_v6 }
 0x54c   : > { %v1153_v8 = vpop.f32.mrf.mxu0 }
 0x54d   : > { %1962 = vmatmul.msk.f32.vlgmr.msra.gmra.mxu2 %vm825_vm1, %v1153_v8 }
 0x56b   : > { %v974_v9 = vpop.f32.mrf.mxu1 }
 0x56c   : > { %v998_v11 = vadd.f32 %v2596_v36, %v974_v9  ;;  %v1227_v36 = vld [vmem:[%s2800_s8 + $0x10] sm:$0xff] }
 0x56d   : > { %1249 = vmatpush.msrb.mxu1 %v1227_v36 }
 0x56f   : > { %1250 = vmatpush.msrb.mxu1 %v1226_v37 }
 0x571   : > { %1251 = vmatpush.msrb.mxu1 %v1225_v38 }
 0x573   : > { %v1086_v10 = vpop.f32.mrf.mxu1 }
 0x574   : > { %v1089_v12 = vadd.f32 %v1086_v10, %v998_v11 }
 0x5d0   : > { %v1176_v14 = vpop.f32.mrf.mxu2 }
 0x5d1   : > { %v1179_v15 = vadd.f32 %v1176_v14, %v1089_v12 }
 0x5d3   : > { %v1184_v16 = vadd.f32 %v2071_v13, %v1179_v15 }
 0x5d5   : > { %v1185_v17 = vadd.f32 %v1184_v16, %v2553_v4 }
 0x5d7   : > { %v1188_v18 = vsel %vm794_vm0, %v1185_v17, 0.0 }
 0x5d8   : > { %1189 = vadd.xlane.f32.xlu0 %v1188_v18 }
 0x64b   : > { %v1190_v26 = vpop.xlane.xlu0 %1189 }
 0x64c   : > { %v1198_v27 = vmul.f32 %v2625_v25, %v1190_v26 }
 0x64e   : > { %v1199_v28 = vsub.f32 %v1185_v17, %v1198_v27 }
 0x650   : > { %v1200_v29 = vmul.f32 %v1199_v28, %v1199_v28 }
 0x652   : > { %v1201_v4 = vsel %vm794_vm0, %v1200_v29, 0.0 }
 0x653   : > { %1202 = vadd.xlane.f32.xlu1 %v1201_v4 }
 0x66c   : > { %1360 = vrot.lane.b32.xlu1 %v2672_v56, %s2337_s5 }
 0x674   : > { %1473 = vrot.lane.b32.xlu1 %v2672_v56, %s2342_s1 }
 0x6c6   : > { %v1203_v39 = vpop.xlane.xlu1 %1202 }
 0x6c7   : > { %v1204_v40 = vmul.f32 %v1203_v39, %v2625_v25 }
 0x6c9   : > { %v1205_v41 = vadd.f32 1e-12, %v1204_v40 }
 0x6cb   : > { %2101 = vrsqrt.f32 %v1205_v41  ;;  %vm1212_vm4 = vweird.f32 %v1205_v41 }
 0x6d1   : > { %v2102_v42 = vpop.eup %2101 }
 0x6d2   : > { %v1207_v43 = vmul.f32 %v2102_v42, %v1205_v41  ;;  %vm1213_vm3 = vweird.f32 %v2102_v42 }
 0x6d3   : > { %vm1214_vm5 = vmor %vm1212_vm4, %vm1213_vm3 }
 0x6d4   : > { %v1208_v44 = vmul.f32 %v2102_v42, %v1207_v43 }
 0x6d6   : > { %v1209_v45 = vmul.f32 0.5, %v1208_v44 }
 0x6d8   : > { %v1210_v46 = vsub.f32 1.5, %v1209_v45 }
 0x6da   : > { %v1211_v47 = vmul.f32 %v2102_v42, %v1210_v46 }
 0x6dc   : > { %v1215_v49 = vsel %vm1214_vm5, %v2102_v42, %v1211_v47 }
 0x6dd   : > { %v1216_v50 = vmul.f32 %v1215_v49, %v1199_v28 }
 0x6de   : > { %v1361_v60 = vpop.permute.xlu1 %1360 }
 0x6df   : > { %v1220_v52 = vmul.f32 %v2072_v48, %v1216_v50  ;;  %1969 = vmatpush.xpose.msk.msra.mxu1 %vm825_vm1, %v1361_v60  ;;  %v1288_v50 = vld [vmem:[%s2804_s12 + $0x8] sm:$0xff] }
 0x6e0   : > { %1443 = vmatpush.msra.mxu0 %v1288_v50 }
 0x6e1   : > { %v2665_v53 = vadd.f32 %v2073_v51, %v1220_v52  ;;  %v1289_v51 = vld [vmem:[%s2804_s12 + $0x10] sm:$0xff] }
 0x6e3   : > { %1963 = vmatmul.msk.f32.vlgmr.msrb.gmra.mxu1 %vm794_vm0, %v2665_v53 }
 0x6e6   : > { %v1474_v61 = vpop.permute.xlu1 %1473 }
 0x6e7   : > { %1975 = vmatpush.xpose.msk.msrb.mxu1 %vm825_vm1, %v1474_v61 }
 0x760   : > { %v1253_v58 = vpop.f32.mrf.mxu1 }
 0x761   : > { %v1254_v59 = vadd.f32 %v2075_v57, %v1253_v58 }
 0x763   : > { %1966 = vmatmul.msk.f32.vlgmr.msrb.gmra.mxu0 %vm825_vm1, %v1254_v59 }
 0x764   : > { %1556 = vmatpush.msrb.mxu0 %v1289_v51  ;;  %v2080_v51 = vld [vmem:[#allocation7] ss:$0 sm:$0xff] }
 0x7e0   : > { %v1314_v62 = vpop.f32.mrf.mxu0 }
 0x7e1   : > { %v1317_v63 = vmul.f32 0.35355338, %v1314_v62 }
 0x7e3   : > { %v1319_v0 = vsel %vm1318_vm6, %v1317_v63, -inf }
 0x7e4   : > { %1320 = vmax.xlane.f32.xlu2 %v1319_v0 }
 0x7fc   : > { %1358 = vrot.lane.b32.xlu2 %v1254_v59, %s2337_s5  ;;  %s2846_s5 = smov 104  }
 0x804   : > { %1471 = vrot.lane.b32.xlu2 %v1254_v59, %s2342_s1 }
 0x857   : > { %v1321_v1 = vpop.xlane.xlu2 %1320 }
 0x858   : > { %v1322_v2 = vsub.f32 %v1317_v63, %v1321_v1  ;;  %v2076_v1 = vld [vmem:[%s2805_s13] ss:$0 sm:$0xff] }
 0x85a   : > { %v1323_v3 = vmul.f32 1.442695, %v1322_v2 }
 0x85c   : > { %2103 = vpow2.f32 %v1323_v3 }
 0x85f   : > { %v1359_v5 = vpop.permute.xlu2 %1358 }
 0x860   : > { %1970 = vmatmul.msk.f32.vlgmr.msra.gmra.mxu1 %vm825_vm1, %v1359_v5 }
 0x862   : > { %v2104_v6 = vpop.eup %2103 }
 0x863   : > { %v1325_v7 = vsel %vm1318_vm6, %v2104_v6, 0.0 }
 0x864   : > { %1326 = vadd.xlane.f32.xlu0 %v1325_v7 }
 0x867   : > { %v1472_v8 = vpop.permute.xlu2 %1471 }
 0x868   : > { %1976 = vmatmul.msk.f32.vlgmr.msrb.gmra.mxu1 %vm825_vm1, %v1472_v8 }
 0x878   : > { %1330 = vrot.lane.b32.xlu0 %v2672_v56, %s2845_s25 }
 0x880   : > { %1564 = vrot.lane.b32.xlu0 %v2672_v56, %s2846_s5 }
 0x888   : > { %1562 = vrot.lane.b32.xlu0 %v1254_v59, %s2846_s5  ;;  %v1290_v59 = vld [vmem:[%s2804_s12 + $0x18] sm:$0xff] }
 0x8d7   : > { %v1327_v10 = vpop.xlane.xlu0 %1326 }
 0x8d8   : > { %2105 = vrcp.f32 %v1327_v10 }
 0x8dd   : > { %v1383_v9 = vpop.f32.mrf.mxu1 }
 0x8de   : > { %v1386_v11 = vmul.f32 0.35355338, %v1383_v9  ;;  %v2106_v15 = vpop.eup %2105 }
 0x8df   : > { %v1329_v17 = vmul.f32 %v2106_v15, %v2104_v6  ;;  %v1691_v15 = vld [vmem:[%s2808_s16] sm:$0xff] }
 0x8e0   : > { %v1387_v12 = vsel %vm1318_vm6, %v1386_v11, -inf }
 0x8e1   : > { %1388 = vmax.xlane.f32.xlu0 %v1387_v12 }
 0x8e5   : > { %v1496_v13 = vpop.f32.mrf.mxu1 }
 0x8e6   : > { %v1499_v14 = vmul.f32 0.35355338, %v1496_v13  ;;  %v1694_v13 = vld [vmem:[%s2808_s16 + $0x18] sm:$0xff] }
 0x8e8   : > { %v1500_v16 = vsel %vm1318_vm6, %v1499_v14, -inf }
 0x8e9   : > { %1501 = vmax.xlane.f32.xlu1 %v1500_v16 }
 0x8ea   : > { %v1331_v18 = vpop.permute.xlu0 %1330 }
 0x8eb   : > { %1967 = vmatpush.msk.msrb.mxu2 %vm1335_vm7, %v1331_v18 }
 0x8ec   : > { %1968 = vmatmul.msk.f32.vlgmr.msrb.gmra.mxu2 %vm1318_vm6, %v1329_v17 }
 0x8ed   : > { %1466 = vmatpush.msra.mxu2 %v1287_v19 }
 0x8f2   : > { %v1565_v20 = vpop.permute.xlu0 %1564 }
 0x8f3   : > { %1980 = vmatpush.xpose.msk.msrb.mxu2 %vm825_vm1, %v1565_v20 }
 0x8fa   : > { %v1563_v21 = vpop.permute.xlu0 %1562 }
 0x954   : > { %v1389_v22 = vpop.xlane.xlu0 %1388 }
 0x955   : > { %v1390_v23 = vsub.f32 %v1386_v11, %v1389_v22 }
 0x957   : > { %v1391_v24 = vmul.f32 1.442695, %v1390_v23 }
 0x959   : > { %2107 = vpow2.f32 %v1391_v24 }
 0x95c   : > { %v1502_v26 = vpop.xlane.xlu1 %1501 }
 0x95d   : > { %v1503_v27 = vsub.f32 %v1499_v14, %v1502_v26  ;;  %v1692_v14 = vld [vmem:[%s2808_s16 + $0x8] sm:$0xff]  ;;  %v2077_v26 = vld [vmem:[#allocation2] ss:$0 sm:$0xff] }
 0x95f   : > { %v2108_v28 = vpop.eup %2107  ;;  %v1504_v29 = vmul.f32 1.442695, %v1503_v27 }
 0x960   : > { %v1393_v4 = vsel %vm1318_vm6, %v2108_v28, 0.0 }
 0x961   : > { %2109 = vpow2.f32 %v1504_v29  ;;  %1394 = vadd.xlane.f32.xlu0 %v1393_v4  ;;  %v2078_v29 = vld [vmem:[#allocation4] ss:$0 sm:$0xff] }
 0x967   : > { %v2110_v30 = vpop.eup %2109 }
 0x968   : > { %v1506_v31 = vsel %vm1318_vm6, %v2110_v30, 0.0 }
 0x969   : > { %1507 = vadd.xlane.f32.xlu1 %v1506_v31  ;;  %v1738_v31 = vld [vmem:[%s2810_s18 + $0x38] sm:$0xff] }
 0x96f   : > { %v1355_v32 = vpop.f32.mrf.mxu2 }
 0x970   : > { %1974 = vmatmul.msk.f32.vlgmr.msra.gmra.mxu2 %vm825_vm1, %v1355_v32  ;;  %v1737_v32 = vld [vmem:[%s2810_s18 + $0x30] sm:$0xff] }
 0x971   : > { %1755 = vmatpush.msra.mxu2 %v1738_v31 }
 0x973   : > { %1756 = vmatpush.msra.mxu2 %v1737_v32 }
 0x978   : > { %1981 = vmatmul.msk.f32.vlgmr.msrb.gmra.mxu2 %vm825_vm1, %v1563_v21 }
 0x982   : > { %1511 = vrot.lane.b32.xlu1 %v2672_v56, %s2847_s26 }
 0x9d4   : > { %v1395_v37 = vpop.xlane.xlu0 %1394 }
 0x9d5   : > { %2111 = vrcp.f32 %v1395_v37  ;;  %v1732_v37 = vld [vmem:[%s2810_s18 + $0x8] sm:$0xff] }
 0x9db   : > { %v2112_v42 = vpop.eup %2111 }
 0x9dc   : > { %v1508_v40 = vpop.xlane.xlu1 %1507  ;;  %v1397_v43 = vmul.f32 %v2112_v42, %v2108_v28 }
 0x9f3   : > { %v1468_v33 = vpop.f32.mrf.mxu2 }
 0x9f4   : > { %v1512_v45 = vpop.permute.xlu1 %1511 }
 0x9fb   : > { %v1587_v34 = vpop.f32.mrf.mxu2 }
 0x9fc   : > { %v1590_v35 = vmul.f32 0.35355338, %v1587_v34  ;;  %v1735_v34 = vld [vmem:[%s2810_s18 + $0x20] sm:$0xff] }
 0x9fe   : > { %v1591_v36 = vsel %vm1318_vm6, %v1590_v35, -inf }
 0x9ff   : > { %1592 = vmax.xlane.f32.xlu2 %v1591_v36  ;;  %v1733_v36 = vld [vmem:[%s2810_s18 + $0x10] sm:$0xff] }
 0xa17   : > { %1398 = vrot.lane.b32.xlu2 %v2672_v56, %s2848_s28 }
 0xa72   : > { %v1593_v38 = vpop.xlane.xlu2 %1592 }
 0xa73   : > { %v1594_v39 = vsub.f32 %v1590_v35, %v1593_v38  ;;  %v1734_v35 = vld [vmem:[%s2810_s18 + $0x18] sm:$0xff]  ;;  %v1731_v38 = vld [vmem:[%s2810_s18] sm:$0xff] }
 0xa75   : > { %v1595_v41 = vmul.f32 1.442695, %v1594_v39  ;;  %v2079_v39 = vld [vmem:[#allocation6] ss:$0 sm:$0xff] }
 0xa77   : > { %2113 = vpow2.f32 %v1595_v41 }
 0xa78   : > { %2115 = vrcp.f32 %v1508_v40 }
 0xa7a   : > { %v1399_v44 = vpop.permute.xlu2 %1398 }
 0xa7b   : > { %1971 = vmatpush.msk.msrb.mxu3 %vm1335_vm7, %v1399_v44 }
 0xa7c   : > { %1972 = vmatmul.msk.f32.vlgmr.msrb.gmra.mxu3 %vm1318_vm6, %v1397_v43 }
 0xa7d   : > { %v2114_v46 = vpop.eup %2113  ;;  %1977 = vmatpush.msk.msra.mxu3 %vm1335_vm7, %v1512_v45 }
 0xa7e   : > { %v1597_v47 = vsel %vm1318_vm6, %v2114_v46, 0.0  ;;  %v2116_v48 = vpop.eup %2115 }
 0xa7f   : > { %1598 = vadd.xlane.f32.xlu0 %v1597_v47  ;;  %v1510_v49 = vmul.f32 %v2116_v48, %v2110_v30  ;;  %1647 = vmatpush.msrb.mxu3 %v1290_v59 }
 0xa84   : > { %1978 = vmatmul.msk.f32.vlgmr.msra.gmra.mxu3 %vm1318_vm6, %v1510_v49 }
 0xa93   : > { %1602 = vrot.lane.b32.xlu0 %v2672_v56, %s2849_s2 }
 0xaf2   : > { %v1599_v52 = vpop.xlane.xlu0 %1598 }
 0xaf3   : > { %2117 = vrcp.f32 %v1599_v52 }
 0xaf9   : > { %v2118_v55 = vpop.eup %2117 }
 0xafa   : > { %v1601_v57 = vmul.f32 %v2118_v55, %v2114_v46 }
 0xaff   : > { %v1422_v54 = vpop.f32.mrf.mxu3 }
 0xb00   : > { %1973 = vmatmul.msk.f32.vlgmr.msra.gmra.mxu0 %vm825_vm1, %v1422_v54 }
 0xb01   : > { %1714 = vmatpush.msra.mxu0 %v1694_v13 }
 0xb05   : > { %v1603_v58 = vpop.permute.xlu0 %1602 }
 0xb06   : > { %1982 = vmatpush.msk.msra.mxu1 %vm1335_vm7, %v1603_v58 }
 0xb07   : > { %v1535_v56 = vpop.f32.mrf.mxu3  ;;  %1983 = vmatmul.msk.f32.vlgmr.msra.gmra.mxu1 %vm1318_vm6, %v1601_v57 }
 0xb08   : > { %1979 = vmatmul.msk.f32.vlgmr.msrb.gmra.mxu0 %vm825_vm1, %v1535_v56 }
 0xb7d   : > { %v1445_v61 = vpop.f32.mrf.mxu0 }
 0xb7e   : > { %v1469_v63 = vadd.f32 %v1468_v33, %v1445_v61  ;;  %v1736_v33 = vld [vmem:[%s2810_s18 + $0x28] sm:$0xff] }
 0xb7f   : > { %1757 = vmatpush.msra.mxu2 %v1736_v33 }
 0xb81   : > { %1758 = vmatpush.msra.mxu2 %v1735_v34 }
 0xb83   : > { %1759 = vmatpush.msra.mxu2 %v1734_v35 }
 0xb84   : > { %v1626_v60 = vpop.f32.mrf.mxu1 }
 0xb85   : > { %1984 = vmatmul.msk.f32.vlgmr.msrb.gmra.mxu3 %vm825_vm1, %v1626_v60  ;;  %v1558_v62 = vpop.f32.mrf.mxu0  ;;  %1760 = vmatpush.msra.mxu2 %v1733_v36 }
 0xb86   : > { %v1561_v0 = vadd.f32 %v1558_v62, %v1469_v63 }
 0xb87   : > { %1761 = vmatpush.msra.mxu2 %v1732_v37 }
 0xb89   : > { %1762 = vmatpush.msra.mxu2 %v1731_v38 }
 0xc08   : > { %v1649_v2 = vpop.f32.mrf.mxu3 }
 0xc09   : > { %v1652_v3 = vadd.f32 %v1649_v2, %v1561_v0 }
 0xc0b   : > { %v1657_v5 = vadd.f32 %v2076_v1, %v1652_v3 }
 0xc0d   : > { %v1658_v6 = vadd.f32 %v1657_v5, %v2665_v53  ;;  %v1693_v53 = vld [vmem:[%s2808_s16 + $0x10] sm:$0xff] }
 0xc0e   : > { %1715 = vmatpush.msra.mxu0 %v1693_v53 }
 0xc0f   : > { %v1661_v7 = vsel %vm794_vm0, %v1658_v6, 0.0 }
 0xc10   : > { %1662 = vadd.xlane.f32.xlu2 %v1661_v7  ;;  %1716 = vmatpush.msra.mxu0 %v1692_v14 }
 0xc12   : > { %1717 = vmatpush.msra.mxu0 %v1691_v15 }
 0xc83   : > { %v1663_v8 = vpop.xlane.xlu2 %1662 }
 0xc84   : > { %v1664_v9 = vmul.f32 %v1663_v8, %v2625_v25  ;;  %v2081_v8 = vld [vmem:[#allocation9] ss:$0 sm:$0xff] }
 0xc86   : > { %v1665_v10 = vsub.f32 %v1658_v6, %v1664_v9 }
 0xc88   : > { %v1666_v11 = vmul.f32 %v1665_v10, %v1665_v10 }
 0xc8a   : > { %v1667_v12 = vsel %vm794_vm0, %v1666_v11, 0.0 }
 0xc8b   : > { %1668 = vadd.xlane.f32.xlu0 %v1667_v12 }
 0xcfe   : > { %v1669_v16 = vpop.xlane.xlu0 %1668 }
 0xcff   : > { %v1670_v17 = vmul.f32 %v1669_v16, %v2625_v25 }
 0xd01   : > { %v1671_v18 = vadd.f32 1e-12, %v1670_v17 }
 0xd03   : > { %2119 = vrsqrt.f32 %v1671_v18  ;;  %vm1678_vm9 = vweird.f32 %v1671_v18 }
 0xd09   : > { %v2120_v19 = vpop.eup %2119 }
 0xd0a   : > { %v1673_v20 = vmul.f32 %v2120_v19, %v1671_v18  ;;  %vm1679_vm8 = vweird.f32 %v2120_v19 }
 0xd0b   : > { %vm1680_vm10 = vmor %vm1678_vm9, %vm1679_vm8 }
 0xd0c   : > { %v1674_v21 = vmul.f32 %v2120_v19, %v1673_v20 }
 0xd0e   : > { %v1675_v22 = vmul.f32 0.5, %v1674_v21 }
 0xd10   : > { %v1676_v23 = vsub.f32 1.5, %v1675_v22 }
 0xd12   : > { %v1677_v24 = vmul.f32 %v2120_v19, %v1676_v23 }
 0xd14   : > { %v1681_v27 = vsel %vm1680_vm10, %v2120_v19, %v1677_v24 }
 0xd15   : > { %v1682_v28 = vmul.f32 %v1681_v27, %v1665_v10  ;;  %v2082_v10 = vld [vmem:[#allocation10] ss:$0 sm:$0xff] }
 0xd17   : > { %v1686_v4 = vmul.f32 %v2077_v26, %v1682_v28 }
 0xd19   : > { %v1690_v30 = vadd.f32 %v2078_v29, %v1686_v4 }
 0xd1b   : > { %1985 = vmatmul.msk.f32.vlgmr.msra.gmra.mxu0 %vm794_vm0, %v1690_v30 }
 0xd98   : > { %v1719_v40 = vpop.f32.mrf.mxu0 }
 0xd99   : > { %v1720_v41 = vadd.f32 %v2079_v39, %v1719_v40 }
 0xd9b   : > { %v1723_v42 = vmul.f32 0.044715, %v1720_v41  ;;  %v1722_v48 = vmul.f32 0.5, %v1720_v41 }
 0xd9d   : > { %v1724_v43 = vmul.f32 %v1723_v42, %v1720_v41 }
 0xd9f   : > { %v1725_v44 = vmul.f32 %v1724_v43, %v1720_v41 }
 0xda1   : > { %v1726_v45 = vadd.f32 %v1725_v44, %v1720_v41 }
 0xda3   : > { %v1727_v46 = vmul.f32 0.7978846, %v1726_v45 }
 0xda5   : > { %2121 = vtanh.f32 %v1727_v46 }
 0xdab   : > { %v2122_v47 = vpop.eup %2121 }
 0xdac   : > { %v1729_v49 = vadd.f32 1.0, %v2122_v47 }
 0xdae   : > { %v1730_v50 = vmul.f32 %v1729_v49, %v1722_v48 }
 0xdb0   : > { %1986 = vmatmul.msk.f32.vlgmr.msra.gmra.mxu2 %vm1743_vm11, %v1730_v50 }
 0xe33   : > { %v1764_v52 = vpop.f32.mrf.mxu2 }
 0xe34   : > { %v1765_v54 = vadd.f32 %v2080_v51, %v1764_v52 }
 0xe36   : > { %v1767_v55 = vadd.f32 %v1765_v54, %v1690_v30 }
 0xe38   : > { %v1770_v57 = vsel %vm794_vm0, %v1767_v55, 0.0 }
 0xe39   : > { %1771 = vadd.xlane.f32.xlu1 %v1770_v57 }
 0xeac   : > { %v1772_v58 = vpop.xlane.xlu1 %1771 }
 0xead   : > { %v1773_v56 = vmul.f32 %v1772_v58, %v2625_v25 }
 0xeaf   : > { %v1774_v59 = vsub.f32 %v1767_v55, %v1773_v56 }
 0xeb1   : > { %v1775_v60 = vmul.f32 %v1774_v59, %v1774_v59 }
 0xeb3   : > { %v1776_v61 = vsel %vm794_vm0, %v1775_v60, 0.0 }
 0xeb4   : > { %1777 = vadd.xlane.f32.xlu2 %v1776_v61 }
 0xf27   : > { %v1778_v62 = vpop.xlane.xlu2 %1777 }
 0xf28   : > { %v1779_v63 = vmul.f32 %v1778_v62, %v2625_v25 }
 0xf2a   : > { %v1780_v0 = vadd.f32 1e-12, %v1779_v63 }
 0xf2c   : > { %2123 = vrsqrt.f32 %v1780_v0  ;;  %vm1787_vm13 = vweird.f32 %v1780_v0 }
 0xf32   : > { %v2124_v1 = vpop.eup %2123 }
 0xf33   : > { %v1782_v2 = vmul.f32 %v2124_v1, %v1780_v0  ;;  %vm1788_vm12 = vweird.f32 %v2124_v1 }
 0xf34   : > { %vm1789_vm14 = vmor %vm1787_vm13, %vm1788_vm12 }
 0xf35   : > { %v1783_v3 = vmul.f32 %v2124_v1, %v1782_v2 }
 0xf37   : > { %v1784_v5 = vmul.f32 0.5, %v1783_v3 }
 0xf39   : > { %v1785_v6 = vsub.f32 1.5, %v1784_v5 }
 0xf3b   : > { %v1786_v7 = vmul.f32 %v2124_v1, %v1785_v6 }
 0xf3d   : > { %v1790_v9 = vsel %vm1789_vm14, %v2124_v1, %v1786_v7 }
 0xf3e   : > { %v1791_v11 = vmul.f32 %v1790_v9, %v1774_v59 }
 0xf40   : > { %v1795_v12 = vmul.f32 %v2081_v8, %v1791_v11 }
 0xf42   : > { %v1799_v25 = vadd.f32 %v2082_v10, %v1795_v12 }
 0xf44   : > { %1800 = vst.msk [vmem:[%s783_s19] sm:$0xff] %vm794_vm0, %v1799_v25 }
 0xf45 PF: > { %s36_s3 = sadd.s32 1, %s2327_s3  }
 0xf46   : > { %p33_p7 = scmp.ge.s32.totalorder %s36_s3, 4  }
 0xf48   :  { %35 = sbr.rel (!%p33_p7) target bundleno = 15 (0xf), region = 166 }
 0xf4d   :  { %1820 = vsyncpa [#allocation3], 1 }
 0xf4e   :  { %1822 = vsyncpa [#allocation3 + $0x1], 1 }
 0xf4f   :  { %1823 = vsyncpa [#allocation5], 1 }
 0xf50   :  { %1824 = vsyncpa [#allocation8], 1 }
 0xf51   :  { %1825 = vsyncpa [#allocation11], 1 }

// kernel: blip_forward.21
= control target key start
LH: loop header
LB: loop body
LE: loop exit
PB: predicated region body
PF: predicated region fallthrough
CT: control target
= control target key end

     0   :  { %13 = vsyncpa [#allocation3], 0  ;;  %s1350_s0 = inlined_call_operand.vmem [shape: f32[2,8,32], index: 0, kind: input, shape index: {}]   ;;  %s1351_s1 = inlined_call_operand.hbm [shape: f32[1,32], index: 1, kind: input, shape index: {}]   ;;  %s1352_s2 = inlined_call_operand.vmem [shape: f32[32,96], index: 2, kind: input, shape index: {}]   ;;  %s1353_s3 = inlined_call_operand.vmem [shape: f32[32,32], index: 3, kind: input, shape index: {}]   ;;  %s1354_s4 = inlined_call_operand.hbm [shape: f32[1,32], index: 4, kind: input, shape index: {}]   ;;  %s1355_s5 = inlined_call_operand.vmem [shape: f32[32,64], index: 5, kind: input, shape index: {}]   ;;  %s1356_s6 = inlined_call_operand.vmem [shape: f32[32,64], index: 6, kind: input, shape index: {}]   ;;  %s1357_s7 = inlined_call_operand.vmem [shape: f32[64,32], index: 7, kind: input, shape index: {}]   ;;  %s1358_s8 = inlined_call_operand.vmem [shape: f32[2,8,32], index: 8, kind: output, shape index: {}]  }
   0x1   :  { %14 = vsyncpa [#allocation5], 0  ;;  %s1175_s27 = smov 0  }
   0x2 LB: > { %s236_s30 = sshll.u32 %s1351_s1, 4  ;;  %s940_s9 = sadd.s32 4294967295, %s1114_s27   ;;  %s1114_s27 = sphi %s1175_s27, %s20_s27   ;;  %s237_s30 = int_to_ptr.hbm [resolvable:$true] %s236_s30 }
   0x3   : > { %p942_p0 = scmp.ge.s32.totalorder %s1114_s27, 1  ;;  %p224_p1 = scmp.lt.s32.totalorder %s1114_s27, 3 }
   0x4   : > { %p988_p2 = scmp.eq.s32.totalorder %s940_s9, 0  ;;  %s1116_s11 = smov [#allocation2]  }
   0x5   : > { %p1186_p3 = pnand %p942_p0, %p224_p1  ;;  %s238_s12 = sshll.u32 %s1116_s11, 4  ;;  %s239_s12 = int_to_ptr.vmem [resolvable:$true] %s238_s12 }
   0x6   : > { %s254_s15 = sshll.u32 %s1354_s4, 4  ;;  %s1117_s16 = smov [#allocation4]   ;;  %s255_s15 = int_to_ptr.hbm [resolvable:$true] %s254_s15 }
   0x7   : > { %p981_p4 = pneg %p1186_p3  ;;  %s256_s17 = sshll.u32 %s1117_s16, 4  ;;  %s257_s17 = int_to_ptr.vmem [resolvable:$true] %s256_s17 }
   0x8   : > { %285 = sbr.rel (%p1186_p3) target bundleno = 2032 (0x7f0), region = 52 }
   0x9   : > { %p982_p5 = pnand %p988_p2, %p981_p4 }
   0xb   : > { %984 = dma.hbm_to_vmem [thread:$0]  (!%p982_p5), %s237_s30, 16, %s239_s12, [#allocation3]  }
   0xc   : > { %987 = dma.hbm_to_vmem [thread:$0]  (!%p982_p5), %s255_s15, 16, %s257_s17, [#allocation5]  }
   0xd   : > { %1105 = dma.done.wait (%p988_p2), [#allocation3], 16  }
   0xe   : > { %1107 = vsyncadd (%p988_p2), [#allocation3], 4294967280 }
   0xf   : > { %1109 = dma.done.wait (%p988_p2), [#allocation5], 16  }
  0x10   : > { %1111 = vsyncadd (%p988_p2), [#allocation5], 4294967280  ;;  %p323_p6 = scmp.lt.s32.totalorder %s940_s9, 1  ;;  %vm334_vm0 = vcmask 261120   ;;  %v1118_v3 = vmov 32.0   ;;  %v365_v7 = vld [vmem:[%s1352_s2 + $0x18] sm:$0xff] }
  0x11   : > { %1016 = vrcp.f32 %v1118_v3  ;;  %381 = vmatpush.msra.mxu0 %v365_v7  ;;  %v364_v8 = vld [vmem:[%s1352_s2 + $0x10] sm:$0xff]  ;;  %v363_v9 = vld [vmem:[%s1352_s2 + $0x8] sm:$0xff]  ;;  %v362_v11 = vld [vmem:[%s1352_s2] sm:$0xff]  ;;  %s1119_s10 = smov 88   ;;  %s1120_s11 = smov 96   ;;  %vm396_vm5 = vcmask 64512  }
  0x12   : > { %s1361_s9 = smov (!%p323_p6, %s940_s9), 1  ;;  %v1014_v23 = vld [vmem:[#allocation2] ss:$0 sm:$0xff]  ;;  %s1121_s12 = smov 120   ;;  %v390_v59 = vld [vmem:[%s1353_s3 + $0x8] sm:$0xff]  ;;  %vm839_vm9 = vcmask 523264  }
  0x13   : > { %s949_s18 = sshll.u32 %s1361_s9, 3  ;;  %382 = vmatpush.msra.mxu0 %v364_v8  ;;  %s1122_s13 = smov 80   ;;  %v389_v28 = vld [vmem:[%s1353_s3] sm:$0xff] }
  0x14   : > { %s326_s21 = scalar_lea.vmem %s1350_s0, %s949_s18  ;;  %s1123_s14 = smov 64  }
  0x15   : > { %v1210_v0 = vld [vmem:[%s326_s21] sm:$0xff]  ;;  %383 = vmatpush.msra.mxu0 %v363_v9  ;;  %s1124_s15 = smov 72   ;;  %s1125_s16 = smov 112  }
  0x16   : > { %v333_v1 = vmul.f32 %v1210_v0, %v1210_v0  ;;  %s1126_s20 = smov 56   ;;  %s1127_s21 = smov 104  }
  0x17   : > { %v1017_v4 = vpop.eup %1016  ;;  %384 = vmatpush.msra.mxu0 %v362_v11  ;;  %s1128_s24 = smov 40   ;;  %s1129_s25 = smov 48  }
  0x18   : > { %v335_v2 = vsel %vm334_vm0, %v333_v1, 0.0  ;;  %v339_v5 = vmul.f32 32.0, %v1017_v4  ;;  %vm343_vm1 = vweird.f32 %v1017_v4  ;;  %s330_s26 = scalar_lea.vmem %s1358_s8, %s949_s18 }
  0x19   : > { %336 = vadd.xlane.f32.xlu0 %v335_v2 }
  0x1a   : > { %v340_v6 = vsub.f32 1.0, %v339_v5 }
  0x1c   : > { %v341_v10 = vmul.f32 %v1017_v4, %v340_v6 }
  0x1e   : > { %v342_v12 = vadd.f32 %v1017_v4, %v341_v10 }
  0x20   : > { %v1227_v13 = vsel %vm343_vm1, %v1017_v4, %v342_v12 }
  0x8c   : > { %v337_v14 = vpop.xlane.xlu0 %336 }
  0x8d   : > { %v345_v15 = vmul.f32 %v1227_v13, %v337_v14 }
  0x8f   : > { %v346_v16 = vadd.f32 1e-06, %v345_v15 }
  0x91   : > { %1018 = vrsqrt.f32 %v346_v16  ;;  %vm353_vm3 = vweird.f32 %v346_v16 }
  0x97   : > { %v1019_v17 = vpop.eup %1018 }
  0x98   : > { %v348_v18 = vmul.f32 %v1019_v17, %v346_v16  ;;  %vm354_vm2 = vweird.f32 %v1019_v17 }
  0x99   : > { %vm355_vm4 = vmor %vm353_vm3, %vm354_vm2 }
  0x9a   : > { %v349_v19 = vmul.f32 %v1019_v17, %v348_v18 }
  0x9c   : > { %v350_v20 = vmul.f32 0.5, %v349_v19 }
  0x9e   : > { %v351_v21 = vsub.f32 1.5, %v350_v20 }
  0xa0   : > { %v352_v22 = vmul.f32 %v1019_v17, %v351_v21 }
  0xa2   : > { %v356_v24 = vsel %vm355_vm4, %v1019_v17, %v352_v22  ;;  %v392_v22 = vld [vmem:[%s1353_s3 + $0x18] sm:$0xff] }
  0xa3   : > { %v357_v25 = vmul.f32 %v356_v24, %v1210_v0 }
  0xa5   : > { %v361_v26 = vmul.f32 %v1014_v23, %v357_v25  ;;  %v391_v23 = vld [vmem:[%s1353_s3 + $0x10] sm:$0xff] }
  0xa7   : > { %951 = vmatmul.msk.f32.vlgmr.msra.gmra.mxu0 %vm334_vm0, %v361_v26 }
 0x124   : > { %v1232_v27 = vpop.f32.mrf.mxu0 }
 0x125   : > { %460 = vrot.lane.b32.xlu1 %v1232_v27, %s1119_s10  ;;  %394 = vrot.lane.b32.xlu0 %v1232_v27, %s1120_s11 }
 0x12d   : > { %458 = vrot.lane.b32.xlu1 %v1232_v27, %s1121_s12  ;;  %571 = vrot.lane.b32.xlu0 %v1232_v27, %s1122_s13 }
 0x135   : > { %432 = vrot.lane.b32.xlu1 %v1232_v27, %s1123_s14  ;;  %660 = vrot.lane.b32.xlu0 %v1232_v27, %s1124_s15 }
 0x13d   : > { %569 = vrot.lane.b32.xlu0 %v1232_v27, %s1125_s16 }
 0x197   : > { %v461_v29 = vpop.permute.xlu1 %460  ;;  %v395_v30 = vpop.permute.xlu0 %394 }
 0x198   : > { %952 = vmatpush.xpose.msk.msra.mxu1 %vm396_vm5, %v395_v30  ;;  %955 = vmatpush.xpose.msk.msra.mxu3 %vm396_vm5, %v461_v29 }
 0x19b   : > { %953 = vmatmul.msk.f32.vlgmr.msra.gmra.mxu1 %vm396_vm5, %v1232_v27 }
 0x19c   : > { %564 = vmatpush.msrb.mxu3 %v389_v28  ;;  %541 = vmatpush.msrb.mxu1 %v390_v59  ;;  %v833_v59 = vld [vmem:[%s1357_s7 + $0x10] sm:$0xff] }
 0x19e   : > { %652 = vmatpush.msra.mxu1 %v391_v23 }
 0x19f   : > { %v459_v31 = vpop.permute.xlu1 %458  ;;  %v572_v32 = vpop.permute.xlu0 %571 }
 0x1a0   : > { %956 = vmatmul.msk.f32.vlgmr.msra.gmra.mxu3 %vm396_vm5, %v459_v31 }
 0x1a7   : > { %v433_v33 = vpop.permute.xlu1 %432  ;;  %v661_v34 = vpop.permute.xlu0 %660 }
 0x1a8   : > { %453 = vmatpush.msra.mxu2 %v433_v33  ;;  %964 = vmatpush.xpose.msk.msra.mxu3 %vm396_vm5, %v661_v34 }
 0x1af   : > { %v570_v58 = vpop.permute.xlu0 %569 }
 0x218   : > { %v418_v35 = vpop.f32.mrf.mxu1 }
 0x219   : > { %v421_v36 = vsel %vm396_vm5, %v418_v35, -inf }
 0x21a   : > { %422 = vmax.xlane.f32.xlu2 %v421_v36  ;;  %v809_v36 = vld [vmem:[%s1356_s6 + $0x18] sm:$0xff] }
 0x223   : > { %v483_v42 = vpop.f32.mrf.mxu3 }
 0x224   : > { %v486_v43 = vsel %vm396_vm5, %v483_v42, -inf }
 0x28d   : > { %v423_v37 = vpop.xlane.xlu2 %422 }
 0x28e   : > { %v424_v38 = vsub.f32 %v418_v35, %v423_v37  ;;  %v773_v35 = vld [vmem:[%s1355_s5 + $0x18] sm:$0xff]  ;;  %v808_v37 = vld [vmem:[%s1356_s6 + $0x10] sm:$0xff] }
 0x290   : > { %v425_v39 = vmul.f32 1.442695, %v424_v38  ;;  %v771_v38 = vld [vmem:[%s1355_s5 + $0x8] sm:$0xff] }
 0x292   : > { %1020 = vpow2.f32 %v425_v39  ;;  %v807_v39 = vld [vmem:[%s1356_s6 + $0x8] sm:$0xff] }
 0x298   : > { %v1021_v40 = vpop.eup %1020 }
 0x299   : > { %v427_v41 = vsel %vm396_vm5, %v1021_v40, 0.0 }
 0x29a   : > { %428 = vadd.xlane.f32.xlu2 %v427_v41  ;;  %v806_v41 = vld [vmem:[%s1356_s6] sm:$0xff] }
 0x2a2   : > { %487 = vmax.xlane.f32.xlu2 %v486_v43 }
 0x2ba   : > { %497 = vrot.lane.b32.xlu2 %v1232_v27, %s1126_s20 }
 0x2c2   : > { %658 = vrot.lane.b32.xlu2 %v1232_v27, %s1127_s21 }
 0x30d   : > { %v429_v44 = vpop.xlane.xlu2 %428 }
 0x30e   : > { %1022 = vrcp.f32 %v429_v44 }
 0x314   : > { %v1023_v45 = vpop.eup %1022 }
 0x315   : > { %v488_v46 = vpop.xlane.xlu2 %487  ;;  %v431_v47 = vmul.f32 %v1023_v45, %v1021_v40  ;;  %v770_v40 = vld [vmem:[%s1355_s5] sm:$0xff] }
 0x316   : > { %v489_v48 = vsub.f32 %v483_v42, %v488_v46 }
 0x317   : > { %954 = vmatmul.msk.f32.vlgmr.msra.gmra.mxu2 %vm396_vm5, %v431_v47 }
 0x318   : > { %v490_v49 = vmul.f32 1.442695, %v489_v48 }
 0x31a   : > { %1024 = vpow2.f32 %v490_v49 }
 0x31d   : > { %v498_v50 = vpop.permute.xlu2 %497 }
 0x31e   : > { %518 = vmatpush.msrb.mxu2 %v498_v50 }
 0x320   : > { %960 = vmatpush.xpose.msk.msra.mxu2 %vm396_vm5, %v572_v32  ;;  %v1025_v51 = vpop.eup %1024 }
 0x321   : > { %v492_v52 = vsel %vm396_vm5, %v1025_v51, 0.0 }
 0x322   : > { %493 = vadd.xlane.f32.xlu1 %v492_v52 }
 0x325   : > { %v659_v57 = vpop.permute.xlu2 %658 }
 0x395   : > { %v494_v53 = vpop.xlane.xlu1 %493 }
 0x396   : > { %1026 = vrcp.f32 %v494_v53 }
 0x39a   : > { %v455_v54 = vpop.f32.mrf.mxu2 }
 0x39b   : > { %959 = vmatmul.msk.f32.vlgmr.msrb.gmra.mxu3 %vm396_vm5, %v455_v54 }
 0x39c   : > { %v1027_v55 = vpop.eup %1026  ;;  %822 = vmatpush.msrb.mxu3 %v809_v36 }
 0x39d   : > { %v496_v56 = vmul.f32 %v1027_v55, %v1025_v51  ;;  %v1015_v51 = vld [vmem:[#allocation4] ss:$0 sm:$0xff]  ;;  %v837_v55 = vld [vmem:[%s1357_s7 + $0x30] sm:$0xff] }
 0x39e   : > { %823 = vmatpush.msrb.mxu3 %v808_v37 }
 0x39f   : > { %957 = vmatmul.msk.f32.vlgmr.msrb.gmra.mxu2 %vm396_vm5, %v496_v56  ;;  %v836_v56 = vld [vmem:[%s1357_s7 + $0x28] sm:$0xff] }
 0x3a0   : > { %824 = vmatpush.msrb.mxu3 %v807_v39 }
 0x3a2   : > { %825 = vmatpush.msrb.mxu3 %v806_v41 }
 0x3a3   : > { %965 = vmatmul.msk.f32.vlgmr.msra.gmra.mxu3 %vm396_vm5, %v659_v57  ;;  %v835_v57 = vld [vmem:[%s1357_s7 + $0x20] sm:$0xff] }
 0x3a7   : > { %961 = vmatmul.msk.f32.vlgmr.msra.gmra.mxu2 %vm396_vm5, %v570_v58  ;;  %v834_v58 = vld [vmem:[%s1357_s7 + $0x18] sm:$0xff] }
 0x41e   : > { %v566_v60 = vpop.f32.mrf.mxu3 }
 0x422   : > { %v520_v61 = vpop.f32.mrf.mxu2 }
 0x423   : > { %958 = vmatmul.msk.f32.vlgmr.msrb.gmra.mxu1 %vm396_vm5, %v520_v61  ;;  %v831_v61 = vld [vmem:[%s1357_s7] sm:$0xff] }
 0x424   : > { %789 = vmatpush.msrb.mxu1 %v773_v35 }
 0x426   : > { %v683_v62 = vpop.f32.mrf.mxu3 }
 0x427   : > { %v686_v63 = vsel %vm396_vm5, %v683_v62, -inf }
 0x428   : > { %687 = vmax.xlane.f32.xlu2 %v686_v63 }
 0x42a   : > { %v594_v1 = vpop.f32.mrf.mxu2 }
 0x42b   : > { %v597_v2 = vsel %vm396_vm5, %v594_v1, -inf }
 0x42c   : > { %598 = vmax.xlane.f32.xlu0 %v597_v2 }
 0x440   : > { %697 = vrot.lane.b32.xlu0 %v1232_v27, %s1128_s24 }
 0x49b   : > { %v688_v3 = vpop.xlane.xlu2 %687 }
 0x49c   : > { %v689_v6 = vsub.f32 %v683_v62, %v688_v3 }
 0x49e   : > { %v690_v8 = vmul.f32 1.442695, %v689_v6 }
 0x49f   : > { %v599_v4 = vpop.xlane.xlu0 %598 }
 0x4a0   : > { %v600_v5 = vsub.f32 %v594_v1, %v599_v4  ;;  %v543_v26 = vpop.f32.mrf.mxu1 }
 0x4a2   : > { %v601_v7 = vmul.f32 1.442695, %v600_v5 }
 0x4a4   : > { %1028 = vpow2.f32 %v601_v7 }
 0x4a5   : > { %1030 = vpow2.f32 %v690_v8 }
 0x4aa   : > { %v1029_v9 = vpop.eup %1028 }
 0x4ab   : > { %v603_v10 = vsel %vm396_vm5, %v1029_v9, 0.0  ;;  %v1031_v11 = vpop.eup %1030 }
 0x4ac   : > { %604 = vadd.xlane.f32.xlu1 %v603_v10  ;;  %v692_v14 = vsel %vm396_vm5, %v1031_v11, 0.0 }
 0x4b2   : > { %v698_v12 = vpop.permute.xlu0 %697 }
 0x4b3   : > { %718 = vmatpush.msrb.mxu0 %v698_v12 }
 0x4b4   : > { %693 = vadd.xlane.f32.xlu1 %v692_v14 }
 0x4cd   : > { %608 = vrot.lane.b32.xlu1 %v1232_v27, %s1129_s25  ;;  %v567_v27 = vadd.f32 %v566_v60, %v543_v26  ;;  %v832_v60 = vld [vmem:[%s1357_s7 + $0x8] sm:$0xff] }
 0x51f   : > { %v605_v15 = vpop.xlane.xlu1 %604 }
 0x527   : > { %v694_v16 = vpop.xlane.xlu1 %693 }
 0x528   : > { %1032 = vrcp.f32 %v694_v16 }
 0x529   : > { %1034 = vrcp.f32 %v605_v15 }
 0x52e   : > { %v1033_v17 = vpop.eup %1032 }
 0x52f   : > { %v696_v18 = vmul.f32 %v1033_v17, %v1031_v11  ;;  %v1035_v19 = vpop.eup %1034 }
 0x530   : > { %v607_v20 = vmul.f32 %v1035_v19, %v1029_v9 }
 0x531   : > { %966 = vmatmul.msk.f32.vlgmr.msrb.gmra.mxu0 %vm396_vm5, %v696_v18 }
 0x53f   : > { %v609_v21 = vpop.permute.xlu1 %608 }
 0x540   : > { %629 = vmatpush.msrb.mxu2 %v609_v21 }
 0x541   : > { %962 = vmatmul.msk.f32.vlgmr.msrb.gmra.mxu2 %vm396_vm5, %v607_v20 }
 0x542   : > { %741 = vmatpush.msra.mxu2 %v392_v22 }
 0x5ae   : > { %v720_v24 = vpop.f32.mrf.mxu0 }
 0x5af   : > { %967 = vmatmul.msk.f32.vlgmr.msra.gmra.mxu2 %vm396_vm5, %v720_v24 }
 0x5c4   : > { %v631_v25 = vpop.f32.mrf.mxu2 }
 0x5c5   : > { %963 = vmatmul.msk.f32.vlgmr.msra.gmra.mxu1 %vm396_vm5, %v631_v25 }
 0x632   : > { %v743_v30 = vpop.f32.mrf.mxu2 }
 0x642   : > { %v654_v28 = vpop.f32.mrf.mxu1 }
 0x643   : > { %v657_v29 = vadd.f32 %v654_v28, %v567_v27 }
 0x645   : > { %v746_v31 = vadd.f32 %v743_v30, %v657_v29 }
 0x647   : > { %v1283_v32 = vadd.f32 %v746_v31, %v1210_v0  ;;  %v772_v0 = vld [vmem:[%s1355_s5 + $0x10] sm:$0xff] }
 0x648   : > { %790 = vmatpush.msrb.mxu1 %v772_v0 }
 0x649   : > { %v749_v33 = vmul.f32 %v1283_v32, %v1283_v32 }
 0x64a   : > { %791 = vmatpush.msrb.mxu1 %v771_v38 }
 0x64b   : > { %v750_v34 = vsel %vm334_vm0, %v749_v33, 0.0 }
 0x64c   : > { %751 = vadd.xlane.f32.xlu2 %v750_v34  ;;  %792 = vmatpush.msrb.mxu1 %v770_v40 }
 0x6bf   : > { %v752_v42 = vpop.xlane.xlu2 %751 }
 0x6c0   : > { %v753_v43 = vmul.f32 %v752_v42, %v1227_v13  ;;  %v838_v13 = vld [vmem:[%s1357_s7 + $0x38] sm:$0xff] }
 0x6c1   : > { %851 = vmatpush.msra.mxu0 %v838_v13 }
 0x6c2   : > { %v754_v44 = vadd.f32 1e-06, %v753_v43 }
 0x6c3   : > { %852 = vmatpush.msra.mxu0 %v837_v55 }
 0x6c4   : > { %1036 = vrsqrt.f32 %v754_v44  ;;  %vm761_vm7 = vweird.f32 %v754_v44 }
 0x6c5   : > { %853 = vmatpush.msra.mxu0 %v836_v56 }
 0x6c7   : > { %854 = vmatpush.msra.mxu0 %v835_v57 }
 0x6c9   : > { %855 = vmatpush.msra.mxu0 %v834_v58 }
 0x6ca   : > { %v1037_v45 = vpop.eup %1036 }
 0x6cb   : > { %v756_v46 = vmul.f32 %v1037_v45, %v754_v44  ;;  %vm762_vm6 = vweird.f32 %v1037_v45  ;;  %856 = vmatpush.msra.mxu0 %v833_v59 }
 0x6cc   : > { %vm763_vm8 = vmor %vm761_vm7, %vm762_vm6 }
 0x6cd   : > { %v757_v47 = vmul.f32 %v1037_v45, %v756_v46  ;;  %857 = vmatpush.msra.mxu0 %v832_v60 }
 0x6cf   : > { %v758_v48 = vmul.f32 0.5, %v757_v47  ;;  %858 = vmatpush.msra.mxu0 %v831_v61 }
 0x6d1   : > { %v759_v49 = vsub.f32 1.5, %v758_v48 }
 0x6d3   : > { %v760_v50 = vmul.f32 %v1037_v45, %v759_v49 }
 0x6d5   : > { %v764_v52 = vsel %vm763_vm8, %v1037_v45, %v760_v50 }
 0x6d6   : > { %v765_v53 = vmul.f32 %v764_v52, %v1283_v32 }
 0x6d8   : > { %v769_v54 = vmul.f32 %v1015_v51, %v765_v53 }
 0x6da   : > { %968 = vmatmul.msk.f32.vlgmr.msrb.gmra.mxu1 %vm334_vm0, %v769_v54  ;;  %969 = vmatmul.msk.f32.vlgmr.msrb.gmra.mxu3 %vm334_vm0, %v769_v54 }
 0x757   : > { %v794_v62 = vpop.f32.mrf.mxu1 }
 0x758   : > { %v798_v63 = vmul.f32 0.044715, %v794_v62  ;;  %v797_v6 = vmul.f32 0.5, %v794_v62 }
 0x75a   : > { %v799_v1 = vmul.f32 %v798_v63, %v794_v62 }
 0x75c   : > { %v800_v2 = vmul.f32 %v799_v1, %v794_v62 }
 0x75d   : > { %v827_v9 = vpop.f32.mrf.mxu3 }
 0x75e   : > { %v801_v3 = vadd.f32 %v800_v2, %v794_v62 }
 0x760   : > { %v802_v4 = vmul.f32 0.7978846, %v801_v3 }
 0x762   : > { %1038 = vtanh.f32 %v802_v4 }
 0x768   : > { %v1039_v5 = vpop.eup %1038 }
 0x769   : > { %v804_v7 = vadd.f32 1.0, %v1039_v5 }
 0x76b   : > { %v805_v8 = vmul.f32 %v804_v7, %v797_v6 }
 0x76d   : > { %v830_v10 = vmul.f32 %v827_v9, %v805_v8 }
 0x76f   : > { %970 = vmatmul.msk.f32.vlgmr.msra.gmra.mxu0 %vm839_vm9, %v830_v10 }
 0x7ec   : > { %v860_v11 = vpop.f32.mrf.mxu0 }
 0x7ed   : > { %v863_v12 = vadd.f32 %v860_v11, %v1283_v32 }
 0x7ef   : > { %864 = vst.msk [vmem:[%s330_s26] sm:$0xff] %vm334_vm0, %v863_v12 }
 0x7f0 PF: > { %s20_s27 = sadd.s32 1, %s1114_s27  }
 0x7f1   : > { %p17_p7 = scmp.ge.s32.totalorder %s20_s27, 4  }
 0x7f3   :  { %19 = sbr.rel (!%p17_p7) target bundleno = 2 (0x2), region = 91 }
 0x7f8   :  { %884 = vsyncpa [#allocation3], 1 }
 0x7f9   :  { %886 = vsyncpa [#allocation3 + $0x1], 1 }
 0x7fa   :  { %887 = vsyncpa [#allocation5], 1 }

// kernel: blip_forward.18
= control target key start
LH: loop header
LB: loop body
LE: loop exit
PB: predicated region body
PF: predicated region fallthrough
CT: control target
= control target key end

     0   :  { %s2322_s0 = inlined_call_operand.vmem [shape: f32[2,8,32], index: 0, kind: input, shape index: {}]   ;;  %s2323_s1 = inlined_call_operand.vmem [shape: f32[2,5,32], index: 1, kind: input, shape index: {}]   ;;  %s2324_s2 = inlined_call_operand.vmem [shape: f32[32,96], index: 2, kind: input, shape index: {}]   ;;  %s2325_s3 = inlined_call_operand.vmem [shape: f32[1,96], index: 3, kind: input, shape index: {}]   ;;  %s2326_s4 = inlined_call_operand.vmem [shape: f32[32,32], index: 4, kind: input, shape index: {}]   ;;  %s2327_s5 = inlined_call_operand.vmem [shape: f32[1,32], index: 5, kind: input, shape index: {}]   ;;  %s2328_s6 = inlined_call_operand.vmem [shape: f32[1,32], index: 6, kind: input, shape index: {}]   ;;  %s2329_s7 = inlined_call_operand.vmem [shape: f32[1,32], index: 7, kind: input, shape index: {}]   ;;  %s2330_s8 = inlined_call_operand.vmem [shape: f32[32,32], index: 8, kind: input, shape index: {}]   ;;  %s2331_s9 = inlined_call_operand.vmem [shape: f32[1,32], index: 9, kind: input, shape index: {}]   ;;  %s2332_s10 = inlined_call_operand.vmem [shape: f32[32,64], index: 10, kind: input, shape index: {}]   ;;  %s2333_s11 = inlined_call_operand.vmem [shape: f32[1,64], index: 11, kind: input, shape index: {}]   ;;  %s2334_s12 = inlined_call_operand.vmem [shape: f32[32,32], index: 12, kind: input, shape index: {}]   ;;  %s2335_s13 = inlined_call_operand.vmem [shape: f32[1,32], index: 13, kind: input, shape index: {}]   ;;  %s2336_s14 = inlined_call_operand.vmem [shape: f32[1,32], index: 14, kind: input, shape index: {}]   ;;  %s2337_s15 = inlined_call_operand.vmem [shape: f32[1,32], index: 15, kind: input, shape index: {}]   ;;  %s2338_s16 = inlined_call_operand.vmem [shape: f32[32,64], index: 16, kind: input, shape index: {}]   ;;  %s2339_s17 = inlined_call_operand.vmem [shape: f32[1,64], index: 17, kind: input, shape index: {}]   ;;  %s2340_s18 = inlined_call_operand.vmem [shape: f32[64,32], index: 18, kind: input, shape index: {}]   ;;  %s2341_s19 = inlined_call_operand.vmem [shape: f32[1,32], index: 19, kind: input, shape index: {}]   ;;  %s2342_s20 = inlined_call_operand.vmem [shape: f32[1,32], index: 20, kind: input, shape index: {}]   ;;  %s2343_s21 = inlined_call_operand.vmem [shape: f32[1,32], index: 21, kind: input, shape index: {}]   ;;  %s2344_s22 = inlined_call_operand.vmem [shape: f32[2,8,32], index: 22, kind: output, shape index: {}]  }
   0x1   :  { %2358 = sst [smem:[#allocation2_spill]] %s2322_s0 }
   0x2   :  { %2359 = sst [smem:[#allocation3_spill]] %s2323_s1 }
   0x3   :  { %2360 = sst [smem:[#allocation4_spill]] %s2324_s2 }
   0x4   :  { %2361 = sst [smem:[#allocation5_spill]] %s2325_s3  ;;  %s2039_s3 = smov 0  }
   0x5   :  { %2362 = sst [smem:[#allocation6_spill]] %s2326_s4 }
   0x6   :  { %2363 = sst [smem:[#allocation7_spill]] %s2327_s5 }
   0x7   :  { %2364 = sst [smem:[#allocation8_spill]] %s2328_s6 }
   0x8 LB: > { %s1778_s28 = sadd.s32 4294967295, %s1910_s3   ;;  %p1782_p0 = scmp.ge.s32.totalorder %s1910_s3, 1  ;;  %s1910_s3 = sphi %s2039_s3, %s32_s3  }
   0x9   : > { %p620_p1 = scmp.lt.s32.totalorder %s1910_s3, 3 }
   0xb   : > { %p621_p2 = pnand %p1782_p0, %p620_p1 }
   0xc   : > { %s2365_s4 = sld [smem:[#allocation4_spill]] (!%p621_p2)  ;;  %p684_p3 = scmp.lt.s32.totalorder (!%p621_p2), %s1778_s28, 1 }
   0xd   : > { %624 = sbr.rel (%p621_p2) target bundleno = 3876 (0xf24), region = 108  ;;  %s2366_s27 = sld [smem:[#allocation2_spill]] (!%p621_p2) }
   0xe   : > { %s2367_s23 = sld [smem:[#allocation5_spill]] (!%p621_p2)  ;;  %s2352_s1 = smov (!%p621_p2), 96  }
   0xf   : > { %s2355_s5 = smov (!%p621_p2), 120   ;;  %s2347_s24 = smov (!%p621_p2), 72  }
  0x10   : > { %s2350_s6 = smov (!%p621_p2), 104   ;;  %s2349_s26 = smov (!%p621_p2), 80  }
  0x11   : > { %s1918_s2 = smov (!%p621_p2), 64   ;;  %s2368_s0 = sld [smem:[#allocation6_spill]] (!%p621_p2) }
  0x12   : > { %v701_v0 = vld [vmem:[%s2365_s4 + $0x18] sm:$0xff]  ;;  %v700_v1 = vld [vmem:[%s2365_s4 + $0x10] sm:$0xff]  ;;  %v699_v2 = vld [vmem:[%s2365_s4 + $0x8] sm:$0xff]  ;;  %s2380_s28 = smov (!%p684_p3, %s1778_s28), 1  ;;  %vm706_vm0 = vcmask 261120   ;;  %vm737_vm1 = vcmask 64512  }
  0x13   : > { %722 = vmatpush.msra.mxu0 %v701_v0  ;;  %v698_v3 = vld [vmem:[%s2365_s4] sm:$0xff]  ;;  %s2059_s25 = sshll.u32 %s2380_s28, 3  ;;  %s2348_s28 = smov 88   ;;  %vm1230_vm6 = vcmask 39936   ;;  %vm1247_vm7 = vcmask 1044480   ;;  %vm1655_vm11 = vcmask 523264  }
  0x14   : > { %s687_s29 = scalar_lea.vmem %s2366_s27, %s2059_s25  ;;  %v1849_v5 = vld [vmem:[%s2367_s23] ss:$0 sm:$0xff]  ;;  %s2353_s27 = smov 112  }
  0x15   : > { %723 = vmatpush.msra.mxu0 %v700_v1  ;;  %v2065_v4 = vld [vmem:[%s687_s29] sm:$0xff]  ;;  %s1920_s23 = smov 48   ;;  %s1922_s29 = smov 40  }
  0x16   : > { %s2372_s30 = smov 120  }
  0x17   : > { %724 = vmatpush.msra.mxu0 %v699_v2  ;;  %v730_v26 = vld [vmem:[%s2368_s0] sm:$0xff]  ;;  %v731_v2 = vld [vmem:[%s2368_s0 + $0x8] sm:$0xff] }
  0x19   : > { %725 = vmatpush.msra.mxu0 %v698_v3  ;;  %v732_v3 = vld [vmem:[%s2368_s0 + $0x10] sm:$0xff] }
  0x1a   : > { %1786 = vmatmul.msk.f32.vlgmr.msra.gmra.mxu0 %vm706_vm0, %v2065_v4 }
  0x97   : > { %v727_v6 = vpop.f32.mrf.mxu0 }
  0x98   : > { %v2072_v7 = vadd.f32 %v1849_v5, %v727_v6 }
  0x9a   : > { %802 = vrot.lane.b32.xlu2 %v2072_v7, %s2348_s28  ;;  %735 = vrot.lane.b32.xlu0 %v2072_v7, %s2352_s1  ;;  %s2370_s1 = sld [smem:[#allocation3_spill]]  ;;  %s2377_s28 = smov 88  }
  0xa2   : > { %800 = vrot.lane.b32.xlu2 %v2072_v7, %s2355_s5 }
  0xaa   : > { %1004 = vrot.lane.b32.xlu2 %v2072_v7, %s2347_s24  ;;  %s2378_s24 = smov 72  }
  0xb2   : > { %1002 = vrot.lane.b32.xlu2 %v2072_v7, %s2350_s6 }
  0xba   : > { %914 = vrot.lane.b32.xlu2 %v2072_v7, %s2349_s26  ;;  %s2374_s26 = smov 96  }
  0xf4   : > { %v803_v8 = vpop.permute.xlu2 %802 }
  0xfc   : > { %v801_v9 = vpop.permute.xlu2 %800 }
 0x104   : > { %v1005_v10 = vpop.permute.xlu2 %1004 }
 0x10c   : > { %v1003_v11 = vpop.permute.xlu2 %1002  ;;  %v736_v12 = vpop.permute.xlu0 %735 }
 0x10d   : > { %1787 = vmatpush.xpose.msk.msra.mxu1 %vm737_vm1, %v736_v12 }
 0x110   : > { %1788 = vmatmul.msk.f32.vlgmr.msra.gmra.mxu1 %vm737_vm1, %v2072_v7 }
 0x111   : > { %884 = vmatpush.msrb.mxu1 %v731_v2 }
 0x113   : > { %996 = vmatpush.msra.mxu1 %v732_v3 }
 0x114   : > { %v915_v13 = vpop.permute.xlu2 %914 }
 0x115   : > { %1795 = vmatpush.xpose.msk.msrb.mxu0 %vm737_vm1, %v915_v13 }
 0x18d   : > { %v759_v14 = vpop.f32.mrf.mxu1 }
 0x18e   : > { %v762_v15 = vmul.f32 0.35355338, %v759_v14 }
 0x190   : > { %v763_v16 = vsel %vm737_vm1, %v762_v15, -inf }
 0x191   : > { %764 = vmax.xlane.f32.xlu0 %v763_v16 }
 0x204   : > { %v765_v17 = vpop.xlane.xlu0 %764 }
 0x205   : > { %v766_v18 = vsub.f32 %v762_v15, %v765_v17 }
 0x207   : > { %v767_v19 = vmul.f32 1.442695, %v766_v18 }
 0x209   : > { %1862 = vpow2.f32 %v767_v19  ;;  %v1923_v19 = vmov 32.0  }
 0x20f   : > { %v1863_v20 = vpop.eup %1862 }
 0x210   : > { %v769_v21 = vsel %vm737_vm1, %v1863_v20, 0.0 }
 0x211   : > { %770 = vadd.xlane.f32.xlu1 %v769_v21 }
 0x22a   : > { %774 = vrot.lane.b32.xlu1 %v2072_v7, %s1918_s2  ;;  %s1921_s2 = smov 56  }
 0x232   : > { %912 = vrot.lane.b32.xlu1 %v2072_v7, %s2353_s27  ;;  %s691_s27 = scalar_lea.vmem %s2370_s1, %s2059_s25  ;;  %s2373_s1 = smov 112  }
 0x284   : > { %v771_v22 = vpop.xlane.xlu1 %770 }
 0x285   : > { %1864 = vrcp.f32 %v771_v22 }
 0x28b   : > { %v1865_v23 = vpop.eup %1864 }
 0x28c   : > { %v773_v25 = vmul.f32 %v1865_v23, %v1863_v20 }
 0x29c   : > { %v775_v24 = vpop.permute.xlu1 %774 }
 0x29d   : > { %795 = vmatpush.msra.mxu3 %v775_v24 }
 0x29e   : > { %1789 = vmatmul.msk.f32.vlgmr.msra.gmra.mxu3 %vm737_vm1, %v773_v25 }
 0x29f   : > { %1790 = vmatpush.xpose.msk.msrb.mxu3 %vm737_vm1, %v803_v8 }
 0x2a3   : > { %907 = vmatpush.msra.mxu3 %v730_v26 }
 0x2a4   : > { %v913_v27 = vpop.permute.xlu1 %912 }
 0x2a5   : > { %1796 = vmatmul.msk.f32.vlgmr.msrb.gmra.mxu0 %vm737_vm1, %v913_v27 }
 0x2a6   : > { %1791 = vmatmul.msk.f32.vlgmr.msrb.gmra.mxu3 %vm737_vm1, %v801_v9 }
 0x2a7   : > { %1799 = vmatpush.xpose.msk.msrb.mxu3 %vm737_vm1, %v1005_v10 }
 0x321   : > { %v797_v28 = vpop.f32.mrf.mxu3 }
 0x322   : > { %1794 = vmatmul.msk.f32.vlgmr.msra.gmra.mxu3 %vm737_vm1, %v797_v28  ;;  %v937_v29 = vpop.f32.mrf.mxu0 }
 0x323   : > { %v940_v30 = vmul.f32 0.35355338, %v937_v29 }
 0x325   : > { %v941_v31 = vsel %vm737_vm1, %v940_v30, -inf }
 0x326   : > { %942 = vmax.xlane.f32.xlu1 %v941_v31  ;;  %v1170_v31 = vld [vmem:[%s2332_s10 + $0x10] sm:$0xff] }
 0x329   : > { %v825_v32 = vpop.f32.mrf.mxu3 }
 0x32a   : > { %v828_v33 = vmul.f32 0.35355338, %v825_v32  ;;  %1800 = vmatmul.msk.f32.vlgmr.msrb.gmra.mxu3 %vm737_vm1, %v1003_v11  ;;  %v1169_v32 = vld [vmem:[%s2332_s10 + $0x8] sm:$0xff] }
 0x32c   : > { %v829_v34 = vsel %vm737_vm1, %v828_v33, -inf }
 0x32d   : > { %830 = vmax.xlane.f32.xlu2 %v829_v34  ;;  %v697_v34 = vld [vmem:[%s691_s27] sm:$0x1f]  ;;  %s2375_s27 = smov 104  }
 0x33f   : > { %952 = vrot.lane.b32.xlu1 %v2072_v7, %s1920_s23  ;;  %s2371_s23 = sld [smem:[#allocation8_spill]] }
 0x399   : > { %v943_v39 = vpop.xlane.xlu1 %942 }
 0x39a   : > { %v944_v42 = vsub.f32 %v940_v30, %v943_v39  ;;  %v1171_v30 = vld [vmem:[%s2332_s10 + $0x18] sm:$0xff] }
 0x39b   : > { %1191 = vmatpush.msra.mxu3 %v1171_v30 }
 0x39c   : > { %v945_v44 = vmul.f32 1.442695, %v944_v42 }
 0x39d   : > { %1192 = vmatpush.msra.mxu3 %v1170_v31 }
 0x39f   : > { %1193 = vmatpush.msra.mxu3 %v1169_v32 }
 0x3a0   : > { %v831_v35 = vpop.xlane.xlu2 %830 }
 0x3a1   : > { %v832_v37 = vsub.f32 %v828_v33, %v831_v35  ;;  %v1168_v33 = vld [vmem:[%s2332_s10] sm:$0xff]  ;;  %v1140_v35 = vld [vmem:[%s2330_s8 + $0x18] sm:$0xff] }
 0x3a2   : > { %1194 = vmatpush.msra.mxu3 %v1168_v33 }
 0x3a3   : > { %v833_v38 = vmul.f32 1.442695, %v832_v37  ;;  %1804 = vmatmul.msk.f32.vlgmr.msra.gmra.mxu3 %vm706_vm0, %v697_v34  ;;  %v1138_v37 = vld [vmem:[%s2330_s8 + $0x8] sm:$0xff] }
 0x3a5   : > { %v2108_v36 = vpop.f32.mrf.mxu3  ;;  %1866 = vpow2.f32 %v833_v38  ;;  %v1137_v38 = vld [vmem:[%s2330_s8] sm:$0xff] }
 0x3a6   : > { %1868 = vpow2.f32 %v945_v44 }
 0x3ab   : > { %v1867_v45 = vpop.eup %1866 }
 0x3ac   : > { %v835_v46 = vsel %vm737_vm1, %v1867_v45, 0.0  ;;  %v1869_v47 = vpop.eup %1868 }
 0x3ad   : > { %v1027_v40 = vpop.f32.mrf.mxu3  ;;  %v947_v48 = vsel %vm737_vm1, %v1869_v47, 0.0 }
 0x3ae   : > { %v1030_v41 = vmul.f32 0.35355338, %v1027_v40 }
 0x3b0   : > { %v1031_v43 = vsel %vm737_vm1, %v1030_v41, -inf }
 0x3b1   : > { %1032 = vmax.xlane.f32.xlu0 %v1031_v43  ;;  %v953_v59 = vpop.permute.xlu1 %952 }
 0x3b9   : > { %836 = vadd.xlane.f32.xlu0 %v835_v46 }
 0x3c1   : > { %948 = vadd.xlane.f32.xlu0 %v947_v48  ;;  %v1851_v48 = vld [vmem:[%s2371_s23] ss:$0 sm:$0xff] }
 0x3d5   : > { %840 = vrot.lane.b32.xlu0 %v2072_v7, %s1921_s2  ;;  %s2369_s2 = sld [smem:[#allocation7_spill]] }
 0x3db   : > { %v1850_v13 = vld [vmem:[%s2369_s2] ss:$0 sm:$0xff]  ;;  %s2376_s2 = smov 80  }
 0x424   : > { %v1033_v49 = vpop.xlane.xlu0 %1032 }
 0x425   : > { %v1034_v50 = vsub.f32 %v1030_v41, %v1033_v49 }
 0x427   : > { %v1035_v51 = vmul.f32 1.442695, %v1034_v50 }
 0x429   : > { %1870 = vpow2.f32 %v1035_v51  ;;  %v1852_v51 = vld [vmem:[%s2329_s7] ss:$0 sm:$0xff] }
 0x42c   : > { %v837_v54 = vpop.xlane.xlu0 %836 }
 0x42d   : > { %1872 = vrcp.f32 %v837_v54  ;;  %v1853_v54 = vld [vmem:[%s2333_s11] ss:$0 sm:$0xff] }
 0x42f   : > { %v1871_v52 = vpop.eup %1870 }
 0x430   : > { %v1037_v53 = vsel %vm737_vm1, %v1871_v52, 0.0 }
 0x431   : > { %1038 = vadd.xlane.f32.xlu2 %v1037_v53 }
 0x433   : > { %v1873_v56 = vpop.eup %1872 }
 0x434   : > { %v949_v55 = vpop.xlane.xlu0 %948  ;;  %v839_v58 = vmul.f32 %v1873_v56, %v1867_v45 }
 0x435   : > { %1874 = vrcp.f32 %v949_v55  ;;  %v1196_v55 = vpop.f32.mrf.mxu3 }
 0x436   : > { %v2184_v56 = vadd.f32 %v1853_v54, %v1196_v55 }
 0x43b   : > { %v1875_v60 = vpop.eup %1874 }
 0x43c   : > { %v951_v61 = vmul.f32 %v1875_v60, %v1869_v47 }
 0x447   : > { %v841_v57 = vpop.permute.xlu0 %840 }
 0x448   : > { %861 = vmatpush.msra.mxu2 %v841_v57  ;;  %v1854_v57 = vld [vmem:[%s2331_s9] ss:$0 sm:$0xff] }
 0x449   : > { %1042 = vrot.lane.b32.xlu2 %v2072_v7, %s1922_s29  ;;  %1792 = vmatmul.msk.f32.vlgmr.msra.gmra.mxu2 %vm737_vm1, %v839_v58  ;;  %v733_v7 = vld [vmem:[%s2368_s0 + $0x18] sm:$0xff] }
 0x44a   : > { %973 = vmatpush.msrb.mxu2 %v953_v59 }
 0x44c   : > { %1086 = vmatpush.msra.mxu2 %v733_v7 }
 0x451   : > { %1797 = vmatmul.msk.f32.vlgmr.msrb.gmra.mxu2 %vm737_vm1, %v951_v61 }
 0x4a4   : > { %v1039_v62 = vpop.xlane.xlu2 %1038 }
 0x4a5   : > { %1876 = vrcp.f32 %v1039_v62 }
 0x4a6   : > { %1878 = vrcp.f32 %v1923_v19  ;;  %v1199_v19 = vld [vmem:[%s2334_s12] sm:$0xff] }
 0x4ab   : > { %v1877_v63 = vpop.eup %1876 }
 0x4ac   : > { %v1041_v0 = vmul.f32 %v1877_v63, %v1871_v52  ;;  %v1043_v1 = vpop.permute.xlu2 %1042  ;;  %v1879_v20 = vpop.eup %1878 }
 0x4ad   : > { %1063 = vmatpush.msra.mxu0 %v1043_v1  ;;  %v1104_v21 = vmul.f32 32.0, %v1879_v20  ;;  %vm1108_vm2 = vweird.f32 %v1879_v20 }
 0x4ae   : > { %1801 = vmatmul.msk.f32.vlgmr.msra.gmra.mxu0 %vm737_vm1, %v1041_v0 }
 0x4af   : > { %v1105_v22 = vsub.f32 1.0, %v1104_v21  ;;  %1805 = vmatpush.xpose.msk.msrb.mxu0 %vm737_vm1, %v2184_v56 }
 0x4b1   : > { %v1106_v23 = vmul.f32 %v1879_v20, %v1105_v22 }
 0x4b3   : > { %v1107_v24 = vadd.f32 %v1879_v20, %v1106_v23 }
 0x4b5   : > { %v2137_v25 = vsel %vm1108_vm2, %v1879_v20, %v1107_v24 }
 0x4cc   : > { %v863_v5 = vpop.f32.mrf.mxu2 }
 0x4cd   : > { %1793 = vmatmul.msk.f32.vlgmr.msrb.gmra.mxu1 %vm737_vm1, %v863_v5 }
 0x4ce   : > { %1160 = vmatpush.msrb.mxu1 %v1140_v35 }
 0x4d4   : > { %v975_v6 = vpop.f32.mrf.mxu2 }
 0x4d5   : > { %1798 = vmatmul.msk.f32.vlgmr.msra.gmra.mxu1 %vm737_vm1, %v975_v6 }
 0x52b   : > { %v1065_v8 = vpop.f32.mrf.mxu0 }
 0x52c   : > { %1802 = vmatmul.msk.f32.vlgmr.msra.gmra.mxu2 %vm737_vm1, %v1065_v8 }
 0x54a   : > { %v886_v9 = vpop.f32.mrf.mxu1 }
 0x54b   : > { %v910_v11 = vadd.f32 %v2108_v36, %v886_v9  ;;  %v1139_v36 = vld [vmem:[%s2330_s8 + $0x10] sm:$0xff] }
 0x54c   : > { %1161 = vmatpush.msrb.mxu1 %v1139_v36 }
 0x54e   : > { %1162 = vmatpush.msrb.mxu1 %v1138_v37 }
 0x550   : > { %1163 = vmatpush.msrb.mxu1 %v1137_v38 }
 0x552   : > { %v998_v10 = vpop.f32.mrf.mxu1 }
 0x553   : > { %v1001_v12 = vadd.f32 %v998_v10, %v910_v11 }
 0x5af   : > { %v1088_v14 = vpop.f32.mrf.mxu2 }
 0x5b0   : > { %v1091_v15 = vadd.f32 %v1088_v14, %v1001_v12 }
 0x5b2   : > { %v1096_v16 = vadd.f32 %v1850_v13, %v1091_v15 }
 0x5b4   : > { %v1097_v17 = vadd.f32 %v1096_v16, %v2065_v4 }
 0x5b6   : > { %v1100_v18 = vsel %vm706_vm0, %v1097_v17, 0.0 }
 0x5b7   : > { %1101 = vadd.xlane.f32.xlu0 %v1100_v18 }
 0x62a   : > { %v1102_v26 = vpop.xlane.xlu0 %1101 }
 0x62b   : > { %v1110_v27 = vmul.f32 %v2137_v25, %v1102_v26 }
 0x62d   : > { %v1111_v28 = vsub.f32 %v1097_v17, %v1110_v27 }
 0x62f   : > { %v1112_v29 = vmul.f32 %v1111_v28, %v1111_v28 }
 0x631   : > { %v1113_v4 = vsel %vm706_vm0, %v1112_v29, 0.0 }
 0x632   : > { %1114 = vadd.xlane.f32.xlu1 %v1113_v4 }
 0x64b   : > { %1272 = vrot.lane.b32.xlu1 %v2184_v56, %s2372_s30 }
 0x653   : > { %1385 = vrot.lane.b32.xlu1 %v2184_v56, %s2373_s1 }
 0x6a5   : > { %v1115_v39 = vpop.xlane.xlu1 %1114 }
 0x6a6   : > { %v1116_v40 = vmul.f32 %v1115_v39, %v2137_v25 }
 0x6a8   : > { %v1117_v41 = vadd.f32 1e-12, %v1116_v40 }
 0x6aa   : > { %1880 = vrsqrt.f32 %v1117_v41  ;;  %vm1124_vm4 = vweird.f32 %v1117_v41 }
 0x6b0   : > { %v1881_v42 = vpop.eup %1880 }
 0x6b1   : > { %v1119_v43 = vmul.f32 %v1881_v42, %v1117_v41  ;;  %vm1125_vm3 = vweird.f32 %v1881_v42 }
 0x6b2   : > { %vm1126_vm5 = vmor %vm1124_vm4, %vm1125_vm3 }
 0x6b3   : > { %v1120_v44 = vmul.f32 %v1881_v42, %v1119_v43 }
 0x6b5   : > { %v1121_v45 = vmul.f32 0.5, %v1120_v44 }
 0x6b7   : > { %v1122_v46 = vsub.f32 1.5, %v1121_v45 }
 0x6b9   : > { %v1123_v47 = vmul.f32 %v1881_v42, %v1122_v46 }
 0x6bb   : > { %v1127_v49 = vsel %vm1126_vm5, %v1881_v42, %v1123_v47 }
 0x6bc   : > { %v1128_v50 = vmul.f32 %v1127_v49, %v1111_v28 }
 0x6bd   : > { %v1273_v60 = vpop.permute.xlu1 %1272 }
 0x6be   : > { %v1132_v52 = vmul.f32 %v1851_v48, %v1128_v50  ;;  %1809 = vmatpush.xpose.msk.msra.mxu1 %vm737_vm1, %v1273_v60  ;;  %v1200_v50 = vld [vmem:[%s2334_s12 + $0x8] sm:$0xff] }
 0x6bf   : > { %1355 = vmatpush.msra.mxu0 %v1200_v50 }
 0x6c0   : > { %v2177_v53 = vadd.f32 %v1852_v51, %v1132_v52  ;;  %v1201_v51 = vld [vmem:[%s2334_s12 + $0x10] sm:$0xff] }
 0x6c2   : > { %1803 = vmatmul.msk.f32.vlgmr.msrb.gmra.mxu1 %vm706_vm0, %v2177_v53 }
 0x6c5   : > { %v1386_v61 = vpop.permute.xlu1 %1385 }
 0x6c6   : > { %1815 = vmatpush.xpose.msk.msrb.mxu1 %vm737_vm1, %v1386_v61 }
 0x73f   : > { %v1165_v58 = vpop.f32.mrf.mxu1 }
 0x740   : > { %v1166_v59 = vadd.f32 %v1854_v57, %v1165_v58 }
 0x742   : > { %1806 = vmatmul.msk.f32.vlgmr.msrb.gmra.mxu0 %vm737_vm1, %v1166_v59 }
 0x743   : > { %1468 = vmatpush.msrb.mxu0 %v1201_v51  ;;  %v1859_v51 = vld [vmem:[%s2341_s19] ss:$0 sm:$0xff] }
 0x7bf   : > { %v1226_v62 = vpop.f32.mrf.mxu0 }
 0x7c0   : > { %v1229_v63 = vmul.f32 0.35355338, %v1226_v62 }
 0x7c2   : > { %v1231_v0 = vsel %vm1230_vm6, %v1229_v63, -inf }
 0x7c3   : > { %1232 = vmax.xlane.f32.xlu2 %v1231_v0 }
 0x7db   : > { %1270 = vrot.lane.b32.xlu2 %v1166_v59, %s2372_s30 }
 0x7e3   : > { %1383 = vrot.lane.b32.xlu2 %v1166_v59, %s2373_s1 }
 0x836   : > { %v1233_v1 = vpop.xlane.xlu2 %1232 }
 0x837   : > { %v1234_v2 = vsub.f32 %v1229_v63, %v1233_v1  ;;  %v1855_v1 = vld [vmem:[%s2335_s13] ss:$0 sm:$0xff] }
 0x839   : > { %v1235_v3 = vmul.f32 1.442695, %v1234_v2 }
 0x83b   : > { %1882 = vpow2.f32 %v1235_v3 }
 0x83e   : > { %v1271_v5 = vpop.permute.xlu2 %1270 }
 0x83f   : > { %1810 = vmatmul.msk.f32.vlgmr.msra.gmra.mxu1 %vm737_vm1, %v1271_v5 }
 0x841   : > { %v1883_v6 = vpop.eup %1882 }
 0x842   : > { %v1237_v7 = vsel %vm1230_vm6, %v1883_v6, 0.0 }
 0x843   : > { %1238 = vadd.xlane.f32.xlu0 %v1237_v7 }
 0x846   : > { %v1384_v8 = vpop.permute.xlu2 %1383 }
 0x847   : > { %1816 = vmatmul.msk.f32.vlgmr.msrb.gmra.mxu1 %vm737_vm1, %v1384_v8 }
 0x857   : > { %1242 = vrot.lane.b32.xlu0 %v2184_v56, %s2374_s26 }
 0x85f   : > { %1476 = vrot.lane.b32.xlu0 %v2184_v56, %s2375_s27 }
 0x867   : > { %1474 = vrot.lane.b32.xlu0 %v1166_v59, %s2375_s27  ;;  %v1202_v59 = vld [vmem:[%s2334_s12 + $0x18] sm:$0xff] }
 0x8b6   : > { %v1239_v10 = vpop.xlane.xlu0 %1238 }
 0x8b7   : > { %1884 = vrcp.f32 %v1239_v10 }
 0x8bc   : > { %v1295_v9 = vpop.f32.mrf.mxu1 }
 0x8bd   : > { %v1298_v11 = vmul.f32 0.35355338, %v1295_v9  ;;  %v1885_v15 = vpop.eup %1884 }
 0x8be   : > { %v1241_v17 = vmul.f32 %v1885_v15, %v1883_v6  ;;  %v1603_v15 = vld [vmem:[%s2338_s16] sm:$0xff] }
 0x8bf   : > { %v1299_v12 = vsel %vm1230_vm6, %v1298_v11, -inf }
 0x8c0   : > { %1300 = vmax.xlane.f32.xlu0 %v1299_v12 }
 0x8c4   : > { %v1408_v13 = vpop.f32.mrf.mxu1 }
 0x8c5   : > { %v1411_v14 = vmul.f32 0.35355338, %v1408_v13  ;;  %v1606_v13 = vld [vmem:[%s2338_s16 + $0x18] sm:$0xff] }
 0x8c7   : > { %v1412_v16 = vsel %vm1230_vm6, %v1411_v14, -inf }
 0x8c8   : > { %1413 = vmax.xlane.f32.xlu1 %v1412_v16 }
 0x8c9   : > { %v1243_v18 = vpop.permute.xlu0 %1242 }
 0x8ca   : > { %1807 = vmatpush.msk.msrb.mxu2 %vm1247_vm7, %v1243_v18 }
 0x8cb   : > { %1808 = vmatmul.msk.f32.vlgmr.msrb.gmra.mxu2 %vm1230_vm6, %v1241_v17 }
 0x8cc   : > { %1378 = vmatpush.msra.mxu2 %v1199_v19 }
 0x8d1   : > { %v1477_v20 = vpop.permute.xlu0 %1476 }
 0x8d2   : > { %1820 = vmatpush.xpose.msk.msrb.mxu2 %vm737_vm1, %v1477_v20 }
 0x8d9   : > { %v1475_v21 = vpop.permute.xlu0 %1474 }
 0x933   : > { %v1301_v22 = vpop.xlane.xlu0 %1300 }
 0x934   : > { %v1302_v23 = vsub.f32 %v1298_v11, %v1301_v22 }
 0x936   : > { %v1303_v24 = vmul.f32 1.442695, %v1302_v23 }
 0x938   : > { %1886 = vpow2.f32 %v1303_v24 }
 0x93b   : > { %v1414_v26 = vpop.xlane.xlu1 %1413 }
 0x93c   : > { %v1415_v27 = vsub.f32 %v1411_v14, %v1414_v26  ;;  %v1604_v14 = vld [vmem:[%s2338_s16 + $0x8] sm:$0xff]  ;;  %v1856_v26 = vld [vmem:[%s2336_s14] ss:$0 sm:$0xff] }
 0x93e   : > { %v1887_v28 = vpop.eup %1886  ;;  %v1416_v29 = vmul.f32 1.442695, %v1415_v27 }
 0x93f   : > { %v1305_v4 = vsel %vm1230_vm6, %v1887_v28, 0.0 }
 0x940   : > { %1888 = vpow2.f32 %v1416_v29  ;;  %1306 = vadd.xlane.f32.xlu0 %v1305_v4  ;;  %v1857_v29 = vld [vmem:[%s2337_s15] ss:$0 sm:$0xff] }
 0x946   : > { %v1889_v30 = vpop.eup %1888 }
 0x947   : > { %v1418_v31 = vsel %vm1230_vm6, %v1889_v30, 0.0 }
 0x948   : > { %1419 = vadd.xlane.f32.xlu1 %v1418_v31  ;;  %v1650_v31 = vld [vmem:[%s2340_s18 + $0x38] sm:$0xff] }
 0x94e   : > { %v1267_v32 = vpop.f32.mrf.mxu2 }
 0x94f   : > { %1814 = vmatmul.msk.f32.vlgmr.msra.gmra.mxu2 %vm737_vm1, %v1267_v32  ;;  %v1649_v32 = vld [vmem:[%s2340_s18 + $0x30] sm:$0xff] }
 0x950   : > { %1667 = vmatpush.msra.mxu2 %v1650_v31 }
 0x952   : > { %1668 = vmatpush.msra.mxu2 %v1649_v32 }
 0x957   : > { %1821 = vmatmul.msk.f32.vlgmr.msrb.gmra.mxu2 %vm737_vm1, %v1475_v21 }
 0x961   : > { %1423 = vrot.lane.b32.xlu1 %v2184_v56, %s2376_s2 }
 0x9b3   : > { %v1307_v37 = vpop.xlane.xlu0 %1306 }
 0x9b4   : > { %1890 = vrcp.f32 %v1307_v37  ;;  %v1644_v37 = vld [vmem:[%s2340_s18 + $0x8] sm:$0xff] }
 0x9ba   : > { %v1891_v42 = vpop.eup %1890 }
 0x9bb   : > { %v1420_v40 = vpop.xlane.xlu1 %1419  ;;  %v1309_v43 = vmul.f32 %v1891_v42, %v1887_v28 }
 0x9d2   : > { %v1380_v33 = vpop.f32.mrf.mxu2 }
 0x9d3   : > { %v1424_v45 = vpop.permute.xlu1 %1423 }
 0x9da   : > { %v1499_v34 = vpop.f32.mrf.mxu2 }
 0x9db   : > { %v1502_v35 = vmul.f32 0.35355338, %v1499_v34  ;;  %v1647_v34 = vld [vmem:[%s2340_s18 + $0x20] sm:$0xff] }
 0x9dd   : > { %v1503_v36 = vsel %vm1230_vm6, %v1502_v35, -inf }
 0x9de   : > { %1504 = vmax.xlane.f32.xlu2 %v1503_v36  ;;  %v1645_v36 = vld [vmem:[%s2340_s18 + $0x10] sm:$0xff] }
 0x9f6   : > { %1310 = vrot.lane.b32.xlu2 %v2184_v56, %s2377_s28  ;;  %s695_s28 = scalar_lea.vmem %s2344_s22, %s2059_s25 }
 0xa51   : > { %v1505_v38 = vpop.xlane.xlu2 %1504 }
 0xa52   : > { %v1506_v39 = vsub.f32 %v1502_v35, %v1505_v38  ;;  %v1646_v35 = vld [vmem:[%s2340_s18 + $0x18] sm:$0xff]  ;;  %v1643_v38 = vld [vmem:[%s2340_s18] sm:$0xff] }
 0xa54   : > { %v1507_v41 = vmul.f32 1.442695, %v1506_v39  ;;  %v1858_v39 = vld [vmem:[%s2339_s17] ss:$0 sm:$0xff] }
 0xa56   : > { %1892 = vpow2.f32 %v1507_v41 }
 0xa57   : > { %1894 = vrcp.f32 %v1420_v40 }
 0xa59   : > { %v1311_v44 = vpop.permute.xlu2 %1310 }
 0xa5a   : > { %1811 = vmatpush.msk.msrb.mxu3 %vm1247_vm7, %v1311_v44 }
 0xa5b   : > { %1812 = vmatmul.msk.f32.vlgmr.msrb.gmra.mxu3 %vm1230_vm6, %v1309_v43 }
 0xa5c   : > { %v1893_v46 = vpop.eup %1892  ;;  %1817 = vmatpush.msk.msra.mxu3 %vm1247_vm7, %v1424_v45 }
 0xa5d   : > { %v1509_v47 = vsel %vm1230_vm6, %v1893_v46, 0.0  ;;  %v1895_v48 = vpop.eup %1894 }
 0xa5e   : > { %1510 = vadd.xlane.f32.xlu0 %v1509_v47  ;;  %v1422_v49 = vmul.f32 %v1895_v48, %v1889_v30  ;;  %1559 = vmatpush.msrb.mxu3 %v1202_v59 }
 0xa63   : > { %1818 = vmatmul.msk.f32.vlgmr.msra.gmra.mxu3 %vm1230_vm6, %v1422_v49 }
 0xa72   : > { %1514 = vrot.lane.b32.xlu0 %v2184_v56, %s2378_s24 }
 0xad1   : > { %v1511_v52 = vpop.xlane.xlu0 %1510 }
 0xad2   : > { %1896 = vrcp.f32 %v1511_v52 }
 0xad8   : > { %v1897_v55 = vpop.eup %1896 }
 0xad9   : > { %v1513_v57 = vmul.f32 %v1897_v55, %v1893_v46 }
 0xade   : > { %v1334_v54 = vpop.f32.mrf.mxu3 }
 0xadf   : > { %1813 = vmatmul.msk.f32.vlgmr.msra.gmra.mxu0 %vm737_vm1, %v1334_v54 }
 0xae0   : > { %1626 = vmatpush.msra.mxu0 %v1606_v13 }
 0xae4   : > { %v1515_v58 = vpop.permute.xlu0 %1514 }
 0xae5   : > { %1822 = vmatpush.msk.msra.mxu1 %vm1247_vm7, %v1515_v58 }
 0xae6   : > { %v1447_v56 = vpop.f32.mrf.mxu3  ;;  %1823 = vmatmul.msk.f32.vlgmr.msra.gmra.mxu1 %vm1230_vm6, %v1513_v57 }
 0xae7   : > { %1819 = vmatmul.msk.f32.vlgmr.msrb.gmra.mxu0 %vm737_vm1, %v1447_v56 }
 0xb5c   : > { %v1357_v61 = vpop.f32.mrf.mxu0 }
 0xb5d   : > { %v1381_v63 = vadd.f32 %v1380_v33, %v1357_v61  ;;  %v1648_v33 = vld [vmem:[%s2340_s18 + $0x28] sm:$0xff] }
 0xb5e   : > { %1669 = vmatpush.msra.mxu2 %v1648_v33 }
 0xb60   : > { %1670 = vmatpush.msra.mxu2 %v1647_v34 }
 0xb62   : > { %1671 = vmatpush.msra.mxu2 %v1646_v35 }
 0xb63   : > { %v1538_v60 = vpop.f32.mrf.mxu1 }
 0xb64   : > { %1824 = vmatmul.msk.f32.vlgmr.msrb.gmra.mxu3 %vm737_vm1, %v1538_v60  ;;  %v1470_v62 = vpop.f32.mrf.mxu0  ;;  %1672 = vmatpush.msra.mxu2 %v1645_v36 }
 0xb65   : > { %v1473_v0 = vadd.f32 %v1470_v62, %v1381_v63 }
 0xb66   : > { %1673 = vmatpush.msra.mxu2 %v1644_v37 }
 0xb68   : > { %1674 = vmatpush.msra.mxu2 %v1643_v38 }
 0xbe7   : > { %v1561_v2 = vpop.f32.mrf.mxu3 }
 0xbe8   : > { %v1564_v3 = vadd.f32 %v1561_v2, %v1473_v0 }
 0xbea   : > { %v1569_v5 = vadd.f32 %v1855_v1, %v1564_v3 }
 0xbec   : > { %v1570_v6 = vadd.f32 %v1569_v5, %v2177_v53  ;;  %v1605_v53 = vld [vmem:[%s2338_s16 + $0x10] sm:$0xff] }
 0xbed   : > { %1627 = vmatpush.msra.mxu0 %v1605_v53 }
 0xbee   : > { %v1573_v7 = vsel %vm706_vm0, %v1570_v6, 0.0 }
 0xbef   : > { %1574 = vadd.xlane.f32.xlu2 %v1573_v7  ;;  %1628 = vmatpush.msra.mxu0 %v1604_v14 }
 0xbf1   : > { %1629 = vmatpush.msra.mxu0 %v1603_v15 }
 0xc62   : > { %v1575_v8 = vpop.xlane.xlu2 %1574 }
 0xc63   : > { %v1576_v9 = vmul.f32 %v1575_v8, %v2137_v25  ;;  %v1860_v8 = vld [vmem:[%s2342_s20] ss:$0 sm:$0xff] }
 0xc65   : > { %v1577_v10 = vsub.f32 %v1570_v6, %v1576_v9 }
 0xc67   : > { %v1578_v11 = vmul.f32 %v1577_v10, %v1577_v10 }
 0xc69   : > { %v1579_v12 = vsel %vm706_vm0, %v1578_v11, 0.0 }
 0xc6a   : > { %1580 = vadd.xlane.f32.xlu0 %v1579_v12 }
 0xcdd   : > { %v1581_v16 = vpop.xlane.xlu0 %1580 }
 0xcde   : > { %v1582_v17 = vmul.f32 %v1581_v16, %v2137_v25 }
 0xce0   : > { %v1583_v18 = vadd.f32 1e-12, %v1582_v17 }
 0xce2   : > { %1898 = vrsqrt.f32 %v1583_v18  ;;  %vm1590_vm9 = vweird.f32 %v1583_v18 }
 0xce8   : > { %v1899_v19 = vpop.eup %1898 }
 0xce9   : > { %v1585_v20 = vmul.f32 %v1899_v19, %v1583_v18  ;;  %vm1591_vm8 = vweird.f32 %v1899_v19 }
 0xcea   : > { %vm1592_vm10 = vmor %vm1590_vm9, %vm1591_vm8 }
 0xceb   : > { %v1586_v21 = vmul.f32 %v1899_v19, %v1585_v20 }
 0xced   : > { %v1587_v22 = vmul.f32 0.5, %v1586_v21 }
 0xcef   : > { %v1588_v23 = vsub.f32 1.5, %v1587_v22 }
 0xcf1   : > { %v1589_v24 = vmul.f32 %v1899_v19, %v1588_v23 }
 0xcf3   : > { %v1593_v27 = vsel %vm1592_vm10, %v1899_v19, %v1589_v24 }
 0xcf4   : > { %v1594_v28 = vmul.f32 %v1593_v27, %v1577_v10 }
 0xcf6   : > { %v1598_v4 = vmul.f32 %v1856_v26, %v1594_v28 }
 0xcf8   : > { %v1602_v30 = vadd.f32 %v1857_v29, %v1598_v4 }
 0xcfa   : > { %1825 = vmatmul.msk.f32.vlgmr.msra.gmra.mxu0 %vm706_vm0, %v1602_v30 }
 0xd77   : > { %v1631_v40 = vpop.f32.mrf.mxu0 }
 0xd78   : > { %v1632_v41 = vadd.f32 %v1858_v39, %v1631_v40 }
 0xd7a   : > { %v1635_v42 = vmul.f32 0.044715, %v1632_v41  ;;  %v1634_v48 = vmul.f32 0.5, %v1632_v41 }
 0xd7c   : > { %v1636_v43 = vmul.f32 %v1635_v42, %v1632_v41 }
 0xd7e   : > { %v1637_v44 = vmul.f32 %v1636_v43, %v1632_v41 }
 0xd80   : > { %v1638_v45 = vadd.f32 %v1637_v44, %v1632_v41 }
 0xd82   : > { %v1639_v46 = vmul.f32 0.7978846, %v1638_v45 }
 0xd84   : > { %1900 = vtanh.f32 %v1639_v46 }
 0xd8a   : > { %v1901_v47 = vpop.eup %1900 }
 0xd8b   : > { %v1641_v49 = vadd.f32 1.0, %v1901_v47 }
 0xd8d   : > { %v1642_v50 = vmul.f32 %v1641_v49, %v1634_v48 }
 0xd8f   : > { %1826 = vmatmul.msk.f32.vlgmr.msra.gmra.mxu2 %vm1655_vm11, %v1642_v50 }
 0xe12   : > { %v1676_v52 = vpop.f32.mrf.mxu2 }
 0xe13   : > { %v1677_v54 = vadd.f32 %v1859_v51, %v1676_v52 }
 0xe15   : > { %v1679_v55 = vadd.f32 %v1677_v54, %v1602_v30 }
 0xe17   : > { %v1682_v57 = vsel %vm706_vm0, %v1679_v55, 0.0 }
 0xe18   : > { %1683 = vadd.xlane.f32.xlu1 %v1682_v57 }
 0xe8b   : > { %v1684_v58 = vpop.xlane.xlu1 %1683 }
 0xe8c   : > { %v1685_v56 = vmul.f32 %v1684_v58, %v2137_v25 }
 0xe8e   : > { %v1686_v59 = vsub.f32 %v1679_v55, %v1685_v56 }
 0xe90   : > { %v1687_v60 = vmul.f32 %v1686_v59, %v1686_v59 }
 0xe92   : > { %v1688_v61 = vsel %vm706_vm0, %v1687_v60, 0.0 }
 0xe93   : > { %1689 = vadd.xlane.f32.xlu2 %v1688_v61 }
 0xf06   : > { %v1690_v62 = vpop.xlane.xlu2 %1689 }
 0xf07   : > { %v1691_v63 = vmul.f32 %v1690_v62, %v2137_v25  ;;  %v1861_v25 = vld [vmem:[%s2343_s21] ss:$0 sm:$0xff] }
 0xf09   : > { %v1692_v0 = vadd.f32 1e-12, %v1691_v63 }
 0xf0b   : > { %1902 = vrsqrt.f32 %v1692_v0  ;;  %vm1699_vm13 = vweird.f32 %v1692_v0 }
 0xf11   : > { %v1903_v1 = vpop.eup %1902 }
 0xf12   : > { %v1694_v2 = vmul.f32 %v1903_v1, %v1692_v0  ;;  %vm1700_vm12 = vweird.f32 %v1903_v1 }
 0xf13   : > { %vm1701_vm14 = vmor %vm1699_vm13, %vm1700_vm12 }
 0xf14   : > { %v1695_v3 = vmul.f32 %v1903_v1, %v1694_v2 }
 0xf16   : > { %v1696_v5 = vmul.f32 0.5, %v1695_v3 }
 0xf18   : > { %v1697_v6 = vsub.f32 1.5, %v1696_v5 }
 0xf1a   : > { %v1698_v7 = vmul.f32 %v1903_v1, %v1697_v6 }
 0xf1c   : > { %v1702_v9 = vsel %vm1701_vm14, %v1903_v1, %v1698_v7 }
 0xf1d   : > { %v1703_v10 = vmul.f32 %v1702_v9, %v1686_v59 }
 0xf1f   : > { %v1707_v11 = vmul.f32 %v1860_v8, %v1703_v10 }
 0xf21   : > { %v1711_v12 = vadd.f32 %v1861_v25, %v1707_v11 }
 0xf23   : > { %1712 = vst.msk [vmem:[%s695_s28] sm:$0xff] %vm706_vm0, %v1711_v12 }
 0xf24 PF: > { %s32_s3 = sadd.s32 1, %s1910_s3  }
 0xf25   : > { %p29_p4 = scmp.ge.s32.totalorder %s32_s3, 4  }
 0xf27   :  { %31 = sbr.rel (!%p29_p4) target bundleno = 8 (0x8), region = 141 }

// kernel: blip_forward.24
= control target key start
LH: loop header
LB: loop body
LE: loop exit
PB: predicated region body
PF: predicated region fallthrough
CT: control target
= control target key end

     0   :  { %vm19_vm0 = vcmask 261120   ;;  %vm23_vm1 = vcmask 257024   ;;  %v86_v6 = vmov 32.0   ;;  %s129_s0 = inlined_call_operand.vmem [shape: f32[12,32], index: 0, kind: input, shape index: {}]   ;;  %s130_s1 = inlined_call_operand.vmem [shape: f32[1,32], index: 1, kind: input, shape index: {}]   ;;  %s131_s2 = inlined_call_operand.vmem [shape: f32[1,32], index: 2, kind: input, shape index: {}]   ;;  %s132_s3 = inlined_call_operand.vmem [shape: f32[12,32], index: 3, kind: output, shape index: {}]  }
   0x1   :  { %v14_v0 = vld [vmem:[%s129_s0] sm:$0xff]  ;;  %v15_v2 = vld [vmem:[%s129_s0 + $0x8] sm:$0xf]  ;;  %80 = vrcp.f32 %v86_v6 }
   0x2   :  { %v17_v1 = vmul.f32 %v14_v0, %v14_v0  ;;  %v18_v4 = vmul.f32 %v15_v2, %v15_v2  ;;  %v78_v27 = vld [vmem:[%s130_s1] ss:$0 sm:$0xff] }
   0x3   :  { %v79_v30 = vld [vmem:[%s131_s2] ss:$0 sm:$0xff] }
   0x4   :  { %v20_v3 = vsel %vm19_vm0, %v17_v1, 0.0  ;;  %v24_v5 = vsel %vm23_vm1, %v18_v4, 0.0 }
   0x5   :  { %21 = vadd.xlane.f32.xlu0 %v20_v3 }
   0x7   :  { %v81_v7 = vpop.eup %80 }
   0x8   :  { %v28_v8 = vmul.f32 32.0, %v81_v7  ;;  %vm32_vm2 = vweird.f32 %v81_v7 }
   0xa   :  { %v29_v9 = vsub.f32 1.0, %v28_v8 }
   0xc   :  { %v30_v10 = vmul.f32 %v81_v7, %v29_v9 }
   0xd   :  { %25 = vadd.xlane.f32.xlu0 %v24_v5 }
   0xe   :  { %v31_v11 = vadd.f32 %v81_v7, %v30_v10 }
  0x10   :  { %v33_v12 = vsel %vm32_vm2, %v81_v7, %v31_v11 }
  0x78   :  { %v22_v13 = vpop.xlane.xlu0 %21 }
  0x79   :  { %v34_v14 = vmul.f32 %v33_v12, %v22_v13 }
  0x7b   :  { %v36_v15 = vadd.f32 1e-06, %v34_v14 }
  0x7d   :  { %82 = vrsqrt.f32 %v36_v15  ;;  %vm44_vm4 = vweird.f32 %v36_v15 }
  0x80   :  { %v26_v16 = vpop.xlane.xlu0 %25 }
  0x81   :  { %v35_v17 = vmul.f32 %v33_v12, %v26_v16 }
  0x83   :  { %v83_v18 = vpop.eup %82  ;;  %v37_v19 = vadd.f32 1e-06, %v35_v17 }
  0x84   :  { %v39_v20 = vmul.f32 %v83_v18, %v36_v15  ;;  %vm45_vm3 = vweird.f32 %v83_v18 }
  0x85   :  { %84 = vrsqrt.f32 %v37_v19  ;;  %vm46_vm5 = vmor %vm44_vm4, %vm45_vm3  ;;  %vm54_vm7 = vweird.f32 %v37_v19 }
  0x86   :  { %v40_v21 = vmul.f32 %v83_v18, %v39_v20 }
  0x88   :  { %v41_v22 = vmul.f32 0.5, %v40_v21 }
  0x8a   :  { %v42_v23 = vsub.f32 1.5, %v41_v22 }
  0x8b   :  { %v85_v24 = vpop.eup %84 }
  0x8c   :  { %v43_v25 = vmul.f32 %v83_v18, %v42_v23  ;;  %v49_v26 = vmul.f32 %v85_v24, %v37_v19  ;;  %vm55_vm6 = vweird.f32 %v85_v24 }
  0x8d   :  { %vm56_vm8 = vmor %vm54_vm7, %vm55_vm6 }
  0x8e   :  { %v47_v28 = vsel %vm46_vm5, %v83_v18, %v43_v25  ;;  %v50_v29 = vmul.f32 %v85_v24, %v49_v26 }
  0x8f   :  { %v58_v31 = vmul.f32 %v47_v28, %v14_v0 }
  0x90   :  { %v51_v32 = vmul.f32 0.5, %v50_v29 }
  0x91   :  { %v63_v33 = vmul.f32 %v78_v27, %v58_v31 }
  0x92   :  { %v52_v34 = vsub.f32 1.5, %v51_v32 }
  0x93   :  { %v69_v35 = vadd.f32 %v79_v30, %v63_v33 }
  0x94   :  { %v53_v36 = vmul.f32 %v85_v24, %v52_v34 }
  0x95   :  { %71 = vst.msk [vmem:[%s132_s3] sm:$0xff] %vm19_vm0, %v69_v35 }
  0x96   :  { %v57_v37 = vsel %vm56_vm8, %v85_v24, %v53_v36 }
  0x97   :  { %v59_v38 = vmul.f32 %v57_v37, %v15_v2 }
  0x99   :  { %v64_v39 = vmul.f32 %v78_v27, %v59_v38 }
  0x9b   :  { %v70_v40 = vadd.f32 %v79_v30, %v64_v39 }
  0x9d   :  { %72 = vst.msk [vmem:[%s132_s3 + $0x8] sm:$0xf] %vm23_vm1, %v70_v40 }

// kernel: blip_forward.25
= control target key start
LH: loop header
LB: loop body
LE: loop exit
PB: predicated region body
PF: predicated region fallthrough
CT: control target
= control target key end

     0   :  { %v218_v3 = vmov 0   ;;  %s275_s0 = inlined_call_operand.vmem [shape: f32[12,32], index: 0, kind: input, shape index: {}]   ;;  %s276_s1 = inlined_call_operand.vmem [shape: f32[32,128], index: 1, kind: input, shape index: {}]   ;;  %s277_s2 = inlined_call_operand.vmem [shape: s32[12,1], index: 2, kind: input, shape index: {}]   ;;  %s278_s3 = inlined_call_operand.hbm [shape: f32[1,1], index: 3, kind: output, shape index: {}]  }
   0x1   :  { %v20_v0 = vld [vmem:[%s276_s1 + $0x18] sm:$0xff]  ;;  %v19_v1 = vld [vmem:[%s276_s1 + $0x10] sm:$0xff]  ;;  %v18_v2 = vld [vmem:[%s276_s1 + $0x8] sm:$0xff]  ;;  %180 = vset.pattern.permute.xlu1 %v218_v3  ;;  %181 = vset.pattern.permute.xlu0 %v218_v3 }
   0x2   :  { %169 = vmatpush.msra.mxu1 %v20_v0  ;;  %40 = vmatpush.msra.mxu0 %v20_v0  ;;  %v52_v4 = vld [vmem:[%s277_s2 + $0x8] sm:$0xf] }
   0x3   :  { %8 = vsyncpa [#allocation3], 0  ;;  %v17_v5 = vld [vmem:[%s276_s1] sm:$0xff]  ;;  %82 = vperm.xlu1 %180, %v52_v4   ;;  %v16_v6 = vld [vmem:[%s275_s0 + $0x8] sm:$0xf]  ;;  %vm21_vm0 = vcmask 261120   ;;  %v76_v9 = vlaneseq }
   0x4   :  { %170 = vmatpush.msra.mxu1 %v19_v1  ;;  %41 = vmatpush.msra.mxu0 %v19_v1  ;;  %v15_v7 = vld [vmem:[%s275_s0] sm:$0xff]  ;;  %vm55_vm2 = vcmask 1043456   ;;  %vm94_vm4 = vcmp.ne.s32.totalorder %v52_v4, 4294967196  ;;  %v219_v28 = vmov 0.0   ;;  %vm103_vm6 = vcmask 7168   ;;  %s156_s4 = sshll.u32 %s278_s3, 4  ;;  %s157_s4 = int_to_ptr.hbm [resolvable:$true] %s156_s4 }
   0x5   :  { %v51_v8 = vld [vmem:[%s277_s2] sm:$0xff]  ;;  %v77_v10 = vand.u32 127, %v76_v9  ;;  %v168_v29 = vsel %vm94_vm4, 1.0, %v219_v28  ;;  %vm105_vm7 = vcmask 3072   ;;  %s220_s2 = smov [#allocation2]   ;;  %vm147_vm12 = vcmask 0  }
   0x6   :  { %171 = vmatpush.msra.mxu1 %v18_v2  ;;  %42 = vmatpush.msra.mxu0 %v18_v2  ;;  %vm93_vm5 = vcmp.ne.s32.totalorder %v51_v8, 4294967196  ;;  %v119_v32 = vsel %vm105_vm7, %v168_v29, 0.0  ;;  %s154_s28 = sshll.u32 %s220_s2, 4  ;;  %s155_s28 = int_to_ptr.vmem [resolvable:$true] %s154_s28 }
   0x7   :  { %v167_v30 = vsel %vm93_vm5, 1.0, %v219_v28 }
   0x8   :  { %172 = vmatpush.msra.mxu1 %v17_v5  ;;  %43 = vmatpush.msra.mxu0 %v17_v5  ;;  %v118_v31 = vsel %vm103_vm6, %v167_v30, 0.0 }
   0x9   :  { %166 = vmatmul.msk.f32.vlgmr.msra.gmra.mxu1 %vm21_vm0, %v16_v6  ;;  %165 = vmatmul.msk.f32.vlgmr.msra.gmra.mxu0 %vm21_vm0, %v15_v7  ;;  %v120_v33 = vadd.f32 %v119_v32, %v118_v31 }
   0xb   :  { %79 = vperm.xlu1 %180, %v51_v8  }
  0x75   :  { %v83_v11 = vpop.permute.xlu1 %82 }
  0x76   :  { %vm85_vm1 = vcmp.eq.s32.totalorder %v77_v10, %v83_v11 }
  0x7d   :  { %v80_v17 = vpop.permute.xlu1 %79 }
  0x7e   :  { %vm84_vm3 = vcmp.eq.s32.totalorder %v77_v10, %v80_v17 }
  0x86   :  { %v48_v12 = vpop.f32.mrf.mxu1  ;;  %v45_v16 = vpop.f32.mrf.mxu0 }
  0x87   :  { %v56_v13 = vsel %vm55_vm2, %v48_v12, -inf  ;;  %v87_v14 = vsel %vm85_vm1, %v48_v12, 0.0  ;;  %v86_v18 = vsel %vm84_vm3, %v45_v16, 0.0 }
  0x88   :  { %57 = vmax.xlane.f32.xlu0 %v56_v13  ;;  %v90_v15 = vsel %vm55_vm2, %v87_v14, 0.0 }
  0x89   :  { %91 = vadd.xlane.f32.xlu1 %v90_v15 }
  0x90   :  { %53 = vmax.xlane.f32.xlu0 %v45_v16 }
  0x98   :  { %88 = vadd.xlane.f32.xlu0 %v86_v18 }
  0xa0   :  { %121 = vadd.xlane.f32.xlu0 %v120_v33 }
  0xfb   :  { %v58_v19 = vpop.xlane.xlu0 %57 }
  0xfc   :  { %v60_v22 = vsub.f32 %v48_v12, %v58_v19  ;;  %v92_v44 = vpop.xlane.xlu1 %91 }
  0xfe   :  { %v63_v24 = vmul.f32 1.442695, %v60_v22 }
 0x103   :  { %v54_v20 = vpop.xlane.xlu0 %53 }
 0x104   :  { %v59_v21 = vsub.f32 %v45_v16, %v54_v20 }
 0x106   :  { %v61_v23 = vmul.f32 1.442695, %v59_v21 }
 0x108   :  { %182 = vpow2.f32 %v61_v23 }
 0x109   :  { %184 = vpow2.f32 %v63_v24 }
 0x10b   :  { %v89_v40 = vpop.xlane.xlu0 %88 }
 0x10e   :  { %v183_v25 = vpop.eup %182 }
 0x10f   :  { %65 = vadd.xlane.f32.xlu2 %v183_v25  ;;  %v185_v26 = vpop.eup %184 }
 0x110   :  { %v67_v27 = vsel %vm55_vm2, %v185_v26, 0.0 }
 0x113   :  { %v122_v51 = vpop.xlane.xlu0 %121 }
 0x114   :  { %v123_v52 = vrot.slane %v122_v51, 4 }
 0x116   :  { %v124_v53 = vadd.f32 %v123_v52, %v122_v51 }
 0x117   :  { %68 = vadd.xlane.f32.xlu2 %v67_v27 }
 0x118   :  { %v125_v54 = vrot.slane %v124_v53, 2 }
 0x11a   :  { %v126_v58 = vadd.f32 %v125_v54, %v124_v53 }
 0x11c   :  { %v127_v61 = vrot.slane %v126_v58, 1 }
 0x11e   :  { %v128_v0 = vadd.f32 %v127_v61, %v126_v58 }
 0x182   :  { %v66_v34 = vpop.xlane.xlu2 %65 }
 0x183   :  { %186 = vlog2.f32 %v66_v34 }
 0x189   :  { %v187_v35 = vpop.eup %186 }
 0x18a   :  { %v71_v36 = vmul.f32 0.6931472, %v187_v35  ;;  %v69_v37 = vpop.xlane.xlu2 %68 }
 0x18b   :  { %188 = vlog2.f32 %v69_v37 }
 0x18c   :  { %v74_v38 = vadd.f32 %v71_v36, %v54_v20 }
 0x18e   :  { %v99_v41 = vsub.f32 %v74_v38, %v89_v40 }
 0x190   :  { %v101_v46 = vmul.f32 %v167_v30, %v99_v41 }
 0x191   :  { %v189_v39 = vpop.eup %188 }
 0x192   :  { %v73_v42 = vmul.f32 0.6931472, %v189_v39  ;;  %v104_v48 = vsel %vm103_vm6, %v101_v46, 0.0 }
 0x194   :  { %v75_v43 = vadd.f32 %v73_v42, %v58_v19 }
 0x196   :  { %v100_v45 = vsub.f32 %v75_v43, %v92_v44 }
 0x198   :  { %v102_v47 = vmul.f32 %v168_v29, %v100_v45 }
 0x19a   :  { %v106_v49 = vsel %vm105_vm7, %v102_v47, 0.0 }
 0x19b   :  { %v107_v50 = vadd.f32 %v106_v49, %v104_v48 }
 0x19d   :  { %108 = vadd.xlane.f32.xlu2 %v107_v50 }
 0x210   :  { %v109_v55 = vpop.xlane.xlu2 %108 }
 0x211   :  { %v110_v56 = vrot.slane %v109_v55, 4 }
 0x213   :  { %v111_v57 = vadd.f32 %v110_v56, %v109_v55 }
 0x215   :  { %v112_v59 = vrot.slane %v111_v57, 2 }
 0x217   :  { %v113_v60 = vadd.f32 %v112_v59, %v111_v57 }
 0x219   :  { %v114_v62 = vrot.slane %v113_v60, 1 }
 0x21b   :  { %v115_v63 = vadd.f32 %v114_v62, %v113_v60 }
 0x21d   :  { %173 = vpush %v115_v63 }
 0x21e   :  { %175 = vpush %v128_v0 }
 0x24e   :  { %s174_s0 = spop %173 }
 0x24f   :  { %s176_s1 = spop %175  ;;  %v117_v12 = vstv %s174_s0 }
 0x250   :  { %v130_v1 = vstv %s176_s1 }
 0x251   :  { %v131_v2 = vmax.f32 %v130_v1, 1.0 }
 0x253   :  { %190 = vrcp.f32 %v131_v2  ;;  %v143_v6 = vand.u32 2147483648, %v131_v2  ;;  %v141_v8 = vand.u32 2147483647, %v131_v2  ;;  %vm137_vm9 = vweird.f32 %v131_v2 }
 0x255   :  { %v144_v10 = vor.u32 1.1754944e-38, %v143_v6  ;;  %vm142_vm11 = vcmp.eq.f32.partialorder %v141_v8, 8.507059e+37 }
 0x259   :  { %v191_v3 = vpop.eup %190 }
 0x25a   :  { %v133_v4 = vmul.f32 %v191_v3, %v131_v2  ;;  %vm138_vm8 = vweird.f32 %v191_v3 }
 0x25b   :  { %vm139_vm10 = vmor %vm137_vm9, %vm138_vm8 }
 0x25c   :  { %v134_v5 = vsub.f32 1.0, %v133_v4 }
 0x25e   :  { %v135_v7 = vmul.f32 %v191_v3, %v134_v5 }
 0x260   :  { %v136_v9 = vadd.f32 %v191_v3, %v135_v7 }
 0x262   :  { %v140_v11 = vsel %vm139_vm10, %v191_v3, %v136_v9 }
 0x263   :  { %v145_v13 = vsel %vm142_vm11, %v144_v10, %v140_v11 }
 0x264   :  { %v146_v14 = vmul.f32 %v145_v13, %v117_v12 }
 0x266   :  { %148 = vst.msk [vmem:[#allocation2] sm:$0x1] %vm147_vm12, %v146_v14 }
 0x267   :  { %159 = dma.vmem_to_hbm [thread:$0]  %s155_s28, 16, %s157_s4, [#allocation3]  }
 0x268   :  { %216 = dma.done.wait [#allocation3], 16  }
 0x269   :  { %217 = vsyncadd [#allocation3], 4294967280 }
 0x26a   :  { %164 = vsyncpa [#allocation3], 1 }

// kernel: blip_forward.23
= control target key start
LH: loop header
LB: loop body
LE: loop exit
PB: predicated region body
PF: predicated region fallthrough
CT: control target
= control target key end

     0   :  { %s1711_s25 = smov 0   ;;  %s1982_s0 = inlined_call_operand.vmem [shape: f32[2,6,32], index: 0, kind: input, shape index: {}]   ;;  %s1983_s1 = inlined_call_operand.vmem [shape: f32[2,8,32], index: 1, kind: input, shape index: {}]   ;;  %s1984_s2 = inlined_call_operand.vmem [shape: f32[1,32], index: 2, kind: input, shape index: {}]   ;;  %s1985_s3 = inlined_call_operand.vmem [shape: f32[32,96], index: 3, kind: input, shape index: {}]   ;;  %s1986_s4 = inlined_call_operand.vmem [shape: f32[32,32], index: 4, kind: input, shape index: {}]   ;;  %s1987_s5 = inlined_call_operand.vmem [shape: f32[1,32], index: 5, kind: input, shape index: {}]   ;;  %s1988_s6 = inlined_call_operand.vmem [shape: f32[32,32], index: 6, kind: input, shape index: {}]   ;;  %s1989_s7 = inlined_call_operand.vmem [shape: f32[32,64], index: 7, kind: input, shape index: {}]   ;;  %s1990_s8 = inlined_call_operand.vmem [shape: f32[32,32], index: 8, kind: input, shape index: {}]   ;;  %s1991_s9 = inlined_call_operand.vmem [shape: f32[1,32], index: 9, kind: input, shape index: {}]   ;;  %s1992_s10 = inlined_call_operand.vmem [shape: f32[32,64], index: 10, kind: input, shape index: {}]   ;;  %s1993_s11 = inlined_call_operand.vmem [shape: f32[32,64], index: 11, kind: input, shape index: {}]   ;;  %s1994_s12 = inlined_call_operand.vmem [shape: f32[64,32], index: 12, kind: input, shape index: {}]   ;;  %s1995_s13 = inlined_call_operand.vmem [shape: f32[2,6,32], index: 13, kind: output, shape index: {}]  }
   0x1 LB: > { %s1504_s26 = sadd.s32 4294967295, %s1627_s25   ;;  %p1508_p0 = scmp.ge.s32.totalorder %s1627_s25, 1  ;;  %s1627_s25 = sphi %s1711_s25, %s23_s25  }
   0x2   : > { %p395_p1 = scmp.lt.s32.totalorder %s1627_s25, 3 }
   0x4   : > { %p396_p2 = pnand %p1508_p0, %p395_p1 }
   0x5   : > { %p441_p3 = scmp.lt.s32.totalorder (!%p396_p2), %s1504_s26, 1  ;;  %s1630_s24 = smov (!%p396_p2), 64  }
   0x6   : > { %399 = sbr.rel (%p396_p2) target bundleno = 3464 (0xd88), region = 72  ;;  %s1632_s28 = smov (!%p396_p2), 88  }
   0x7   : > { %s1633_s29 = smov (!%p396_p2), 80   ;;  %s1635_s14 = smov (!%p396_p2), 104  }
   0x8   : > { %s1636_s15 = smov (!%p396_p2), 112   ;;  %s1637_s16 = smov (!%p396_p2), 120  }
   0x9   : > { %s1638_s17 = smov (!%p396_p2), 48   ;;  %s1639_s20 = smov (!%p396_p2), 56  }
   0xa   : > { %s1640_s21 = smov (!%p396_p2), 40  }
   0xb   : > { %s1999_s26 = smov (!%p441_p3, %s1504_s26), 1  ;;  %vm457_vm0 = vcmask 259072   ;;  %v1629_v3 = vmov 32.0   ;;  %v488_v7 = vld [vmem:[%s1985_s3 + $0x18] sm:$0xff]  ;;  %v487_v8 = vld [vmem:[%s1985_s3 + $0x10] sm:$0xff]  ;;  %v486_v9 = vld [vmem:[%s1985_s3 + $0x8] sm:$0xff]  ;;  %v517_v35 = vlaneseq }
   0xc   : > { %s1719_s27 = sshll.u32 %s1999_s26, 3  ;;  %1579 = vrcp.f32 %v1629_v3  ;;  %505 = vmatpush.msra.mxu0 %v488_v7  ;;  %v485_v11 = vld [vmem:[%s1985_s3] sm:$0xff]  ;;  %vm489_vm5 = vcmask 261120   ;;  %s1631_s26 = smov 96   ;;  %vm569_vm6 = vcmask 1045504   ;;  %vm525_vm7 = vcmask 64512  }
   0xd   : > { %s444_s30 = scalar_lea.vmem %s1982_s0, %s1719_s27  ;;  %v1576_v23 = vld [vmem:[%s1984_s2] ss:$0 sm:$0xff]  ;;  %v518_v36 = vshrl.u32 %v517_v35, 7  ;;  %v520_v37 = vand.u32 127, %v517_v35  ;;  %vm551_vm9 = vcmask 46080   ;;  %vm565_vm10 = vcmask 48128  }
   0xe   : > { %v1725_v0 = vld [vmem:[%s444_s30] sm:$0x3f]  ;;  %506 = vmatpush.msra.mxu0 %v487_v8  ;;  %s1996_s30 = smov 72   ;;  %vm994_vm14 = vcmask 62464  }
   0xf   : > { %v456_v1 = vmul.f32 %v1725_v0, %v1725_v0  ;;  %vm521_vm8 = vcmp.le.s32.totalorder %v520_v37, %v518_v36  ;;  %v513_v54 = vld [vmem:[%s1986_s4] sm:$0xff] }
  0x10   : > { %507 = vmatpush.msra.mxu0 %v486_v9 }
  0x11   : > { %v458_v2 = vsel %vm457_vm0, %v456_v1, 0.0 }
  0x12   : > { %459 = vadd.xlane.f32.xlu0 %v458_v2  ;;  %v1580_v4 = vpop.eup %1579  ;;  %508 = vmatpush.msra.mxu0 %v485_v11 }
  0x13   : > { %v462_v5 = vmul.f32 32.0, %v1580_v4  ;;  %vm466_vm1 = vweird.f32 %v1580_v4 }
  0x15   : > { %v463_v6 = vsub.f32 1.0, %v462_v5 }
  0x17   : > { %v464_v10 = vmul.f32 %v1580_v4, %v463_v6 }
  0x19   : > { %v465_v12 = vadd.f32 %v1580_v4, %v464_v10 }
  0x1b   : > { %v1742_v13 = vsel %vm466_vm1, %v1580_v4, %v465_v12 }
  0x85   : > { %v460_v14 = vpop.xlane.xlu0 %459 }
  0x86   : > { %v468_v15 = vmul.f32 %v1742_v13, %v460_v14 }
  0x88   : > { %v469_v16 = vadd.f32 1e-06, %v468_v15 }
  0x8a   : > { %1581 = vrsqrt.f32 %v469_v16  ;;  %vm476_vm3 = vweird.f32 %v469_v16 }
  0x90   : > { %v1582_v17 = vpop.eup %1581 }
  0x91   : > { %v471_v18 = vmul.f32 %v1582_v17, %v469_v16  ;;  %vm477_vm2 = vweird.f32 %v1582_v17 }
  0x92   : > { %vm478_vm4 = vmor %vm476_vm3, %vm477_vm2  ;;  %vm1413_vm3 = vcmask 523264  }
  0x93   : > { %v472_v19 = vmul.f32 %v1582_v17, %v471_v18 }
  0x95   : > { %v473_v20 = vmul.f32 0.5, %v472_v19 }
  0x97   : > { %v474_v21 = vsub.f32 1.5, %v473_v20 }
  0x99   : > { %v475_v22 = vmul.f32 %v1582_v17, %v474_v21 }
  0x9b   : > { %v479_v24 = vsel %vm478_vm4, %v1582_v17, %v475_v22 }
  0x9c   : > { %v480_v25 = vmul.f32 %v479_v24, %v1725_v0  ;;  %v515_v24 = vld [vmem:[%s1986_s4 + $0x10] sm:$0xff] }
  0x9e   : > { %v484_v26 = vmul.f32 %v1576_v23, %v480_v25  ;;  %v514_v23 = vld [vmem:[%s1986_s4 + $0x8] sm:$0xff] }
  0x9f   : > { %677 = vmatpush.msra.mxu1 %v514_v23 }
  0xa0   : > { %1512 = vmatmul.msk.f32.vlgmr.msra.gmra.mxu0 %vm489_vm5, %v484_v26 }
  0xa1   : > { %790 = vmatpush.msrb.mxu1 %v515_v24 }
 0x11d   : > { %v1750_v27 = vpop.f32.mrf.mxu0 }
 0x11e   : > { %563 = vrot.lane.b32.xlu2 %v1750_v27, %s1630_s24  ;;  %523 = vrot.lane.b32.xlu0 %v1750_v27, %s1631_s26 }
 0x126   : > { %594 = vrot.lane.b32.xlu2 %v1750_v27, %s1632_s28  ;;  %707 = vrot.lane.b32.xlu0 %v1750_v27, %s1633_s29 }
 0x12e   : > { %798 = vrot.lane.b32.xlu2 %v1750_v27, %s1996_s30 }
 0x136   : > { %796 = vrot.lane.b32.xlu2 %v1750_v27, %s1635_s14 }
 0x13e   : > { %705 = vrot.lane.b32.xlu2 %v1750_v27, %s1636_s15 }
 0x178   : > { %v564_v28 = vpop.permute.xlu2 %563 }
 0x179   : > { %1515 = vmatpush.msk.msra.mxu2 %vm569_vm6, %v564_v28 }
 0x180   : > { %v595_v29 = vpop.permute.xlu2 %594 }
 0x188   : > { %v799_v30 = vpop.permute.xlu2 %798 }
 0x190   : > { %v524_v31 = vpop.permute.xlu0 %523  ;;  %v797_v32 = vpop.permute.xlu2 %796 }
 0x191   : > { %1513 = vmatpush.xpose.msk.msra.mxu3 %vm525_vm7, %v524_v31  ;;  %v516_v31 = vld [vmem:[%s1986_s4 + $0x18] sm:$0xff] }
 0x194   : > { %1514 = vmatmul.msk.f32.vlgmr.msra.gmra.mxu3 %vm525_vm7, %v1750_v27 }
 0x195   : > { %1517 = vmatpush.xpose.msk.msrb.mxu3 %vm525_vm7, %v595_v29 }
 0x198   : > { %v708_v33 = vpop.permute.xlu0 %707  ;;  %v706_v34 = vpop.permute.xlu2 %705 }
 0x199   : > { %1523 = vmatpush.xpose.msk.msrb.mxu0 %vm525_vm7, %v708_v33  ;;  %700 = vmatpush.msra.mxu3 %v513_v54  ;;  %v940_v33 = vld [vmem:[%s1989_s7 + $0x18] sm:$0xff] }
 0x19c   : > { %1524 = vmatmul.msk.f32.vlgmr.msrb.gmra.mxu0 %vm525_vm7, %v706_v34  ;;  %v939_v34 = vld [vmem:[%s1989_s7 + $0x10] sm:$0xff] }
 0x217   : > { %v547_v38 = vpop.f32.mrf.mxu3 }
 0x218   : > { %v550_v39 = vsel %vm521_vm8, %v547_v38, -1e+30 }
 0x219   : > { %v730_v40 = vpop.f32.mrf.mxu0  ;;  %v552_v41 = vsel %vm551_vm9, %v550_v39, -inf }
 0x21a   : > { %v733_v42 = vsel %vm521_vm8, %v730_v40, -1e+30  ;;  %553 = vmax.xlane.f32.xlu1 %v552_v41 }
 0x21b   : > { %v734_v43 = vsel %vm551_vm9, %v733_v42, -inf }
 0x21c   : > { %735 = vmax.xlane.f32.xlu2 %v734_v43 }
 0x28d   : > { %v554_v44 = vpop.xlane.xlu1 %553 }
 0x28e   : > { %v555_v45 = vsub.f32 %v550_v39, %v554_v44  ;;  %v938_v44 = vld [vmem:[%s1989_s7 + $0x8] sm:$0xff] }
 0x28f   : > { %v736_v46 = vpop.xlane.xlu2 %735 }
 0x290   : > { %v556_v47 = vmul.f32 1.442695, %v555_v45  ;;  %v737_v48 = vsub.f32 %v733_v42, %v736_v46  ;;  %v913_v46 = vld [vmem:[%s1988_s6 + $0x18] sm:$0xff] }
 0x292   : > { %1583 = vpow2.f32 %v556_v47  ;;  %v738_v49 = vmul.f32 1.442695, %v737_v48  ;;  %v912_v47 = vld [vmem:[%s1988_s6 + $0x10] sm:$0xff]  ;;  %v911_v48 = vld [vmem:[%s1988_s6 + $0x8] sm:$0xff] }
 0x294   : > { %1585 = vpow2.f32 %v738_v49  ;;  %v910_v49 = vld [vmem:[%s1988_s6] sm:$0xff] }
 0x298   : > { %v1584_v50 = vpop.eup %1583 }
 0x299   : > { %v558_v51 = vsel %vm551_vm9, %v1584_v50, 0.0 }
 0x29a   : > { %v1586_v52 = vpop.eup %1585  ;;  %559 = vadd.xlane.f32.xlu1 %v558_v51 }
 0x29b   : > { %v740_v53 = vsel %vm551_vm9, %v1586_v52, 0.0 }
 0x29c   : > { %741 = vadd.xlane.f32.xlu2 %v740_v53 }
 0x2b3   : > { %592 = vrot.lane.b32.xlu1 %v1750_v27, %s1637_s16 }
 0x2b4   : > { %745 = vrot.lane.b32.xlu2 %v1750_v27, %s1638_s17 }
 0x30d   : > { %v560_v55 = vpop.xlane.xlu1 %559 }
 0x30e   : > { %1587 = vrcp.f32 %v560_v55 }
 0x30f   : > { %v742_v16 = vpop.xlane.xlu2 %741 }
 0x314   : > { %v1588_v56 = vpop.eup %1587 }
 0x315   : > { %v562_v57 = vmul.f32 %v1588_v56, %v1584_v50 }
 0x317   : > { %1516 = vmatmul.msk.f32.vlgmr.msra.gmra.mxu2 %vm565_vm10, %v562_v57  ;;  %v746_v20 = vpop.permute.xlu2 %745 }
 0x325   : > { %v593_v58 = vpop.permute.xlu1 %592 }
 0x326   : > { %1518 = vmatmul.msk.f32.vlgmr.msrb.gmra.mxu3 %vm525_vm7, %v593_v58 }
 0x327   : > { %1528 = vmatpush.xpose.msk.msrb.mxu3 %vm525_vm7, %v799_v30 }
 0x39a   : > { %v589_v59 = vpop.f32.mrf.mxu2 }
 0x39b   : > { %1522 = vmatmul.msk.f32.vlgmr.msra.gmra.mxu3 %vm525_vm7, %v589_v59  ;;  %v1577_v59 = vld [vmem:[%s1987_s5] ss:$0 sm:$0xff] }
 0x39c   : > { %956 = vmatpush.msra.mxu3 %v940_v33 }
 0x39e   : > { %957 = vmatpush.msra.mxu3 %v939_v34 }
 0x3a0   : > { %958 = vmatpush.msra.mxu3 %v938_v44 }
 0x3a3   : > { %1529 = vmatmul.msk.f32.vlgmr.msrb.gmra.mxu3 %vm525_vm7, %v797_v32 }
 0x3a9   : > { %v617_v60 = vpop.f32.mrf.mxu3 }
 0x3aa   : > { %v620_v61 = vsel %vm521_vm8, %v617_v60, -1e+30 }
 0x3ab   : > { %v621_v62 = vsel %vm551_vm9, %v620_v61, -inf }
 0x3ac   : > { %622 = vmax.xlane.f32.xlu0 %v621_v62 }
 0x41e   : > { %v702_v63 = vpop.f32.mrf.mxu3 }
 0x41f   : > { %v623_v1 = vpop.xlane.xlu0 %622 }
 0x420   : > { %v624_v2 = vsub.f32 %v620_v61, %v623_v1 }
 0x422   : > { %v625_v3 = vmul.f32 1.442695, %v624_v2 }
 0x424   : > { %1589 = vpow2.f32 %v625_v3 }
 0x426   : > { %v821_v4 = vpop.f32.mrf.mxu3 }
 0x427   : > { %v824_v5 = vsel %vm521_vm8, %v821_v4, -1e+30 }
 0x428   : > { %v825_v6 = vsel %vm551_vm9, %v824_v5, -inf }
 0x429   : > { %826 = vmax.xlane.f32.xlu1 %v825_v6 }
 0x42a   : > { %v1590_v7 = vpop.eup %1589 }
 0x42b   : > { %v627_v8 = vsel %vm551_vm9, %v1590_v7, 0.0 }
 0x42c   : > { %628 = vadd.xlane.f32.xlu0 %v627_v8 }
 0x442   : > { %632 = vrot.lane.b32.xlu1 %v1750_v27, %s1639_s20  ;;  %s448_s20 = scalar_lea.vmem %s1983_s1, %s1719_s27 }
 0x443   : > { %v454_v45 = vld [vmem:[%s448_s20] sm:$0xff] }
 0x49c   : > { %v827_v9 = vpop.xlane.xlu1 %826 }
 0x49d   : > { %v828_v10 = vsub.f32 %v824_v5, %v827_v9 }
 0x49f   : > { %v829_v11 = vmul.f32 1.442695, %v828_v10  ;;  %v629_v14 = vpop.xlane.xlu0 %628 }
 0x4a1   : > { %1591 = vpow2.f32 %v829_v11 }
 0x4a2   : > { %1593 = vrcp.f32 %v629_v14 }
 0x4a3   : > { %1595 = vrcp.f32 %v742_v16 }
 0x4a7   : > { %v1592_v12 = vpop.eup %1591 }
 0x4a8   : > { %v831_v15 = vsel %vm551_vm9, %v1592_v12, 0.0  ;;  %v1594_v17 = vpop.eup %1593 }
 0x4a9   : > { %832 = vadd.xlane.f32.xlu0 %v831_v15  ;;  %v631_v19 = vmul.f32 %v1594_v17, %v1590_v7  ;;  %v1596_v21 = vpop.eup %1595 }
 0x4aa   : > { %v744_v22 = vmul.f32 %v1596_v21, %v1586_v52 }
 0x4b4   : > { %v633_v18 = vpop.permute.xlu1 %632 }
 0x4b5   : > { %1519 = vmatpush.msk.msrb.mxu2 %vm569_vm6, %v633_v18 }
 0x4b6   : > { %1520 = vmatmul.msk.f32.vlgmr.msrb.gmra.mxu2 %vm565_vm10, %v631_v19 }
 0x4b7   : > { %1525 = vmatpush.msk.msra.mxu2 %vm569_vm6, %v746_v20 }
 0x4b9   : > { %881 = vmatpush.msrb.mxu2 %v516_v31 }
 0x4bd   : > { %836 = vrot.lane.b32.xlu0 %v1750_v27, %s1640_s21 }
 0x4be   : > { %1526 = vmatmul.msk.f32.vlgmr.msra.gmra.mxu2 %vm565_vm10, %v744_v22 }
 0x51c   : > { %v833_v25 = vpop.xlane.xlu0 %832 }
 0x51d   : > { %1597 = vrcp.f32 %v833_v25 }
 0x523   : > { %v1598_v26 = vpop.eup %1597 }
 0x524   : > { %v835_v28 = vmul.f32 %v1598_v26, %v1592_v12  ;;  %v964_v12 = vld [vmem:[%s1990_s8] sm:$0xff] }
 0x52f   : > { %v837_v29 = vpop.permute.xlu0 %836 }
 0x530   : > { %1530 = vmatpush.msk.msra.mxu0 %vm569_vm6, %v837_v29 }
 0x531   : > { %1531 = vmatmul.msk.f32.vlgmr.msra.gmra.mxu0 %vm565_vm10, %v835_v28 }
 0x539   : > { %v656_v27 = vpop.f32.mrf.mxu2 }
 0x53a   : > { %1521 = vmatmul.msk.f32.vlgmr.msra.gmra.mxu1 %vm525_vm7, %v656_v27 }
 0x53b   : > { %929 = vmatpush.msra.mxu1 %v913_v46 }
 0x53d   : > { %930 = vmatpush.msra.mxu1 %v912_v47 }
 0x53f   : > { %931 = vmatpush.msra.mxu1 %v911_v48 }
 0x541   : > { %v769_v30 = vpop.f32.mrf.mxu2  ;;  %932 = vmatpush.msra.mxu1 %v910_v49 }
 0x542   : > { %1527 = vmatmul.msk.f32.vlgmr.msrb.gmra.mxu1 %vm525_vm7, %v769_v30 }
 0x5ae   : > { %v860_v32 = vpop.f32.mrf.mxu0 }
 0x5af   : > { %1532 = vmatmul.msk.f32.vlgmr.msrb.gmra.mxu2 %vm525_vm7, %v860_v32 }
 0x5b7   : > { %v679_v35 = vpop.f32.mrf.mxu1 }
 0x5b8   : > { %v703_v37 = vadd.f32 %v702_v63, %v679_v35 }
 0x5bf   : > { %v792_v36 = vpop.f32.mrf.mxu1 }
 0x5c0   : > { %v795_v38 = vadd.f32 %v792_v36, %v703_v37 }
 0x632   : > { %v883_v39 = vpop.f32.mrf.mxu2 }
 0x633   : > { %v886_v40 = vadd.f32 %v883_v39, %v795_v38 }
 0x635   : > { %v1822_v41 = vadd.f32 %v886_v40, %v1725_v0  ;;  %v937_v0 = vld [vmem:[%s1989_s7] sm:$0xff] }
 0x636   : > { %959 = vmatpush.msra.mxu3 %v937_v0 }
 0x637   : > { %v889_v42 = vmul.f32 %v1822_v41, %v1822_v41  ;;  %1534 = vmatmul.msk.f32.vlgmr.msra.gmra.mxu3 %vm489_vm5, %v454_v45 }
 0x639   : > { %v890_v43 = vsel %vm457_vm0, %v889_v42, 0.0 }
 0x63a   : > { %891 = vadd.xlane.f32.xlu1 %v890_v43 }
 0x6ad   : > { %v892_v50 = vpop.xlane.xlu1 %891 }
 0x6ae   : > { %v893_v51 = vmul.f32 %v892_v50, %v1742_v13 }
 0x6b0   : > { %v894_v52 = vadd.f32 1e-06, %v893_v51 }
 0x6b2   : > { %1599 = vrsqrt.f32 %v894_v52  ;;  %vm901_vm12 = vweird.f32 %v894_v52 }
 0x6b8   : > { %v1600_v53 = vpop.eup %1599 }
 0x6b9   : > { %v896_v54 = vmul.f32 %v1600_v53, %v894_v52  ;;  %vm902_vm11 = vweird.f32 %v1600_v53  ;;  %v965_v52 = vld [vmem:[%s1990_s8 + $0x8] sm:$0xff] }
 0x6ba   : > { %vm903_vm13 = vmor %vm901_vm12, %vm902_vm11  ;;  %v1856_v63 = vpop.f32.mrf.mxu3 }
 0x6bb   : > { %v897_v55 = vmul.f32 %v1600_v53, %v896_v54  ;;  %1006 = vrot.lane.b32.xlu1 %v1856_v63, %s1631_s26  ;;  %1535 = vmatpush.xpose.msk.msrb.mxu0 %vm525_vm7, %v1856_v63  ;;  %s452_s26 = scalar_lea.vmem %s1995_s13, %s1719_s27 }
 0x6bd   : > { %v898_v56 = vmul.f32 0.5, %v897_v55 }
 0x6bf   : > { %v899_v57 = vsub.f32 1.5, %v898_v56  ;;  %1115 = vmatpush.msra.mxu0 %v965_v52 }
 0x6c1   : > { %v900_v58 = vmul.f32 %v1600_v53, %v899_v57 }
 0x6c3   : > { %v904_v60 = vsel %vm903_vm13, %v1600_v53, %v900_v58  ;;  %1234 = vrot.lane.b32.xlu1 %v1856_v63, %s1635_s14  ;;  %v966_v53 = vld [vmem:[%s1990_s8 + $0x10] sm:$0xff] }
 0x6c4   : > { %v905_v61 = vmul.f32 %v904_v60, %v1822_v41  ;;  %v967_v60 = vld [vmem:[%s1990_s8 + $0x18] sm:$0xff] }
 0x6c6   : > { %v909_v62 = vmul.f32 %v1577_v59, %v905_v61 }
 0x6c8   : > { %1533 = vmatmul.msk.f32.vlgmr.msra.gmra.mxu1 %vm489_vm5, %v909_v62 }
 0x72d   : > { %v1007_v2 = vpop.permute.xlu1 %1006 }
 0x72e   : > { %1027 = vmatpush.msra.mxu2 %v1007_v2 }
 0x730   : > { %1138 = vmatpush.msrb.mxu2 %v964_v12  ;;  %v1381_v12 = vld [vmem:[%s1993_s11 + $0x8] sm:$0xff] }
 0x735   : > { %v1235_v17 = vpop.permute.xlu1 %1234 }
 0x745   : > { %v934_v1 = vpop.f32.mrf.mxu1 }
 0x746   : > { %1143 = vrot.lane.b32.xlu1 %v934_v1, %s1636_s15  ;;  %1536 = vmatmul.msk.f32.vlgmr.msrb.gmra.mxu0 %vm525_vm7, %v934_v1 }
 0x747   : > { %1226 = vmatpush.msrb.mxu0 %v966_v53 }
 0x7b8   : > { %v1144_v19 = vpop.permute.xlu1 %1143 }
 0x7c3   : > { %v991_v3 = vpop.f32.mrf.mxu0 }
 0x7c4   : > { %v995_v4 = vsel %vm994_vm14, %v991_v3, -inf }
 0x7c5   : > { %996 = vmax.xlane.f32.xlu2 %v995_v4 }
 0x7dd   : > { %1034 = vrot.lane.b32.xlu2 %v1856_v63, %s1637_s16 }
 0x7e5   : > { %1145 = vrot.lane.b32.xlu2 %v1856_v63, %s1636_s15 }
 0x838   : > { %v997_v5 = vpop.xlane.xlu2 %996 }
 0x839   : > { %v998_v6 = vsub.f32 %v991_v3, %v997_v5 }
 0x83b   : > { %v999_v7 = vmul.f32 1.442695, %v998_v6 }
 0x83d   : > { %1601 = vpow2.f32 %v999_v7 }
 0x840   : > { %v1035_v8 = vpop.permute.xlu2 %1034 }
 0x841   : > { %1538 = vmatpush.xpose.msk.msrb.mxu1 %vm525_vm7, %v1035_v8  ;;  %v1347_v8 = vld [vmem:[%s1992_s10 + $0x18] sm:$0xff] }
 0x843   : > { %v1602_v9 = vpop.eup %1601 }
 0x844   : > { %v1001_v10 = vsel %vm994_vm14, %v1602_v9, 0.0 }
 0x845   : > { %1002 = vadd.xlane.f32.xlu0 %v1001_v10  ;;  %v1382_v10 = vld [vmem:[%s1993_s11 + $0x10] sm:$0xff] }
 0x848   : > { %v1146_v11 = vpop.permute.xlu2 %1145 }
 0x849   : > { %1543 = vmatpush.xpose.msk.msra.mxu1 %vm525_vm7, %v1146_v11  ;;  %v1345_v11 = vld [vmem:[%s1992_s10 + $0x8] sm:$0xff] }
 0x859   : > { %1032 = vrot.lane.b32.xlu0 %v934_v1, %s1637_s16 }
 0x861   : > { %1232 = vrot.lane.b32.xlu0 %v934_v1, %s1635_s14 }
 0x8b8   : > { %v1003_v14 = vpop.xlane.xlu0 %1002 }
 0x8b9   : > { %1603 = vrcp.f32 %v1003_v14  ;;  %v1344_v14 = vld [vmem:[%s1992_s10] sm:$0xff] }
 0x8bf   : > { %v1604_v15 = vpop.eup %1603 }
 0x8c0   : > { %v1005_v16 = vmul.f32 %v1604_v15, %v1602_v9  ;;  %v1383_v9 = vld [vmem:[%s1993_s11 + $0x18] sm:$0xff]  ;;  %v1380_v15 = vld [vmem:[%s1993_s11] sm:$0xff] }
 0x8c2   : > { %1537 = vmatmul.msk.f32.vlgmr.msra.gmra.mxu2 %vm525_vm7, %v1005_v16 }
 0x8c3   : > { %1547 = vmatpush.xpose.msk.msra.mxu2 %vm525_vm7, %v1235_v17 }
 0x8cb   : > { %v1033_v18 = vpop.permute.xlu0 %1032 }
 0x8cc   : > { %1539 = vmatmul.msk.f32.vlgmr.msrb.gmra.mxu1 %vm525_vm7, %v1033_v18 }
 0x8d3   : > { %v1233_v23 = vpop.permute.xlu0 %1232 }
 0x8d4   : > { %1544 = vmatmul.msk.f32.vlgmr.msra.gmra.mxu1 %vm525_vm7, %v1144_v19 }
 0x945   : > { %v1029_v20 = vpop.f32.mrf.mxu2 }
 0x946   : > { %1542 = vmatmul.msk.f32.vlgmr.msrb.gmra.mxu2 %vm525_vm7, %v1029_v20 }
 0x947   : > { %1396 = vmatpush.msrb.mxu2 %v1383_v9 }
 0x949   : > { %v1057_v21 = vpop.f32.mrf.mxu1  ;;  %1397 = vmatpush.msrb.mxu2 %v1382_v10 }
 0x94a   : > { %v1060_v22 = vsel %vm994_vm14, %v1057_v21, -inf }
 0x94b   : > { %1061 = vmax.xlane.f32.xlu0 %v1060_v22  ;;  %1398 = vmatpush.msrb.mxu2 %v1381_v12 }
 0x94d   : > { %1399 = vmatpush.msrb.mxu2 %v1380_v15 }
 0x94e   : > { %1548 = vmatmul.msk.f32.vlgmr.msra.gmra.mxu2 %vm525_vm7, %v1233_v23 }
 0x951   : > { %v1168_v24 = vpop.f32.mrf.mxu1 }
 0x952   : > { %v1171_v25 = vsel %vm994_vm14, %v1168_v24, -inf }
 0x953   : > { %1172 = vmax.xlane.f32.xlu2 %v1171_v25  ;;  %v1578_v25 = vld [vmem:[%s1991_s9] ss:$0 sm:$0xff] }
 0x9be   : > { %v1062_v26 = vpop.xlane.xlu0 %1061 }
 0x9bf   : > { %v1063_v28 = vsub.f32 %v1057_v21, %v1062_v26 }
 0x9c1   : > { %v1064_v29 = vmul.f32 1.442695, %v1063_v28 }
 0x9c3   : > { %1605 = vpow2.f32 %v1064_v29 }
 0x9c6   : > { %v1173_v27 = vpop.xlane.xlu2 %1172 }
 0x9c7   : > { %v1174_v30 = vsub.f32 %v1168_v24, %v1173_v27  ;;  %v1411_v27 = vld [vmem:[%s1994_s12 + $0x30] sm:$0xff] }
 0x9c9   : > { %v1606_v31 = vpop.eup %1605  ;;  %v1175_v32 = vmul.f32 1.442695, %v1174_v30  ;;  %v1140_v33 = vpop.f32.mrf.mxu2  ;;  %v1410_v30 = vld [vmem:[%s1994_s12 + $0x28] sm:$0xff] }
 0x9ca   : > { %v1066_v34 = vsel %vm994_vm14, %v1606_v31, 0.0 }
 0x9cb   : > { %1607 = vpow2.f32 %v1175_v32  ;;  %1067 = vadd.xlane.f32.xlu0 %v1066_v34  ;;  %v1408_v32 = vld [vmem:[%s1994_s12 + $0x18] sm:$0xff]  ;;  %v1406_v34 = vld [vmem:[%s1994_s12 + $0x8] sm:$0xff] }
 0x9d1   : > { %v1608_v35 = vpop.eup %1607  ;;  %v1257_v36 = vpop.f32.mrf.mxu2 }
 0x9d2   : > { %v1260_v37 = vsel %vm994_vm14, %v1257_v36, -inf  ;;  %v1177_v38 = vsel %vm994_vm14, %v1608_v35, 0.0 }
 0x9d3   : > { %1261 = vmax.xlane.f32.xlu1 %v1260_v37  ;;  %1178 = vadd.xlane.f32.xlu2 %v1177_v38 }
 0x9eb   : > { %1182 = vrot.lane.b32.xlu2 %v1856_v63, %s1633_s29 }
 0x9ec   : > { %1071 = vrot.lane.b32.xlu1 %v1856_v63, %s1632_s28  ;;  %s1997_s28 = smov 72  }
 0xa3e   : > { %v1068_v44 = vpop.xlane.xlu0 %1067 }
 0xa46   : > { %v1262_v39 = vpop.xlane.xlu1 %1261  ;;  %v1179_v45 = vpop.xlane.xlu2 %1178 }
 0xa47   : > { %v1263_v40 = vsub.f32 %v1257_v36, %v1262_v39 }
 0xa49   : > { %v1264_v42 = vmul.f32 1.442695, %v1263_v40 }
 0xa4b   : > { %1609 = vpow2.f32 %v1264_v42 }
 0xa4c   : > { %1611 = vrcp.f32 %v1068_v44 }
 0xa4d   : > { %1613 = vrcp.f32 %v1179_v45 }
 0xa4e   : > { %v1183_v49 = vpop.permute.xlu2 %1182 }
 0xa51   : > { %v1610_v43 = vpop.eup %1609 }
 0xa52   : > { %v1266_v0 = vsel %vm994_vm14, %v1610_v43, 0.0  ;;  %v1612_v46 = vpop.eup %1611 }
 0xa53   : > { %1267 = vadd.xlane.f32.xlu0 %v1266_v0  ;;  %v1070_v47 = vmul.f32 %v1612_v46, %v1606_v31  ;;  %v1614_v50 = vpop.eup %1613  ;;  %v1409_v31 = vld [vmem:[%s1994_s12 + $0x20] sm:$0xff] }
 0xa54   : > { %v1181_v51 = vmul.f32 %v1614_v50, %v1608_v35  ;;  %v1405_v35 = vld [vmem:[%s1994_s12] sm:$0xff] }
 0xa5e   : > { %v1072_v48 = vpop.permute.xlu1 %1071 }
 0xa5f   : > { %1092 = vmatpush.msrb.mxu3 %v1072_v48 }
 0xa60   : > { %1540 = vmatmul.msk.f32.vlgmr.msrb.gmra.mxu3 %vm525_vm7, %v1070_v47 }
 0xa61   : > { %1203 = vmatpush.msra.mxu3 %v1183_v49 }
 0xa63   : > { %1315 = vmatpush.msrb.mxu3 %v967_v60 }
 0xa67   : > { %1271 = vrot.lane.b32.xlu0 %v1856_v63, %s1997_s28 }
 0xa68   : > { %1545 = vmatmul.msk.f32.vlgmr.msra.gmra.mxu3 %vm525_vm7, %v1181_v51 }
 0xac6   : > { %v1268_v54 = vpop.xlane.xlu0 %1267 }
 0xac7   : > { %1615 = vrcp.f32 %v1268_v54 }
 0xacd   : > { %v1616_v55 = vpop.eup %1615 }
 0xace   : > { %v1270_v56 = vmul.f32 %v1616_v55, %v1610_v43 }
 0xad9   : > { %v1272_v57 = vpop.permute.xlu0 %1271 }
 0xada   : > { %1292 = vmatpush.msrb.mxu1 %v1272_v57 }
 0xadb   : > { %1549 = vmatmul.msk.f32.vlgmr.msrb.gmra.mxu1 %vm525_vm7, %v1270_v56 }
 0xae3   : > { %v1094_v58 = vpop.f32.mrf.mxu3 }
 0xae4   : > { %1541 = vmatmul.msk.f32.vlgmr.msra.gmra.mxu0 %vm525_vm7, %v1094_v58 }
 0xae5   : > { %1363 = vmatpush.msra.mxu0 %v1347_v8 }
 0xaeb   : > { %v1205_v59 = vpop.f32.mrf.mxu3 }
 0xaec   : > { %1546 = vmatmul.msk.f32.vlgmr.msrb.gmra.mxu0 %vm525_vm7, %v1205_v59 }
 0xb58   : > { %v1294_v61 = vpop.f32.mrf.mxu1 }
 0xb59   : > { %1550 = vmatmul.msk.f32.vlgmr.msrb.gmra.mxu3 %vm525_vm7, %v1294_v61 }
 0xb61   : > { %v1117_v62 = vpop.f32.mrf.mxu0 }
 0xb62   : > { %v1141_v1 = vadd.f32 %v1140_v33, %v1117_v62  ;;  %v1407_v33 = vld [vmem:[%s1994_s12 + $0x10] sm:$0xff] }
 0xb69   : > { %v1228_v63 = vpop.f32.mrf.mxu0 }
 0xb6a   : > { %v1231_v2 = vadd.f32 %v1228_v63, %v1141_v1 }
 0xbdc   : > { %v1317_v3 = vpop.f32.mrf.mxu3 }
 0xbdd   : > { %v1320_v4 = vadd.f32 %v1317_v3, %v1231_v2 }
 0xbdf   : > { %v1913_v5 = vadd.f32 %v1320_v4, %v1822_v41  ;;  %v1346_v41 = vld [vmem:[%s1992_s10 + $0x10] sm:$0xff] }
 0xbe0   : > { %1364 = vmatpush.msra.mxu0 %v1346_v41 }
 0xbe1   : > { %v1323_v6 = vmul.f32 %v1913_v5, %v1913_v5 }
 0xbe2   : > { %1365 = vmatpush.msra.mxu0 %v1345_v11 }
 0xbe3   : > { %v1324_v7 = vsel %vm457_vm0, %v1323_v6, 0.0 }
 0xbe4   : > { %1325 = vadd.xlane.f32.xlu1 %v1324_v7  ;;  %1366 = vmatpush.msra.mxu0 %v1344_v14 }
 0xc57   : > { %v1326_v16 = vpop.xlane.xlu1 %1325 }
 0xc58   : > { %v1327_v17 = vmul.f32 %v1326_v16, %v1742_v13  ;;  %v1412_v13 = vld [vmem:[%s1994_s12 + $0x38] sm:$0xff] }
 0xc59   : > { %1425 = vmatpush.msra.mxu1 %v1412_v13 }
 0xc5a   : > { %v1328_v18 = vadd.f32 1e-06, %v1327_v17 }
 0xc5b   : > { %1426 = vmatpush.msra.mxu1 %v1411_v27 }
 0xc5c   : > { %1617 = vrsqrt.f32 %v1328_v18  ;;  %vm1335_vm1 = vweird.f32 %v1328_v18 }
 0xc5d   : > { %1427 = vmatpush.msra.mxu1 %v1410_v30 }
 0xc5f   : > { %1428 = vmatpush.msra.mxu1 %v1409_v31 }
 0xc61   : > { %1429 = vmatpush.msra.mxu1 %v1408_v32 }
 0xc62   : > { %v1618_v19 = vpop.eup %1617 }
 0xc63   : > { %v1330_v20 = vmul.f32 %v1618_v19, %v1328_v18  ;;  %vm1336_vm15 = vweird.f32 %v1618_v19  ;;  %1430 = vmatpush.msra.mxu1 %v1407_v33 }
 0xc64   : > { %vm1337_vm2 = vmor %vm1335_vm1, %vm1336_vm15 }
 0xc65   : > { %v1331_v21 = vmul.f32 %v1618_v19, %v1330_v20  ;;  %1431 = vmatpush.msra.mxu1 %v1406_v34 }
 0xc67   : > { %v1332_v22 = vmul.f32 0.5, %v1331_v21  ;;  %1432 = vmatpush.msra.mxu1 %v1405_v35 }
 0xc69   : > { %v1333_v23 = vsub.f32 1.5, %v1332_v22 }
 0xc6b   : > { %v1334_v24 = vmul.f32 %v1618_v19, %v1333_v23 }
 0xc6d   : > { %v1338_v26 = vsel %vm1337_vm2, %v1618_v19, %v1334_v24 }
 0xc6e   : > { %v1339_v28 = vmul.f32 %v1338_v26, %v1913_v5 }
 0xc70   : > { %v1343_v29 = vmul.f32 %v1578_v25, %v1339_v28 }
 0xc72   : > { %1551 = vmatmul.msk.f32.vlgmr.msra.gmra.mxu0 %vm489_vm5, %v1343_v29  ;;  %1552 = vmatmul.msk.f32.vlgmr.msrb.gmra.mxu2 %vm489_vm5, %v1343_v29 }
 0xcef   : > { %v1368_v36 = vpop.f32.mrf.mxu0 }
 0xcf0   : > { %v1372_v37 = vmul.f32 0.044715, %v1368_v36  ;;  %v1371_v44 = vmul.f32 0.5, %v1368_v36 }
 0xcf2   : > { %v1373_v38 = vmul.f32 %v1372_v37, %v1368_v36 }
 0xcf4   : > { %v1374_v39 = vmul.f32 %v1373_v38, %v1368_v36 }
 0xcf5   : > { %v1401_v46 = vpop.f32.mrf.mxu2 }
 0xcf6   : > { %v1375_v40 = vadd.f32 %v1374_v39, %v1368_v36 }
 0xcf8   : > { %v1376_v42 = vmul.f32 0.7978846, %v1375_v40 }
 0xcfa   : > { %1619 = vtanh.f32 %v1376_v42 }
 0xd00   : > { %v1620_v43 = vpop.eup %1619 }
 0xd01   : > { %v1378_v0 = vadd.f32 1.0, %v1620_v43 }
 0xd03   : > { %v1379_v45 = vmul.f32 %v1378_v0, %v1371_v44 }
 0xd05   : > { %v1404_v47 = vmul.f32 %v1401_v46, %v1379_v45 }
 0xd07   : > { %1553 = vmatmul.msk.f32.vlgmr.msra.gmra.mxu1 %vm1413_vm3, %v1404_v47 }
 0xd84   : > { %v1434_v48 = vpop.f32.mrf.mxu1 }
 0xd85   : > { %v1437_v49 = vadd.f32 %v1434_v48, %v1913_v5 }
 0xd87   : > { %1438 = vst.msk [vmem:[%s452_s26] sm:$0x3f] %vm457_vm0, %v1437_v49 }
 0xd88 PF: > { %s23_s25 = sadd.s32 1, %s1627_s25  }
 0xd89   : > { %p20_p4 = scmp.ge.s32.totalorder %s23_s25, 4  }
 0xd8b   :  { %22 = sbr.rel (!%p20_p4) target bundleno = 1 (0x1), region = 105 }

</bundles_post_ra>
